<compile_context>
chip_gen: v7x
topology: tpu7x:2x2x1
jax: 0.10.0
libtpu: 0.0.40
codegen_flags: <defaults>
</compile_context>

<pallas_src>
import functools

import jax
import jax.numpy as jnp
from jax.experimental import pallas as pl
from jax.experimental.pallas import tpu as pltpu


_VMEM = pl.BlockSpec(memory_space=pltpu.MemorySpace.VMEM)
_VMEM_LIMIT = 32 * 1024 * 1024       # safe everywhere: > v5e 16 MiB default, < v7x 64 MiB phys
_MAX_ROW_TILE = 512                  # ~85%+ HBM roofline, fits v7x VMEM with double-buffering


def _round_up(x, m):
    return (x + m - 1) // m * m


def _row_tiling(m):
    tm = min(_MAX_ROW_TILE, _round_up(m, 8))
    return tm, _round_up(m, tm)


def _grid_params():
    return pltpu.CompilerParams(dimension_semantics=("parallel",),
                                vmem_limit_bytes=_VMEM_LIMIT)


# ------------------------------------------------------------------ kernels ---

def _mm_ln_kernel(x_ref, w_ref, b_ref, g_ref, bt_ref, o_ref, *, eps, act):
    """bf16 [tm,K] @ [K,N] (f32 acc) + bias -> LayerNorm(N) (-> GELU), one VMEM pass."""
    acc = jnp.dot(x_ref[...], w_ref[...], preferred_element_type=jnp.float32)
    acc = acc + b_ref[...]
    mean = jnp.mean(acc, axis=-1, keepdims=True)
    var = jnp.mean((acc - mean) ** 2, axis=-1, keepdims=True)
    y = (acc - mean) * jax.lax.rsqrt(var + eps) * g_ref[...] + bt_ref[...]
    if act == "gelu":
        # TODO(synk): PyTorch nn.GELU defaults to exact erf; tanh approximation used here.
        y = jax.nn.gelu(y)
    o_ref[...] = y.astype(o_ref.dtype)


def _mm_bias_kernel(x_ref, w_ref, b_ref, o_ref, *, act):
    acc = jnp.dot(x_ref[...], w_ref[...], preferred_element_type=jnp.float32)
    acc = acc + b_ref[...]
    if act == "gelu":
        acc = jax.nn.gelu(acc)
    o_ref[...] = acc.astype(o_ref.dtype)


def _mm_bias_res_kernel(x_ref, w_ref, b_ref, r_ref, o_ref):
    """Matmul + bias with the residual add fused into the epilogue."""
    acc = jnp.dot(x_ref[...], w_ref[...], preferred_element_type=jnp.float32)
    o_ref[...] = (acc + b_ref[...] + r_ref[...]).astype(o_ref.dtype)


def _dw_se_res_kernel(x_ref, wdw_ref, bdw_ref, w1_ref, b1_ref, w2_ref, b2_ref,
                      o_ref, *, k, H, W, pad):
    """One image: depthwise kxk conv + SE gate + residual add, fully fused in VMEM."""
    xp = x_ref[0]                                    # [H+2p, W+2p, C] (pre-padded, f32)
    wdw = wdw_ref[...]                               # [k*k, C] row-indexed tap weights
    acc = jnp.zeros((H, W, o_ref.shape[-1]), jnp.float32)
    for t in range(k * k):                           # static tap loop (f32 VPU work)
        di, dj = t // k, t % k
        acc = acc + xp[di:di + H, dj:dj + W, :] * wdw[t]
    d = acc + bdw_ref[...]                           # [H, W, C]
    # SE squeeze (GAP) kept entirely in VMEM — no lane-sparse HBM round trips.
    pooled = jnp.mean(jnp.mean(d, axis=0), axis=0, keepdims=True)      # [1, C]
    h = jnp.dot(pooled.astype(jnp.bfloat16), w1_ref[...],
                preferred_element_type=jnp.float32) + b1_ref[...]
    h = jnp.maximum(h, 0.0)
    s = jnp.dot(h.astype(jnp.bfloat16), w2_ref[...],
                preferred_element_type=jnp.float32) + b2_ref[...]
    s = jax.nn.sigmoid(s)                            # [1, C]
    shortcut = xp[pad:pad + H, pad:pad + W, :]
    o_ref[0] = (shortcut + d * s[0]).astype(o_ref.dtype)


def _gap_ln_head_kernel(x_ref, g_ref, bt_ref, w_ref, b_ref, o_ref, *, eps):
    """GAP over H*W -> LayerNorm(C) -> Linear(C, 128), fused."""
    feat = jnp.mean(x_ref[...], axis=1)              # [B, C]
    mean = jnp.mean(feat, axis=-1, keepdims=True)
    var = jnp.mean((feat - mean) ** 2, axis=-1, keepdims=True)
    feat = (feat - mean) * jax.lax.rsqrt(var + eps) * g_ref[...] + bt_ref[...]
    out = jnp.dot(feat.astype(jnp.bfloat16), w_ref[...],
                  preferred_element_type=jnp.float32) + b_ref[...]
    o_ref[...] = out.astype(o_ref.dtype)


# ----------------------------------------------------------------- wrappers ---

def matmul_ln(x, w, b, gamma, beta, *, act=None, eps=1e-6, out_dtype=jnp.float32):
    M, K = x.shape
    N = w.shape[1]
    tm, Mp = _row_tiling(M)
    if Mp != M:
        x = jnp.pad(x, ((0, Mp - M), (0, 0)))
    out = pl.pallas_call(
        functools.partial(_mm_ln_kernel, eps=eps, act=act),
        out_shape=jax.ShapeDtypeStruct((Mp, N), out_dtype),
        grid=(Mp // tm,),
        in_specs=[
            pl.BlockSpec((tm, K), lambda i: (i, 0)),
            pl.BlockSpec((K, N), lambda i: (0, 0)),
            pl.BlockSpec((1, N), lambda i: (0, 0)),
            pl.BlockSpec((1, N), lambda i: (0, 0)),
            pl.BlockSpec((1, N), lambda i: (0, 0)),
        ],
        out_specs=pl.BlockSpec((tm, N), lambda i: (i, 0)),
        compiler_params=_grid_params(),
    )(x.astype(jnp.bfloat16), w.astype(jnp.bfloat16),
      b.reshape(1, N), gamma.reshape(1, N), beta.reshape(1, N))
    return out[:M] if Mp != M else out


def matmul_bias(x, w, b, *, act=None, out_dtype=jnp.float32):
    M, K = x.shape
    N = w.shape[1]
    tm, Mp = _row_tiling(M)
    if Mp != M:
        x = jnp.pad(x, ((0, Mp - M), (0, 0)))
    out = pl.pallas_call(
        functools.partial(_mm_bias_kernel, act=act),
        out_shape=jax.ShapeDtypeStruct((Mp, N), out_dtype),
        grid=(Mp // tm,),
        in_specs=[
            pl.BlockSpec((tm, K), lambda i: (i, 0)),
            pl.BlockSpec((K, N), lambda i: (0, 0)),
            pl.BlockSpec((1, N), lambda i: (0, 0)),
        ],
        out_specs=pl.BlockSpec((tm, N), lambda i: (i, 0)),
        compiler_params=_grid_params(),
    )(x.astype(jnp.bfloat16), w.astype(jnp.bfloat16), b.reshape(1, N))
    return out[:M] if Mp != M else out


def matmul_bias_residual(x, w, b, residual, *, out_dtype=jnp.float32):
    M, K = x.shape
    N = w.shape[1]
    tm, Mp = _row_tiling(M)
    if Mp != M:
        x = jnp.pad(x, ((0, Mp - M), (0, 0)))
        residual = jnp.pad(residual, ((0, Mp - M), (0, 0)))
    out = pl.pallas_call(
        _mm_bias_res_kernel,
        out_shape=jax.ShapeDtypeStruct((Mp, N), out_dtype),
        grid=(Mp // tm,),
        in_specs=[
            pl.BlockSpec((tm, K), lambda i: (i, 0)),
            pl.BlockSpec((K, N), lambda i: (0, 0)),
            pl.BlockSpec((1, N), lambda i: (0, 0)),
            pl.BlockSpec((tm, N), lambda i: (i, 0)),
        ],
        out_specs=pl.BlockSpec((tm, N), lambda i: (i, 0)),
        compiler_params=_grid_params(),
    )(x.astype(jnp.bfloat16), w.astype(jnp.bfloat16), b.reshape(1, N),
      residual.astype(jnp.float32))
    return out[:M] if Mp != M else out


def dw_se_residual(x, w_dw, b_dw, w1, b1, w2, b2, *, k=7):
    """x: [B,H,W,C] f32 -> x + dwconv_kxk(x) * SE(dwconv_kxk(x)); batch-parallel grid."""
    B, H, W, C = x.shape
    pad = (k - 1) // 2
    # TODO(synk): halo row-band tiling (manual DMA) would remove this HBM pad copy.
    xp = jnp.pad(x, ((0, 0), (pad, pad), (pad, pad), (0, 0)))
    Hp, Wp = H + 2 * pad, W + 2 * pad
    return pl.pallas_call(
        functools.partial(_dw_se_res_kernel, k=k, H=H, W=W, pad=pad),
        out_shape=jax.ShapeDtypeStruct((B, H, W, C), jnp.float32),
        grid=(B,),
        in_specs=[
            pl.BlockSpec((1, Hp, Wp, C), lambda b: (b, 0, 0, 0)),
            pl.BlockSpec((k * k, C), lambda b: (0, 0)),
            pl.BlockSpec((1, C), lambda b: (0, 0)),
            pl.BlockSpec((C, C // 4), lambda b: (0, 0)),
            pl.BlockSpec((1, C // 4), lambda b: (0, 0)),
            pl.BlockSpec((C // 4, C), lambda b: (0, 0)),
            pl.BlockSpec((1, C), lambda b: (0, 0)),
        ],
        out_specs=pl.BlockSpec((1, H, W, C), lambda b: (b, 0, 0, 0)),
        compiler_params=_grid_params(),
    )(xp, w_dw.reshape(k * k, C), b_dw.reshape(1, C),
      w1.astype(jnp.bfloat16), b1.reshape(1, -1),
      w2.astype(jnp.bfloat16), b2.reshape(1, C))


def gap_ln_head(x, gamma, beta, w, b, *, eps=1e-5):
    B, HW, C = x.shape
    N = w.shape[1]
    return pl.pallas_call(
        functools.partial(_gap_ln_head_kernel, eps=eps),
        out_shape=jax.ShapeDtypeStruct((B, N), jnp.float32),
        in_specs=[_VMEM] * 5,
        out_specs=_VMEM,
        compiler_params=pltpu.CompilerParams(vmem_limit_bytes=_VMEM_LIMIT),
    )(x, gamma.reshape(1, C), beta.reshape(1, C),
      w.astype(jnp.bfloat16), b.reshape(1, N))


# -------------------------------------------------------------------- glue ---

def _im2col(x, k, stride, pad):
    """NHWC im2col (pure slicing glue; the matmul runs in Pallas, cols kept in bf16)."""
    B, H, W, C = x.shape
    xp = jnp.pad(x, ((0, 0), (pad, pad), (pad, pad), (0, 0)))
    Ho = (H + 2 * pad - k) // stride + 1
    Wo = (W + 2 * pad - k) // stride + 1
    cols = []
    for di in range(k):
        for dj in range(k):
            cols.append(xp[:, di:di + stride * (Ho - 1) + 1:stride,
                           dj:dj + stride * (Wo - 1) + 1:stride, :])
    return jnp.concatenate(cols, axis=-1), Ho, Wo            # [B, Ho, Wo, k*k*C]


def _init_params(key):
    """Deterministic synthetic parameters (shapes implied by the module)."""
    C1, C = 96, 192
    ks = jax.random.split(key, 10)

    def dense(k, fan_in, shape):
        return jax.random.normal(k, shape, jnp.float32) / jnp.sqrt(float(fan_in))

    p = {}
    p["embed_w"] = dense(ks[0], 1, (3,))
    p["embed_b"] = 0.1 * dense(ks[9], 1, (3,))
    p["stem1_w"] = dense(ks[1], 27, (3, 3, 3, C1))
    p["stem1_b"] = jnp.zeros((C1,), jnp.float32)
    p["ln1_g"], p["ln1_b"] = jnp.ones((C1,), jnp.float32), jnp.zeros((C1,), jnp.float32)
    p["stem2_w"] = dense(ks[2], 9 * C1, (9 * C1, C))
    p["stem2_b"] = jnp.zeros((C,), jnp.float32)
    p["ln2_g"], p["ln2_b"] = jnp.ones((C,), jnp.float32), jnp.zeros((C,), jnp.float32)
    p["dw_w"] = dense(ks[3], 49, (7, 7, C))
    p["dw_b"] = jnp.zeros((C,), jnp.float32)
    p["se1_w"] = dense(ks[4], C, (C, C // 4))
    p["se1_b"] = jnp.zeros((C // 4,), jnp.float32)
    p["se2_w"] = dense(ks[5], C // 4, (C // 4, C))
    p["se2_b"] = jnp.zeros((C,), jnp.float32)
    p["ffn1_w"] = dense(ks[6], C, (C, 4 * C))
    p["ffn1_b"] = jnp.zeros((4 * C,), jnp.float32)
    p["ffn2_w"] = dense(ks[7], 4 * C, (4 * C, C))
    p["ffn2_b"] = jnp.zeros((C,), jnp.float32)
    p["norm_g"], p["norm_b"] = jnp.ones((C,), jnp.float32), jnp.zeros((C,), jnp.float32)
    p["head_w"] = dense(ks[8], C, (C, 128))
    p["head_b"] = jnp.zeros((128,), jnp.float32)
    return p


def cog_replknet_forward(x, p):
    """x: [B, 1, H, W] (NCHW, like the PyTorch module) -> features [B, 128]."""
    B, Cin, H, W = x.shape
    x = jnp.transpose(x, (0, 2, 3, 1))                       # NCHW -> NHWC, [B,H,W,1]

    # --- conv_embed (1x1, 1->3) folded into stem-1 weights (exact fold) --------
    # y = x*we + be; stem1 zero-pads y.  Append a ones-channel to x so that zero-
    # padding the augmented input reproduces zero-padding of y exactly.
    w1 = p["stem1_w"]                                        # [3,3,3,C1]
    wf = jnp.stack([jnp.einsum("c,ijco->ijo", p["embed_w"], w1),
                    jnp.einsum("c,ijco->ijo", p["embed_b"], w1)], axis=2)   # [3,3,2,C1]
    x_aug = jnp.concatenate([x, jnp.ones_like(x)], axis=-1)  # [B,H,W,2]

    # --- UniRepLKNet stem: (Conv3x3 s2 + LN + GELU) and (Conv3x3 s2 + LN), fused
    cols, H2, W2 = _im2col(x_aug, 3, 2, 1)                   # [B,H2,W2,18]
    C1 = wf.shape[-1]
    y = matmul_ln(cols.reshape(B * H2 * W2, 9 * 2), wf.reshape(9 * 2, C1),
                  p["stem1_b"], p["ln1_g"], p["ln1_b"], act="gelu",
                  out_dtype=jnp.bfloat16)
    y = y.reshape(B, H2, W2, C1)

    cols, H4, W4 = _im2col(y, 3, 2, 1)                       # bf16 [B,H4,W4,9*C1]
    C = p["stem2_w"].shape[-1]                               # 192
    y = matmul_ln(cols.reshape(B * H4 * W4, 9 * C1), p["stem2_w"], p["stem2_b"],
                  p["ln2_g"], p["ln2_b"], act=None, out_dtype=jnp.float32)
    y = y.reshape(B, H4, W4, C)

    # --- LarK-style block: fused (dwconv7x7 + SE + residual), then GELU-FFN ----
    # TODO(synk): GRN unit and dilated-reparam branches of the real block omitted.
    y = dw_se_residual(y, p["dw_w"], p["dw_b"],
                       p["se1_w"], p["se1_b"], p["se2_w"], p["se2_b"], k=7)

    yr = y.reshape(B * H4 * W4, C)
    f = matmul_bias(yr, p["ffn1_w"], p["ffn1_b"], act="gelu", out_dtype=jnp.bfloat16)
    y = matmul_bias_residual(f, p["ffn2_w"], p["ffn2_b"], yr)      # residual fused
    y = y.reshape(B, H4, W4, C)

    # --- head: GAP -> LayerNorm(192) -> Linear(192, 128), fused ----------------
    return gap_ln_head(y.reshape(B, H4 * W4, C), p["norm_g"], p["norm_b"],
                       p["head_w"], p["head_b"], eps=1e-5)


if __name__ == "__main__":
    key = jax.random.PRNGKey(0)
    k_x, k_p = jax.random.split(key)
    x = jax.random.normal(k_x, (2, 1, 16, 16), jnp.float32)   # [B, 1, H, W] like PyTorch
    params = _init_params(k_p)

    fwd = jax.jit(cog_replknet_forward)
    out = jax.block_until_ready(fwd(x, params))
    assert out.shape == (2, 128) and out.dtype == jnp.float32
    assert bool(jnp.all(jnp.isfinite(out)))
    print("KERNEL_OK")
</pallas_src>

<mosaic_0001>
module attributes {stable_mosaic.version = 11 : i64} {
  func.func @_mm_ln_kernel(%arg0: i32, %arg1: memref<128x18xbf16, #tpu.memory_space<vmem>>, %arg2: memref<18x96xbf16, #tpu.memory_space<vmem>>, %arg3: memref<1x96xf32, #tpu.memory_space<vmem>>, %arg4: memref<1x96xf32, #tpu.memory_space<vmem>>, %arg5: memref<1x96xf32, #tpu.memory_space<vmem>>, %arg6: memref<128x96xbf16, #tpu.memory_space<vmem>>) attributes {dimension_semantics = [#tpu.dimension_semantics<parallel>], iteration_bounds = array<i64: 1>, scalar_prefetch = 0 : i64, scratch_operands = 0 : i64, tpu.core_type = #tpu.core_type<tc>, window_params = [{transform_indices = @transform_0, window_bounds = array<i64: 128, 18>}, {pipeline_mode = #tpu.pipeline_mode<synchronous>, transform_indices = @transform_1, window_bounds = array<i64: 18, 96>}, {pipeline_mode = #tpu.pipeline_mode<synchronous>, transform_indices = @transform_2, window_bounds = array<i64: 1, 96>}, {pipeline_mode = #tpu.pipeline_mode<synchronous>, transform_indices = @transform_3, window_bounds = array<i64: 1, 96>}, {pipeline_mode = #tpu.pipeline_mode<synchronous>, transform_indices = @transform_4, window_bounds = array<i64: 1, 96>}, {transform_indices = @transform_5, window_bounds = array<i64: 128, 96>}]} {
    %c0 = arith.constant 0 : index
    %c0_0 = arith.constant 0 : index
    %0 = vector.load %arg1[%c0, %c0_0] : memref<128x18xbf16, #tpu.memory_space<vmem>>, vector<128x18xbf16>
    %c0_1 = arith.constant 0 : index
    %c0_2 = arith.constant 0 : index
    %1 = vector.load %arg2[%c0_1, %c0_2] : memref<18x96xbf16, #tpu.memory_space<vmem>>, vector<18x96xbf16>
    %cst = arith.constant dense<0.000000e+00> : vector<128x96xf32>
    %2 = tpu.matmul %0, %1, %cst {dimension_numbers = #tpu.dot_dimension_numbers<[1], [0], [0], [1], [0, 0, 1, 1], [], []>} : vector<128x18xbf16>, vector<18x96xbf16>, vector<128x96xf32> -> vector<128x96xf32>
    %c0_3 = arith.constant 0 : index
    %c0_4 = arith.constant 0 : index
    %3 = vector.load %arg3[%c0_3, %c0_4] : memref<1x96xf32, #tpu.memory_space<vmem>>, vector<1x96xf32>
    %4 = vector.broadcast %3 : vector<1x96xf32> to vector<128x96xf32>
    %5 = arith.addf %2, %4 : vector<128x96xf32>
    %cst_5 = arith.constant dense<0.000000e+00> : vector<128xf32>
    %6 = vector.multi_reduction <add>, %5, %cst_5 [1] : vector<128x96xf32> to vector<128xf32>
    %7 = vector.shape_cast %6 : vector<128xf32> to vector<128x1xf32>
    %cst_6 = arith.constant 9.600000e+01 : f32
    %8 = vector.broadcast %cst_6 : f32 to vector<128x1xf32>
    %9 = arith.divf %7, %8 : vector<128x1xf32>
    %10 = vector.broadcast %9 : vector<128x1xf32> to vector<128x96xf32>
    %11 = arith.subf %5, %10 : vector<128x96xf32>
    %12 = arith.mulf %11, %11 : vector<128x96xf32>
    %cst_7 = arith.constant dense<0.000000e+00> : vector<128xf32>
    %13 = vector.multi_reduction <add>, %12, %cst_7 [1] : vector<128x96xf32> to vector<128xf32>
    %14 = vector.shape_cast %13 : vector<128xf32> to vector<128x1xf32>
    %cst_8 = arith.constant 9.600000e+01 : f32
    %15 = vector.broadcast %cst_8 : f32 to vector<128x1xf32>
    %16 = arith.divf %14, %15 : vector<128x1xf32>
    %17 = vector.broadcast %9 : vector<128x1xf32> to vector<128x96xf32>
    %18 = arith.subf %5, %17 : vector<128x96xf32>
    %cst_9 = arith.constant 9.99999997E-7 : f32
    %19 = vector.broadcast %cst_9 : f32 to vector<128x1xf32>
    %20 = arith.addf %16, %19 : vector<128x1xf32>
    %21 = math.rsqrt %20 : vector<128x1xf32>
    %22 = vector.broadcast %21 : vector<128x1xf32> to vector<128x96xf32>
    %23 = arith.mulf %18, %22 : vector<128x96xf32>
    %c0_10 = arith.constant 0 : index
    %c0_11 = arith.constant 0 : index
    %24 = vector.load %arg4[%c0_10, %c0_11] : memref<1x96xf32, #tpu.memory_space<vmem>>, vector<1x96xf32>
    %25 = vector.broadcast %24 : vector<1x96xf32> to vector<128x96xf32>
    %26 = arith.mulf %23, %25 : vector<128x96xf32>
    %c0_12 = arith.constant 0 : index
    %c0_13 = arith.constant 0 : index
    %27 = vector.load %arg5[%c0_12, %c0_13] : memref<1x96xf32, #tpu.memory_space<vmem>>, vector<1x96xf32>
    %28 = vector.broadcast %27 : vector<1x96xf32> to vector<128x96xf32>
    %29 = arith.addf %26, %28 : vector<128x96xf32>
    %30 = arith.mulf %29, %29 : vector<128x96xf32>
    %31 = arith.mulf %29, %30 : vector<128x96xf32>
    %cst_14 = arith.constant 4.471500e-02 : f32
    %32 = vector.broadcast %cst_14 : f32 to vector<128x96xf32>
    %33 = arith.mulf %32, %31 : vector<128x96xf32>
    %34 = arith.addf %29, %33 : vector<128x96xf32>
    %cst_15 = arith.constant 0.797884583 : f32
    %35 = vector.broadcast %cst_15 : f32 to vector<128x96xf32>
    %36 = arith.mulf %35, %34 : vector<128x96xf32>
    %37 = math.tanh %36 : vector<128x96xf32>
    %cst_16 = arith.constant 1.000000e+00 : f32
    %38 = vector.broadcast %cst_16 : f32 to vector<128x96xf32>
    %39 = arith.addf %38, %37 : vector<128x96xf32>
    %cst_17 = arith.constant 5.000000e-01 : f32
    %40 = vector.broadcast %cst_17 : f32 to vector<128x96xf32>
    %41 = arith.mulf %40, %39 : vector<128x96xf32>
    %42 = arith.mulf %29, %41 : vector<128x96xf32>
    %43 = arith.truncf %42 : vector<128x96xf32> to vector<128x96xbf16>
    %c0_18 = arith.constant 0 : index
    %c0_19 = arith.constant 0 : index
    %44 = vector.load %arg6[%c0_18, %c0_19] : memref<128x96xbf16, #tpu.memory_space<vmem>>, vector<128x96xbf16>
    tpu.vector_store %arg6[%c0_18, %c0_19], %43 {strides = array<i32>} : memref<128x96xbf16, #tpu.memory_space<vmem>>, vector<128x96xbf16>,
    return
  }
  func.func @transform_0(%arg0: i32) -> (i32, i32) {
    %c0_i32 = arith.constant 0 : i32
    %c0_i32_0 = arith.constant 0 : i32
    return %arg0, %c0_i32 : i32, i32
  }
  func.func @transform_1(%arg0: i32) -> (i32, i32) {
    %c0_i32 = arith.constant 0 : i32
    %c0_i32_0 = arith.constant 0 : i32
    %c0_i32_1 = arith.constant 0 : i32
    return %c0_i32, %c0_i32_0 : i32, i32
  }
  func.func @transform_2(%arg0: i32) -> (i32, i32) {
    %c0_i32 = arith.constant 0 : i32
    %c0_i32_0 = arith.constant 0 : i32
    %c0_i32_1 = arith.constant 0 : i32
    return %c0_i32, %c0_i32_0 : i32, i32
  }
  func.func @transform_3(%arg0: i32) -> (i32, i32) {
    %c0_i32 = arith.constant 0 : i32
    %c0_i32_0 = arith.constant 0 : i32
    %c0_i32_1 = arith.constant 0 : i32
    return %c0_i32, %c0_i32_0 : i32, i32
  }
  func.func @transform_4(%arg0: i32) -> (i32, i32) {
    %c0_i32 = arith.constant 0 : i32
    %c0_i32_0 = arith.constant 0 : i32
    %c0_i32_1 = arith.constant 0 : i32
    return %c0_i32, %c0_i32_0 : i32, i32
  }
  func.func @transform_5(%arg0: i32) -> (i32, i32) {
    %c0_i32 = arith.constant 0 : i32
    %c0_i32_0 = arith.constant 0 : i32
    return %arg0, %c0_i32 : i32, i32
  }
}

module attributes {stable_mosaic.version = 11 : i64} {
  func.func @_mm_ln_kernel(%arg0: i32, %arg1: memref<32x864xbf16, #tpu.memory_space<vmem>>, %arg2: memref<864x192xbf16, #tpu.memory_space<vmem>>, %arg3: memref<1x192xf32, #tpu.memory_space<vmem>>, %arg4: memref<1x192xf32, #tpu.memory_space<vmem>>, %arg5: memref<1x192xf32, #tpu.memory_space<vmem>>, %arg6: memref<32x192xf32, #tpu.memory_space<vmem>>) attributes {dimension_semantics = [#tpu.dimension_semantics<parallel>], iteration_bounds = array<i64: 1>, scalar_prefetch = 0 : i64, scratch_operands = 0 : i64, tpu.core_type = #tpu.core_type<tc>, window_params = [{transform_indices = @transform_0, window_bounds = array<i64: 32, 864>}, {pipeline_mode = #tpu.pipeline_mode<synchronous>, transform_indices = @transform_1, window_bounds = array<i64: 864, 192>}, {pipeline_mode = #tpu.pipeline_mode<synchronous>, transform_indices = @transform_2, window_bounds = array<i64: 1, 192>}, {pipeline_mode = #tpu.pipeline_mode<synchronous>, transform_indices = @transform_3, window_bounds = array<i64: 1, 192>}, {pipeline_mode = #tpu.pipeline_mode<synchronous>, transform_indices = @transform_4, window_bounds = array<i64: 1, 192>}, {transform_indices = @transform_5, window_bounds = array<i64: 32, 192>}]} {
    %c0 = arith.constant 0 : index
    %c0_0 = arith.constant 0 : index
    %0 = vector.load %arg1[%c0, %c0_0] : memref<32x864xbf16, #tpu.memory_space<vmem>>, vector<32x864xbf16>
    %c0_1 = arith.constant 0 : index
    %c0_2 = arith.constant 0 : index
    %1 = vector.load %arg2[%c0_1, %c0_2] : memref<864x192xbf16, #tpu.memory_space<vmem>>, vector<864x192xbf16>
    %cst = arith.constant dense<0.000000e+00> : vector<32x192xf32>
    %2 = tpu.matmul %0, %1, %cst {dimension_numbers = #tpu.dot_dimension_numbers<[1], [0], [0], [1], [0, 0, 1, 1], [], []>} : vector<32x864xbf16>, vector<864x192xbf16>, vector<32x192xf32> -> vector<32x192xf32>
    %c0_3 = arith.constant 0 : index
    %c0_4 = arith.constant 0 : index
    %3 = vector.load %arg3[%c0_3, %c0_4] : memref<1x192xf32, #tpu.memory_space<vmem>>, vector<1x192xf32>
    %4 = vector.broadcast %3 : vector<1x192xf32> to vector<32x192xf32>
    %5 = arith.addf %2, %4 : vector<32x192xf32>
    %cst_5 = arith.constant dense<0.000000e+00> : vector<32xf32>
    %6 = vector.multi_reduction <add>, %5, %cst_5 [1] : vector<32x192xf32> to vector<32xf32>
    %7 = vector.shape_cast %6 : vector<32xf32> to vector<32x1xf32>
    %cst_6 = arith.constant 1.920000e+02 : f32
    %8 = vector.broadcast %cst_6 : f32 to vector<32x1xf32>
    %9 = arith.divf %7, %8 : vector<32x1xf32>
    %10 = vector.broadcast %9 : vector<32x1xf32> to vector<32x192xf32>
    %11 = arith.subf %5, %10 : vector<32x192xf32>
    %12 = arith.mulf %11, %11 : vector<32x192xf32>
    %cst_7 = arith.constant dense<0.000000e+00> : vector<32xf32>
    %13 = vector.multi_reduction <add>, %12, %cst_7 [1] : vector<32x192xf32> to vector<32xf32>
    %14 = vector.shape_cast %13 : vector<32xf32> to vector<32x1xf32>
    %cst_8 = arith.constant 1.920000e+02 : f32
    %15 = vector.broadcast %cst_8 : f32 to vector<32x1xf32>
    %16 = arith.divf %14, %15 : vector<32x1xf32>
    %17 = vector.broadcast %9 : vector<32x1xf32> to vector<32x192xf32>
    %18 = arith.subf %5, %17 : vector<32x192xf32>
    %cst_9 = arith.constant 9.99999997E-7 : f32
    %19 = vector.broadcast %cst_9 : f32 to vector<32x1xf32>
    %20 = arith.addf %16, %19 : vector<32x1xf32>
    %21 = math.rsqrt %20 : vector<32x1xf32>
    %22 = vector.broadcast %21 : vector<32x1xf32> to vector<32x192xf32>
    %23 = arith.mulf %18, %22 : vector<32x192xf32>
    %c0_10 = arith.constant 0 : index
    %c0_11 = arith.constant 0 : index
    %24 = vector.load %arg4[%c0_10, %c0_11] : memref<1x192xf32, #tpu.memory_space<vmem>>, vector<1x192xf32>
    %25 = vector.broadcast %24 : vector<1x192xf32> to vector<32x192xf32>
    %26 = arith.mulf %23, %25 : vector<32x192xf32>
    %c0_12 = arith.constant 0 : index
    %c0_13 = arith.constant 0 : index
    %27 = vector.load %arg5[%c0_12, %c0_13] : memref<1x192xf32, #tpu.memory_space<vmem>>, vector<1x192xf32>
    %28 = vector.broadcast %27 : vector<1x192xf32> to vector<32x192xf32>
    %29 = arith.addf %26, %28 : vector<32x192xf32>
    %c0_14 = arith.constant 0 : index
    %c0_15 = arith.constant 0 : index
    %30 = vector.load %arg6[%c0_14, %c0_15] : memref<32x192xf32, #tpu.memory_space<vmem>>, vector<32x192xf32>
    tpu.vector_store %arg6[%c0_14, %c0_15], %29 {strides = array<i32>} : memref<32x192xf32, #tpu.memory_space<vmem>>, vector<32x192xf32>,
    return
  }
  func.func @transform_0(%arg0: i32) -> (i32, i32) {
    %c0_i32 = arith.constant 0 : i32
    %c0_i32_0 = arith.constant 0 : i32
    return %arg0, %c0_i32 : i32, i32
  }
  func.func @transform_1(%arg0: i32) -> (i32, i32) {
    %c0_i32 = arith.constant 0 : i32
    %c0_i32_0 = arith.constant 0 : i32
    %c0_i32_1 = arith.constant 0 : i32
    return %c0_i32, %c0_i32_0 : i32, i32
  }
  func.func @transform_2(%arg0: i32) -> (i32, i32) {
    %c0_i32 = arith.constant 0 : i32
    %c0_i32_0 = arith.constant 0 : i32
    %c0_i32_1 = arith.constant 0 : i32
    return %c0_i32, %c0_i32_0 : i32, i32
  }
  func.func @transform_3(%arg0: i32) -> (i32, i32) {
    %c0_i32 = arith.constant 0 : i32
    %c0_i32_0 = arith.constant 0 : i32
    %c0_i32_1 = arith.constant 0 : i32
    return %c0_i32, %c0_i32_0 : i32, i32
  }
  func.func @transform_4(%arg0: i32) -> (i32, i32) {
    %c0_i32 = arith.constant 0 : i32
    %c0_i32_0 = arith.constant 0 : i32
    %c0_i32_1 = arith.constant 0 : i32
    return %c0_i32, %c0_i32_0 : i32, i32
  }
  func.func @transform_5(%arg0: i32) -> (i32, i32) {
    %c0_i32 = arith.constant 0 : i32
    %c0_i32_0 = arith.constant 0 : i32
    return %arg0, %c0_i32 : i32, i32
  }
}

module attributes {stable_mosaic.version = 11 : i64} {
  func.func @_dw_se_res_kernel(%arg0: i32, %arg1: memref<1x10x10x192xf32, #tpu.memory_space<vmem>>, %arg2: memref<49x192xf32, #tpu.memory_space<vmem>>, %arg3: memref<1x192xf32, #tpu.memory_space<vmem>>, %arg4: memref<192x48xbf16, #tpu.memory_space<vmem>>, %arg5: memref<1x48xf32, #tpu.memory_space<vmem>>, %arg6: memref<48x192xbf16, #tpu.memory_space<vmem>>, %arg7: memref<1x192xf32, #tpu.memory_space<vmem>>, %arg8: memref<1x4x4x192xf32, #tpu.memory_space<vmem>>) attributes {dimension_semantics = [#tpu.dimension_semantics<parallel>], iteration_bounds = array<i64: 2>, scalar_prefetch = 0 : i64, scratch_operands = 0 : i64, tpu.core_type = #tpu.core_type<tc>, window_params = [{transform_indices = @transform_0, window_bounds = array<i64: 1, 10, 10, 192>}, {pipeline_mode = #tpu.pipeline_mode<synchronous>, transform_indices = @transform_1, window_bounds = array<i64: 49, 192>}, {pipeline_mode = #tpu.pipeline_mode<synchronous>, transform_indices = @transform_2, window_bounds = array<i64: 1, 192>}, {pipeline_mode = #tpu.pipeline_mode<synchronous>, transform_indices = @transform_3, window_bounds = array<i64: 192, 48>}, {pipeline_mode = #tpu.pipeline_mode<synchronous>, transform_indices = @transform_4, window_bounds = array<i64: 1, 48>}, {pipeline_mode = #tpu.pipeline_mode<synchronous>, transform_indices = @transform_5, window_bounds = array<i64: 48, 192>}, {pipeline_mode = #tpu.pipeline_mode<synchronous>, transform_indices = @transform_6, window_bounds = array<i64: 1, 192>}, {transform_indices = @transform_7, window_bounds = array<i64: 1, 4, 4, 192>}]} {
    %c0 = arith.constant 0 : index
    %c0_0 = arith.constant 0 : index
    %c0_1 = arith.constant 0 : index
    %c0_2 = arith.constant 0 : index
    %0 = vector.load %arg1[%c0, %c0_0, %c0_1, %c0_2] : memref<1x10x10x192xf32, #tpu.memory_space<vmem>>, vector<1x10x10x192xf32>
    %1 = vector.shape_cast %0 : vector<1x10x10x192xf32> to vector<10x10x192xf32>
    %c0_3 = arith.constant 0 : index
    %c0_4 = arith.constant 0 : index
    %2 = vector.load %arg2[%c0_3, %c0_4] : memref<49x192xf32, #tpu.memory_space<vmem>>, vector<49x192xf32>
    %cst = arith.constant 0.000000e+00 : f32
    %3 = vector.broadcast %cst : f32 to vector<4x4x192xf32>
    %4 = vector.extract_strided_slice %1 {offsets = [0, 0, 0], sizes = [4, 4, 192], strides = [1, 1, 1]} : vector<10x10x192xf32> to vector<4x4x192xf32>
    %5 = vector.extract_strided_slice %2 {offsets = [0, 0], sizes = [1, 192], strides = [1, 1]} : vector<49x192xf32> to vector<1x192xf32>
    %6 = vector.shape_cast %5 : vector<1x192xf32> to vector<192xf32>
    %7 = vector.shape_cast %6 : vector<192xf32> to vector<1x1x192xf32>
    %8 = vector.broadcast %7 : vector<1x1x192xf32> to vector<4x4x192xf32>
    %9 = arith.mulf %4, %8 : vector<4x4x192xf32>
    %10 = arith.addf %3, %9 : vector<4x4x192xf32>
    %11 = vector.extract_strided_slice %1 {offsets = [0, 1, 0], sizes = [4, 4, 192], strides = [1, 1, 1]} : vector<10x10x192xf32> to vector<4x4x192xf32>
    %12 = vector.extract_strided_slice %2 {offsets = [1, 0], sizes = [1, 192], strides = [1, 1]} : vector<49x192xf32> to vector<1x192xf32>
    %13 = vector.shape_cast %12 : vector<1x192xf32> to vector<192xf32>
    %14 = vector.shape_cast %13 : vector<192xf32> to vector<1x1x192xf32>
    %15 = vector.broadcast %14 : vector<1x1x192xf32> to vector<4x4x192xf32>
    %16 = arith.mulf %11, %15 : vector<4x4x192xf32>
    %17 = arith.addf %10, %16 : vector<4x4x192xf32>
    %18 = vector.extract_strided_slice %1 {offsets = [0, 2, 0], sizes = [4, 4, 192], strides = [1, 1, 1]} : vector<10x10x192xf32> to vector<4x4x192xf32>
    %19 = vector.extract_strided_slice %2 {offsets = [2, 0], sizes = [1, 192], strides = [1, 1]} : vector<49x192xf32> to vector<1x192xf32>
    %20 = vector.shape_cast %19 : vector<1x192xf32> to vector<192xf32>
    %21 = vector.shape_cast %20 : vector<192xf32> to vector<1x1x192xf32>
    %22 = vector.broadcast %21 : vector<1x1x192xf32> to vector<4x4x192xf32>
    %23 = arith.mulf %18, %22 : vector<4x4x192xf32>
    %24 = arith.addf %17, %23 : vector<4x4x192xf32>
    %25 = vector.extract_strided_slice %1 {offsets = [0, 3, 0], sizes = [4, 4, 192], strides = [1, 1, 1]} : vector<10x10x192xf32> to vector<4x4x192xf32>
    %26 = vector.extract_strided_slice %2 {offsets = [3, 0], sizes = [1, 192], strides = [1, 1]} : vector<49x192xf32> to vector<1x192xf32>
    %27 = vector.shape_cast %26 : vector<1x192xf32> to vector<192xf32>
    %28 = vector.shape_cast %27 : vector<192xf32> to vector<1x1x192xf32>
    %29 = vector.broadcast %28 : vector<1x1x192xf32> to vector<4x4x192xf32>
    %30 = arith.mulf %25, %29 : vector<4x4x192xf32>
    %31 = arith.addf %24, %30 : vector<4x4x192xf32>
    %32 = vector.extract_strided_slice %1 {offsets = [0, 4, 0], sizes = [4, 4, 192], strides = [1, 1, 1]} : vector<10x10x192xf32> to vector<4x4x192xf32>
    %33 = vector.extract_strided_slice %2 {offsets = [4, 0], sizes = [1, 192], strides = [1, 1]} : vector<49x192xf32> to vector<1x192xf32>
    %34 = vector.shape_cast %33 : vector<1x192xf32> to vector<192xf32>
    %35 = vector.shape_cast %34 : vector<192xf32> to vector<1x1x192xf32>
    %36 = vector.broadcast %35 : vector<1x1x192xf32> to vector<4x4x192xf32>
    %37 = arith.mulf %32, %36 : vector<4x4x192xf32>
    %38 = arith.addf %31, %37 : vector<4x4x192xf32>
    %39 = vector.extract_strided_slice %1 {offsets = [0, 5, 0], sizes = [4, 4, 192], strides = [1, 1, 1]} : vector<10x10x192xf32> to vector<4x4x192xf32>
    %40 = vector.extract_strided_slice %2 {offsets = [5, 0], sizes = [1, 192], strides = [1, 1]} : vector<49x192xf32> to vector<1x192xf32>
    %41 = vector.shape_cast %40 : vector<1x192xf32> to vector<192xf32>
    %42 = vector.shape_cast %41 : vector<192xf32> to vector<1x1x192xf32>
    %43 = vector.broadcast %42 : vector<1x1x192xf32> to vector<4x4x192xf32>
    %44 = arith.mulf %39, %43 : vector<4x4x192xf32>
    %45 = arith.addf %38, %44 : vector<4x4x192xf32>
    %46 = vector.extract_strided_slice %1 {offsets = [0, 6, 0], sizes = [4, 4, 192], strides = [1, 1, 1]} : vector<10x10x192xf32> to vector<4x4x192xf32>
    %47 = vector.extract_strided_slice %2 {offsets = [6, 0], sizes = [1, 192], strides = [1, 1]} : vector<49x192xf32> to vector<1x192xf32>
    %48 = vector.shape_cast %47 : vector<1x192xf32> to vector<192xf32>
    %49 = vector.shape_cast %48 : vector<192xf32> to vector<1x1x192xf32>
    %50 = vector.broadcast %49 : vector<1x1x192xf32> to vector<4x4x192xf32>
    %51 = arith.mulf %46, %50 : vector<4x4x192xf32>
    %52 = arith.addf %45, %51 : vector<4x4x192xf32>
    %53 = vector.extract_strided_slice %1 {offsets = [1, 0, 0], sizes = [4, 4, 192], strides = [1, 1, 1]} : vector<10x10x192xf32> to vector<4x4x192xf32>
    %54 = vector.extract_strided_slice %2 {offsets = [7, 0], sizes = [1, 192], strides = [1, 1]} : vector<49x192xf32> to vector<1x192xf32>
    %55 = vector.shape_cast %54 : vector<1x192xf32> to vector<192xf32>
    %56 = vector.shape_cast %55 : vector<192xf32> to vector<1x1x192xf32>
    %57 = vector.broadcast %56 : vector<1x1x192xf32> to vector<4x4x192xf32>
    %58 = arith.mulf %53, %57 : vector<4x4x192xf32>
    %59 = arith.addf %52, %58 : vector<4x4x192xf32>
    %60 = vector.extract_strided_slice %1 {offsets = [1, 1, 0], sizes = [4, 4, 192], strides = [1, 1, 1]} : vector<10x10x192xf32> to vector<4x4x192xf32>
    %61 = vector.extract_strided_slice %2 {offsets = [8, 0], sizes = [1, 192], strides = [1, 1]} : vector<49x192xf32> to vector<1x192xf32>
    %62 = vector.shape_cast %61 : vector<1x192xf32> to vector<192xf32>
    %63 = vector.shape_cast %62 : vector<192xf32> to vector<1x1x192xf32>
    %64 = vector.broadcast %63 : vector<1x1x192xf32> to vector<4x4x192xf32>
    %65 = arith.mulf %60, %64 : vector<4x4x192xf32>
    %66 = arith.addf %59, %65 : vector<4x4x192xf32>
    %67 = vector.extract_strided_slice %1 {offsets = [1, 2, 0], sizes = [4, 4, 192], strides = [1, 1, 1]} : vector<10x10x192xf32> to vector<4x4x192xf32>
    %68 = vector.extract_strided_slice %2 {offsets = [9, 0], sizes = [1, 192], strides = [1, 1]} : vector<49x192xf32> to vector<1x192xf32>
    %69 = vector.shape_cast %68 : vector<1x192xf32> to vector<192xf32>
    %70 = vector.shape_cast %69 : vector<192xf32> to vector<1x1x192xf32>
    %71 = vector.broadcast %70 : vector<1x1x192xf32> to vector<4x4x192xf32>
    %72 = arith.mulf %67, %71 : vector<4x4x192xf32>
    %73 = arith.addf %66, %72 : vector<4x4x192xf32>
    %74 = vector.extract_strided_slice %1 {offsets = [1, 3, 0], sizes = [4, 4, 192], strides = [1, 1, 1]} : vector<10x10x192xf32> to vector<4x4x192xf32>
    %75 = vector.extract_strided_slice %2 {offsets = [10, 0], sizes = [1, 192], strides = [1, 1]} : vector<49x192xf32> to vector<1x192xf32>
    %76 = vector.shape_cast %75 : vector<1x192xf32> to vector<192xf32>
    %77 = vector.shape_cast %76 : vector<192xf32> to vector<1x1x192xf32>
    %78 = vector.broadcast %77 : vector<1x1x192xf32> to vector<4x4x192xf32>
    %79 = arith.mulf %74, %78 : vector<4x4x192xf32>
    %80 = arith.addf %73, %79 : vector<4x4x192xf32>
    %81 = vector.extract_strided_slice %1 {offsets = [1, 4, 0], sizes = [4, 4, 192], strides = [1, 1, 1]} : vector<10x10x192xf32> to vector<4x4x192xf32>
    %82 = vector.extract_strided_slice %2 {offsets = [11, 0], sizes = [1, 192], strides = [1, 1]} : vector<49x192xf32> to vector<1x192xf32>
    %83 = vector.shape_cast %82 : vector<1x192xf32> to vector<192xf32>
    %84 = vector.shape_cast %83 : vector<192xf32> to vector<1x1x192xf32>
    %85 = vector.broadcast %84 : vector<1x1x192xf32> to vector<4x4x192xf32>
    %86 = arith.mulf %81, %85 : vector<4x4x192xf32>
    %87 = arith.addf %80, %86 : vector<4x4x192xf32>
    %88 = vector.extract_strided_slice %1 {offsets = [1, 5, 0], sizes = [4, 4, 192], strides = [1, 1, 1]} : vector<10x10x192xf32> to vector<4x4x192xf32>
    %89 = vector.extract_strided_slice %2 {offsets = [12, 0], sizes = [1, 192], strides = [1, 1]} : vector<49x192xf32> to vector<1x192xf32>
    %90 = vector.shape_cast %89 : vector<1x192xf32> to vector<192xf32>
    %91 = vector.shape_cast %90 : vector<192xf32> to vector<1x1x192xf32>
    %92 = vector.broadcast %91 : vector<1x1x192xf32> to vector<4x4x192xf32>
    %93 = arith.mulf %88, %92 : vector<4x4x192xf32>
    %94 = arith.addf %87, %93 : vector<4x4x192xf32>
    %95 = vector.extract_strided_slice %1 {offsets = [1, 6, 0], sizes = [4, 4, 192], strides = [1, 1, 1]} : vector<10x10x192xf32> to vector<4x4x192xf32>
    %96 = vector.extract_strided_slice %2 {offsets = [13, 0], sizes = [1, 192], strides = [1, 1]} : vector<49x192xf32> to vector<1x192xf32>
    %97 = vector.shape_cast %96 : vector<1x192xf32> to vector<192xf32>
    %98 = vector.shape_cast %97 : vector<192xf32> to vector<1x1x192xf32>
    %99 = vector.broadcast %98 : vector<1x1x192xf32> to vector<4x4x192xf32>
    %100 = arith.mulf %95, %99 : vector<4x4x192xf32>
    %101 = arith.addf %94, %100 : vector<4x4x192xf32>
    %102 = vector.extract_strided_slice %1 {offsets = [2, 0, 0], sizes = [4, 4, 192], strides = [1, 1, 1]} : vector<10x10x192xf32> to vector<4x4x192xf32>
    %103 = vector.extract_strided_slice %2 {offsets = [14, 0], sizes = [1, 192], strides = [1, 1]} : vector<49x192xf32> to vector<1x192xf32>
    %104 = vector.shape_cast %103 : vector<1x192xf32> to vector<192xf32>
    %105 = vector.shape_cast %104 : vector<192xf32> to vector<1x1x192xf32>
    %106 = vector.broadcast %105 : vector<1x1x192xf32> to vector<4x4x192xf32>
    %107 = arith.mulf %102, %106 : vector<4x4x192xf32>
    %108 = arith.addf %101, %107 : vector<4x4x192xf32>
    %109 = vector.extract_strided_slice %1 {offsets = [2, 1, 0], sizes = [4, 4, 192], strides = [1, 1, 1]} : vector<10x10x192xf32> to vector<4x4x192xf32>
    %110 = vector.extract_strided_slice %2 {offsets = [15, 0], sizes = [1, 192], strides = [1, 1]} : vector<49x192xf32> to vector<1x192xf32>
    %111 = vector.shape_cast %110 : vector<1x192xf32> to vector<192xf32>
    %112 = vector.shape_cast %111 : vector<192xf32> to vector<1x1x192xf32>
    %113 = vector.broadcast %112 : vector<1x1x192xf32> to vector<4x4x192xf32>
    %114 = arith.mulf %109, %113 : vector<4x4x192xf32>
    %115 = arith.addf %108, %114 : vector<4x4x192xf32>
    %116 = vector.extract_strided_slice %1 {offsets = [2, 2, 0], sizes = [4, 4, 192], strides = [1, 1, 1]} : vector<10x10x192xf32> to vector<4x4x192xf32>
    %117 = vector.extract_strided_slice %2 {offsets = [16, 0], sizes = [1, 192], strides = [1, 1]} : vector<49x192xf32> to vector<1x192xf32>
    %118 = vector.shape_cast %117 : vector<1x192xf32> to vector<192xf32>
    %119 = vector.shape_cast %118 : vector<192xf32> to vector<1x1x192xf32>
    %120 = vector.broadcast %119 : vector<1x1x192xf32> to vector<4x4x192xf32>
    %121 = arith.mulf %116, %120 : vector<4x4x192xf32>
    %122 = arith.addf %115, %121 : vector<4x4x192xf32>
    %123 = vector.extract_strided_slice %1 {offsets = [2, 3, 0], sizes = [4, 4, 192], strides = [1, 1, 1]} : vector<10x10x192xf32> to vector<4x4x192xf32>
    %124 = vector.extract_strided_slice %2 {offsets = [17, 0], sizes = [1, 192], strides = [1, 1]} : vector<49x192xf32> to vector<1x192xf32>
    %125 = vector.shape_cast %124 : vector<1x192xf32> to vector<192xf32>
    %126 = vector.shape_cast %125 : vector<192xf32> to vector<1x1x192xf32>
    %127 = vector.broadcast %126 : vector<1x1x192xf32> to vector<4x4x192xf32>
    %128 = arith.mulf %123, %127 : vector<4x4x192xf32>
    %129 = arith.addf %122, %128 : vector<4x4x192xf32>
    %130 = vector.extract_strided_slice %1 {offsets = [2, 4, 0], sizes = [4, 4, 192], strides = [1, 1, 1]} : vector<10x10x192xf32> to vector<4x4x192xf32>
    %131 = vector.extract_strided_slice %2 {offsets = [18, 0], sizes = [1, 192], strides = [1, 1]} : vector<49x192xf32> to vector<1x192xf32>
    %132 = vector.shape_cast %131 : vector<1x192xf32> to vector<192xf32>
    %133 = vector.shape_cast %132 : vector<192xf32> to vector<1x1x192xf32>
    %134 = vector.broadcast %133 : vector<1x1x192xf32> to vector<4x4x192xf32>
    %135 = arith.mulf %130, %134 : vector<4x4x192xf32>
    %136 = arith.addf %129, %135 : vector<4x4x192xf32>
    %137 = vector.extract_strided_slice %1 {offsets = [2, 5, 0], sizes = [4, 4, 192], strides = [1, 1, 1]} : vector<10x10x192xf32> to vector<4x4x192xf32>
    %138 = vector.extract_strided_slice %2 {offsets = [19, 0], sizes = [1, 192], strides = [1, 1]} : vector<49x192xf32> to vector<1x192xf32>
    %139 = vector.shape_cast %138 : vector<1x192xf32> to vector<192xf32>
    %140 = vector.shape_cast %139 : vector<192xf32> to vector<1x1x192xf32>
    %141 = vector.broadcast %140 : vector<1x1x192xf32> to vector<4x4x192xf32>
    %142 = arith.mulf %137, %141 : vector<4x4x192xf32>
    %143 = arith.addf %136, %142 : vector<4x4x192xf32>
    %144 = vector.extract_strided_slice %1 {offsets = [2, 6, 0], sizes = [4, 4, 192], strides = [1, 1, 1]} : vector<10x10x192xf32> to vector<4x4x192xf32>
    %145 = vector.extract_strided_slice %2 {offsets = [20, 0], sizes = [1, 192], strides = [1, 1]} : vector<49x192xf32> to vector<1x192xf32>
    %146 = vector.shape_cast %145 : vector<1x192xf32> to vector<192xf32>
    %147 = vector.shape_cast %146 : vector<192xf32> to vector<1x1x192xf32>
    %148 = vector.broadcast %147 : vector<1x1x192xf32> to vector<4x4x192xf32>
    %149 = arith.mulf %144, %148 : vector<4x4x192xf32>
    %150 = arith.addf %143, %149 : vector<4x4x192xf32>
    %151 = vector.extract_strided_slice %1 {offsets = [3, 0, 0], sizes = [4, 4, 192], strides = [1, 1, 1]} : vector<10x10x192xf32> to vector<4x4x192xf32>
    %152 = vector.extract_strided_slice %2 {offsets = [21, 0], sizes = [1, 192], strides = [1, 1]} : vector<49x192xf32> to vector<1x192xf32>
    %153 = vector.shape_cast %152 : vector<1x192xf32> to vector<192xf32>
    %154 = vector.shape_cast %153 : vector<192xf32> to vector<1x1x192xf32>
    %155 = vector.broadcast %154 : vector<1x1x192xf32> to vector<4x4x192xf32>
    %156 = arith.mulf %151, %155 : vector<4x4x192xf32>
    %157 = arith.addf %150, %156 : vector<4x4x192xf32>
    %158 = vector.extract_strided_slice %1 {offsets = [3, 1, 0], sizes = [4, 4, 192], strides = [1, 1, 1]} : vector<10x10x192xf32> to vector<4x4x192xf32>
    %159 = vector.extract_strided_slice %2 {offsets = [22, 0], sizes = [1, 192], strides = [1, 1]} : vector<49x192xf32> to vector<1x192xf32>
    %160 = vector.shape_cast %159 : vector<1x192xf32> to vector<192xf32>
    %161 = vector.shape_cast %160 : vector<192xf32> to vector<1x1x192xf32>
    %162 = vector.broadcast %161 : vector<1x1x192xf32> to vector<4x4x192xf32>
    %163 = arith.mulf %158, %162 : vector<4x4x192xf32>
    %164 = arith.addf %157, %163 : vector<4x4x192xf32>
    %165 = vector.extract_strided_slice %1 {offsets = [3, 2, 0], sizes = [4, 4, 192], strides = [1, 1, 1]} : vector<10x10x192xf32> to vector<4x4x192xf32>
    %166 = vector.extract_strided_slice %2 {offsets = [23, 0], sizes = [1, 192], strides = [1, 1]} : vector<49x192xf32> to vector<1x192xf32>
    %167 = vector.shape_cast %166 : vector<1x192xf32> to vector<192xf32>
    %168 = vector.shape_cast %167 : vector<192xf32> to vector<1x1x192xf32>
    %169 = vector.broadcast %168 : vector<1x1x192xf32> to vector<4x4x192xf32>
    %170 = arith.mulf %165, %169 : vector<4x4x192xf32>
    %171 = arith.addf %164, %170 : vector<4x4x192xf32>
    %172 = vector.extract_strided_slice %1 {offsets = [3, 3, 0], sizes = [4, 4, 192], strides = [1, 1, 1]} : vector<10x10x192xf32> to vector<4x4x192xf32>
    %173 = vector.extract_strided_slice %2 {offsets = [24, 0], sizes = [1, 192], strides = [1, 1]} : vector<49x192xf32> to vector<1x192xf32>
    %174 = vector.shape_cast %173 : vector<1x192xf32> to vector<192xf32>
    %175 = vector.shape_cast %174 : vector<192xf32> to vector<1x1x192xf32>
    %176 = vector.broadcast %175 : vector<1x1x192xf32> to vector<4x4x192xf32>
    %177 = arith.mulf %172, %176 : vector<4x4x192xf32>
    %178 = arith.addf %171, %177 : vector<4x4x192xf32>
    %179 = vector.extract_strided_slice %1 {offsets = [3, 4, 0], sizes = [4, 4, 192], strides = [1, 1, 1]} : vector<10x10x192xf32> to vector<4x4x192xf32>
    %180 = vector.extract_strided_slice %2 {offsets = [25, 0], sizes = [1, 192], strides = [1, 1]} : vector<49x192xf32> to vector<1x192xf32>
    %181 = vector.shape_cast %180 : vector<1x192xf32> to vector<192xf32>
    %182 = vector.shape_cast %181 : vector<192xf32> to vector<1x1x192xf32>
    %183 = vector.broadcast %182 : vector<1x1x192xf32> to vector<4x4x192xf32>
    %184 = arith.mulf %179, %183 : vector<4x4x192xf32>
    %185 = arith.addf %178, %184 : vector<4x4x192xf32>
    %186 = vector.extract_strided_slice %1 {offsets = [3, 5, 0], sizes = [4, 4, 192], strides = [1, 1, 1]} : vector<10x10x192xf32> to vector<4x4x192xf32>
    %187 = vector.extract_strided_slice %2 {offsets = [26, 0], sizes = [1, 192], strides = [1, 1]} : vector<49x192xf32> to vector<1x192xf32>
    %188 = vector.shape_cast %187 : vector<1x192xf32> to vector<192xf32>
    %189 = vector.shape_cast %188 : vector<192xf32> to vector<1x1x192xf32>
    %190 = vector.broadcast %189 : vector<1x1x192xf32> to vector<4x4x192xf32>
    %191 = arith.mulf %186, %190 : vector<4x4x192xf32>
    %192 = arith.addf %185, %191 : vector<4x4x192xf32>
    %193 = vector.extract_strided_slice %1 {offsets = [3, 6, 0], sizes = [4, 4, 192], strides = [1, 1, 1]} : vector<10x10x192xf32> to vector<4x4x192xf32>
    %194 = vector.extract_strided_slice %2 {offsets = [27, 0], sizes = [1, 192], strides = [1, 1]} : vector<49x192xf32> to vector<1x192xf32>
    %195 = vector.shape_cast %194 : vector<1x192xf32> to vector<192xf32>
    %196 = vector.shape_cast %195 : vector<192xf32> to vector<1x1x192xf32>
    %197 = vector.broadcast %196 : vector<1x1x192xf32> to vector<4x4x192xf32>
    %198 = arith.mulf %193, %197 : vector<4x4x192xf32>
    %199 = arith.addf %192, %198 : vector<4x4x192xf32>
    %200 = vector.extract_strided_slice %1 {offsets = [4, 0, 0], sizes = [4, 4, 192], strides = [1, 1, 1]} : vector<10x10x192xf32> to vector<4x4x192xf32>
    %201 = vector.extract_strided_slice %2 {offsets = [28, 0], sizes = [1, 192], strides = [1, 1]} : vector<49x192xf32> to vector<1x192xf32>
    %202 = vector.shape_cast %201 : vector<1x192xf32> to vector<192xf32>
    %203 = vector.shape_cast %202 : vector<192xf32> to vector<1x1x192xf32>
    %204 = vector.broadcast %203 : vector<1x1x192xf32> to vector<4x4x192xf32>
    %205 = arith.mulf %200, %204 : vector<4x4x192xf32>
    %206 = arith.addf %199, %205 : vector<4x4x192xf32>
    %207 = vector.extract_strided_slice %1 {offsets = [4, 1, 0], sizes = [4, 4, 192], strides = [1, 1, 1]} : vector<10x10x192xf32> to vector<4x4x192xf32>
    %208 = vector.extract_strided_slice %2 {offsets = [29, 0], sizes = [1, 192], strides = [1, 1]} : vector<49x192xf32> to vector<1x192xf32>
    %209 = vector.shape_cast %208 : vector<1x192xf32> to vector<192xf32>
    %210 = vector.shape_cast %209 : vector<192xf32> to vector<1x1x192xf32>
    %211 = vector.broadcast %210 : vector<1x1x192xf32> to vector<4x4x192xf32>
    %212 = arith.mulf %207, %211 : vector<4x4x192xf32>
    %213 = arith.addf %206, %212 : vector<4x4x192xf32>
    %214 = vector.extract_strided_slice %1 {offsets = [4, 2, 0], sizes = [4, 4, 192], strides = [1, 1, 1]} : vector<10x10x192xf32> to vector<4x4x192xf32>
    %215 = vector.extract_strided_slice %2 {offsets = [30, 0], sizes = [1, 192], strides = [1, 1]} : vector<49x192xf32> to vector<1x192xf32>
    %216 = vector.shape_cast %215 : vector<1x192xf32> to vector<192xf32>
    %217 = vector.shape_cast %216 : vector<192xf32> to vector<1x1x192xf32>
    %218 = vector.broadcast %217 : vector<1x1x192xf32> to vector<4x4x192xf32>
    %219 = arith.mulf %214, %218 : vector<4x4x192xf32>
    %220 = arith.addf %213, %219 : vector<4x4x192xf32>
    %221 = vector.extract_strided_slice %1 {offsets = [4, 3, 0], sizes = [4, 4, 192], strides = [1, 1, 1]} : vector<10x10x192xf32> to vector<4x4x192xf32>
    %222 = vector.extract_strided_slice %2 {offsets = [31, 0], sizes = [1, 192], strides = [1, 1]} : vector<49x192xf32> to vector<1x192xf32>
    %223 = vector.shape_cast %222 : vector<1x192xf32> to vector<192xf32>
    %224 = vector.shape_cast %223 : vector<192xf32> to vector<1x1x192xf32>
    %225 = vector.broadcast %224 : vector<1x1x192xf32> to vector<4x4x192xf32>
    %226 = arith.mulf %221, %225 : vector<4x4x192xf32>
    %227 = arith.addf %220, %226 : vector<4x4x192xf32>
    %228 = vector.extract_strided_slice %1 {offsets = [4, 4, 0], sizes = [4, 4, 192], strides = [1, 1, 1]} : vector<10x10x192xf32> to vector<4x4x192xf32>
    %229 = vector.extract_strided_slice %2 {offsets = [32, 0], sizes = [1, 192], strides = [1, 1]} : vector<49x192xf32> to vector<1x192xf32>
    %230 = vector.shape_cast %229 : vector<1x192xf32> to vector<192xf32>
    %231 = vector.shape_cast %230 : vector<192xf32> to vector<1x1x192xf32>
    %232 = vector.broadcast %231 : vector<1x1x192xf32> to vector<4x4x192xf32>
    %233 = arith.mulf %228, %232 : vector<4x4x192xf32>
    %234 = arith.addf %227, %233 : vector<4x4x192xf32>
    %235 = vector.extract_strided_slice %1 {offsets = [4, 5, 0], sizes = [4, 4, 192], strides = [1, 1, 1]} : vector<10x10x192xf32> to vector<4x4x192xf32>
    %236 = vector.extract_strided_slice %2 {offsets = [33, 0], sizes = [1, 192], strides = [1, 1]} : vector<49x192xf32> to vector<1x192xf32>
    %237 = vector.shape_cast %236 : vector<1x192xf32> to vector<192xf32>
    %238 = vector.shape_cast %237 : vector<192xf32> to vector<1x1x192xf32>
    %239 = vector.broadcast %238 : vector<1x1x192xf32> to vector<4x4x192xf32>
    %240 = arith.mulf %235, %239 : vector<4x4x192xf32>
    %241 = arith.addf %234, %240 : vector<4x4x192xf32>
    %242 = vector.extract_strided_slice %1 {offsets = [4, 6, 0], sizes = [4, 4, 192], strides = [1, 1, 1]} : vector<10x10x192xf32> to vector<4x4x192xf32>
    %243 = vector.extract_strided_slice %2 {offsets = [34, 0], sizes = [1, 192], strides = [1, 1]} : vector<49x192xf32> to vector<1x192xf32>
    %244 = vector.shape_cast %243 : vector<1x192xf32> to vector<192xf32>
    %245 = vector.shape_cast %244 : vector<192xf32> to vector<1x1x192xf32>
    %246 = vector.broadcast %245 : vector<1x1x192xf32> to vector<4x4x192xf32>
    %247 = arith.mulf %242, %246 : vector<4x4x192xf32>
    %248 = arith.addf %241, %247 : vector<4x4x192xf32>
    %249 = vector.extract_strided_slice %1 {offsets = [5, 0, 0], sizes = [4, 4, 192], strides = [1, 1, 1]} : vector<10x10x192xf32> to vector<4x4x192xf32>
    %250 = vector.extract_strided_slice %2 {offsets = [35, 0], sizes = [1, 192], strides = [1, 1]} : vector<49x192xf32> to vector<1x192xf32>
    %251 = vector.shape_cast %250 : vector<1x192xf32> to vector<192xf32>
    %252 = vector.shape_cast %251 : vector<192xf32> to vector<1x1x192xf32>
    %253 = vector.broadcast %252 : vector<1x1x192xf32> to vector<4x4x192xf32>
    %254 = arith.mulf %249, %253 : vector<4x4x192xf32>
    %255 = arith.addf %248, %254 : vector<4x4x192xf32>
    %256 = vector.extract_strided_slice %1 {offsets = [5, 1, 0], sizes = [4, 4, 192], strides = [1, 1, 1]} : vector<10x10x192xf32> to vector<4x4x192xf32>
    %257 = vector.extract_strided_slice %2 {offsets = [36, 0], sizes = [1, 192], strides = [1, 1]} : vector<49x192xf32> to vector<1x192xf32>
    %258 = vector.shape_cast %257 : vector<1x192xf32> to vector<192xf32>
    %259 = vector.shape_cast %258 : vector<192xf32> to vector<1x1x192xf32>
    %260 = vector.broadcast %259 : vector<1x1x192xf32> to vector<4x4x192xf32>
    %261 = arith.mulf %256, %260 : vector<4x4x192xf32>
    %262 = arith.addf %255, %261 : vector<4x4x192xf32>
    %263 = vector.extract_strided_slice %1 {offsets = [5, 2, 0], sizes = [4, 4, 192], strides = [1, 1, 1]} : vector<10x10x192xf32> to vector<4x4x192xf32>
    %264 = vector.extract_strided_slice %2 {offsets = [37, 0], sizes = [1, 192], strides = [1, 1]} : vector<49x192xf32> to vector<1x192xf32>
    %265 = vector.shape_cast %264 : vector<1x192xf32> to vector<192xf32>
    %266 = vector.shape_cast %265 : vector<192xf32> to vector<1x1x192xf32>
    %267 = vector.broadcast %266 : vector<1x1x192xf32> to vector<4x4x192xf32>
    %268 = arith.mulf %263, %267 : vector<4x4x192xf32>
    %269 = arith.addf %262, %268 : vector<4x4x192xf32>
    %270 = vector.extract_strided_slice %1 {offsets = [5, 3, 0], sizes = [4, 4, 192], strides = [1, 1, 1]} : vector<10x10x192xf32> to vector<4x4x192xf32>
    %271 = vector.extract_strided_slice %2 {offsets = [38, 0], sizes = [1, 192], strides = [1, 1]} : vector<49x192xf32> to vector<1x192xf32>
    %272 = vector.shape_cast %271 : vector<1x192xf32> to vector<192xf32>
    %273 = vector.shape_cast %272 : vector<192xf32> to vector<1x1x192xf32>
    %274 = vector.broadcast %273 : vector<1x1x192xf32> to vector<4x4x192xf32>
    %275 = arith.mulf %270, %274 : vector<4x4x192xf32>
    %276 = arith.addf %269, %275 : vector<4x4x192xf32>
    %277 = vector.extract_strided_slice %1 {offsets = [5, 4, 0], sizes = [4, 4, 192], strides = [1, 1, 1]} : vector<10x10x192xf32> to vector<4x4x192xf32>
    %278 = vector.extract_strided_slice %2 {offsets = [39, 0], sizes = [1, 192], strides = [1, 1]} : vector<49x192xf32> to vector<1x192xf32>
    %279 = vector.shape_cast %278 : vector<1x192xf32> to vector<192xf32>
    %280 = vector.shape_cast %279 : vector<192xf32> to vector<1x1x192xf32>
    %281 = vector.broadcast %280 : vector<1x1x192xf32> to vector<4x4x192xf32>
    %282 = arith.mulf %277, %281 : vector<4x4x192xf32>
    %283 = arith.addf %276, %282 : vector<4x4x192xf32>
    %284 = vector.extract_strided_slice %1 {offsets = [5, 5, 0], sizes = [4, 4, 192], strides = [1, 1, 1]} : vector<10x10x192xf32> to vector<4x4x192xf32>
    %285 = vector.extract_strided_slice %2 {offsets = [40, 0], sizes = [1, 192], strides = [1, 1]} : vector<49x192xf32> to vector<1x192xf32>
    %286 = vector.shape_cast %285 : vector<1x192xf32> to vector<192xf32>
    %287 = vector.shape_cast %286 : vector<192xf32> to vector<1x1x192xf32>
    %288 = vector.broadcast %287 : vector<1x1x192xf32> to vector<4x4x192xf32>
    %289 = arith.mulf %284, %288 : vector<4x4x192xf32>
    %290 = arith.addf %283, %289 : vector<4x4x192xf32>
    %291 = vector.extract_strided_slice %1 {offsets = [5, 6, 0], sizes = [4, 4, 192], strides = [1, 1, 1]} : vector<10x10x192xf32> to vector<4x4x192xf32>
    %292 = vector.extract_strided_slice %2 {offsets = [41, 0], sizes = [1, 192], strides = [1, 1]} : vector<49x192xf32> to vector<1x192xf32>
    %293 = vector.shape_cast %292 : vector<1x192xf32> to vector<192xf32>
    %294 = vector.shape_cast %293 : vector<192xf32> to vector<1x1x192xf32>
    %295 = vector.broadcast %294 : vector<1x1x192xf32> to vector<4x4x192xf32>
    %296 = arith.mulf %291, %295 : vector<4x4x192xf32>
    %297 = arith.addf %290, %296 : vector<4x4x192xf32>
    %298 = vector.extract_strided_slice %1 {offsets = [6, 0, 0], sizes = [4, 4, 192], strides = [1, 1, 1]} : vector<10x10x192xf32> to vector<4x4x192xf32>
    %299 = vector.extract_strided_slice %2 {offsets = [42, 0], sizes = [1, 192], strides = [1, 1]} : vector<49x192xf32> to vector<1x192xf32>
    %300 = vector.shape_cast %299 : vector<1x192xf32> to vector<192xf32>
    %301 = vector.shape_cast %300 : vector<192xf32> to vector<1x1x192xf32>
    %302 = vector.broadcast %301 : vector<1x1x192xf32> to vector<4x4x192xf32>
    %303 = arith.mulf %298, %302 : vector<4x4x192xf32>
    %304 = arith.addf %297, %303 : vector<4x4x192xf32>
    %305 = vector.extract_strided_slice %1 {offsets = [6, 1, 0], sizes = [4, 4, 192], strides = [1, 1, 1]} : vector<10x10x192xf32> to vector<4x4x192xf32>
    %306 = vector.extract_strided_slice %2 {offsets = [43, 0], sizes = [1, 192], strides = [1, 1]} : vector<49x192xf32> to vector<1x192xf32>
    %307 = vector.shape_cast %306 : vector<1x192xf32> to vector<192xf32>
    %308 = vector.shape_cast %307 : vector<192xf32> to vector<1x1x192xf32>
    %309 = vector.broadcast %308 : vector<1x1x192xf32> to vector<4x4x192xf32>
    %310 = arith.mulf %305, %309 : vector<4x4x192xf32>
    %311 = arith.addf %304, %310 : vector<4x4x192xf32>
    %312 = vector.extract_strided_slice %1 {offsets = [6, 2, 0], sizes = [4, 4, 192], strides = [1, 1, 1]} : vector<10x10x192xf32> to vector<4x4x192xf32>
    %313 = vector.extract_strided_slice %2 {offsets = [44, 0], sizes = [1, 192], strides = [1, 1]} : vector<49x192xf32> to vector<1x192xf32>
    %314 = vector.shape_cast %313 : vector<1x192xf32> to vector<192xf32>
    %315 = vector.shape_cast %314 : vector<192xf32> to vector<1x1x192xf32>
    %316 = vector.broadcast %315 : vector<1x1x192xf32> to vector<4x4x192xf32>
    %317 = arith.mulf %312, %316 : vector<4x4x192xf32>
    %318 = arith.addf %311, %317 : vector<4x4x192xf32>
    %319 = vector.extract_strided_slice %1 {offsets = [6, 3, 0], sizes = [4, 4, 192], strides = [1, 1, 1]} : vector<10x10x192xf32> to vector<4x4x192xf32>
    %320 = vector.extract_strided_slice %2 {offsets = [45, 0], sizes = [1, 192], strides = [1, 1]} : vector<49x192xf32> to vector<1x192xf32>
    %321 = vector.shape_cast %320 : vector<1x192xf32> to vector<192xf32>
    %322 = vector.shape_cast %321 : vector<192xf32> to vector<1x1x192xf32>
    %323 = vector.broadcast %322 : vector<1x1x192xf32> to vector<4x4x192xf32>
    %324 = arith.mulf %319, %323 : vector<4x4x192xf32>
    %325 = arith.addf %318, %324 : vector<4x4x192xf32>
    %326 = vector.extract_strided_slice %1 {offsets = [6, 4, 0], sizes = [4, 4, 192], strides = [1, 1, 1]} : vector<10x10x192xf32> to vector<4x4x192xf32>
    %327 = vector.extract_strided_slice %2 {offsets = [46, 0], sizes = [1, 192], strides = [1, 1]} : vector<49x192xf32> to vector<1x192xf32>
    %328 = vector.shape_cast %327 : vector<1x192xf32> to vector<192xf32>
    %329 = vector.shape_cast %328 : vector<192xf32> to vector<1x1x192xf32>
    %330 = vector.broadcast %329 : vector<1x1x192xf32> to vector<4x4x192xf32>
    %331 = arith.mulf %326, %330 : vector<4x4x192xf32>
    %332 = arith.addf %325, %331 : vector<4x4x192xf32>
    %333 = vector.extract_strided_slice %1 {offsets = [6, 5, 0], sizes = [4, 4, 192], strides = [1, 1, 1]} : vector<10x10x192xf32> to vector<4x4x192xf32>
    %334 = vector.extract_strided_slice %2 {offsets = [47, 0], sizes = [1, 192], strides = [1, 1]} : vector<49x192xf32> to vector<1x192xf32>
    %335 = vector.shape_cast %334 : vector<1x192xf32> to vector<192xf32>
    %336 = vector.shape_cast %335 : vector<192xf32> to vector<1x1x192xf32>
    %337 = vector.broadcast %336 : vector<1x1x192xf32> to vector<4x4x192xf32>
    %338 = arith.mulf %333, %337 : vector<4x4x192xf32>
    %339 = arith.addf %332, %338 : vector<4x4x192xf32>
    %340 = vector.extract_strided_slice %1 {offsets = [6, 6, 0], sizes = [4, 4, 192], strides = [1, 1, 1]} : vector<10x10x192xf32> to vector<4x4x192xf32>
    %341 = vector.extract_strided_slice %2 {offsets = [48, 0], sizes = [1, 192], strides = [1, 1]} : vector<49x192xf32> to vector<1x192xf32>
    %342 = vector.shape_cast %341 : vector<1x192xf32> to vector<192xf32>
    %343 = vector.shape_cast %342 : vector<192xf32> to vector<1x1x192xf32>
    %344 = vector.broadcast %343 : vector<1x1x192xf32> to vector<4x4x192xf32>
    %345 = arith.mulf %340, %344 : vector<4x4x192xf32>
    %346 = arith.addf %339, %345 : vector<4x4x192xf32>
    %c0_5 = arith.constant 0 : index
    %c0_6 = arith.constant 0 : index
    %347 = vector.load %arg3[%c0_5, %c0_6] : memref<1x192xf32, #tpu.memory_space<vmem>>, vector<1x192xf32>
    %348 = vector.shape_cast %347 : vector<1x192xf32> to vector<1x1x192xf32>
    %349 = vector.broadcast %348 : vector<1x1x192xf32> to vector<4x4x192xf32>
    %350 = arith.addf %346, %349 : vector<4x4x192xf32>
    %cst_7 = arith.constant dense<0.000000e+00> : vector<4x192xf32>
    %351 = vector.multi_reduction <add>, %350, %cst_7 [0] : vector<4x4x192xf32> to vector<4x192xf32>
    %cst_8 = arith.constant 4.000000e+00 : f32
    %352 = vector.broadcast %cst_8 : f32 to vector<4x192xf32>
    %353 = arith.divf %351, %352 : vector<4x192xf32>
    %cst_9 = arith.constant dense<0.000000e+00> : vector<192xf32>
    %354 = vector.multi_reduction <add>, %353, %cst_9 [0] : vector<4x192xf32> to vector<192xf32>
    %355 = vector.shape_cast %354 : vector<192xf32> to vector<1x192xf32>
    %cst_10 = arith.constant 4.000000e+00 : f32
    %356 = vector.broadcast %cst_10 : f32 to vector<1x192xf32>
    %357 = arith.divf %355, %356 : vector<1x192xf32>
    %358 = arith.truncf %357 : vector<1x192xf32> to vector<1x192xbf16>
    %c0_11 = arith.constant 0 : index
    %c0_12 = arith.constant 0 : index
    %359 = vector.load %arg4[%c0_11, %c0_12] : memref<192x48xbf16, #tpu.memory_space<vmem>>, vector<192x48xbf16>
    %cst_13 = arith.constant dense<0.000000e+00> : vector<1x48xf32>
    %360 = tpu.matmul %358, %359, %cst_13 {dimension_numbers = #tpu.dot_dimension_numbers<[1], [0], [0], [1], [0, 0, 1, 1], [], []>} : vector<1x192xbf16>, vector<192x48xbf16>, vector<1x48xf32> -> vector<1x48xf32>
    %c0_14 = arith.constant 0 : index
    %c0_15 = arith.constant 0 : index
    %361 = vector.load %arg5[%c0_14, %c0_15] : memref<1x48xf32, #tpu.memory_space<vmem>>, vector<1x48xf32>
    %362 = arith.addf %360, %361 : vector<1x48xf32>
    %cst_16 = arith.constant 0.000000e+00 : f32
    %363 = vector.broadcast %cst_16 : f32 to vector<1x48xf32>
    %364 = arith.maximumf %362, %363 : vector<1x48xf32>
    %365 = arith.truncf %364 : vector<1x48xf32> to vector<1x48xbf16>
    %c0_17 = arith.constant 0 : index
    %c0_18 = arith.constant 0 : index
    %366 = vector.load %arg6[%c0_17, %c0_18] : memref<48x192xbf16, #tpu.memory_space<vmem>>, vector<48x192xbf16>
    %cst_19 = arith.constant dense<0.000000e+00> : vector<1x192xf32>
    %367 = tpu.matmul %365, %366, %cst_19 {dimension_numbers = #tpu.dot_dimension_numbers<[1], [0], [0], [1], [0, 0, 1, 1], [], []>} : vector<1x48xbf16>, vector<48x192xbf16>, vector<1x192xf32> -> vector<1x192xf32>
    %c0_20 = arith.constant 0 : index
    %c0_21 = arith.constant 0 : index
    %368 = vector.load %arg7[%c0_20, %c0_21] : memref<1x192xf32, #tpu.memory_space<vmem>>, vector<1x192xf32>
    %369 = arith.addf %367, %368 : vector<1x192xf32>
    %370 = arith.negf %369 : vector<1x192xf32>
    %371 = math.exp %370 : vector<1x192xf32>
    %cst_22 = arith.constant 1.000000e+00 : f32
    %372 = vector.broadcast %cst_22 : f32 to vector<1x192xf32>
    %373 = arith.addf %372, %371 : vector<1x192xf32>
    %374 = arith.divf %372, %373 : vector<1x192xf32>
    %375 = vector.extract_strided_slice %1 {offsets = [3, 3, 0], sizes = [4, 4, 192], strides = [1, 1, 1]} : vector<10x10x192xf32> to vector<4x4x192xf32>
    %376 = vector.shape_cast %374 : vector<1x192xf32> to vector<192xf32>
    %377 = vector.shape_cast %376 : vector<192xf32> to vector<1x1x192xf32>
    %378 = vector.broadcast %377 : vector<1x1x192xf32> to vector<4x4x192xf32>
    %379 = arith.mulf %350, %378 : vector<4x4x192xf32>
    %380 = arith.addf %375, %379 : vector<4x4x192xf32>
    %c0_23 = arith.constant 0 : index
    %c0_24 = arith.constant 0 : index
    %c0_25 = arith.constant 0 : index
    %c0_26 = arith.constant 0 : index
    %381 = vector.load %arg8[%c0_23, %c0_24, %c0_25, %c0_26] : memref<1x4x4x192xf32, #tpu.memory_space<vmem>>, vector<1x4x4x192xf32>
    %382 = vector.shape_cast %381 : vector<1x4x4x192xf32> to vector<4x4x192xf32>
    %383 = vector.shape_cast %380 : vector<4x4x192xf32> to vector<1x4x4x192xf32>
    tpu.vector_store %arg8[%c0_23, %c0_24, %c0_25, %c0_26], %383 {strides = array<i32>} : memref<1x4x4x192xf32, #tpu.memory_space<vmem>>, vector<1x4x4x192xf32>,
    return
  }
  func.func @transform_0(%arg0: i32) -> (i32, i32, i32, i32) {
    %c0_i32 = arith.constant 0 : i32
    %c0_i32_0 = arith.constant 0 : i32
    %c0_i32_1 = arith.constant 0 : i32
    %c0_i32_2 = arith.constant 0 : i32
    return %arg0, %c0_i32, %c0_i32_0, %c0_i32_1 : i32, i32, i32, i32
  }
  func.func @transform_1(%arg0: i32) -> (i32, i32) {
    %c0_i32 = arith.constant 0 : i32
    %c0_i32_0 = arith.constant 0 : i32
    %c0_i32_1 = arith.constant 0 : i32
    return %c0_i32, %c0_i32_0 : i32, i32
  }
  func.func @transform_2(%arg0: i32) -> (i32, i32) {
    %c0_i32 = arith.constant 0 : i32
    %c0_i32_0 = arith.constant 0 : i32
    %c0_i32_1 = arith.constant 0 : i32
    return %c0_i32, %c0_i32_0 : i32, i32
  }
  func.func @transform_3(%arg0: i32) -> (i32, i32) {
    %c0_i32 = arith.constant 0 : i32
    %c0_i32_0 = arith.constant 0 : i32
    %c0_i32_1 = arith.constant 0 : i32
    return %c0_i32, %c0_i32_0 : i32, i32
  }
  func.func @transform_4(%arg0: i32) -> (i32, i32) {
    %c0_i32 = arith.constant 0 : i32
    %c0_i32_0 = arith.constant 0 : i32
    %c0_i32_1 = arith.constant 0 : i32
    return %c0_i32, %c0_i32_0 : i32, i32
  }
  func.func @transform_5(%arg0: i32) -> (i32, i32) {
    %c0_i32 = arith.constant 0 : i32
    %c0_i32_0 = arith.constant 0 : i32
    %c0_i32_1 = arith.constant 0 : i32
    return %c0_i32, %c0_i32_0 : i32, i32
  }
  func.func @transform_6(%arg0: i32) -> (i32, i32) {
    %c0_i32 = arith.constant 0 : i32
    %c0_i32_0 = arith.constant 0 : i32
    %c0_i32_1 = arith.constant 0 : i32
    return %c0_i32, %c0_i32_0 : i32, i32
  }
  func.func @transform_7(%arg0: i32) -> (i32, i32, i32, i32) {
    %c0_i32 = arith.constant 0 : i32
    %c0_i32_0 = arith.constant 0 : i32
    %c0_i32_1 = arith.constant 0 : i32
    %c0_i32_2 = arith.constant 0 : i32
    return %arg0, %c0_i32, %c0_i32_0, %c0_i32_1 : i32, i32, i32, i32
  }
}

module attributes {stable_mosaic.version = 11 : i64} {
  func.func @_mm_bias_kernel(%arg0: i32, %arg1: memref<32x192xbf16, #tpu.memory_space<vmem>>, %arg2: memref<192x768xbf16, #tpu.memory_space<vmem>>, %arg3: memref<1x768xf32, #tpu.memory_space<vmem>>, %arg4: memref<32x768xbf16, #tpu.memory_space<vmem>>) attributes {dimension_semantics = [#tpu.dimension_semantics<parallel>], iteration_bounds = array<i64: 1>, scalar_prefetch = 0 : i64, scratch_operands = 0 : i64, tpu.core_type = #tpu.core_type<tc>, window_params = [{transform_indices = @transform_0, window_bounds = array<i64: 32, 192>}, {pipeline_mode = #tpu.pipeline_mode<synchronous>, transform_indices = @transform_1, window_bounds = array<i64: 192, 768>}, {pipeline_mode = #tpu.pipeline_mode<synchronous>, transform_indices = @transform_2, window_bounds = array<i64: 1, 768>}, {transform_indices = @transform_3, window_bounds = array<i64: 32, 768>}]} {
    %c0 = arith.constant 0 : index
    %c0_0 = arith.constant 0 : index
    %0 = vector.load %arg1[%c0, %c0_0] : memref<32x192xbf16, #tpu.memory_space<vmem>>, vector<32x192xbf16>
    %c0_1 = arith.constant 0 : index
    %c0_2 = arith.constant 0 : index
    %1 = vector.load %arg2[%c0_1, %c0_2] : memref<192x768xbf16, #tpu.memory_space<vmem>>, vector<192x768xbf16>
    %cst = arith.constant dense<0.000000e+00> : vector<32x768xf32>
    %2 = tpu.matmul %0, %1, %cst {dimension_numbers = #tpu.dot_dimension_numbers<[1], [0], [0], [1], [0, 0, 1, 1], [], []>} : vector<32x192xbf16>, vector<192x768xbf16>, vector<32x768xf32> -> vector<32x768xf32>
    %c0_3 = arith.constant 0 : index
    %c0_4 = arith.constant 0 : index
    %3 = vector.load %arg3[%c0_3, %c0_4] : memref<1x768xf32, #tpu.memory_space<vmem>>, vector<1x768xf32>
    %4 = vector.broadcast %3 : vector<1x768xf32> to vector<32x768xf32>
    %5 = arith.addf %2, %4 : vector<32x768xf32>
    %6 = arith.mulf %5, %5 : vector<32x768xf32>
    %7 = arith.mulf %5, %6 : vector<32x768xf32>
    %cst_5 = arith.constant 4.471500e-02 : f32
    %8 = vector.broadcast %cst_5 : f32 to vector<32x768xf32>
    %9 = arith.mulf %8, %7 : vector<32x768xf32>
    %10 = arith.addf %5, %9 : vector<32x768xf32>
    %cst_6 = arith.constant 0.797884583 : f32
    %11 = vector.broadcast %cst_6 : f32 to vector<32x768xf32>
    %12 = arith.mulf %11, %10 : vector<32x768xf32>
    %13 = math.tanh %12 : vector<32x768xf32>
    %cst_7 = arith.constant 1.000000e+00 : f32
    %14 = vector.broadcast %cst_7 : f32 to vector<32x768xf32>
    %15 = arith.addf %14, %13 : vector<32x768xf32>
    %cst_8 = arith.constant 5.000000e-01 : f32
    %16 = vector.broadcast %cst_8 : f32 to vector<32x768xf32>
    %17 = arith.mulf %16, %15 : vector<32x768xf32>
    %18 = arith.mulf %5, %17 : vector<32x768xf32>
    %19 = arith.truncf %18 : vector<32x768xf32> to vector<32x768xbf16>
    %c0_9 = arith.constant 0 : index
    %c0_10 = arith.constant 0 : index
    %20 = vector.load %arg4[%c0_9, %c0_10] : memref<32x768xbf16, #tpu.memory_space<vmem>>, vector<32x768xbf16>
    tpu.vector_store %arg4[%c0_9, %c0_10], %19 {strides = array<i32>} : memref<32x768xbf16, #tpu.memory_space<vmem>>, vector<32x768xbf16>,
    return
  }
  func.func @transform_0(%arg0: i32) -> (i32, i32) {
    %c0_i32 = arith.constant 0 : i32
    %c0_i32_0 = arith.constant 0 : i32
    return %arg0, %c0_i32 : i32, i32
  }
  func.func @transform_1(%arg0: i32) -> (i32, i32) {
    %c0_i32 = arith.constant 0 : i32
    %c0_i32_0 = arith.constant 0 : i32
    %c0_i32_1 = arith.constant 0 : i32
    return %c0_i32, %c0_i32_0 : i32, i32
  }
  func.func @transform_2(%arg0: i32) -> (i32, i32) {
    %c0_i32 = arith.constant 0 : i32
    %c0_i32_0 = arith.constant 0 : i32
    %c0_i32_1 = arith.constant 0 : i32
    return %c0_i32, %c0_i32_0 : i32, i32
  }
  func.func @transform_3(%arg0: i32) -> (i32, i32) {
    %c0_i32 = arith.constant 0 : i32
    %c0_i32_0 = arith.constant 0 : i32
    return %arg0, %c0_i32 : i32, i32
  }
}

module attributes {stable_mosaic.version = 11 : i64} {
  func.func @_mm_bias_res_kernel(%arg0: i32, %arg1: memref<32x768xbf16, #tpu.memory_space<vmem>>, %arg2: memref<768x192xbf16, #tpu.memory_space<vmem>>, %arg3: memref<1x192xf32, #tpu.memory_space<vmem>>, %arg4: memref<32x192xf32, #tpu.memory_space<vmem>>, %arg5: memref<32x192xf32, #tpu.memory_space<vmem>>) attributes {dimension_semantics = [#tpu.dimension_semantics<parallel>], iteration_bounds = array<i64: 1>, scalar_prefetch = 0 : i64, scratch_operands = 0 : i64, tpu.core_type = #tpu.core_type<tc>, window_params = [{transform_indices = @transform_0, window_bounds = array<i64: 32, 768>}, {pipeline_mode = #tpu.pipeline_mode<synchronous>, transform_indices = @transform_1, window_bounds = array<i64: 768, 192>}, {pipeline_mode = #tpu.pipeline_mode<synchronous>, transform_indices = @transform_2, window_bounds = array<i64: 1, 192>}, {transform_indices = @transform_3, window_bounds = array<i64: 32, 192>}, {transform_indices = @transform_4, window_bounds = array<i64: 32, 192>}]} {
    %c0 = arith.constant 0 : index
    %c0_0 = arith.constant 0 : index
    %0 = vector.load %arg1[%c0, %c0_0] : memref<32x768xbf16, #tpu.memory_space<vmem>>, vector<32x768xbf16>
    %c0_1 = arith.constant 0 : index
    %c0_2 = arith.constant 0 : index
    %1 = vector.load %arg2[%c0_1, %c0_2] : memref<768x192xbf16, #tpu.memory_space<vmem>>, vector<768x192xbf16>
    %cst = arith.constant dense<0.000000e+00> : vector<32x192xf32>
    %2 = tpu.matmul %0, %1, %cst {dimension_numbers = #tpu.dot_dimension_numbers<[1], [0], [0], [1], [0, 0, 1, 1], [], []>} : vector<32x768xbf16>, vector<768x192xbf16>, vector<32x192xf32> -> vector<32x192xf32>
    %c0_3 = arith.constant 0 : index
    %c0_4 = arith.constant 0 : index
    %3 = vector.load %arg3[%c0_3, %c0_4] : memref<1x192xf32, #tpu.memory_space<vmem>>, vector<1x192xf32>
    %4 = vector.broadcast %3 : vector<1x192xf32> to vector<32x192xf32>
    %5 = arith.addf %2, %4 : vector<32x192xf32>
    %c0_5 = arith.constant 0 : index
    %c0_6 = arith.constant 0 : index
    %6 = vector.load %arg4[%c0_5, %c0_6] : memref<32x192xf32, #tpu.memory_space<vmem>>, vector<32x192xf32>
    %7 = arith.addf %5, %6 : vector<32x192xf32>
    %c0_7 = arith.constant 0 : index
    %c0_8 = arith.constant 0 : index
    %8 = vector.load %arg5[%c0_7, %c0_8] : memref<32x192xf32, #tpu.memory_space<vmem>>, vector<32x192xf32>
    tpu.vector_store %arg5[%c0_7, %c0_8], %7 {strides = array<i32>} : memref<32x192xf32, #tpu.memory_space<vmem>>, vector<32x192xf32>,
    return
  }
  func.func @transform_0(%arg0: i32) -> (i32, i32) {
    %c0_i32 = arith.constant 0 : i32
    %c0_i32_0 = arith.constant 0 : i32
    return %arg0, %c0_i32 : i32, i32
  }
  func.func @transform_1(%arg0: i32) -> (i32, i32) {
    %c0_i32 = arith.constant 0 : i32
    %c0_i32_0 = arith.constant 0 : i32
    %c0_i32_1 = arith.constant 0 : i32
    return %c0_i32, %c0_i32_0 : i32, i32
  }
  func.func @transform_2(%arg0: i32) -> (i32, i32) {
    %c0_i32 = arith.constant 0 : i32
    %c0_i32_0 = arith.constant 0 : i32
    %c0_i32_1 = arith.constant 0 : i32
    return %c0_i32, %c0_i32_0 : i32, i32
  }
  func.func @transform_3(%arg0: i32) -> (i32, i32) {
    %c0_i32 = arith.constant 0 : i32
    %c0_i32_0 = arith.constant 0 : i32
    return %arg0, %c0_i32 : i32, i32
  }
  func.func @transform_4(%arg0: i32) -> (i32, i32) {
    %c0_i32 = arith.constant 0 : i32
    %c0_i32_0 = arith.constant 0 : i32
    return %arg0, %c0_i32 : i32, i32
  }
}

module attributes {stable_mosaic.version = 11 : i64} {
  func.func @_gap_ln_head_kernel(%arg0: memref<2x16x192xf32, #tpu.memory_space<vmem>>, %arg1: memref<1x192xf32, #tpu.memory_space<vmem>>, %arg2: memref<1x192xf32, #tpu.memory_space<vmem>>, %arg3: memref<192x128xbf16, #tpu.memory_space<vmem>>, %arg4: memref<1x128xf32, #tpu.memory_space<vmem>>, %arg5: memref<2x128xf32, #tpu.memory_space<vmem>>) attributes {dimension_semantics = [], scalar_prefetch = 0 : i64, scratch_operands = 0 : i64, tpu.core_type = #tpu.core_type<tc>} {
    %c0 = arith.constant 0 : index
    %c0_0 = arith.constant 0 : index
    %c0_1 = arith.constant 0 : index
    %0 = vector.load %arg0[%c0, %c0_0, %c0_1] : memref<2x16x192xf32, #tpu.memory_space<vmem>>, vector<2x16x192xf32>
    %cst = arith.constant dense<0.000000e+00> : vector<2x192xf32>
    %1 = vector.multi_reduction <add>, %0, %cst [1] : vector<2x16x192xf32> to vector<2x192xf32>
    %cst_2 = arith.constant 1.600000e+01 : f32
    %2 = vector.broadcast %cst_2 : f32 to vector<2x192xf32>
    %3 = arith.divf %1, %2 : vector<2x192xf32>
    %cst_3 = arith.constant dense<0.000000e+00> : vector<2xf32>
    %4 = vector.multi_reduction <add>, %3, %cst_3 [1] : vector<2x192xf32> to vector<2xf32>
    %5 = vector.shape_cast %4 : vector<2xf32> to vector<2x1xf32>
    %cst_4 = arith.constant 1.920000e+02 : f32
    %6 = vector.broadcast %cst_4 : f32 to vector<2x1xf32>
    %7 = arith.divf %5, %6 : vector<2x1xf32>
    %8 = vector.broadcast %7 : vector<2x1xf32> to vector<2x192xf32>
    %9 = arith.subf %3, %8 : vector<2x192xf32>
    %10 = arith.mulf %9, %9 : vector<2x192xf32>
    %cst_5 = arith.constant dense<0.000000e+00> : vector<2xf32>
    %11 = vector.multi_reduction <add>, %10, %cst_5 [1] : vector<2x192xf32> to vector<2xf32>
    %12 = vector.shape_cast %11 : vector<2xf32> to vector<2x1xf32>
    %cst_6 = arith.constant 1.920000e+02 : f32
    %13 = vector.broadcast %cst_6 : f32 to vector<2x1xf32>
    %14 = arith.divf %12, %13 : vector<2x1xf32>
    %15 = vector.broadcast %7 : vector<2x1xf32> to vector<2x192xf32>
    %16 = arith.subf %3, %15 : vector<2x192xf32>
    %cst_7 = arith.constant 9.99999974E-6 : f32
    %17 = vector.broadcast %cst_7 : f32 to vector<2x1xf32>
    %18 = arith.addf %14, %17 : vector<2x1xf32>
    %19 = math.rsqrt %18 : vector<2x1xf32>
    %20 = vector.broadcast %19 : vector<2x1xf32> to vector<2x192xf32>
    %21 = arith.mulf %16, %20 : vector<2x192xf32>
    %c0_8 = arith.constant 0 : index
    %c0_9 = arith.constant 0 : index
    %22 = vector.load %arg1[%c0_8, %c0_9] : memref<1x192xf32, #tpu.memory_space<vmem>>, vector<1x192xf32>
    %23 = vector.broadcast %22 : vector<1x192xf32> to vector<2x192xf32>
    %24 = arith.mulf %21, %23 : vector<2x192xf32>
    %c0_10 = arith.constant 0 : index
    %c0_11 = arith.constant 0 : index
    %25 = vector.load %arg2[%c0_10, %c0_11] : memref<1x192xf32, #tpu.memory_space<vmem>>, vector<1x192xf32>
    %26 = vector.broadcast %25 : vector<1x192xf32> to vector<2x192xf32>
    %27 = arith.addf %24, %26 : vector<2x192xf32>
    %28 = arith.truncf %27 : vector<2x192xf32> to vector<2x192xbf16>
    %c0_12 = arith.constant 0 : index
    %c0_13 = arith.constant 0 : index
    %29 = vector.load %arg3[%c0_12, %c0_13] : memref<192x128xbf16, #tpu.memory_space<vmem>>, vector<192x128xbf16>
    %cst_14 = arith.constant dense<0.000000e+00> : vector<2x128xf32>
    %30 = tpu.matmul %28, %29, %cst_14 {dimension_numbers = #tpu.dot_dimension_numbers<[1], [0], [0], [1], [0, 0, 1, 1], [], []>} : vector<2x192xbf16>, vector<192x128xbf16>, vector<2x128xf32> -> vector<2x128xf32>
    %c0_15 = arith.constant 0 : index
    %c0_16 = arith.constant 0 : index
    %31 = vector.load %arg4[%c0_15, %c0_16] : memref<1x128xf32, #tpu.memory_space<vmem>>, vector<1x128xf32>
    %32 = vector.broadcast %31 : vector<1x128xf32> to vector<2x128xf32>
    %33 = arith.addf %30, %32 : vector<2x128xf32>
    %c0_17 = arith.constant 0 : index
    %c0_18 = arith.constant 0 : index
    %34 = vector.load %arg5[%c0_17, %c0_18] : memref<2x128xf32, #tpu.memory_space<vmem>>, vector<2x128xf32>
    tpu.vector_store %arg5[%c0_17, %c0_18], %33 {strides = array<i32>} : memref<2x128xf32, #tpu.memory_space<vmem>>, vector<2x128xf32>,
    return
  }
}

</mosaic_0001>

<bundles_post_ra>
// kernel: cog_replknet_forward.6
= control target key start
LH: loop header
LB: loop body
LE: loop exit
PB: predicated region body
PF: predicated region fallthrough
CT: control target
= control target key end

     0   :  { %vm121_vm0 = vcmask 1040384   ;;  %vm96_vm1 = vcmask 146432   ;;  %vm222_vm2 = vcmask 785408   ;;  %vm686_vm3 = vcmask 781312   ;;  %s1317_s1 = inlined_call_operand.vmem [shape: bf16[18,96], index: 1, kind: input, shape index: {}]   ;;  %s1318_s0 = inlined_call_operand.vmem [shape: bf16[128,18], index: 0, kind: input, shape index: {}]   ;;  %s1319_s2 = inlined_call_operand.vmem [shape: f32[1,96], index: 2, kind: input, shape index: {}]   ;;  %s1320_s3 = inlined_call_operand.vmem [shape: f32[1,96], index: 3, kind: input, shape index: {}]   ;;  %s1321_s4 = inlined_call_operand.vmem [shape: f32[1,96], index: 4, kind: input, shape index: {}]   ;;  %s1322_s5 = inlined_call_operand.vmem [shape: bf16[128,96], index: 5, kind: output, shape index: {}]  }
   0x1   :  { %v796_v0 = vld [vmem:[%s1317_s1] sm:$0xff]   ;;  %v797_v1 = vld [vmem:[%s1317_s1 + $0x8] ss:$0 sps:$4 sm:$0x11]   ;;  %v802_v7 = vld [vmem:[%s1318_s0 + $0x10] sm:$0xff]  }
   0x2   :  { %v798_v2 = vld [vmem:[%s1318_s0] sm:$0xff]   ;;  %770 = vmatprep.subr.bf16.mxu0 %v796_v0  ;;  %790 = vmatprep.subr.bf16.mxu1 %v796_v0  ;;  %v123_v4 = vsel %vm121_vm0, %v797_v1, 0  ;;  %v800_v5 = vld [vmem:[%s1318_s0 + $0x8] sm:$0xff]   ;;  %v804_v8 = vld [vmem:[%s1318_s0 + $0x30] sm:$0xff]  }
   0x3   :  { %771 = vmatpush3.bf16.msra.mxu0 %v796_v0  ;;  %792 = vmatpush3.bf16.msra.mxu1 %v796_v0  ;;  %v799_v3 = vld [vmem:[%s1318_s0 + $0x20] sm:$0xff]   ;;  %v801_v6 = vld [vmem:[%s1318_s0 + $0x28] sm:$0xff]   ;;  %v803_v9 = vld [vmem:[%s1318_s0 + $0x18] sm:$0xff]  }
   0x4   :  { %794 = vmatprep.subr.msk.bf16.mxu0 %vm121_vm0, %v797_v1  ;;  %795 = vmatprep.subr.msk.bf16.mxu1 %vm121_vm0, %v797_v1  ;;  %v805_v10 = vld [vmem:[%s1318_s0 + $0x38] sm:$0xff]   ;;  %v707_v11 = vld [vmem:[%s1319_s2] ss:$0 sm:$0xff] }
   0x5   :  { %774 = vmatprep.mubr.msk.bf16.mxu0 %vm96_vm1, %v798_v2  ;;  %782 = vmatprep.mubr.msk.bf16.mxu1 %vm96_vm1, %v799_v3 }
   0x7   :  { %773 = vmatpush3.bf16.msra.mxu0 %v123_v4  ;;  %793 = vmatpush3.bf16.msra.mxu1 %v123_v4 }
   0xa   :  { %775 = vmatmul.mubr.msk.bf16.vlgmr.msra.gmra.mrb[0].mxu0 %vm96_vm1, %v800_v5  ;;  %783 = vmatmul.mubr.msk.bf16.vlgmr.msra.gmra.mrb[0].mxu1 %vm96_vm1, %v801_v6 }
   0xb   :  { %778 = vmatprep.mubr.msk.bf16.mxu0 %vm96_vm1, %v802_v7  ;;  %786 = vmatprep.mubr.msk.bf16.mxu1 %vm96_vm1, %v804_v8 }
  0x12   :  { %779 = vmatmul.mubr.msk.bf16.gmra.mrb[4].mxu0 %vm96_vm1, %v803_v9  ;;  %787 = vmatmul.mubr.msk.bf16.gmra.mrb[4].mxu1 %vm96_vm1, %v805_v10 }
  0xdd   :  { %v776_v12 = vpop.f32.mrb[0].mxu0  ;;  %v784_v13 = vpop.f32.mrb[0].mxu1 }
  0xde   :  { %v941_v14 = vadd.f32 %v776_v12, %v707_v11  ;;  %v943_v15 = vadd.f32 %v784_v13, %v707_v11  ;;  %v159_v16 = vpop.f32.mrb[1].mxu0  ;;  %v191_v17 = vpop.f32.mrb[1].mxu1 }
  0xdf   :  { %v777_v18 = vpop.f32.mrb[2].mxu0  ;;  %v785_v19 = vpop.f32.mrb[2].mxu1  ;;  %v945_v20 = vadd.f32 %v707_v11, %v159_v16  ;;  %v953_v26 = vadd.f32 %v707_v11, %v191_v17 }
  0xe0   :  { %v947_v21 = vadd.f32 %v777_v18, %v707_v11  ;;  %v162_v22 = vpop.f32.mrb[3].mxu0  ;;  %v194_v23 = vpop.f32.mrb[3].mxu1  ;;  %v253_v24 = vsel %vm222_vm2, %v943_v15, 0.0  ;;  %v229_v25 = vsel %vm222_vm2, %v941_v14, 0.0  ;;  %v955_v27 = vadd.f32 %v785_v19, %v707_v11 }
  0xe1   :  { %254 = vadd.xlane.f32.xlu0 %v253_v24  ;;  %230 = vadd.xlane.f32.xlu1 %v229_v25  ;;  %v223_v29 = vsel %vm222_vm2, %v945_v20, 0.0  ;;  %v961_v36 = vadd.f32 %v707_v11, %v162_v22  ;;  %v963_v37 = vadd.f32 %v707_v11, %v194_v23  ;;  %v247_v39 = vsel %vm222_vm2, %v953_v26, 0.0 }
  0xe2   :  { %v232_v28 = vsel %vm222_vm2, %v947_v21, 0.0  ;;  %v256_v38 = vsel %vm222_vm2, %v955_v27, 0.0 }
  0xe3   :  { %v250_v44 = vsel %vm222_vm2, %v963_v37, 0.0  ;;  %v226_v45 = vsel %vm222_vm2, %v961_v36, 0.0 }
  0xe5   :  { %233 = vadd.xlane.f32.xlu1 %v232_v28  ;;  %224 = vadd.xlane.f32.xlu0 %v223_v29  ;;  %v780_v30 = vpop.f32.mrb[4].mxu0  ;;  %v788_v31 = vpop.f32.mrb[4].mxu1 }
  0xe6   :  { %v175_v32 = vpop.f32.mrb[5].mxu0  ;;  %v207_v33 = vpop.f32.mrb[5].mxu1  ;;  %v969_v42 = vadd.f32 %v780_v30, %v707_v11  ;;  %v997_v56 = vadd.f32 %v788_v31, %v707_v11 }
  0xe7   :  { %v781_v34 = vpop.f32.mrb[6].mxu0  ;;  %v789_v35 = vpop.f32.mrb[6].mxu1  ;;  %v981_v48 = vadd.f32 %v707_v11, %v175_v32  ;;  %v985_v50 = vadd.f32 %v707_v11, %v207_v33 }
  0xe8   :  { %v178_v40 = vpop.f32.mrb[7].mxu0  ;;  %v210_v41 = vpop.f32.mrb[7].mxu1  ;;  %v971_v43 = vadd.f32 %v781_v34, %v707_v11  ;;  %v241_v47 = vsel %vm222_vm2, %v969_v42, 0.0  ;;  %v999_v57 = vadd.f32 %v789_v35, %v707_v11  ;;  %v265_v59 = vsel %vm222_vm2, %v997_v56, 0.0 }
  0xe9   :  { %257 = vadd.xlane.f32.xlu1 %v256_v38  ;;  %248 = vadd.xlane.f32.xlu0 %v247_v39  ;;  %v983_v49 = vadd.f32 %v707_v11, %v178_v40  ;;  %v987_v51 = vadd.f32 %v707_v11, %v210_v41  ;;  %v235_v53 = vsel %vm222_vm2, %v981_v48, 0.0  ;;  %v259_v55 = vsel %vm222_vm2, %v985_v50, 0.0 }
  0xea   :  { %v244_v46 = vsel %vm222_vm2, %v971_v43, 0.0  ;;  %v268_v58 = vsel %vm222_vm2, %v999_v57, 0.0 }
  0xeb   :  { %v238_v52 = vsel %vm222_vm2, %v983_v49, 0.0  ;;  %v262_v54 = vsel %vm222_vm2, %v987_v51, 0.0 }
  0xed   :  { %251 = vadd.xlane.f32.xlu1 %v250_v44  ;;  %227 = vadd.xlane.f32.xlu0 %v226_v45 }
  0xf1   :  { %245 = vadd.xlane.f32.xlu1 %v244_v46  ;;  %242 = vadd.xlane.f32.xlu0 %v241_v47 }
  0xf5   :  { %239 = vadd.xlane.f32.xlu1 %v238_v52  ;;  %236 = vadd.xlane.f32.xlu0 %v235_v53 }
  0xf9   :  { %263 = vadd.xlane.f32.xlu1 %v262_v54  ;;  %260 = vadd.xlane.f32.xlu0 %v259_v55 }
  0xfd   :  { %269 = vadd.xlane.f32.xlu1 %v268_v58  ;;  %266 = vadd.xlane.f32.xlu0 %v265_v59 }
 0x16e   :  { %v255_v60 = vpop.xlane.xlu0 %254  ;;  %v231_v61 = vpop.xlane.xlu1 %230 }
 0x16f   :  { %v282_v62 = vmul.f32 0.010416667, %v255_v60  ;;  %v274_v63 = vmul.f32 0.010416667, %v231_v61 }
 0x171   :  { %v1006_v0 = vsub.f32 %v943_v15, %v282_v62  ;;  %v1009_v1 = vsub.f32 %v941_v14, %v274_v63 }
 0x172   :  { %v234_v2 = vpop.xlane.xlu1 %233  ;;  %v225_v3 = vpop.xlane.xlu0 %224 }
 0x173   :  { %v275_v4 = vmul.f32 0.010416667, %v234_v2  ;;  %v272_v5 = vmul.f32 0.010416667, %v225_v3  ;;  %v306_v6 = vmul.f32 %v1009_v1, %v1009_v1  ;;  %v314_v10 = vmul.f32 %v1006_v0, %v1006_v0 }
 0x175   :  { %v1014_v7 = vsub.f32 %v947_v21, %v275_v4  ;;  %v1017_v8 = vsub.f32 %v945_v20, %v272_v5  ;;  %v326_v9 = vsel %vm222_vm2, %v306_v6, 0.0  ;;  %v350_v20 = vsel %vm222_vm2, %v314_v10, 0.0 }
 0x176   :  { %v258_v11 = vpop.xlane.xlu1 %257  ;;  %327 = vadd.xlane.f32.xlu0 %v326_v9  ;;  %v249_v12 = vpop.xlane.xlu0 %248 }
 0x177   :  { %v283_v13 = vmul.f32 0.010416667, %v258_v11  ;;  %v280_v14 = vmul.f32 0.010416667, %v249_v12  ;;  %v307_v15 = vmul.f32 %v1014_v7, %v1014_v7  ;;  %v304_v16 = vmul.f32 %v1017_v8, %v1017_v8 }
 0x179   :  { %v1027_v17 = vsub.f32 %v955_v27, %v283_v13  ;;  %v1030_v18 = vsub.f32 %v953_v26, %v280_v14  ;;  %v329_v19 = vsel %vm222_vm2, %v307_v15, 0.0  ;;  %v320_v28 = vsel %vm222_vm2, %v304_v16, 0.0 }
 0x17a   :  { %v252_v21 = vpop.xlane.xlu1 %251  ;;  %330 = vadd.xlane.f32.xlu1 %v329_v19  ;;  %351 = vadd.xlane.f32.xlu0 %v350_v20  ;;  %v228_v22 = vpop.xlane.xlu0 %227 }
 0x17b   :  { %v281_v23 = vmul.f32 0.010416667, %v252_v21  ;;  %v273_v24 = vmul.f32 0.010416667, %v228_v22  ;;  %v315_v25 = vmul.f32 %v1027_v17, %v1027_v17  ;;  %v312_v30 = vmul.f32 %v1030_v18, %v1030_v18 }
 0x17d   :  { %v1038_v27 = vsub.f32 %v963_v37, %v281_v23  ;;  %v1041_v26 = vsub.f32 %v961_v36, %v273_v24  ;;  %v353_v29 = vsel %vm222_vm2, %v315_v25, 0.0  ;;  %v344_v39 = vsel %vm222_vm2, %v312_v30, 0.0 }
 0x17e   :  { %v246_v31 = vpop.xlane.xlu1 %245  ;;  %354 = vadd.xlane.f32.xlu1 %v353_v29  ;;  %321 = vadd.xlane.f32.xlu0 %v320_v28  ;;  %v243_v32 = vpop.xlane.xlu0 %242 }
 0x17f   :  { %v279_v33 = vmul.f32 0.010416667, %v246_v31  ;;  %v278_v34 = vmul.f32 0.010416667, %v243_v32  ;;  %v305_v35 = vmul.f32 %v1041_v26, %v1041_v26  ;;  %v313_v37 = vmul.f32 %v1038_v27, %v1038_v27 }
 0x181   :  { %v1051_v36 = vsub.f32 %v971_v43, %v279_v33  ;;  %v1054_v38 = vsub.f32 %v969_v42, %v278_v34  ;;  %v323_v40 = vsel %vm222_vm2, %v305_v35, 0.0  ;;  %v347_v52 = vsel %vm222_vm2, %v313_v37, 0.0 }
 0x182   :  { %v240_v41 = vpop.xlane.xlu1 %239  ;;  %345 = vadd.xlane.f32.xlu0 %v344_v39  ;;  %324 = vadd.xlane.f32.xlu1 %v323_v40  ;;  %v237_v44 = vpop.xlane.xlu0 %236 }
 0x183   :  { %v277_v45 = vmul.f32 0.010416667, %v240_v41  ;;  %v276_v46 = vmul.f32 0.010416667, %v237_v44  ;;  %v310_v47 = vmul.f32 %v1054_v38, %v1054_v38  ;;  %v311_v54 = vmul.f32 %v1051_v36, %v1051_v36  ;;  %v1104_v44 = vld [vmem:[%s1320_s3] ss:$0 sm:$0xff] }
 0x185   :  { %v1062_v43 = vsub.f32 %v983_v49, %v277_v45  ;;  %v1065_v42 = vsub.f32 %v981_v48, %v276_v46  ;;  %v338_v53 = vsel %vm222_vm2, %v310_v47, 0.0  ;;  %v341_v63 = vsel %vm222_vm2, %v311_v54, 0.0  ;;  %v1110_v54 = vld [vmem:[%s1321_s4] ss:$0 sm:$0xff] }
 0x186   :  { %v264_v55 = vpop.xlane.xlu1 %263  ;;  %348 = vadd.xlane.f32.xlu1 %v347_v52  ;;  %339 = vadd.xlane.f32.xlu0 %v338_v53  ;;  %v261_v58 = vpop.xlane.xlu0 %260 }
 0x187   :  { %v285_v59 = vmul.f32 0.010416667, %v264_v55  ;;  %v284_v60 = vmul.f32 0.010416667, %v261_v58  ;;  %v308_v61 = vmul.f32 %v1065_v42, %v1065_v42  ;;  %v309_v49 = vmul.f32 %v1062_v43, %v1062_v43 }
 0x189   :  { %v1075_v48 = vsub.f32 %v987_v51, %v285_v59  ;;  %v1078_v62 = vsub.f32 %v985_v50, %v284_v60  ;;  %v332_v2 = vsel %vm222_vm2, %v308_v61, 0.0  ;;  %v335_v10 = vsel %vm222_vm2, %v309_v49, 0.0 }
 0x18a   :  { %v270_v3 = vpop.xlane.xlu1 %269  ;;  %342 = vadd.xlane.f32.xlu1 %v341_v63  ;;  %333 = vadd.xlane.f32.xlu0 %v332_v2  ;;  %v267_v4 = vpop.xlane.xlu0 %266 }
 0x18b   :  { %v287_v5 = vmul.f32 0.010416667, %v270_v3  ;;  %v286_v6 = vmul.f32 0.010416667, %v267_v4  ;;  %v316_v9 = vmul.f32 %v1078_v62, %v1078_v62  ;;  %v317_v12 = vmul.f32 %v1075_v48, %v1075_v48 }
 0x18d   :  { %v1086_v51 = vsub.f32 %v999_v57, %v287_v5  ;;  %v1089_v50 = vsub.f32 %v997_v56, %v286_v6  ;;  %v356_v11 = vsel %vm222_vm2, %v316_v9, 0.0  ;;  %v359_v14 = vsel %vm222_vm2, %v317_v12, 0.0 }
 0x18e   :  { %336 = vadd.xlane.f32.xlu1 %v335_v10  ;;  %357 = vadd.xlane.f32.xlu0 %v356_v11 }
 0x18f   :  { %v318_v13 = vmul.f32 %v1089_v50, %v1089_v50  ;;  %v319_v57 = vmul.f32 %v1086_v51, %v1086_v51 }
 0x191   :  { %v362_v15 = vsel %vm222_vm2, %v318_v13, 0.0  ;;  %v365_v56 = vsel %vm222_vm2, %v319_v57, 0.0 }
 0x192   :  { %360 = vadd.xlane.f32.xlu1 %v359_v14  ;;  %363 = vadd.xlane.f32.xlu0 %v362_v15 }
 0x196   :  { %366 = vadd.xlane.f32.xlu1 %v365_v56 }
 0x203   :  { %v328_v16 = vpop.xlane.xlu0 %327 }
 0x204   :  { %v370_v19 = vmul.f32 0.010416667, %v328_v16 }
 0x206   :  { %v386_v20 = vadd.f32 1e-06, %v370_v19 }
 0x207   :  { %v331_v21 = vpop.xlane.xlu1 %330  ;;  %v352_v22 = vpop.xlane.xlu0 %351 }
 0x208   :  { %806 = vrsqrt.f32 %v386_v20  ;;  %v371_v23 = vmul.f32 0.010416667, %v331_v21  ;;  %v378_v24 = vmul.f32 0.010416667, %v352_v22 }
 0x20a   :  { %v387_v25 = vadd.f32 1e-06, %v371_v23  ;;  %v394_v28 = vadd.f32 1e-06, %v378_v24 }
 0x20b   :  { %v355_v29 = vpop.xlane.xlu1 %354  ;;  %v322_v30 = vpop.xlane.xlu0 %321 }
 0x20c   :  { %808 = vrsqrt.f32 %v387_v25  ;;  %v379_v31 = vmul.f32 0.010416667, %v355_v29  ;;  %v368_v32 = vmul.f32 0.010416667, %v322_v30 }
 0x20d   :  { %810 = vrsqrt.f32 %v394_v28 }
 0x20e   :  { %v395_v33 = vadd.f32 1e-06, %v379_v31  ;;  %v384_v34 = vadd.f32 1e-06, %v368_v32 }
 0x20f   :  { %v325_v35 = vpop.xlane.xlu1 %324  ;;  %v346_v37 = vpop.xlane.xlu0 %345 }
 0x210   :  { %812 = vrsqrt.f32 %v395_v33  ;;  %v369_v39 = vmul.f32 0.010416667, %v325_v35  ;;  %v376_v40 = vmul.f32 0.010416667, %v346_v37 }
 0x211   :  { %814 = vrsqrt.f32 %v384_v34 }
 0x212   :  { %v807_v41 = vpop.eup %806  ;;  %v385_v45 = vadd.f32 1e-06, %v369_v39  ;;  %v392_v46 = vadd.f32 1e-06, %v376_v40 }
 0x213   :  { %v418_v47 = vmul.f32 %v807_v41, %v1009_v1  ;;  %v349_v52 = vpop.xlane.xlu1 %348  ;;  %v340_v53 = vpop.xlane.xlu0 %339 }
 0x214   :  { %816 = vrsqrt.f32 %v385_v45  ;;  %v377_v55 = vmul.f32 0.010416667, %v349_v52  ;;  %v374_v58 = vmul.f32 0.010416667, %v340_v53 }
 0x215   :  { %v441_v59 = vmul.f32 %v1104_v44, %v418_v47  ;;  %818 = vrsqrt.f32 %v392_v46 }
 0x216   :  { %v809_v60 = vpop.eup %808  ;;  %v393_v61 = vadd.f32 1e-06, %v377_v55  ;;  %v390_v49 = vadd.f32 1e-06, %v374_v58 }
 0x217   :  { %v811_v63 = vpop.eup %810  ;;  %v1114_v2 = vadd.f32 %v1110_v54, %v441_v59  ;;  %v419_v1 = vmul.f32 %v809_v60, %v1014_v7  ;;  %v343_v3 = vpop.xlane.xlu1 %342 }
 0x218   :  { %v334_v4 = vpop.xlane.xlu0 %333  ;;  %v426_v5 = vmul.f32 %v811_v63, %v1006_v0  ;;  %820 = vrsqrt.f32 %v393_v61  ;;  %v375_v6 = vmul.f32 0.010416667, %v343_v3 }
 0x219   :  { %v372_v9 = vmul.f32 0.010416667, %v334_v4  ;;  %v480_v10 = vmul.f32 %v1114_v2, %v1114_v2  ;;  %v442_v11 = vmul.f32 %v1104_v44, %v419_v1  ;;  %822 = vrsqrt.f32 %v390_v49 }
 0x21a   :  { %v813_v12 = vpop.eup %812  ;;  %v449_v13 = vmul.f32 %v1104_v44, %v426_v5  ;;  %v391_v14 = vadd.f32 1e-06, %v375_v6 }
 0x21b   :  { %v388_v15 = vadd.f32 1e-06, %v372_v9  ;;  %v815_v57 = vpop.eup %814  ;;  %v496_v7 = vmul.f32 %v480_v10, %v1114_v2  ;;  %v1124_v56 = vadd.f32 %v1110_v54, %v442_v11  ;;  %v427_v0 = vmul.f32 %v813_v12, %v1027_v17  ;;  %v337_v16 = vpop.xlane.xlu1 %336 }
 0x21c   :  { %v358_v19 = vpop.xlane.xlu0 %357  ;;  %v1128_v20 = vadd.f32 %v1110_v54, %v449_v13  ;;  %v416_v21 = vmul.f32 %v815_v57, %v1017_v8  ;;  %824 = vrsqrt.f32 %v391_v14  ;;  %v373_v22 = vmul.f32 0.010416667, %v337_v16 }
 0x21d   :  { %v512_v23 = vmul.f32 0.044715, %v496_v7  ;;  %v481_v24 = vmul.f32 %v1124_v56, %v1124_v56  ;;  %v450_v25 = vmul.f32 %v1104_v44, %v427_v0  ;;  %826 = vrsqrt.f32 %v388_v15 }
 0x21e   :  { %v817_v28 = vpop.eup %816  ;;  %v488_v17 = vmul.f32 %v1128_v20, %v1128_v20  ;;  %v439_v29 = vmul.f32 %v1104_v44, %v416_v21  ;;  %v389_v30 = vadd.f32 1e-06, %v373_v22  ;;  %v380_v31 = vmul.f32 0.010416667, %v358_v19 }
 0x21f   :  { %v819_v32 = vpop.eup %818  ;;  %v528_v8 = vadd.f32 %v512_v23, %v1114_v2  ;;  %v497_v33 = vmul.f32 %v481_v24, %v1124_v56  ;;  %v1140_v34 = vadd.f32 %v1110_v54, %v450_v25  ;;  %v417_v35 = vmul.f32 %v817_v28, %v1041_v26 }
 0x220   :  { %v504_v37 = vmul.f32 %v488_v17, %v1128_v20  ;;  %v1145_v39 = vadd.f32 %v1110_v54, %v439_v29  ;;  %v424_v40 = vmul.f32 %v819_v32, %v1030_v18  ;;  %828 = vrsqrt.f32 %v389_v30 }
 0x221   :  { %v544_v41 = vmul.f32 0.7978846, %v528_v8  ;;  %v513_v45 = vmul.f32 0.044715, %v497_v33  ;;  %v489_v46 = vmul.f32 %v1140_v34, %v1140_v34  ;;  %v440_v47 = vmul.f32 %v1104_v44, %v417_v35 }
 0x222   :  { %v821_v52 = vpop.eup %820  ;;  %v520_v53 = vmul.f32 0.044715, %v504_v37  ;;  %v478_v26 = vmul.f32 %v1145_v39, %v1145_v39  ;;  %v447_v55 = vmul.f32 %v1104_v44, %v424_v40  ;;  %v1154_v58 = vadd.f32 1e-06, %v380_v31 }
 0x223   :  { %v823_v59 = vpop.eup %822  ;;  %830 = vtanh.f32 %v544_v41  ;;  %v529_v18 = vadd.f32 %v513_v45, %v1124_v56  ;;  %v505_v60 = vmul.f32 %v489_v46, %v1140_v34  ;;  %v1159_v61 = vadd.f32 %v1110_v54, %v440_v47 }
 0x224   :  { %v536_v49 = vadd.f32 %v520_v53, %v1128_v20  ;;  %v494_v63 = vmul.f32 %v478_v26, %v1145_v39  ;;  %v1164_v1 = vadd.f32 %v1110_v54, %v447_v55  ;;  %v425_v3 = vmul.f32 %v821_v52, %v1038_v27 }
 0x225   :  { %v545_v4 = vmul.f32 0.7978846, %v529_v18  ;;  %v521_v5 = vmul.f32 0.044715, %v505_v60  ;;  %v479_v6 = vmul.f32 %v1159_v61, %v1159_v61  ;;  %v422_v9 = vmul.f32 %v823_v59, %v1054_v38 }
 0x226   :  { %v825_v10 = vpop.eup %824  ;;  %v552_v11 = vmul.f32 0.7978846, %v536_v49  ;;  %v510_v12 = vmul.f32 0.044715, %v494_v63  ;;  %v486_v13 = vmul.f32 %v1164_v1, %v1164_v1  ;;  %v448_v14 = vmul.f32 %v1104_v44, %v425_v3 }
 0x227   :  { %v827_v15 = vpop.eup %826  ;;  %832 = vtanh.f32 %v545_v4  ;;  %v537_v57 = vadd.f32 %v521_v5, %v1140_v34  ;;  %v495_v27 = vmul.f32 %v479_v6, %v1159_v61  ;;  %v445_v7 = vmul.f32 %v1104_v44, %v422_v9 }
 0x228   :  { %834 = vtanh.f32 %v552_v11  ;;  %v526_v0 = vadd.f32 %v510_v12, %v1145_v39  ;;  %v502_v38 = vmul.f32 %v486_v13, %v1164_v1  ;;  %v1179_v16 = vadd.f32 %v1110_v54, %v448_v14 }
 0x229   :  { %v553_v19 = vmul.f32 0.7978846, %v537_v57  ;;  %v511_v21 = vmul.f32 0.044715, %v495_v27  ;;  %v1182_v22 = vadd.f32 %v1110_v54, %v445_v7  ;;  %v423_v23 = vmul.f32 %v825_v10, %v1051_v36 }
 0x22a   :  { %v829_v24 = vpop.eup %828  ;;  %v542_v25 = vmul.f32 0.7978846, %v526_v0  ;;  %v518_v28 = vmul.f32 0.044715, %v502_v38  ;;  %v487_v17 = vmul.f32 %v1179_v16, %v1179_v16  ;;  %v420_v29 = vmul.f32 %v827_v15, %v1065_v42  ;;  %v361_v15 = vpop.xlane.xlu1 %360 }
 0x22b   :  { %836 = vtanh.f32 %v553_v19  ;;  %v527_v30 = vadd.f32 %v511_v21, %v1159_v61  ;;  %v484_v31 = vmul.f32 %v1182_v22, %v1182_v22  ;;  %v446_v32 = vmul.f32 %v1104_v44, %v423_v23 }
 0x22c   :  { %838 = vtanh.f32 %v542_v25  ;;  %v534_v36 = vadd.f32 %v518_v28, %v1164_v1  ;;  %v503_v8 = vmul.f32 %v487_v17, %v1179_v16  ;;  %v443_v33 = vmul.f32 %v1104_v44, %v420_v29 }
 0x22d   :  { %v831_v35 = vpop.eup %830  ;;  %v543_v37 = vmul.f32 0.7978846, %v527_v30  ;;  %v500_v42 = vmul.f32 %v484_v31, %v1182_v22  ;;  %v1197_v40 = vadd.f32 %v1110_v54, %v446_v32  ;;  %v421_v41 = vmul.f32 %v829_v24, %v1062_v43  ;;  %v364_v31 = vpop.xlane.xlu0 %363 }
 0x22e   :  { %v576_v45 = vadd.f32 1.0, %v831_v35  ;;  %v550_v46 = vmul.f32 0.7978846, %v534_v36  ;;  %v519_v47 = vmul.f32 0.044715, %v503_v8  ;;  %v1201_v52 = vadd.f32 %v1110_v54, %v443_v33 }
 0x22f   :  { %840 = vtanh.f32 %v543_v37  ;;  %v516_v53 = vmul.f32 0.044715, %v500_v42  ;;  %v485_v26 = vmul.f32 %v1197_v40, %v1197_v40  ;;  %v444_v55 = vmul.f32 %v1104_v44, %v421_v41 }
 0x230   :  { %v592_v59 = vmul.f32 0.5, %v576_v45  ;;  %842 = vtanh.f32 %v550_v46  ;;  %v535_v18 = vadd.f32 %v519_v47, %v1179_v16  ;;  %v482_v43 = vmul.f32 %v1201_v52, %v1201_v52  ;;  %v367_v47 = vpop.xlane.xlu1 %366 }
 0x231   :  { %v833_v60 = vpop.eup %832  ;;  %v532_v49 = vadd.f32 %v516_v53, %v1182_v22  ;;  %v501_v63 = vmul.f32 %v485_v26, %v1197_v40  ;;  %v1212_v3 = vadd.f32 %v1110_v54, %v444_v55  ;;  %844 = vrsqrt.f32 %v1154_v58 }
 0x232   :  { %v835_v4 = vpop.eup %834  ;;  %v608_v5 = vmul.f32 %v592_v59, %v1114_v2  ;;  %v577_v6 = vadd.f32 1.0, %v833_v60  ;;  %v551_v9 = vmul.f32 0.7978846, %v535_v18  ;;  %v498_v10 = vmul.f32 %v482_v43, %v1201_v52 }
 0x233   :  { %v584_v11 = vadd.f32 1.0, %v835_v4  ;;  %v548_v12 = vmul.f32 0.7978846, %v532_v49  ;;  %v517_v13 = vmul.f32 0.044715, %v501_v63  ;;  %v483_v14 = vmul.f32 %v1212_v3, %v1212_v3 }
 0x234   :  { %v746_v57 = vpack.c.bf16 %v608_v5, %v608_v5  ;;  %v593_v27 = vmul.f32 0.5, %v577_v6  ;;  %846 = vtanh.f32 %v551_v9  ;;  %v514_v7 = vmul.f32 0.044715, %v498_v10 }
 0x235   :  { %v837_v0 = vpop.eup %836  ;;  %v600_v58 = vmul.f32 0.5, %v584_v11  ;;  %848 = vtanh.f32 %v548_v12  ;;  %v533_v2 = vadd.f32 %v517_v13, %v1197_v40  ;;  %v499_v38 = vmul.f32 %v483_v14, %v1212_v3 }
 0x236   :  { %v839_v19 = vpop.eup %838  ;;  %689 = vst.msk [vmem:[%s1322_s5 + $0x8] sm:$0xf] %vm686_vm3, %v746_v57  ;;  %v609_v21 = vmul.f32 %v593_v27, %v1124_v56  ;;  %v585_v23 = vadd.f32 1.0, %v837_v0  ;;  %v530_v24 = vadd.f32 %v514_v7, %v1201_v52  ;;  %v381_v25 = vmul.f32 0.010416667, %v361_v15 }
 0x237   :  { %v616_v28 = vmul.f32 %v600_v58, %v1128_v20  ;;  %v574_v17 = vadd.f32 1.0, %v839_v19  ;;  %v549_v29 = vmul.f32 0.7978846, %v533_v2  ;;  %v515_v30 = vmul.f32 0.044715, %v499_v38 }
 0x238   :  { %v747_v32 = vpack.c.bf16 %v609_v21, %v609_v21  ;;  %v601_v36 = vmul.f32 0.5, %v585_v23  ;;  %v546_v8 = vmul.f32 0.7978846, %v530_v24  ;;  %v397_v33 = vadd.f32 1e-06, %v381_v25 }
 0x239   :  { %v841_v35 = vpop.eup %840  ;;  %v754_v37 = vpack.c.bf16 %v616_v28, %v616_v28  ;;  %v590_v42 = vmul.f32 0.5, %v574_v17  ;;  %850 = vtanh.f32 %v549_v29  ;;  %v531_v56 = vadd.f32 %v515_v30, %v1212_v3 }
 0x23a   :  { %v843_v41 = vpop.eup %842  ;;  %690 = vst.msk [vmem:[%s1322_s5 + $0xc] sm:$0xf] %vm686_vm3, %v747_v32  ;;  %v617_v20 = vmul.f32 %v601_v36, %v1140_v34  ;;  %v575_v45 = vadd.f32 1.0, %v841_v35  ;;  %852 = vtanh.f32 %v546_v8  ;;  %v382_v46 = vmul.f32 0.010416667, %v364_v31 }
 0x23b   :  { %v845_v53 = vpop.eup %844  ;;  %697 = vst.msk [vmem:[%s1322_s5 + $0x28] sm:$0xf] %vm686_vm3, %v754_v37  ;;  %v606_v26 = vmul.f32 %v590_v42, %v1145_v39  ;;  %v582_v55 = vadd.f32 1.0, %v843_v41  ;;  %v547_v59 = vmul.f32 0.7978846, %v531_v56  ;;  %854 = vrsqrt.f32 %v397_v33 }
 0x23c   :  { %v755_v18 = vpack.c.bf16 %v617_v20, %v617_v20  ;;  %v591_v43 = vmul.f32 0.5, %v575_v45  ;;  %v428_v60 = vmul.f32 %v845_v53, %v1078_v62  ;;  %v398_v34 = vadd.f32 1e-06, %v382_v46 }
 0x23d   :  { %v744_v49 = vpack.c.bf16 %v606_v26, %v606_v26  ;;  %v598_v63 = vmul.f32 0.5, %v582_v55  ;;  %856 = vtanh.f32 %v547_v59  ;;  %v383_v4 = vmul.f32 0.010416667, %v367_v47 }
 0x23e   :  { %v847_v5 = vpop.eup %846  ;;  %698 = vst.msk [vmem:[%s1322_s5 + $0x2c] sm:$0xf] %vm686_vm3, %v755_v18  ;;  %v607_v39 = vmul.f32 %v591_v43, %v1159_v61  ;;  %v451_v6 = vmul.f32 %v1104_v44, %v428_v60  ;;  %858 = vrsqrt.f32 %v398_v34 }
 0x23f   :  { %v849_v9 = vpop.eup %848  ;;  %687 = vst.msk [vmem:[%s1322_s5] sm:$0xf] %vm686_vm3, %v744_v49  ;;  %v614_v62 = vmul.f32 %v598_v63, %v1164_v1  ;;  %v583_v10 = vadd.f32 1.0, %v847_v5  ;;  %v399_v11 = vadd.f32 1e-06, %v383_v4 }
 0x240   :  { %v745_v12 = vpack.c.bf16 %v607_v39, %v607_v39  ;;  %v580_v13 = vadd.f32 1.0, %v849_v9  ;;  %v1252_v14 = vadd.f32 %v1110_v54, %v451_v6 }
 0x241   :  { %v752_v15 = vpack.c.bf16 %v614_v62, %v614_v62  ;;  %v599_v61 = vmul.f32 0.5, %v583_v10  ;;  %860 = vrsqrt.f32 %v399_v11 }
 0x242   :  { %688 = vst.msk [vmem:[%s1322_s5 + $0x4] sm:$0xf] %vm686_vm3, %v745_v12  ;;  %v596_v57 = vmul.f32 0.5, %v580_v13  ;;  %v490_v27 = vmul.f32 %v1252_v14, %v1252_v14 }
 0x243   :  { %v851_v1 = vpop.eup %850  ;;  %695 = vst.msk [vmem:[%s1322_s5 + $0x20] sm:$0xf] %vm686_vm3, %v752_v15  ;;  %v615_v7 = vmul.f32 %v599_v61, %v1179_v16 }
 0x244   :  { %v853_v0 = vpop.eup %852  ;;  %v612_v58 = vmul.f32 %v596_v57, %v1182_v22  ;;  %v581_v2 = vadd.f32 1.0, %v851_v1  ;;  %v506_v38 = vmul.f32 %v490_v27, %v1252_v14 }
 0x245   :  { %v855_v19 = vpop.eup %854  ;;  %v753_v21 = vpack.c.bf16 %v615_v7, %v615_v7  ;;  %v578_v23 = vadd.f32 1.0, %v853_v0 }
 0x246   :  { %v750_v24 = vpack.c.bf16 %v612_v58, %v612_v58  ;;  %v597_v25 = vmul.f32 0.5, %v581_v2  ;;  %v522_v28 = vmul.f32 0.044715, %v506_v38  ;;  %v429_v17 = vmul.f32 %v855_v19, %v1075_v48 }
 0x247   :  { %v857_v29 = vpop.eup %856  ;;  %696 = vst.msk [vmem:[%s1322_s5 + $0x24] sm:$0xf] %vm686_vm3, %v753_v21  ;;  %v594_v16 = vmul.f32 0.5, %v578_v23 }
 0x248   :  { %v859_v30 = vpop.eup %858  ;;  %693 = vst.msk [vmem:[%s1322_s5 + $0x18] sm:$0xf] %vm686_vm3, %v750_v24  ;;  %v613_v22 = vmul.f32 %v597_v25, %v1197_v40  ;;  %v579_v31 = vadd.f32 1.0, %v857_v29  ;;  %v538_v32 = vadd.f32 %v522_v28, %v1252_v14  ;;  %v452_v48 = vmul.f32 %v1104_v44, %v429_v17 }
 0x249   :  { %v610_v36 = vmul.f32 %v594_v16, %v1201_v52  ;;  %v430_v8 = vmul.f32 %v859_v30, %v1089_v50 }
 0x24a   :  { %v751_v33 = vpack.c.bf16 %v613_v22, %v613_v22  ;;  %v595_v35 = vmul.f32 0.5, %v579_v31  ;;  %v554_v37 = vmul.f32 0.7978846, %v538_v32  ;;  %v475_v42 = vadd.f32 %v1110_v54, %v452_v48 }
 0x24b   :  { %v861_v56 = vpop.eup %860  ;;  %v748_v41 = vpack.c.bf16 %v610_v36, %v610_v36  ;;  %v453_v20 = vmul.f32 %v1104_v44, %v430_v8 }
 0x24c   :  { %694 = vst.msk [vmem:[%s1322_s5 + $0x1c] sm:$0xf] %vm686_vm3, %v751_v33  ;;  %v611_v40 = vmul.f32 %v595_v35, %v1212_v3  ;;  %862 = vtanh.f32 %v554_v37  ;;  %v491_v52 = vmul.f32 %v475_v42, %v475_v42  ;;  %v431_v50 = vmul.f32 %v861_v56, %v1086_v51 }
 0x24d   :  { %691 = vst.msk [vmem:[%s1322_s5 + $0x10] sm:$0xf] %vm686_vm3, %v748_v41  ;;  %v476_v45 = vadd.f32 %v1110_v54, %v453_v20 }
 0x24e   :  { %v749_v46 = vpack.c.bf16 %v611_v40, %v611_v40  ;;  %v507_v47 = vmul.f32 %v491_v52, %v475_v42  ;;  %v454_v53 = vmul.f32 %v1104_v44, %v431_v50 }
 0x24f   :  { %v492_v26 = vmul.f32 %v476_v45, %v476_v45 }
 0x250   :  { %692 = vst.msk [vmem:[%s1322_s5 + $0x14] sm:$0xf] %vm686_vm3, %v749_v46  ;;  %v523_v3 = vmul.f32 0.044715, %v507_v47  ;;  %v477_v51 = vadd.f32 %v1110_v54, %v454_v53 }
 0x251   :  { %v508_v55 = vmul.f32 %v492_v26, %v476_v45 }
 0x252   :  { %v539_v59 = vadd.f32 %v523_v3, %v475_v42  ;;  %v493_v18 = vmul.f32 %v477_v51, %v477_v51 }
 0x253   :  { %v524_v43 = vmul.f32 0.044715, %v508_v55 }
 0x254   :  { %v555_v60 = vmul.f32 0.7978846, %v539_v59  ;;  %v509_v34 = vmul.f32 %v493_v18, %v477_v51 }
 0x255   :  { %v540_v49 = vadd.f32 %v524_v43, %v476_v45 }
 0x256   :  { %v863_v63 = vpop.eup %862  ;;  %864 = vtanh.f32 %v555_v60  ;;  %v525_v4 = vmul.f32 0.044715, %v509_v34 }
 0x257   :  { %v586_v44 = vadd.f32 1.0, %v863_v63  ;;  %v556_v5 = vmul.f32 0.7978846, %v540_v49 }
 0x258   :  { %v541_v39 = vadd.f32 %v525_v4, %v477_v51 }
 0x259   :  { %v602_v6 = vmul.f32 0.5, %v586_v44  ;;  %866 = vtanh.f32 %v556_v5 }
 0x25a   :  { %v557_v9 = vmul.f32 0.7978846, %v541_v39 }
 0x25b   :  { %v618_v62 = vmul.f32 %v602_v6, %v1252_v14 }
 0x25c   :  { %868 = vtanh.f32 %v557_v9 }
 0x25d   :  { %v756_v54 = vpack.c.bf16 %v618_v62, %v618_v62 }
 0x25f   :  { %699 = vst.msk [vmem:[%s1322_s5 + $0x30] sm:$0xf] %vm686_vm3, %v756_v54 }
 0x260   :  { %v865_v10 = vpop.eup %864 }
 0x261   :  { %v587_v11 = vadd.f32 1.0, %v865_v10 }
 0x263   :  { %v867_v12 = vpop.eup %866  ;;  %v603_v13 = vmul.f32 0.5, %v587_v11 }
 0x264   :  { %v588_v15 = vadd.f32 1.0, %v867_v12 }
 0x265   :  { %v619_v61 = vmul.f32 %v603_v13, %v475_v42 }
 0x266   :  { %v869_v57 = vpop.eup %868  ;;  %v604_v27 = vmul.f32 0.5, %v588_v15 }
 0x267   :  { %v757_v1 = vpack.c.bf16 %v619_v61, %v619_v61  ;;  %v589_v7 = vadd.f32 1.0, %v869_v57 }
 0x268   :  { %v620_v0 = vmul.f32 %v604_v27, %v476_v45 }
 0x269   :  { %700 = vst.msk [vmem:[%s1322_s5 + $0x34] sm:$0xf] %vm686_vm3, %v757_v1  ;;  %v605_v14 = vmul.f32 0.5, %v589_v7 }
 0x26a   :  { %v758_v58 = vpack.c.bf16 %v620_v0, %v620_v0 }
 0x26b   :  { %v621_v2 = vmul.f32 %v605_v14, %v477_v51 }
 0x26c   :  { %701 = vst.msk [vmem:[%s1322_s5 + $0x38] sm:$0xf] %vm686_vm3, %v758_v58 }
 0x26d   :  { %v759_v38 = vpack.c.bf16 %v621_v2, %v621_v2 }
 0x26f   :  { %702 = vst.msk [vmem:[%s1322_s5 + $0x3c] sm:$0xf] %vm686_vm3, %v759_v38 }

// kernel: cog_replknet_forward.7
= control target key start
LH: loop header
LB: loop body
LE: loop exit
PB: predicated region body
PF: predicated region fallthrough
CT: control target
= control target key end

     0   :  { %vm767_vm0 = vcmask 785408   ;;  %vm986_vm1 = vcmask 523264   ;;  %s1913_s1 = inlined_call_operand.vmem [shape: bf16[864,192], index: 1, kind: input, shape index: {}]   ;;  %s1914_s0 = inlined_call_operand.vmem [shape: bf16[32,864], index: 0, kind: input, shape index: {}]   ;;  %s1915_s2 = inlined_call_operand.vmem [shape: f32[1,192], index: 2, kind: input, shape index: {}]   ;;  %s1916_s3 = inlined_call_operand.vmem [shape: f32[1,192], index: 3, kind: input, shape index: {}]   ;;  %s1917_s4 = inlined_call_operand.vmem [shape: f32[1,192], index: 4, kind: input, shape index: {}]   ;;  %s1918_s5 = inlined_call_operand.vmem [shape: f32[32,192], index: 5, kind: output, shape index: {}]  }
   0x1   :  { %v1269_v0 = vld [vmem:[%s1913_s1 + $0x4] ss:$8 sps:$4 sm:$0xff]   ;;  %v1271_v1 = vld [vmem:[%s1913_s1] ss:$8 sps:$4 sm:$0xff]   ;;  %v1272_v2 = vld [vmem:[%s1913_s1 + $0x14] ss:$8 sps:$4 sm:$0xff]  }
   0x2   :  { %774 = vmatprep.subr.bf16.mxu1 %v1269_v0  ;;  %v1274_v3 = vld [vmem:[%s1913_s1 + $0x10] ss:$8 sps:$4 sm:$0xff]   ;;  %v1275_v4 = vld [vmem:[%s1913_s1 + $0x24] ss:$8 sps:$4 sm:$0xff]   ;;  %v1277_v5 = vld [vmem:[%s1913_s1 + $0x20] ss:$8 sps:$4 sm:$0xff]  }
   0x3   :  { %775 = vmatpush1.bf16.msra.mxu1 %v1271_v1  ;;  %v1283_v6 = vld [vmem:[%s1913_s1 + $0x204] ss:$8 sps:$4 sm:$0xff]   ;;  %v1286_v7 = vld [vmem:[%s1913_s1 + $0x200] ss:$8 sps:$4 sm:$0xff]   ;;  %v1278_v8 = vld [vmem:[%s1913_s1 + $0x34] ss:$8 sps:$4 sm:$0xff]  }
   0x4   :  { %776 = vmatprep.subr.bf16.mxu1 %v1272_v2  ;;  %880 = vmatprep.subr.bf16.mxu0 %v1283_v6  ;;  %v1289_v9 = vld [vmem:[%s1913_s1 + $0x214] ss:$8 sps:$4 sm:$0xff]   ;;  %v1292_v10 = vld [vmem:[%s1913_s1 + $0x210] ss:$8 sps:$4 sm:$0xff]   ;;  %v1281_v12 = vld [vmem:[%s1913_s1 + $0x44] ss:$8 sps:$4 sm:$0xff]  }
   0x5   :  { %881 = vmatpush1.bf16.msra.mxu0 %v1286_v7  ;;  %v1280_v11 = vld [vmem:[%s1913_s1 + $0x30] ss:$8 sps:$4 sm:$0xff]   ;;  %v1295_v13 = vld [vmem:[%s1913_s1 + $0x224] ss:$8 sps:$4 sm:$0xff]   ;;  %v1298_v14 = vld [vmem:[%s1913_s1 + $0x220] ss:$8 sps:$4 sm:$0xff]  }
   0x6   :  { %882 = vmatprep.subr.bf16.mxu0 %v1289_v9  ;;  %v1285_v15 = vld [vmem:[%s1913_s1 + $0x40] ss:$8 sps:$4 sm:$0xff]   ;;  %v1301_v16 = vld [vmem:[%s1913_s1 + $0x234] ss:$8 sps:$4 sm:$0xff]   ;;  %v1291_v18 = vld [vmem:[%s1913_s1 + $0x50] ss:$8 sps:$4 sm:$0xff]  }
   0x7   :  { %777 = vmatpush1.bf16.msra.mxu1 %v1274_v3  ;;  %v1287_v17 = vld [vmem:[%s1913_s1 + $0x54] ss:$8 sps:$4 sm:$0xff]   ;;  %v1304_v19 = vld [vmem:[%s1913_s1 + $0x230] ss:$8 sps:$4 sm:$0xff]   ;;  %v1307_v20 = vld [vmem:[%s1913_s1 + $0x244] ss:$8 sps:$4 sm:$0xff]  }
   0x8   :  { %778 = vmatprep.subr.bf16.mxu1 %v1275_v4  ;;  %v1293_v21 = vld [vmem:[%s1913_s1 + $0x64] ss:$8 sps:$4 sm:$0xff]   ;;  %v1310_v22 = vld [vmem:[%s1913_s1 + $0x240] ss:$8 sps:$4 sm:$0xff]   ;;  %v1313_v24 = vld [vmem:[%s1913_s1 + $0x254] ss:$8 sps:$4 sm:$0xff]  }
   0x9   :  { %883 = vmatpush1.bf16.msra.mxu0 %v1292_v10  ;;  %v1297_v23 = vld [vmem:[%s1913_s1 + $0x60] ss:$8 sps:$4 sm:$0xff]   ;;  %v1299_v25 = vld [vmem:[%s1913_s1 + $0x74] ss:$8 sps:$4 sm:$0xff]   ;;  %v1303_v26 = vld [vmem:[%s1913_s1 + $0x70] ss:$8 sps:$4 sm:$0xff]  }
   0xa   :  { %884 = vmatprep.subr.bf16.mxu0 %v1295_v13  ;;  %v1316_v27 = vld [vmem:[%s1913_s1 + $0x250] ss:$8 sps:$4 sm:$0xff]   ;;  %v1319_v28 = vld [vmem:[%s1913_s1 + $0x264] ss:$8 sps:$4 sm:$0xff]   ;;  %v1322_v30 = vld [vmem:[%s1913_s1 + $0x260] ss:$8 sps:$4 sm:$0xff]  }
   0xb   :  { %779 = vmatpush1.bf16.msra.mxu1 %v1277_v5  ;;  %v1305_v29 = vld [vmem:[%s1913_s1 + $0x84] ss:$8 sps:$4 sm:$0xff]   ;;  %v1309_v31 = vld [vmem:[%s1913_s1 + $0x80] ss:$8 sps:$4 sm:$0xff]   ;;  %v1325_v32 = vld [vmem:[%s1913_s1 + $0x274] ss:$8 sps:$4 sm:$0xff]  }
   0xc   :  { %780 = vmatprep.subr.bf16.mxu1 %v1278_v8  ;;  %v1311_v33 = vld [vmem:[%s1913_s1 + $0x94] ss:$8 sps:$4 sm:$0xff]   ;;  %v1315_v34 = vld [vmem:[%s1913_s1 + $0x90] ss:$8 sps:$4 sm:$0xff]   ;;  %v1331_v36 = vld [vmem:[%s1913_s1 + $0x284] ss:$8 sps:$4 sm:$0xff]  }
   0xd   :  { %885 = vmatpush1.bf16.msra.mxu0 %v1298_v14  ;;  %v1328_v35 = vld [vmem:[%s1913_s1 + $0x270] ss:$8 sps:$4 sm:$0xff]   ;;  %v1317_v37 = vld [vmem:[%s1913_s1 + $0xa4] ss:$8 sps:$4 sm:$0xff]   ;;  %v1334_v38 = vld [vmem:[%s1913_s1 + $0x280] ss:$8 sps:$4 sm:$0xff]  }
   0xe   :  { %886 = vmatprep.subr.bf16.mxu0 %v1301_v16  ;;  %v1355_v39 = vld [vmem:[%s1914_s0 + $0x4] ss:$28 sps:$4 sm:$0xff]   ;;  %v1337_v41 = vld [vmem:[%s1913_s1 + $0x294] ss:$8 sps:$4 sm:$0xff]   ;;  %v1340_v43 = vld [vmem:[%s1913_s1 + $0x290] ss:$8 sps:$4 sm:$0xff]  }
   0xf   :  { %781 = vmatpush1.bf16.msra.mxu1 %v1280_v11  ;;  %v1321_v40 = vld [vmem:[%s1913_s1 + $0xa0] ss:$8 sps:$4 sm:$0xff]   ;;  %v1323_v42 = vld [vmem:[%s1913_s1 + $0xb4] ss:$8 sps:$4 sm:$0xff]   ;;  %806 = vmatprep.mubr.bf16.mxu1 %v1355_v39  ;;  %v1327_v44 = vld [vmem:[%s1913_s1 + $0xb0] ss:$8 sps:$4 sm:$0xff]  }
  0x10   :  { %782 = vmatprep.subr.bf16.mxu1 %v1281_v12  ;;  %v1343_v45 = vld [vmem:[%s1913_s1 + $0x2a4] ss:$8 sps:$4 sm:$0xff]   ;;  %v1346_v47 = vld [vmem:[%s1913_s1 + $0x2a0] ss:$8 sps:$4 sm:$0xff]   ;;  %v1349_v49 = vld [vmem:[%s1913_s1 + $0x2b4] ss:$8 sps:$4 sm:$0xff]  }
  0x11   :  { %887 = vmatpush1.bf16.msra.mxu0 %v1304_v19  ;;  %v1329_v46 = vld [vmem:[%s1913_s1 + $0xc4] ss:$8 sps:$4 sm:$0xff]   ;;  %v1333_v48 = vld [vmem:[%s1913_s1 + $0xc0] ss:$8 sps:$4 sm:$0xff]   ;;  %v1335_v50 = vld [vmem:[%s1913_s1 + $0xd4] ss:$8 sps:$4 sm:$0xff]  }
  0x12   :  { %888 = vmatprep.subr.bf16.mxu0 %v1307_v20  ;;  %v1339_v51 = vld [vmem:[%s1913_s1 + $0xd0] ss:$8 sps:$4 sm:$0xff]   ;;  %v1359_v53 = vld [vmem:[%s1913_s1 + $0x2c4] ss:$8 sps:$4 sm:$0xff]   ;;  %v1361_v56 = vld [vmem:[%s1913_s1 + $0x2c0] ss:$8 sps:$4 sm:$0xff]  }
  0x13   :  { %783 = vmatpush1.bf16.msra.mxu1 %v1285_v15  ;;  %v1352_v52 = vld [vmem:[%s1913_s1 + $0x2b0] ss:$8 sps:$4 sm:$0xff]   ;;  %v1341_v55 = vld [vmem:[%s1913_s1 + $0xe4] ss:$8 sps:$4 sm:$0xff]   ;;  %v1345_v57 = vld [vmem:[%s1913_s1 + $0xe0] ss:$8 sps:$4 sm:$0xff]  }
  0x14   :  { %784 = vmatprep.subr.bf16.mxu1 %v1287_v17  ;;  %v1385_v54 = vld [vmem:[%s1914_s0 + $0x14] ss:$28 sps:$4 sm:$0xff]   ;;  %v1371_v62 = vld [vmem:[%s1913_s1 + $0x2e4] ss:$8 sps:$4 sm:$0xff]   ;;  %v1353_v0 = vld [vmem:[%s1914_s0] ss:$28 sps:$4 sm:$0xff]  }
  0x15   :  { %889 = vmatpush1.bf16.msra.mxu0 %v1310_v22  ;;  %912 = vmatprep.mubr.bf16.mxu0 %v1385_v54  ;;  %v1365_v58 = vld [vmem:[%s1913_s1 + $0x2d4] ss:$8 sps:$4 sm:$0xff]   ;;  %v1367_v60 = vld [vmem:[%s1913_s1 + $0x2d0] ss:$8 sps:$4 sm:$0xff]   ;;  %v1358_v63 = vld [vmem:[%s1913_s1 + $0x104] ss:$8 sps:$4 sm:$0xff]  }
  0x16   :  { %890 = vmatprep.subr.bf16.mxu0 %v1313_v24  ;;  %v1347_v59 = vld [vmem:[%s1913_s1 + $0xf4] ss:$8 sps:$4 sm:$0xff]   ;;  %v1351_v61 = vld [vmem:[%s1913_s1 + $0xf0] ss:$8 sps:$4 sm:$0xff]   ;;  %v1373_v1 = vld [vmem:[%s1913_s1 + $0x2e0] ss:$8 sps:$4 sm:$0xff]  }
  0x17   :  { %785 = vmatpush1.bf16.msra.mxu1 %v1291_v18  ;;  %v1356_v2 = vld [vmem:[%s1913_s1 + $0x100] ss:$8 sps:$4 sm:$0xff]   ;;  %v1377_v3 = vld [vmem:[%s1913_s1 + $0x2f4] ss:$8 sps:$4 sm:$0xff]   ;;  %v1362_v5 = vld [vmem:[%s1913_s1 + $0x110] ss:$8 sps:$4 sm:$0xff]  }
  0x18   :  { %786 = vmatprep.subr.bf16.mxu1 %v1293_v21  ;;  %v1364_v4 = vld [vmem:[%s1913_s1 + $0x114] ss:$8 sps:$4 sm:$0xff]   ;;  %v1379_v6 = vld [vmem:[%s1913_s1 + $0x2f0] ss:$8 sps:$4 sm:$0xff]   ;;  %v1370_v7 = vld [vmem:[%s1913_s1 + $0x124] ss:$8 sps:$4 sm:$0xff]  }
  0x19   :  { %891 = vmatpush1.bf16.msra.mxu0 %v1316_v27  ;;  %v1388_v8 = vld [vmem:[%s1913_s1 + $0x304] ss:$8 sps:$4 sm:$0xff]   ;;  %v1386_v10 = vld [vmem:[%s1913_s1 + $0x300] ss:$8 sps:$4 sm:$0xff]   ;;  %v1394_v13 = vld [vmem:[%s1913_s1 + $0x314] ss:$8 sps:$4 sm:$0xff]  }
  0x1a   :  { %892 = vmatprep.subr.bf16.mxu0 %v1319_v28  ;;  %v1383_v9 = vld [vmem:[%s1914_s0 + $0x10] ss:$28 sps:$4 sm:$0xff]   ;;  %v1368_v12 = vld [vmem:[%s1913_s1 + $0x120] ss:$8 sps:$4 sm:$0xff]   ;;  %v1376_v14 = vld [vmem:[%s1913_s1 + $0x134] ss:$8 sps:$4 sm:$0xff]  }
  0x1b   :  { %787 = vmatpush1.bf16.msra.mxu1 %v1297_v23  ;;  %v1407_v11 = vld [vmem:[%s1914_s0 + $0x4c] ss:$28 sps:$4 sm:$0xff]   ;;  %v1374_v15 = vld [vmem:[%s1913_s1 + $0x130] ss:$8 sps:$4 sm:$0xff]   ;;  %v1406_v24 = vld [vmem:[%s1913_s1 + $0x334] ss:$8 sps:$4 sm:$0xff]  }
  0x1c   :  { %788 = vmatprep.subr.bf16.mxu1 %v1299_v25  ;;  %v1392_v16 = vld [vmem:[%s1913_s1 + $0x310] ss:$8 sps:$4 sm:$0xff]   ;;  %v1400_v17 = vld [vmem:[%s1913_s1 + $0x324] ss:$8 sps:$4 sm:$0xff]   ;;  %v1380_v21 = vld [vmem:[%s1913_s1 + $0x140] ss:$8 sps:$4 sm:$0xff]  }
  0x1d   :  { %893 = vmatpush1.bf16.msra.mxu0 %v1322_v30  ;;  %v1435_v18 = vld [vmem:[%s1914_s0 + $0x3c] ss:$28 sps:$4 sm:$0xff]   ;;  %v1382_v19 = vld [vmem:[%s1913_s1 + $0x144] ss:$8 sps:$4 sm:$0xff]   ;;  %v1398_v23 = vld [vmem:[%s1913_s1 + $0x320] ss:$8 sps:$4 sm:$0xff]  }
  0x1e   :  { %894 = vmatprep.subr.bf16.mxu0 %v1325_v32  ;;  %v1438_v20 = vld [vmem:[%s1914_s0 + $0x38] ss:$28 sps:$4 sm:$0xff]   ;;  %v1412_v22 = vld [vmem:[%s1914_s0 + $0x48] ss:$28 sps:$4 sm:$0xff]   ;;  %v1459_v28 = vmov 0  }
  0x1f   :  { %789 = vmatpush1.bf16.msra.mxu1 %v1303_v26  ;;  %v1391_v25 = vld [vmem:[%s1913_s1 + $0x154] ss:$8 sps:$4 sm:$0xff]   ;;  %v1447_v26 = vld [vmem:[%s1914_s0 + $0xc] ss:$28 sps:$4 sm:$0xff]   ;;  %v1404_v27 = vld [vmem:[%s1913_s1 + $0x330] ss:$8 sps:$4 sm:$0xff]  }
  0x20   :  { %790 = vmatprep.subr.bf16.mxu1 %v1305_v29  ;;  %v1389_v29 = vld [vmem:[%s1913_s1 + $0x150] ss:$8 sps:$4 sm:$0xff]   ;;  %v1415_v30 = vld [vmem:[%s1913_s1 + $0x344] ss:$8 sps:$4 sm:$0xff]   ;;  %v1413_v32 = vld [vmem:[%s1913_s1 + $0x340] ss:$8 sps:$4 sm:$0xff]  }
  0x21   :  { %895 = vmatpush1.bf16.msra.mxu0 %v1328_v35  ;;  %v1403_v35 = vld [vmem:[%s1913_s1 + $0x174] ss:$8 sps:$4 sm:$0xff]  }
  0x22   :  { %896 = vmatprep.subr.bf16.mxu0 %v1331_v36  ;;  %v1419_v36 = vld [vmem:[%s1913_s1 + $0x350] ss:$8 sps:$4 sm:$0xff]   ;;  %v1444_v54 = vld [vmem:[%s1913_s1 + $0x1f4] ss:$8 sps:$4 sm:$0xff]  }
  0x23   :  { %791 = vmatpush1.bf16.msra.mxu1 %v1309_v31  ;;  %v1397_v31 = vld [vmem:[%s1913_s1 + $0x164] ss:$8 sps:$4 sm:$0xff]   ;;  %v1425_v39 = vld [vmem:[%s1914_s0 + $0x18] ss:$28 sps:$4 sm:$0xff]  }
  0x24   :  { %792 = vmatprep.subr.bf16.mxu1 %v1311_v33  ;;  %v1395_v33 = vld [vmem:[%s1913_s1 + $0x160] ss:$8 sps:$4 sm:$0xff]  }
  0x25   :  { %897 = vmatpush1.bf16.msra.mxu0 %v1334_v38  ;;  %v1411_v38 = vld [vmem:[%s1913_s1 + $0x184] ss:$8 sps:$4 sm:$0xff]  }
  0x26   :  { %898 = vmatprep.subr.bf16.mxu0 %v1337_v41  ;;  %v1418_v41 = vld [vmem:[%s1913_s1 + $0x194] ss:$8 sps:$4 sm:$0xff]  }
  0x27   :  { %793 = vmatpush1.bf16.msra.mxu1 %v1315_v34  ;;  %v1421_v34 = vld [vmem:[%s1913_s1 + $0x354] ss:$8 sps:$4 sm:$0xff]  }
  0x28   :  { %794 = vmatprep.subr.bf16.mxu1 %v1317_v37  ;;  %v1401_v37 = vld [vmem:[%s1913_s1 + $0x170] ss:$8 sps:$4 sm:$0xff]  }
  0x29   :  { %899 = vmatpush1.bf16.msra.mxu0 %v1340_v43  ;;  %v1424_v43 = vld [vmem:[%s1913_s1 + $0x1a4] ss:$8 sps:$4 sm:$0xff]  }
  0x2a   :  { %900 = vmatprep.subr.bf16.mxu0 %v1343_v45  ;;  %v1422_v45 = vld [vmem:[%s1913_s1 + $0x1a0] ss:$8 sps:$4 sm:$0xff]  }
  0x2b   :  { %795 = vmatpush1.bf16.msra.mxu1 %v1321_v40  ;;  %v1409_v40 = vld [vmem:[%s1913_s1 + $0x180] ss:$8 sps:$4 sm:$0xff]  }
  0x2c   :  { %796 = vmatprep.subr.bf16.mxu1 %v1323_v42  ;;  %v1416_v42 = vld [vmem:[%s1913_s1 + $0x190] ss:$8 sps:$4 sm:$0xff]  }
  0x2d   :  { %901 = vmatpush1.bf16.msra.mxu0 %v1346_v47  ;;  %v1426_v47 = vld [vmem:[%s1913_s1 + $0x1b0] ss:$8 sps:$4 sm:$0xff]  }
  0x2e   :  { %902 = vmatprep.subr.bf16.mxu0 %v1349_v49  ;;  %v1429_v49 = vld [vmem:[%s1913_s1 + $0x1c0] ss:$8 sps:$4 sm:$0xff]  }
  0x2f   :  { %797 = vmatpush1.bf16.msra.mxu1 %v1327_v44  ;;  %v1437_v44 = vld [vmem:[%s1914_s0 + $0x50] ss:$28 sps:$4 sm:$0xff]  }
  0x30   :  { %798 = vmatprep.subr.bf16.mxu1 %v1329_v46  ;;  %v1428_v46 = vld [vmem:[%s1913_s1 + $0x1b4] ss:$8 sps:$4 sm:$0xff]  }
  0x31   :  { %903 = vmatpush1.bf16.msra.mxu0 %v1352_v52  ;;  %v1441_v52 = vld [vmem:[%s1913_s1 + $0x1e4] ss:$8 sps:$4 sm:$0xff]  }
  0x32   :  { %904 = vmatprep.subr.bf16.mxu0 %v1359_v53  ;;  %v1439_v53 = vld [vmem:[%s1913_s1 + $0x1e0] ss:$8 sps:$4 sm:$0xff]  }
  0x33   :  { %799 = vmatpush1.bf16.msra.mxu1 %v1333_v48  ;;  %v1431_v48 = vld [vmem:[%s1913_s1 + $0x1c4] ss:$8 sps:$4 sm:$0xff]  }
  0x34   :  { %800 = vmatprep.subr.bf16.mxu1 %v1335_v50  ;;  %v1434_v50 = vld [vmem:[%s1913_s1 + $0x1d4] ss:$8 sps:$4 sm:$0xff]  }
  0x35   :  { %905 = vmatpush1.bf16.msra.mxu0 %v1361_v56  ;;  %v1445_v56 = vld [vmem:[%s1914_s0 + $0x8] ss:$28 sps:$4 sm:$0xff]  }
  0x36   :  { %906 = vmatprep.subr.bf16.mxu0 %v1365_v58  ;;  %v1450_v58 = vld [vmem:[%s1914_s0 + $0x40] ss:$28 sps:$4 sm:$0xff]  }
  0x37   :  { %801 = vmatpush1.bf16.msra.mxu1 %v1339_v51  ;;  %v1432_v51 = vld [vmem:[%s1913_s1 + $0x1d0] ss:$8 sps:$4 sm:$0xff]  }
  0x38   :  { %802 = vmatprep.subr.bf16.mxu1 %v1341_v55  ;;  %v1442_v55 = vld [vmem:[%s1913_s1 + $0x1f0] ss:$8 sps:$4 sm:$0xff]  }
  0x39   :  { %907 = vmatpush1.bf16.msra.mxu0 %v1367_v60 }
  0x3a   :  { %908 = vmatprep.subr.bf16.mxu0 %v1371_v62 }
  0x3b   :  { %803 = vmatpush1.bf16.msra.mxu1 %v1345_v57  ;;  %v1448_v57 = vld [vmem:[%s1914_s0 + $0x44] ss:$28 sps:$4 sm:$0xff]  }
  0x3c   :  { %804 = vmatprep.subr.bf16.mxu1 %v1347_v59 }
  0x3d   :  { %909 = vmatpush1.bf16.msra.mxu0 %v1373_v1 }
  0x3e   :  { %910 = vmatprep.subr.bf16.mxu0 %v1377_v3  ;;  %v147_v3 = vlaneseq }
  0x3f   :  { %805 = vmatpush1.bf16.msra.mxu1 %v1351_v61 }
  0x40   :  { %827 = vmatprep.subr.bf16.mxu1 %v1358_v63 }
  0x41   :  { %911 = vmatpush1.bf16.msra.mxu0 %v1379_v6  ;;  %v145_v6 = vld [vmem:[%s1915_s2] sm:$0x3] }
  0x42   :  { %807 = vmatmul.mubr.bf16.vlgmr.msra.gmra.mrb[0].mxu1 %v1353_v0  ;;  %933 = vmatprep.subr.bf16.mxu0 %v1388_v8 }
  0x43   :  { %828 = vmatpush1.bf16.msra.mxu1 %v1356_v2  ;;  %816 = vmatprep.mubr.bf16.mxu1 %v1435_v18 }
  0x44   :  { %829 = vmatprep.subr.bf16.mxu1 %v1364_v4  ;;  %913 = vmatmul.mubr.bf16.vlgmr.msra.gmra.mrb[0].mxu0 %v1383_v9  ;;  %v148_v4 = vshrl.u32 %v147_v3, 7 }
  0x45   :  { %934 = vmatpush1.bf16.msra.mxu0 %v1386_v10  ;;  %922 = vmatprep.mubr.bf16.mxu0 %v1407_v11 }
  0x46   :  { %935 = vmatprep.subr.bf16.mxu0 %v1394_v13 }
  0x47   :  { %830 = vmatpush1.bf16.msra.mxu1 %v1362_v5  ;;  %v1858_v5 = vsub.s32 0, %v148_v4 }
  0x48   :  { %831 = vmatprep.subr.bf16.mxu1 %v1370_v7  ;;  %v1863_v7 = vsub.s32 1, %v148_v4 }
  0x49   :  { %936 = vmatpush1.bf16.msra.mxu0 %v1392_v16  ;;  %v150_v8 = vrot.slane %v145_v6, %v1858_v5 }
  0x4a   :  { %817 = vmatmul.mubr.bf16.gmra.mrb[4].mxu1 %v1438_v20  ;;  %937 = vmatprep.subr.bf16.mxu0 %v1400_v17  ;;  %v154_v9 = vrot.slane %v145_v6, %v1863_v7 }
  0x4b   :  { %832 = vmatpush1.bf16.msra.mxu1 %v1368_v12  ;;  %859 = vmatprep.mubr.bf16.mxu1 %v1447_v26 }
  0x4c   :  { %833 = vmatprep.subr.bf16.mxu1 %v1376_v14  ;;  %923 = vmatmul.mubr.bf16.gmra.mrb[4].mxu0 %v1412_v22 }
  0x4d   :  { %938 = vmatpush1.bf16.msra.mxu0 %v1398_v23  ;;  %965 = vmatprep.mubr.bf16.mxu0 %v1459_v28 }
  0x4e   :  { %939 = vmatprep.subr.bf16.mxu0 %v1406_v24 }
  0x4f   :  { %834 = vmatpush1.bf16.msra.mxu1 %v1374_v15 }
  0x50   :  { %835 = vmatprep.subr.bf16.mxu1 %v1382_v19 }
  0x51   :  { %940 = vmatpush1.bf16.msra.mxu0 %v1404_v27 }
  0x52   :  { %941 = vmatprep.subr.bf16.mxu0 %v1415_v30 }
  0x53   :  { %836 = vmatpush1.bf16.msra.mxu1 %v1380_v21 }
  0x54   :  { %837 = vmatprep.subr.bf16.mxu1 %v1391_v25 }
  0x55   :  { %942 = vmatpush1.bf16.msra.mxu0 %v1413_v32 }
  0x56   :  { %943 = vmatprep.subr.bf16.mxu0 %v1421_v34 }
  0x57   :  { %838 = vmatpush1.bf16.msra.mxu1 %v1389_v29 }
  0x58   :  { %839 = vmatprep.subr.bf16.mxu1 %v1397_v31 }
  0x59   :  { %944 = vmatpush1.bf16.msra.mxu0 %v1419_v36 }
  0x5b   :  { %840 = vmatpush1.bf16.msra.mxu1 %v1395_v33 }
  0x5c   :  { %841 = vmatprep.subr.bf16.mxu1 %v1403_v35  ;;  %1234 = vmatmul.mubr.msk.bf16.vlgmr.msra.gmra.mrb[0].mxu0 %vm767_vm0, %v1425_v39 }
  0x5d   :  { %975 = vmatprep.mubr.bf16.mxu0 %v1459_v28 }
  0x5f   :  { %842 = vmatpush1.bf16.msra.mxu1 %v1401_v37 }
  0x60   :  { %843 = vmatprep.subr.bf16.mxu1 %v1411_v38 }
  0x63   :  { %844 = vmatpush1.bf16.msra.mxu1 %v1409_v40 }
  0x64   :  { %845 = vmatprep.subr.bf16.mxu1 %v1418_v41  ;;  %1235 = vmatmul.mubr.msk.bf16.gmra.mrb[4].mxu0 %vm767_vm0, %v1437_v44 }
  0x67   :  { %846 = vmatpush1.bf16.msra.mxu1 %v1416_v42 }
  0x68   :  { %847 = vmatprep.subr.bf16.mxu1 %v1424_v43 }
  0x6b   :  { %848 = vmatpush1.bf16.msra.mxu1 %v1422_v45 }
  0x6c   :  { %849 = vmatprep.subr.bf16.mxu1 %v1428_v46 }
  0x6f   :  { %850 = vmatpush1.bf16.msra.mxu1 %v1426_v47 }
  0x70   :  { %851 = vmatprep.subr.bf16.mxu1 %v1431_v48 }
  0x73   :  { %852 = vmatpush1.bf16.msra.mxu1 %v1429_v49 }
  0x74   :  { %853 = vmatprep.subr.bf16.mxu1 %v1434_v50 }
  0x77   :  { %854 = vmatpush1.bf16.msra.mxu1 %v1432_v51 }
  0x78   :  { %855 = vmatprep.subr.bf16.mxu1 %v1441_v52 }
  0x7b   :  { %856 = vmatpush1.bf16.msra.mxu1 %v1439_v53 }
  0x7c   :  { %857 = vmatprep.subr.bf16.mxu1 %v1444_v54 }
  0x7f   :  { %858 = vmatpush1.bf16.msra.mxu1 %v1442_v55 }
  0x82   :  { %860 = vmatmul.mubr.bf16.vlgmr.msra.gmra.mrb[0].mxu1 %v1445_v56 }
  0x83   :  { %869 = vmatprep.mubr.bf16.mxu1 %v1448_v57 }
  0x8a   :  { %870 = vmatmul.mubr.bf16.gmra.mrb[4].mxu1 %v1450_v58 }
 0x12f   :  { %v967_v59 = vpop.f32.mrb[0].mxu0 }
 0x130   :  { %v969_v60 = vpop.f32.mrb[1].mxu0 }
 0x131   :  { %v971_v61 = vpop.f32.mrb[2].mxu0 }
 0x132   :  { %v973_v62 = vpop.f32.mrb[3].mxu0 }
 0x137   :  { %v977_v63 = vpop.f32.mrb[4].mxu0 }
 0x138   :  { %v979_v0 = vpop.f32.mrb[5].mxu0 }
 0x139   :  { %v981_v1 = vpop.f32.mrb[6].mxu0 }
 0x13a   :  { %v983_v2 = vpop.f32.mrb[7].mxu0 }
 0x155   :  { %v861_v10 = vpop.f32.mrb[0].mxu1 }
 0x156   :  { %v1236_v11 = vadd.f32 %v861_v10, %v150_v8  ;;  %v863_v12 = vpop.f32.mrb[1].mxu1 }
 0x157   :  { %v1238_v13 = vadd.f32 %v863_v12, %v154_v9  ;;  %v865_v14 = vpop.f32.mrb[2].mxu1 }
 0x158   :  { %v1240_v15 = vadd.f32 %v865_v14, %v150_v8  ;;  %v867_v16 = vpop.f32.mrb[3].mxu1  ;;  %v1237_v17 = vadd.f32 %v1236_v11, %v967_v59 }
 0x159   :  { %v1239_v18 = vadd.f32 %v1238_v13, %v969_v60  ;;  %v1242_v19 = vadd.f32 %v867_v16, %v154_v9 }
 0x15a   :  { %v1241_v20 = vadd.f32 %v1240_v15, %v971_v61 }
 0x15b   :  { %v1243_v21 = vadd.f32 %v1242_v19, %v973_v62  ;;  %v987_v22 = vsel %vm986_vm1, %v1239_v18, 0.0 }
 0x15c   :  { %v988_v23 = vadd.f32 %v1237_v17, %v987_v22 }
 0x15d   :  { %v871_v24 = vpop.f32.mrb[4].mxu1  ;;  %v991_v25 = vsel %vm986_vm1, %v1243_v21, 0.0 }
 0x15e   :  { %v1244_v26 = vadd.f32 %v871_v24, %v150_v8  ;;  %989 = vadd.xlane.f32.xlu0 %v988_v23  ;;  %v873_v27 = vpop.f32.mrb[5].mxu1  ;;  %v992_v32 = vadd.f32 %v1241_v20, %v991_v25  ;;  %v1080_v23 = vld [vmem:[%s1917_s4] sm:$0x3] }
 0x15f   :  { %v1246_v28 = vadd.f32 %v873_v27, %v154_v9  ;;  %v875_v29 = vpop.f32.mrb[6].mxu1 }
 0x160   :  { %v1248_v30 = vadd.f32 %v875_v29, %v150_v8  ;;  %v877_v31 = vpop.f32.mrb[7].mxu1  ;;  %v1245_v33 = vadd.f32 %v1244_v26, %v977_v63  ;;  %v1085_v29 = vrot.slane %v1080_v23, %v1858_v5 }
 0x161   :  { %v1247_v34 = vadd.f32 %v1246_v28, %v979_v0  ;;  %v1250_v35 = vadd.f32 %v877_v31, %v154_v9 }
 0x162   :  { %v1249_v36 = vadd.f32 %v1248_v30, %v981_v1  ;;  %993 = vadd.xlane.f32.xlu0 %v992_v32  ;;  %v1089_v30 = vrot.slane %v1080_v23, %v1863_v7 }
 0x163   :  { %v1251_v37 = vadd.f32 %v1250_v35, %v983_v2  ;;  %v995_v38 = vsel %vm986_vm1, %v1247_v34, 0.0 }
 0x164   :  { %v996_v39 = vadd.f32 %v1245_v33, %v995_v38 }
 0x165   :  { %v999_v40 = vsel %vm986_vm1, %v1251_v37, 0.0 }
 0x166   :  { %997 = vadd.xlane.f32.xlu1 %v996_v39  ;;  %v1000_v41 = vadd.f32 %v1249_v36, %v999_v40 }
 0x16a   :  { %1001 = vadd.xlane.f32.xlu1 %v1000_v41 }
 0x1eb   :  { %v990_v42 = vpop.xlane.xlu0 %989 }
 0x1ec   :  { %v1004_v43 = vmul.f32 0.0052083335, %v990_v42 }
 0x1ee   :  { %v1008_v44 = vsub.f32 %v1237_v17, %v1004_v43  ;;  %v1009_v45 = vsub.f32 %v1239_v18, %v1004_v43 }
 0x1ef   :  { %v994_v46 = vpop.xlane.xlu0 %993 }
 0x1f0   :  { %v1005_v47 = vmul.f32 0.0052083335, %v994_v46  ;;  %v1016_v48 = vmul.f32 %v1008_v44, %v1008_v44  ;;  %v1017_v49 = vmul.f32 %v1009_v45, %v1009_v45 }
 0x1f2   :  { %v1010_v50 = vsub.f32 %v1241_v20, %v1005_v47  ;;  %v1011_v51 = vsub.f32 %v1243_v21, %v1005_v47  ;;  %v1024_v52 = vsel %vm986_vm1, %v1017_v49, 0.0  ;;  %v1060_v20 = vld [vmem:[%s1916_s3] sm:$0x3] }
 0x1f3   :  { %v998_v53 = vpop.xlane.xlu1 %997  ;;  %v1025_v54 = vadd.f32 %v1024_v52, %v1016_v48  ;;  %v1065_v25 = vrot.slane %v1060_v20, %v1858_v5  ;;  %v1069_v26 = vrot.slane %v1060_v20, %v1863_v7 }
 0x1f4   :  { %v1006_v55 = vmul.f32 0.0052083335, %v998_v53  ;;  %v1018_v56 = vmul.f32 %v1010_v50, %v1010_v50  ;;  %v1019_v57 = vmul.f32 %v1011_v51, %v1011_v51 }
 0x1f5   :  { %1026 = vadd.xlane.f32.xlu0 %v1025_v54 }
 0x1f6   :  { %v1012_v58 = vsub.f32 %v1245_v33, %v1006_v55  ;;  %v1013_v59 = vsub.f32 %v1247_v34, %v1006_v55  ;;  %v1028_v60 = vsel %vm986_vm1, %v1019_v57, 0.0 }
 0x1f7   :  { %v1002_v61 = vpop.xlane.xlu1 %1001  ;;  %v1029_v62 = vadd.f32 %v1028_v60, %v1018_v56 }
 0x1f8   :  { %v1007_v63 = vmul.f32 0.0052083335, %v1002_v61  ;;  %v1020_v0 = vmul.f32 %v1012_v58, %v1012_v58  ;;  %v1021_v1 = vmul.f32 %v1013_v59, %v1013_v59 }
 0x1f9   :  { %1030 = vadd.xlane.f32.xlu1 %v1029_v62 }
 0x1fa   :  { %v1014_v2 = vsub.f32 %v1249_v36, %v1007_v63  ;;  %v1015_v3 = vsub.f32 %v1251_v37, %v1007_v63  ;;  %v1032_v4 = vsel %vm986_vm1, %v1021_v1, 0.0 }
 0x1fb   :  { %v1033_v6 = vadd.f32 %v1032_v4, %v1020_v0 }
 0x1fc   :  { %v1022_v8 = vmul.f32 %v1014_v2, %v1014_v2  ;;  %v1023_v9 = vmul.f32 %v1015_v3, %v1015_v3 }
 0x1fd   :  { %1034 = vadd.xlane.f32.xlu0 %v1033_v6 }
 0x1fe   :  { %v1036_v10 = vsel %vm986_vm1, %v1023_v9, 0.0 }
 0x1ff   :  { %v1037_v11 = vadd.f32 %v1036_v10, %v1022_v8 }
 0x201   :  { %1038 = vadd.xlane.f32.xlu1 %v1037_v11 }
 0x282   :  { %v1027_v12 = vpop.xlane.xlu0 %1026 }
 0x283   :  { %v1040_v13 = vmul.f32 0.0052083335, %v1027_v12 }
 0x285   :  { %v1044_v14 = vadd.f32 1e-06, %v1040_v13 }
 0x286   :  { %v1031_v15 = vpop.xlane.xlu1 %1030 }
 0x287   :  { %1451 = vrsqrt.f32 %v1044_v14  ;;  %v1041_v16 = vmul.f32 0.0052083335, %v1031_v15 }
 0x289   :  { %v1045_v17 = vadd.f32 1e-06, %v1041_v16 }
 0x28a   :  { %v1035_v18 = vpop.xlane.xlu0 %1034 }
 0x28b   :  { %1453 = vrsqrt.f32 %v1045_v17  ;;  %v1042_v19 = vmul.f32 0.0052083335, %v1035_v18 }
 0x28d   :  { %v1046_v21 = vadd.f32 1e-06, %v1042_v19 }
 0x28e   :  { %v1039_v22 = vpop.xlane.xlu1 %1038 }
 0x28f   :  { %1455 = vrsqrt.f32 %v1046_v21  ;;  %v1043_v24 = vmul.f32 0.0052083335, %v1039_v22 }
 0x291   :  { %v1452_v27 = vpop.eup %1451  ;;  %v1047_v28 = vadd.f32 1e-06, %v1043_v24 }
 0x292   :  { %v1052_v31 = vmul.f32 %v1452_v27, %v1008_v44  ;;  %v1053_v32 = vmul.f32 %v1452_v27, %v1009_v45 }
 0x293   :  { %1457 = vrsqrt.f32 %v1047_v28 }
 0x294   :  { %v1072_v33 = vmul.f32 %v1065_v25, %v1052_v31  ;;  %v1073_v34 = vmul.f32 %v1069_v26, %v1053_v32 }
 0x295   :  { %v1454_v35 = vpop.eup %1453 }
 0x296   :  { %v1092_v36 = vadd.f32 %v1085_v29, %v1072_v33  ;;  %v1093_v37 = vadd.f32 %v1089_v30, %v1073_v34  ;;  %v1054_v38 = vmul.f32 %v1454_v35, %v1010_v50  ;;  %v1055_v39 = vmul.f32 %v1454_v35, %v1011_v51 }
 0x298   :  { %1100 = vst [vmem:[%s1918_s5] sm:$0xff] %v1092_v36  ;;  %1101 = vst.msk [vmem:[%s1918_s5 + $0x8] sm:$0xff] %vm986_vm1, %v1093_v37  ;;  %v1074_v5 = vmul.f32 %v1065_v25, %v1054_v38  ;;  %v1075_v7 = vmul.f32 %v1069_v26, %v1055_v39 }
 0x299   :  { %v1456_v40 = vpop.eup %1455 }
 0x29a   :  { %v1094_v41 = vadd.f32 %v1085_v29, %v1074_v5  ;;  %v1095_v42 = vadd.f32 %v1089_v30, %v1075_v7  ;;  %v1056_v43 = vmul.f32 %v1456_v40, %v1012_v58  ;;  %v1057_v44 = vmul.f32 %v1456_v40, %v1013_v59 }
 0x29c   :  { %1102 = vst [vmem:[%s1918_s5 + $0x10] sm:$0xff] %v1094_v41  ;;  %1103 = vst.msk [vmem:[%s1918_s5 + $0x18] sm:$0xff] %vm986_vm1, %v1095_v42  ;;  %v1076_v45 = vmul.f32 %v1065_v25, %v1056_v43  ;;  %v1077_v46 = vmul.f32 %v1069_v26, %v1057_v44 }
 0x29d   :  { %v1458_v47 = vpop.eup %1457 }
 0x29e   :  { %v1096_v48 = vadd.f32 %v1085_v29, %v1076_v45  ;;  %v1097_v49 = vadd.f32 %v1089_v30, %v1077_v46  ;;  %v1058_v50 = vmul.f32 %v1458_v47, %v1014_v2  ;;  %v1059_v51 = vmul.f32 %v1458_v47, %v1015_v3 }
 0x2a0   :  { %1104 = vst [vmem:[%s1918_s5 + $0x20] sm:$0xff] %v1096_v48  ;;  %1105 = vst.msk [vmem:[%s1918_s5 + $0x28] sm:$0xff] %vm986_vm1, %v1097_v49  ;;  %v1078_v52 = vmul.f32 %v1065_v25, %v1058_v50  ;;  %v1079_v53 = vmul.f32 %v1069_v26, %v1059_v51 }
 0x2a2   :  { %v1098_v54 = vadd.f32 %v1085_v29, %v1078_v52  ;;  %v1099_v55 = vadd.f32 %v1089_v30, %v1079_v53 }
 0x2a4   :  { %1106 = vst [vmem:[%s1918_s5 + $0x30] sm:$0xff] %v1098_v54  ;;  %1107 = vst.msk [vmem:[%s1918_s5 + $0x38] sm:$0xff] %vm986_vm1, %v1099_v55 }

// kernel: cog_replknet_forward.9
= control target key start
LH: loop header
LB: loop body
LE: loop exit
PB: predicated region body
PF: predicated region fallthrough
CT: control target
= control target key end

     0   :  { %vm501_vm0 = vcmask 523264   ;;  %s1773_s1 = inlined_call_operand.vmem [shape: bf16[192,768], index: 1, kind: input, shape index: {}]   ;;  %s1774_s0 = inlined_call_operand.vmem [shape: bf16[32,192], index: 0, kind: input, shape index: {}]   ;;  %s1775_s2 = inlined_call_operand.vmem [shape: f32[1,768], index: 2, kind: input, shape index: {}]   ;;  %s1776_s3 = inlined_call_operand.vmem [shape: bf16[32,768], index: 3, kind: output, shape index: {}]  }
   0x1   :  { %v1101_v0 = vld [vmem:[%s1773_s1 + $0x4] ss:$24 sps:$4 sm:$0xff]   ;;  %v1105_v2 = vld [vmem:[%s1773_s1] ss:$24 sps:$4 sm:$0xff]   ;;  %v1107_v4 = vld [vmem:[%s1773_s1 + $0x34] ss:$24 sps:$4 sm:$0xff]  }
   0x2   :  { %v1103_v1 = vld [vmem:[%s1773_s1 + $0xc] ss:$24 sps:$4 sm:$0xff]   ;;  %508 = vmatprep.subr.bf16.mxu0 %v1101_v0  ;;  %v1106_v3 = vld [vmem:[%s1773_s1 + $0x8] ss:$24 sps:$4 sm:$0xff]   ;;  %v1109_v5 = vld [vmem:[%s1773_s1 + $0x3c] ss:$24 sps:$4 sm:$0xff]  }
   0x3   :  { %561 = vmatprep.subr.bf16.mxu1 %v1103_v1  ;;  %509 = vmatpush1.bf16.msra.mxu0 %v1105_v2  ;;  %v1111_v6 = vld [vmem:[%s1773_s1 + $0x30] ss:$24 sps:$4 sm:$0xff]   ;;  %v1113_v8 = vld [vmem:[%s1773_s1 + $0x64] ss:$24 sps:$4 sm:$0xff]   ;;  %v1117_v10 = vld [vmem:[%s1773_s1 + $0x60] ss:$24 sps:$4 sm:$0xff]  }
   0x4   :  { %562 = vmatpush1.bf16.msra.mxu1 %v1106_v3  ;;  %510 = vmatprep.subr.bf16.mxu0 %v1107_v4  ;;  %v1112_v7 = vld [vmem:[%s1773_s1 + $0x38] ss:$24 sps:$4 sm:$0xff]   ;;  %v1115_v9 = vld [vmem:[%s1773_s1 + $0x6c] ss:$24 sps:$4 sm:$0xff]   ;;  %v1118_v11 = vld [vmem:[%s1773_s1 + $0x68] ss:$24 sps:$4 sm:$0xff]  }
   0x5   :  { %563 = vmatprep.subr.bf16.mxu1 %v1109_v5  ;;  %v1119_v12 = vld [vmem:[%s1773_s1 + $0x94] ss:$24 sps:$4 sm:$0xff]   ;;  %v1123_v14 = vld [vmem:[%s1773_s1 + $0x90] ss:$24 sps:$4 sm:$0xff]   ;;  %v1125_v16 = vld [vmem:[%s1773_s1 + $0xc4] ss:$24 sps:$4 sm:$0xff]  }
   0x6   :  { %v1121_v13 = vld [vmem:[%s1773_s1 + $0x9c] ss:$24 sps:$4 sm:$0xff]   ;;  %v1124_v15 = vld [vmem:[%s1773_s1 + $0x98] ss:$24 sps:$4 sm:$0xff]   ;;  %v1127_v17 = vld [vmem:[%s1773_s1 + $0xcc] ss:$24 sps:$4 sm:$0xff]  }
   0x7   :  { %511 = vmatpush1.bf16.msra.mxu0 %v1111_v6  ;;  %v1129_v18 = vld [vmem:[%s1773_s1 + $0xc0] ss:$24 sps:$4 sm:$0xff]   ;;  %v1131_v20 = vld [vmem:[%s1773_s1 + $0xf4] ss:$24 sps:$4 sm:$0xff]   ;;  %v1135_v22 = vld [vmem:[%s1773_s1 + $0xf0] ss:$24 sps:$4 sm:$0xff]  }
   0x8   :  { %564 = vmatpush1.bf16.msra.mxu1 %v1112_v7  ;;  %512 = vmatprep.subr.bf16.mxu0 %v1113_v8  ;;  %v1130_v19 = vld [vmem:[%s1773_s1 + $0xc8] ss:$24 sps:$4 sm:$0xff]   ;;  %v1133_v21 = vld [vmem:[%s1773_s1 + $0xfc] ss:$24 sps:$4 sm:$0xff]   ;;  %v1136_v23 = vld [vmem:[%s1773_s1 + $0xf8] ss:$24 sps:$4 sm:$0xff]  }
   0x9   :  { %565 = vmatprep.subr.bf16.mxu1 %v1115_v9  ;;  %v1137_v24 = vld [vmem:[%s1773_s1 + $0x124] ss:$24 sps:$4 sm:$0xff]   ;;  %v1141_v26 = vld [vmem:[%s1773_s1 + $0x120] ss:$24 sps:$4 sm:$0xff]   ;;  %v1143_v28 = vld [vmem:[%s1773_s1 + $0x154] ss:$24 sps:$4 sm:$0xff]  }
   0xa   :  { %v1139_v25 = vld [vmem:[%s1773_s1 + $0x12c] ss:$24 sps:$4 sm:$0xff]   ;;  %v1142_v27 = vld [vmem:[%s1773_s1 + $0x128] ss:$24 sps:$4 sm:$0xff]   ;;  %v1145_v29 = vld [vmem:[%s1773_s1 + $0x15c] ss:$24 sps:$4 sm:$0xff]  }
   0xb   :  { %513 = vmatpush1.bf16.msra.mxu0 %v1117_v10  ;;  %v1147_v30 = vld [vmem:[%s1773_s1 + $0x150] ss:$24 sps:$4 sm:$0xff]   ;;  %v1149_v32 = vld [vmem:[%s1773_s1 + $0x184] ss:$24 sps:$4 sm:$0xff]   ;;  %v1153_v34 = vld [vmem:[%s1773_s1 + $0x180] ss:$24 sps:$4 sm:$0xff]  }
   0xc   :  { %566 = vmatpush1.bf16.msra.mxu1 %v1118_v11  ;;  %514 = vmatprep.subr.bf16.mxu0 %v1119_v12  ;;  %v1148_v31 = vld [vmem:[%s1773_s1 + $0x158] ss:$24 sps:$4 sm:$0xff]   ;;  %v1151_v33 = vld [vmem:[%s1773_s1 + $0x18c] ss:$24 sps:$4 sm:$0xff]   ;;  %v1154_v35 = vld [vmem:[%s1773_s1 + $0x188] ss:$24 sps:$4 sm:$0xff]   ;;  %v93_v12 = vlaneseq }
   0xd   :  { %567 = vmatprep.subr.bf16.mxu1 %v1121_v13  ;;  %v1155_v36 = vld [vmem:[%s1773_s1 + $0x1b4] ss:$24 sps:$4 sm:$0xff]   ;;  %v1159_v39 = vld [vmem:[%s1773_s1 + $0x1b0] ss:$24 sps:$4 sm:$0xff]   ;;  %v1161_v41 = vld [vmem:[%s1773_s1 + $0x1e4] ss:$24 sps:$4 sm:$0xff]  }
   0xe   :  { %v1173_v37 = vld [vmem:[%s1774_s0 + $0x4] ss:$8 sps:$4 sm:$0xff]   ;;  %v1157_v38 = vld [vmem:[%s1773_s1 + $0x1bc] ss:$24 sps:$4 sm:$0xff]   ;;  %v1160_v40 = vld [vmem:[%s1773_s1 + $0x1b8] ss:$24 sps:$4 sm:$0xff]  }
   0xf   :  { %515 = vmatpush1.bf16.msra.mxu0 %v1123_v14  ;;  %1047 = vmatprep.mubr.msk.bf16.mxu0 %vm501_vm0, %v1173_v37  ;;  %v1163_v42 = vld [vmem:[%s1773_s1 + $0x1ec] ss:$24 sps:$4 sm:$0xff]   ;;  %v1165_v43 = vld [vmem:[%s1773_s1 + $0x1e0] ss:$24 sps:$4 sm:$0xff]   ;;  %v1169_v46 = vld [vmem:[%s1773_s1 + $0x21c] ss:$24 sps:$4 sm:$0xff]  }
  0x10   :  { %568 = vmatpush1.bf16.msra.mxu1 %v1124_v15  ;;  %516 = vmatprep.subr.bf16.mxu0 %v1125_v16  ;;  %v1166_v44 = vld [vmem:[%s1773_s1 + $0x1e8] ss:$24 sps:$4 sm:$0xff]   ;;  %v1167_v45 = vld [vmem:[%s1773_s1 + $0x214] ss:$24 sps:$4 sm:$0xff]   ;;  %v1172_v48 = vld [vmem:[%s1773_s1 + $0x218] ss:$24 sps:$4 sm:$0xff]  }
  0x11   :  { %569 = vmatprep.subr.bf16.mxu1 %v1127_v17  ;;  %1049 = vmatprep.mubr.msk.bf16.mxu1 %vm501_vm0, %v1173_v37  ;;  %v1171_v47 = vld [vmem:[%s1773_s1 + $0x210] ss:$24 sps:$4 sm:$0xff]   ;;  %v1178_v49 = vld [vmem:[%s1773_s1 + $0x14] ss:$24 sps:$4 sm:$0xff]   ;;  %v1181_v52 = vld [vmem:[%s1773_s1 + $0x44] ss:$24 sps:$4 sm:$0xff]  }
  0x12   :  { %v1438_v50 = vld [vmem:[%s1774_s0] ss:$8 sps:$4 sm:$0xff]   ;;  %v1185_v53 = vld [vmem:[%s1774_s0 + $0x14] ss:$8 sps:$4 sm:$0xff]   ;;  %v1462_v56 = vld [vmem:[%s1774_s0 + $0x10] ss:$8 sps:$4 sm:$0xff]  }
  0x13   :  { %517 = vmatpush1.bf16.msra.mxu0 %v1129_v18  ;;  %v1176_v51 = vld [vmem:[%s1773_s1 + $0x10] ss:$24 sps:$4 sm:$0xff]   ;;  %v1179_v54 = vld [vmem:[%s1773_s1 + $0x40] ss:$24 sps:$4 sm:$0xff]   ;;  %v1184_v55 = vld [vmem:[%s1773_s1 + $0x74] ss:$24 sps:$4 sm:$0xff]  }
  0x14   :  { %570 = vmatpush1.bf16.msra.mxu1 %v1130_v19  ;;  %518 = vmatprep.subr.bf16.mxu0 %v1131_v20  ;;  %v1182_v57 = vld [vmem:[%s1773_s1 + $0x70] ss:$24 sps:$4 sm:$0xff]   ;;  %v1190_v58 = vld [vmem:[%s1773_s1 + $0xa4] ss:$24 sps:$4 sm:$0xff]   ;;  %v1188_v59 = vld [vmem:[%s1773_s1 + $0xa0] ss:$24 sps:$4 sm:$0xff]  }
  0x15   :  { %571 = vmatprep.subr.bf16.mxu1 %v1133_v21  ;;  %v1193_v60 = vld [vmem:[%s1773_s1 + $0xd4] ss:$24 sps:$4 sm:$0xff]   ;;  %v1191_v61 = vld [vmem:[%s1773_s1 + $0xd0] ss:$24 sps:$4 sm:$0xff]   ;;  %v1196_v62 = vld [vmem:[%s1773_s1 + $0x104] ss:$24 sps:$4 sm:$0xff]  }
  0x16   :  { %v1194_v63 = vld [vmem:[%s1773_s1 + $0x100] ss:$24 sps:$4 sm:$0xff]   ;;  %v1199_v0 = vld [vmem:[%s1773_s1 + $0x134] ss:$24 sps:$4 sm:$0xff]   ;;  %v1197_v1 = vld [vmem:[%s1773_s1 + $0x130] ss:$24 sps:$4 sm:$0xff]  }
  0x17   :  { %519 = vmatpush1.bf16.msra.mxu0 %v1135_v22  ;;  %v1202_v2 = vld [vmem:[%s1773_s1 + $0x164] ss:$24 sps:$4 sm:$0xff]   ;;  %v1200_v3 = vld [vmem:[%s1773_s1 + $0x160] ss:$24 sps:$4 sm:$0xff]   ;;  %v1205_v4 = vld [vmem:[%s1773_s1 + $0x194] ss:$24 sps:$4 sm:$0xff]  }
  0x18   :  { %572 = vmatpush1.bf16.msra.mxu1 %v1136_v23  ;;  %520 = vmatprep.subr.bf16.mxu0 %v1137_v24  ;;  %v1203_v5 = vld [vmem:[%s1773_s1 + $0x190] ss:$24 sps:$4 sm:$0xff]   ;;  %v1208_v6 = vld [vmem:[%s1773_s1 + $0x1c4] ss:$24 sps:$4 sm:$0xff]   ;;  %v1206_v7 = vld [vmem:[%s1773_s1 + $0x1c0] ss:$24 sps:$4 sm:$0xff]  }
  0x19   :  { %573 = vmatprep.subr.bf16.mxu1 %v1139_v25  ;;  %v1211_v8 = vld [vmem:[%s1773_s1 + $0x1f4] ss:$24 sps:$4 sm:$0xff]   ;;  %v1209_v9 = vld [vmem:[%s1773_s1 + $0x1f0] ss:$24 sps:$4 sm:$0xff]   ;;  %v1214_v10 = vld [vmem:[%s1773_s1 + $0x224] ss:$24 sps:$4 sm:$0xff]  }
  0x1a   :  { %v1212_v11 = vld [vmem:[%s1773_s1 + $0x220] ss:$24 sps:$4 sm:$0xff]   ;;  %v1527_v13 = vshrl.u32 %v93_v12, 7 }
  0x1b   :  { %521 = vmatpush1.bf16.msra.mxu0 %v1141_v26  ;;  %v1534_v16 = vld [vmem:[%s1775_s2] sm:$0x3f] }
  0x1c   :  { %574 = vmatpush1.bf16.msra.mxu1 %v1142_v27  ;;  %522 = vmatprep.subr.bf16.mxu0 %v1143_v28  ;;  %v95_v14 = vsub.s32 0, %v1527_v13  ;;  %v103_v15 = vsub.s32 2, %v1527_v13  ;;  %v99_v17 = vsub.s32 1, %v1527_v13  ;;  %v107_v18 = vsub.s32 3, %v1527_v13 }
  0x1d   :  { %575 = vmatprep.subr.bf16.mxu1 %v1145_v29 }
  0x1e   :  { %v1539_v19 = vrot.slane %v1534_v16, %v95_v14  ;;  %v1542_v20 = vrot.slane %v1534_v16, %v103_v15  ;;  %v1545_v21 = vrot.slane %v1534_v16, %v99_v17  ;;  %v1548_v22 = vrot.slane %v1534_v16, %v107_v18 }
  0x1f   :  { %523 = vmatpush1.bf16.msra.mxu0 %v1147_v30 }
  0x20   :  { %576 = vmatpush1.bf16.msra.mxu1 %v1148_v31  ;;  %524 = vmatprep.subr.bf16.mxu0 %v1149_v32 }
  0x21   :  { %577 = vmatprep.subr.bf16.mxu1 %v1151_v33 }
  0x23   :  { %525 = vmatpush1.bf16.msra.mxu0 %v1153_v34 }
  0x24   :  { %578 = vmatpush1.bf16.msra.mxu1 %v1154_v35  ;;  %526 = vmatprep.subr.bf16.mxu0 %v1155_v36 }
  0x25   :  { %579 = vmatprep.subr.bf16.mxu1 %v1157_v38 }
  0x27   :  { %527 = vmatpush1.bf16.msra.mxu0 %v1159_v39 }
  0x28   :  { %580 = vmatpush1.bf16.msra.mxu1 %v1160_v40  ;;  %528 = vmatprep.subr.bf16.mxu0 %v1161_v41 }
  0x29   :  { %581 = vmatprep.subr.bf16.mxu1 %v1163_v42 }
  0x2b   :  { %529 = vmatpush1.bf16.msra.mxu0 %v1165_v43 }
  0x2c   :  { %582 = vmatpush1.bf16.msra.mxu1 %v1166_v44  ;;  %530 = vmatprep.subr.bf16.mxu0 %v1167_v45 }
  0x2d   :  { %583 = vmatprep.subr.bf16.mxu1 %v1169_v46 }
  0x2f   :  { %531 = vmatpush1.bf16.msra.mxu0 %v1171_v47 }
  0x30   :  { %584 = vmatpush1.bf16.msra.mxu1 %v1172_v48  ;;  %614 = vmatprep.subr.bf16.mxu0 %v1178_v49 }
  0x31   :  { %1077 = vmatprep.subr.bf16.mxu1 %v1178_v49 }
  0x32   :  { %541 = vmatmul.mubr.bf16.vlgmr.msra.gmra.mrb[0].mxu0 %v1438_v50 }
  0x33   :  { %594 = vmatmul.mubr.bf16.vlgmr.msra.gmra.mrb[0].mxu1 %v1438_v50  ;;  %615 = vmatpush1.bf16.msra.mxu0 %v1176_v51 }
  0x34   :  { %1089 = vmatpush1.bf16.msra.mxu1 %v1176_v51  ;;  %616 = vmatprep.subr.bf16.mxu0 %v1181_v52 }
  0x35   :  { %1078 = vmatprep.subr.bf16.mxu1 %v1181_v52  ;;  %1048 = vmatprep.mubr.msk.bf16.mxu0 %vm501_vm0, %v1185_v53 }
  0x36   :  { %1050 = vmatprep.mubr.msk.bf16.mxu1 %vm501_vm0, %v1185_v53 }
  0x37   :  { %617 = vmatpush1.bf16.msra.mxu0 %v1179_v54 }
  0x38   :  { %1090 = vmatpush1.bf16.msra.mxu1 %v1179_v54  ;;  %618 = vmatprep.subr.bf16.mxu0 %v1184_v55 }
  0x39   :  { %1079 = vmatprep.subr.bf16.mxu1 %v1184_v55 }
  0x3a   :  { %551 = vmatmul.mubr.bf16.gmra.mrb[4].mxu0 %v1462_v56 }
  0x3b   :  { %604 = vmatmul.mubr.bf16.gmra.mrb[4].mxu1 %v1462_v56  ;;  %619 = vmatpush1.bf16.msra.mxu0 %v1182_v57 }
  0x3c   :  { %1091 = vmatpush1.bf16.msra.mxu1 %v1182_v57  ;;  %620 = vmatprep.subr.bf16.mxu0 %v1190_v58 }
  0x3d   :  { %1080 = vmatprep.subr.bf16.mxu1 %v1190_v58  ;;  %1051 = vmatprep.mubr.msk.bf16.mxu0 %vm501_vm0, %v1173_v37 }
  0x3e   :  { %1052 = vmatprep.mubr.msk.bf16.mxu1 %vm501_vm0, %v1185_v53 }
  0x3f   :  { %621 = vmatpush1.bf16.msra.mxu0 %v1188_v59 }
  0x40   :  { %1092 = vmatpush1.bf16.msra.mxu1 %v1188_v59  ;;  %622 = vmatprep.subr.bf16.mxu0 %v1193_v60 }
  0x41   :  { %1081 = vmatprep.subr.bf16.mxu1 %v1193_v60 }
  0x43   :  { %623 = vmatpush1.bf16.msra.mxu0 %v1191_v61 }
  0x44   :  { %1093 = vmatpush1.bf16.msra.mxu1 %v1191_v61  ;;  %624 = vmatprep.subr.bf16.mxu0 %v1196_v62 }
  0x45   :  { %1082 = vmatprep.subr.bf16.mxu1 %v1196_v62 }
  0x47   :  { %625 = vmatpush1.bf16.msra.mxu0 %v1194_v63 }
  0x48   :  { %1094 = vmatpush1.bf16.msra.mxu1 %v1194_v63  ;;  %626 = vmatprep.subr.bf16.mxu0 %v1199_v0 }
  0x49   :  { %1083 = vmatprep.subr.bf16.mxu1 %v1199_v0 }
  0x4b   :  { %627 = vmatpush1.bf16.msra.mxu0 %v1197_v1 }
  0x4c   :  { %1095 = vmatpush1.bf16.msra.mxu1 %v1197_v1  ;;  %628 = vmatprep.subr.bf16.mxu0 %v1202_v2 }
  0x4d   :  { %1084 = vmatprep.subr.bf16.mxu1 %v1202_v2 }
  0x4f   :  { %629 = vmatpush1.bf16.msra.mxu0 %v1200_v3 }
  0x50   :  { %1096 = vmatpush1.bf16.msra.mxu1 %v1200_v3  ;;  %630 = vmatprep.subr.bf16.mxu0 %v1205_v4 }
  0x51   :  { %1085 = vmatprep.subr.bf16.mxu1 %v1205_v4 }
  0x53   :  { %631 = vmatpush1.bf16.msra.mxu0 %v1203_v5 }
  0x54   :  { %1097 = vmatpush1.bf16.msra.mxu1 %v1203_v5  ;;  %632 = vmatprep.subr.bf16.mxu0 %v1208_v6 }
  0x55   :  { %1086 = vmatprep.subr.bf16.mxu1 %v1208_v6 }
  0x57   :  { %633 = vmatpush1.bf16.msra.mxu0 %v1206_v7 }
  0x58   :  { %1098 = vmatpush1.bf16.msra.mxu1 %v1206_v7  ;;  %634 = vmatprep.subr.bf16.mxu0 %v1211_v8 }
  0x59   :  { %1087 = vmatprep.subr.bf16.mxu1 %v1211_v8 }
  0x5b   :  { %635 = vmatpush1.bf16.msra.mxu0 %v1209_v9 }
  0x5c   :  { %1099 = vmatpush1.bf16.msra.mxu1 %v1209_v9  ;;  %636 = vmatprep.subr.bf16.mxu0 %v1214_v10 }
  0x5d   :  { %1088 = vmatprep.subr.bf16.mxu1 %v1214_v10 }
  0x5f   :  { %637 = vmatpush1.bf16.msra.mxu0 %v1212_v11 }
  0x60   :  { %1100 = vmatpush1.bf16.msra.mxu1 %v1212_v11 }
  0x62   :  { %647 = vmatmul.mubr.bf16.vlgmr.msra.gmra.mrb[8].mxu0 %v1438_v50 }
  0x63   :  { %657 = vmatmul.mubr.bf16.vlgmr.msra.gmra.mrb[8].mxu1 %v1462_v56 }
 0x105   :  { %v542_v23 = vpop.f32.mrb[0].mxu0 }
 0x106   :  { %v595_v24 = vpop.f32.mrb[0].mxu1  ;;  %v1551_v25 = vadd.f32 %v542_v23, %v1539_v19  ;;  %v544_v27 = vpop.f32.mrb[1].mxu0 }
 0x107   :  { %v1554_v26 = vadd.f32 %v595_v24, %v1542_v20  ;;  %v597_v28 = vpop.f32.mrb[1].mxu1  ;;  %v1557_v29 = vadd.f32 %v544_v27, %v1545_v21  ;;  %v546_v31 = vpop.f32.mrb[2].mxu0 }
 0x108   :  { %v1560_v30 = vadd.f32 %v597_v28, %v1548_v22  ;;  %v599_v32 = vpop.f32.mrb[2].mxu1  ;;  %v667_v33 = vmul.f32 %v1551_v25, %v1551_v25  ;;  %v1567_v35 = vadd.f32 %v546_v31, %v1539_v19  ;;  %v548_v37 = vpop.f32.mrb[3].mxu0 }
 0x109   :  { %v669_v34 = vmul.f32 %v1554_v26, %v1554_v26  ;;  %v1570_v36 = vadd.f32 %v599_v32, %v1542_v20  ;;  %v601_v38 = vpop.f32.mrb[3].mxu1  ;;  %v668_v39 = vmul.f32 %v1557_v29, %v1557_v29  ;;  %v1577_v41 = vadd.f32 %v548_v37, %v1545_v21 }
 0x10a   :  { %v670_v40 = vmul.f32 %v1560_v30, %v1560_v30  ;;  %v1580_v42 = vadd.f32 %v601_v38, %v1548_v22  ;;  %v691_v43 = vmul.f32 %v667_v33, %v1551_v25  ;;  %v673_v45 = vmul.f32 %v1567_v35, %v1567_v35 }
 0x10b   :  { %v693_v44 = vmul.f32 %v669_v34, %v1554_v26  ;;  %v675_v46 = vmul.f32 %v1570_v36, %v1570_v36  ;;  %v692_v47 = vmul.f32 %v668_v39, %v1557_v29  ;;  %v674_v49 = vmul.f32 %v1577_v41, %v1577_v41 }
 0x10c   :  { %v694_v48 = vmul.f32 %v670_v40, %v1560_v30  ;;  %v676_v50 = vmul.f32 %v1580_v42, %v1580_v42  ;;  %v715_v51 = vmul.f32 0.044715, %v691_v43  ;;  %v697_v53 = vmul.f32 %v673_v45, %v1567_v35 }
 0x10d   :  { %v717_v52 = vmul.f32 0.044715, %v693_v44  ;;  %v699_v54 = vmul.f32 %v675_v46, %v1570_v36  ;;  %v716_v55 = vmul.f32 0.044715, %v692_v47  ;;  %v698_v57 = vmul.f32 %v674_v49, %v1577_v41  ;;  %v552_v59 = vpop.f32.mrb[4].mxu0 }
 0x10e   :  { %v718_v56 = vmul.f32 0.044715, %v694_v48  ;;  %v700_v58 = vmul.f32 %v676_v50, %v1580_v42  ;;  %v605_v60 = vpop.f32.mrb[4].mxu1  ;;  %v739_v61 = vadd.f32 %v715_v51, %v1551_v25  ;;  %v721_v63 = vmul.f32 0.044715, %v697_v53  ;;  %v554_v1 = vpop.f32.mrb[5].mxu0 }
 0x10f   :  { %v741_v62 = vadd.f32 %v717_v52, %v1554_v26  ;;  %v723_v0 = vmul.f32 0.044715, %v699_v54  ;;  %v607_v2 = vpop.f32.mrb[5].mxu1  ;;  %v740_v3 = vadd.f32 %v716_v55, %v1557_v29  ;;  %v722_v5 = vmul.f32 0.044715, %v698_v57  ;;  %v556_v7 = vpop.f32.mrb[6].mxu0 }
 0x110   :  { %v742_v4 = vadd.f32 %v718_v56, %v1560_v30  ;;  %v724_v6 = vmul.f32 0.044715, %v700_v58  ;;  %v609_v8 = vpop.f32.mrb[6].mxu1  ;;  %v763_v9 = vmul.f32 0.7978846, %v739_v61  ;;  %v745_v11 = vadd.f32 %v721_v63, %v1567_v35  ;;  %v558_v14 = vpop.f32.mrb[7].mxu0 }
 0x111   :  { %v765_v10 = vmul.f32 0.7978846, %v741_v62  ;;  %v747_v12 = vadd.f32 %v723_v0, %v1570_v36  ;;  %v611_v15 = vpop.f32.mrb[7].mxu1  ;;  %v764_v17 = vmul.f32 0.7978846, %v740_v3  ;;  %v746_v23 = vadd.f32 %v722_v5, %v1577_v41 }
 0x112   :  { %v766_v18 = vmul.f32 0.7978846, %v742_v4  ;;  %v748_v24 = vadd.f32 %v724_v6, %v1580_v42  ;;  %1215 = vtanh.f32 %v763_v9  ;;  %v769_v27 = vmul.f32 0.7978846, %v745_v11 }
 0x113   :  { %v771_v28 = vmul.f32 0.7978846, %v747_v12  ;;  %v1607_v31 = vadd.f32 %v552_v59, %v1539_v19  ;;  %1217 = vtanh.f32 %v765_v10  ;;  %v770_v32 = vmul.f32 0.7978846, %v746_v23 }
 0x114   :  { %v772_v33 = vmul.f32 0.7978846, %v748_v24  ;;  %v1610_v34 = vadd.f32 %v605_v60, %v1542_v20  ;;  %1219 = vtanh.f32 %v764_v17  ;;  %v1615_v38 = vadd.f32 %v554_v1, %v1545_v21 }
 0x115   :  { %v679_v37 = vmul.f32 %v1607_v31, %v1607_v31  ;;  %v1618_v39 = vadd.f32 %v607_v2, %v1548_v22  ;;  %1221 = vtanh.f32 %v766_v18  ;;  %v1623_v43 = vadd.f32 %v556_v7, %v1539_v19 }
 0x116   :  { %v681_v40 = vmul.f32 %v1610_v34, %v1610_v34  ;;  %v1626_v44 = vadd.f32 %v609_v8, %v1542_v20  ;;  %1223 = vtanh.f32 %v769_v27  ;;  %v680_v46 = vmul.f32 %v1615_v38, %v1615_v38 }
 0x117   :  { %v703_v45 = vmul.f32 %v679_v37, %v1607_v31  ;;  %v682_v47 = vmul.f32 %v1618_v39, %v1618_v39  ;;  %1225 = vtanh.f32 %v771_v28  ;;  %v685_v49 = vmul.f32 %v1623_v43, %v1623_v43 }
 0x118   :  { %v705_v48 = vmul.f32 %v681_v40, %v1610_v34  ;;  %v687_v19 = vmul.f32 %v1626_v44, %v1626_v44  ;;  %1227 = vtanh.f32 %v770_v32  ;;  %v704_v50 = vmul.f32 %v680_v46, %v1615_v38 }
 0x119   :  { %v727_v20 = vmul.f32 0.044715, %v703_v45  ;;  %v706_v51 = vmul.f32 %v682_v47, %v1618_v39  ;;  %1229 = vtanh.f32 %v772_v33  ;;  %v709_v53 = vmul.f32 %v685_v49, %v1623_v43 }
 0x11a   :  { %v729_v52 = vmul.f32 0.044715, %v705_v48  ;;  %v711_v54 = vmul.f32 %v687_v19, %v1626_v44  ;;  %v728_v56 = vmul.f32 0.044715, %v704_v50  ;;  %v1644_v58 = vadd.f32 %v558_v14, %v1545_v21 }
 0x11b   :  { %v751_v55 = vadd.f32 %v727_v20, %v1607_v31  ;;  %v730_v57 = vmul.f32 0.044715, %v706_v51  ;;  %v733_v60 = vmul.f32 0.044715, %v709_v53  ;;  %v1648_v62 = vadd.f32 %v611_v15, %v1548_v22 }
 0x11c   :  { %v753_v59 = vadd.f32 %v729_v52, %v1610_v34  ;;  %v735_v61 = vmul.f32 0.044715, %v711_v54  ;;  %v1216_v63 = vpop.eup %1215  ;;  %v752_v1 = vadd.f32 %v728_v56, %v1615_v38  ;;  %v686_v3 = vmul.f32 %v1644_v58, %v1644_v58 }
 0x11d   :  { %v775_v0 = vmul.f32 0.7978846, %v751_v55  ;;  %v754_v2 = vadd.f32 %v730_v57, %v1618_v39  ;;  %v1218_v4 = vpop.eup %1217  ;;  %v811_v5 = vadd.f32 1.0, %v1216_v63  ;;  %v757_v6 = vadd.f32 %v733_v60, %v1623_v43 }
 0x11e   :  { %v777_v21 = vmul.f32 0.7978846, %v753_v59  ;;  %v759_v7 = vadd.f32 %v735_v61, %v1626_v44  ;;  %v1220_v8 = vpop.eup %1219  ;;  %v813_v9 = vadd.f32 1.0, %v1218_v4  ;;  %v776_v22 = vmul.f32 0.7978846, %v752_v1 }
 0x11f   :  { %1231 = vtanh.f32 %v775_v0  ;;  %v778_v10 = vmul.f32 0.7978846, %v754_v2  ;;  %v1222_v11 = vpop.eup %1221  ;;  %v835_v12 = vmul.f32 0.5, %v811_v5  ;;  %v812_v14 = vadd.f32 1.0, %v1220_v8 }
 0x120   :  { %1233 = vtanh.f32 %v777_v21  ;;  %v781_v15 = vmul.f32 0.7978846, %v757_v6  ;;  %v1224_v17 = vpop.eup %1223  ;;  %v837_v18 = vmul.f32 0.5, %v813_v9  ;;  %v814_v23 = vadd.f32 1.0, %v1222_v11 }
 0x121   :  { %1235 = vtanh.f32 %v776_v22  ;;  %v783_v24 = vmul.f32 0.7978846, %v759_v7  ;;  %v1226_v27 = vpop.eup %1225  ;;  %v859_v28 = vmul.f32 %v835_v12, %v1551_v25  ;;  %v836_v32 = vmul.f32 0.5, %v812_v14 }
 0x122   :  { %v817_v33 = vadd.f32 1.0, %v1224_v17  ;;  %1237 = vtanh.f32 %v778_v10  ;;  %v1228_v37 = vpop.eup %1227  ;;  %v861_v40 = vmul.f32 %v837_v18, %v1554_v26  ;;  %v838_v45 = vmul.f32 0.5, %v814_v23 }
 0x123   :  { %v819_v46 = vadd.f32 1.0, %v1226_v27  ;;  %1239 = vtanh.f32 %v781_v15  ;;  %v1230_v47 = vpop.eup %1229  ;;  %v860_v48 = vmul.f32 %v836_v32, %v1557_v29  ;;  %v818_v19 = vadd.f32 1.0, %v1228_v37 }
 0x124   :  { %v841_v49 = vmul.f32 0.5, %v817_v33  ;;  %1241 = vtanh.f32 %v783_v24  ;;  %v862_v20 = vmul.f32 %v838_v45, %v1560_v30  ;;  %v820_v51 = vadd.f32 1.0, %v1230_v47 }
 0x125   :  { %v843_v50 = vmul.f32 0.5, %v819_v46  ;;  %v710_v25 = vmul.f32 %v686_v3, %v1644_v58  ;;  %v1065_v52 = vpack.c.bf16 %v860_v48, %v859_v28  ;;  %v842_v54 = vmul.f32 0.5, %v818_v19 }
 0x126   :  { %v865_v53 = vmul.f32 %v841_v49, %v1567_v35  ;;  %v688_v26 = vmul.f32 %v1648_v62, %v1648_v62  ;;  %v1066_v55 = vpack.c.bf16 %v862_v20, %v861_v40  ;;  %v844_v29 = vmul.f32 0.5, %v820_v51 }
 0x127   :  { %v867_v56 = vmul.f32 %v843_v50, %v1570_v36  ;;  %v734_v57 = vmul.f32 0.044715, %v710_v25  ;;  %955 = vst [vmem:[%s1776_s3] sm:$0xff] %v1065_v52  ;;  %v866_v30 = vmul.f32 %v842_v54, %v1577_v41  ;;  %v111_v18 = vsub.s32 4, %v1527_v13 }
 0x128   :  { %v712_v59 = vmul.f32 %v688_v26, %v1648_v62  ;;  %956 = vst [vmem:[%s1776_s3 + $0x8] sm:$0xff] %v1066_v55  ;;  %v868_v35 = vmul.f32 %v844_v29, %v1580_v42  ;;  %v115_v27 = vsub.s32 5, %v1527_v13 }
 0x129   :  { %v1232_v60 = vpop.eup %1231  ;;  %v758_v61 = vadd.f32 %v734_v57, %v1644_v58  ;;  %v1068_v63 = vpack.c.bf16 %v866_v30, %v865_v53 }
 0x12a   :  { %v1234_v36 = vpop.eup %1233  ;;  %v823_v0 = vadd.f32 1.0, %v1232_v60  ;;  %v736_v1 = vmul.f32 0.044715, %v712_v59  ;;  %v1069_v3 = vpack.c.bf16 %v868_v35, %v867_v56  ;;  %v1693_v40 = vrot.slane %v1534_v16, %v115_v27 }
 0x12b   :  { %v1236_v2 = vpop.eup %1235  ;;  %v825_v4 = vadd.f32 1.0, %v1234_v36  ;;  %v782_v5 = vmul.f32 0.7978846, %v758_v61  ;;  %958 = vst [vmem:[%s1776_s3 + $0x18] sm:$0xff] %v1068_v63 }
 0x12c   :  { %v1238_v41 = vpop.eup %1237  ;;  %v847_v21 = vmul.f32 0.5, %v823_v0  ;;  %v824_v6 = vadd.f32 1.0, %v1236_v2  ;;  %v760_v7 = vadd.f32 %v736_v1, %v1648_v62  ;;  %959 = vst [vmem:[%s1776_s3 + $0x20] sm:$0xff] %v1069_v3 }
 0x12d   :  { %v1240_v42 = vpop.eup %1239  ;;  %v849_v8 = vmul.f32 0.5, %v825_v4  ;;  %v826_v9 = vadd.f32 1.0, %v1238_v41  ;;  %1243 = vtanh.f32 %v782_v5 }
 0x12e   :  { %v1242_v22 = vpop.eup %1241  ;;  %v871_v10 = vmul.f32 %v847_v21, %v1607_v31  ;;  %v848_v11 = vmul.f32 0.5, %v824_v6  ;;  %v784_v12 = vmul.f32 0.7978846, %v760_v7  ;;  %v829_v17 = vadd.f32 1.0, %v1240_v42 }
 0x12f   :  { %v873_v14 = vmul.f32 %v849_v8, %v1610_v34  ;;  %v850_v15 = vmul.f32 0.5, %v826_v9  ;;  %v831_v24 = vadd.f32 1.0, %v1242_v22  ;;  %v112_v31 = vrot.slane %v1534_v16, %v111_v18 }
 0x130   :  { %v872_v23 = vmul.f32 %v848_v11, %v1615_v38  ;;  %1245 = vtanh.f32 %v784_v12  ;;  %v853_v37 = vmul.f32 0.5, %v829_v17 }
 0x131   :  { %v874_v28 = vmul.f32 %v850_v15, %v1618_v39  ;;  %v855_v34 = vmul.f32 0.5, %v831_v24 }
 0x132   :  { %v1071_v32 = vpack.c.bf16 %v872_v23, %v871_v10  ;;  %v877_v45 = vmul.f32 %v853_v37, %v1623_v43 }
 0x133   :  { %v1072_v33 = vpack.c.bf16 %v874_v28, %v873_v14  ;;  %v879_v19 = vmul.f32 %v855_v34, %v1626_v44 }
 0x134   :  { %961 = vst [vmem:[%s1776_s3 + $0x30] sm:$0xff] %v1071_v32 }
 0x135   :  { %962 = vst [vmem:[%s1776_s3 + $0x38] sm:$0xff] %v1072_v33  ;;  %v648_v13 = vpop.f32.mrb[8].mxu0 }
 0x136   :  { %v658_v38 = vpop.f32.mrb[8].mxu1  ;;  %v1699_v46 = vadd.f32 %v648_v13, %v112_v31  ;;  %v650_v48 = vpop.f32.mrb[9].mxu0 }
 0x137   :  { %v1244_v39 = vpop.eup %1243  ;;  %v1701_v47 = vadd.f32 %v658_v38, %v112_v31  ;;  %v660_v49 = vpop.f32.mrb[9].mxu1  ;;  %v1705_v16 = vadd.f32 %v650_v48, %v1693_v40 }
 0x138   :  { %v830_v20 = vadd.f32 1.0, %v1244_v39  ;;  %v1708_v50 = vadd.f32 %v660_v49, %v1693_v40  ;;  %v652_v51 = vpop.f32.mrb[10].mxu0  ;;  %v662_v25 = vpop.f32.mrb[10].mxu1  ;;  %v671_v43 = vmul.f32 %v1699_v46, %v1699_v46 }
 0x139   :  { %v683_v52 = vmul.f32 %v1701_v47, %v1701_v47  ;;  %v1714_v53 = vadd.f32 %v652_v51, %v112_v31  ;;  %v1716_v54 = vadd.f32 %v662_v25, %v112_v31  ;;  %v654_v44 = vpop.f32.mrb[11].mxu0  ;;  %v664_v26 = vpop.f32.mrb[11].mxu1  ;;  %v672_v29 = vmul.f32 %v1705_v16, %v1705_v16 }
 0x13a   :  { %v1246_v55 = vpop.eup %1245  ;;  %v854_v56 = vmul.f32 0.5, %v830_v20  ;;  %v684_v57 = vmul.f32 %v1708_v50, %v1708_v50  ;;  %v1723_v30 = vadd.f32 %v654_v44, %v1693_v40  ;;  %v695_v60 = vmul.f32 %v671_v43, %v1699_v46 }
 0x13b   :  { %v832_v59 = vadd.f32 1.0, %v1246_v55  ;;  %v707_v35 = vmul.f32 %v683_v52, %v1701_v47  ;;  %v677_v61 = vmul.f32 %v1714_v53, %v1714_v53  ;;  %v696_v63 = vmul.f32 %v672_v29, %v1705_v16 }
 0x13c   :  { %v878_v36 = vmul.f32 %v854_v56, %v1644_v58  ;;  %v708_v0 = vmul.f32 %v684_v57, %v1708_v50  ;;  %v689_v1 = vmul.f32 %v1716_v54, %v1716_v54  ;;  %v719_v3 = vmul.f32 0.044715, %v695_v60 }
 0x13d   :  { %v856_v2 = vmul.f32 0.5, %v832_v59  ;;  %v731_v4 = vmul.f32 0.044715, %v707_v35  ;;  %v701_v5 = vmul.f32 %v677_v61, %v1714_v53  ;;  %v720_v21 = vmul.f32 0.044715, %v696_v63 }
 0x13e   :  { %v1074_v41 = vpack.c.bf16 %v878_v36, %v877_v45  ;;  %v732_v6 = vmul.f32 0.044715, %v708_v0  ;;  %v713_v7 = vmul.f32 %v689_v1, %v1716_v54  ;;  %v743_v58 = vadd.f32 %v719_v3, %v1699_v46 }
 0x13f   :  { %v880_v42 = vmul.f32 %v856_v2, %v1648_v62  ;;  %v755_v8 = vadd.f32 %v731_v4, %v1701_v47  ;;  %v725_v9 = vmul.f32 0.044715, %v701_v5  ;;  %v744_v22 = vadd.f32 %v720_v21, %v1705_v16 }
 0x140   :  { %964 = vst [vmem:[%s1776_s3 + $0x48] sm:$0xff] %v1074_v41  ;;  %v756_v10 = vadd.f32 %v732_v6, %v1708_v50  ;;  %v737_v11 = vmul.f32 0.044715, %v713_v7  ;;  %v678_v12 = vmul.f32 %v1723_v30, %v1723_v30  ;;  %v767_v15 = vmul.f32 0.7978846, %v743_v58 }
 0x141   :  { %v1075_v14 = vpack.c.bf16 %v880_v42, %v879_v19  ;;  %v779_v62 = vmul.f32 0.7978846, %v755_v8  ;;  %v749_v17 = vadd.f32 %v725_v9, %v1714_v53  ;;  %v768_v18 = vmul.f32 0.7978846, %v744_v22 }
 0x142   :  { %v780_v23 = vmul.f32 0.7978846, %v756_v10  ;;  %v761_v24 = vadd.f32 %v737_v11, %v1716_v54  ;;  %v702_v27 = vmul.f32 %v678_v12, %v1723_v30  ;;  %1247 = vtanh.f32 %v767_v15 }
 0x143   :  { %965 = vst [vmem:[%s1776_s3 + $0x50] sm:$0xff] %v1075_v14  ;;  %v773_v28 = vmul.f32 0.7978846, %v749_v17  ;;  %v665_v32 = vadd.f32 %v664_v26, %v1693_v40  ;;  %1249 = vtanh.f32 %v779_v62 }
 0x144   :  { %v785_v33 = vmul.f32 0.7978846, %v761_v24  ;;  %v726_v37 = vmul.f32 0.044715, %v702_v27  ;;  %1251 = vtanh.f32 %v768_v18 }
 0x145   :  { %v690_v31 = vmul.f32 %v665_v32, %v665_v32  ;;  %1253 = vtanh.f32 %v780_v23 }
 0x146   :  { %v750_v34 = vadd.f32 %v726_v37, %v1723_v30  ;;  %1255 = vtanh.f32 %v773_v28 }
 0x147   :  { %v714_v13 = vmul.f32 %v690_v31, %v665_v32  ;;  %1257 = vtanh.f32 %v785_v33 }
 0x148   :  { %v774_v38 = vmul.f32 0.7978846, %v750_v34 }
 0x149   :  { %v738_v39 = vmul.f32 0.044715, %v714_v13 }
 0x14a   :  { %1259 = vtanh.f32 %v774_v38 }
 0x14b   :  { %v762_v45 = vadd.f32 %v738_v39, %v665_v32 }
 0x14c   :  { %v1248_v48 = vpop.eup %1247 }
 0x14d   :  { %v786_v49 = vmul.f32 0.7978846, %v762_v45  ;;  %v1250_v19 = vpop.eup %1249  ;;  %v815_v20 = vadd.f32 1.0, %v1248_v48 }
 0x14e   :  { %v1252_v40 = vpop.eup %1251  ;;  %v827_v51 = vadd.f32 1.0, %v1250_v19 }
 0x14f   :  { %1261 = vtanh.f32 %v786_v49  ;;  %v1254_v25 = vpop.eup %1253  ;;  %v839_v43 = vmul.f32 0.5, %v815_v20  ;;  %v816_v52 = vadd.f32 1.0, %v1252_v40 }
 0x150   :  { %v1256_v44 = vpop.eup %1255  ;;  %v851_v26 = vmul.f32 0.5, %v827_v51  ;;  %v828_v55 = vadd.f32 1.0, %v1254_v25 }
 0x151   :  { %v1258_v56 = vpop.eup %1257  ;;  %v863_v29 = vmul.f32 %v839_v43, %v1699_v46  ;;  %v840_v57 = vmul.f32 0.5, %v816_v52  ;;  %v821_v59 = vadd.f32 1.0, %v1256_v44 }
 0x152   :  { %v875_v60 = vmul.f32 %v851_v26, %v1701_v47  ;;  %v852_v35 = vmul.f32 0.5, %v828_v55  ;;  %v833_v0 = vadd.f32 1.0, %v1258_v56 }
 0x153   :  { %v864_v36 = vmul.f32 %v840_v57, %v1705_v16  ;;  %v845_v63 = vmul.f32 0.5, %v821_v59 }
 0x154   :  { %v1260_v61 = vpop.eup %1259  ;;  %v876_v1 = vmul.f32 %v852_v35, %v1708_v50  ;;  %v857_v46 = vmul.f32 0.5, %v833_v0 }
 0x155   :  { %v822_v2 = vadd.f32 1.0, %v1260_v61  ;;  %v1067_v3 = vpack.c.bf16 %v864_v36, %v863_v29  ;;  %v869_v5 = vmul.f32 %v845_v63, %v1714_v53 }
 0x156   :  { %v1073_v4 = vpack.c.bf16 %v876_v1, %v875_v60  ;;  %v881_v6 = vmul.f32 %v857_v46, %v1716_v54 }
 0x157   :  { %v846_v41 = vmul.f32 0.5, %v822_v2  ;;  %957 = vst [vmem:[%s1776_s3 + $0x10] sm:$0xff] %v1067_v3 }
 0x158   :  { %963 = vst [vmem:[%s1776_s3 + $0x40] sm:$0xff] %v1073_v4 }
 0x159   :  { %v1262_v47 = vpop.eup %1261  ;;  %v870_v16 = vmul.f32 %v846_v41, %v1723_v30 }
 0x15a   :  { %v834_v21 = vadd.f32 1.0, %v1262_v47 }
 0x15b   :  { %v1070_v50 = vpack.c.bf16 %v870_v16, %v869_v5 }
 0x15c   :  { %v858_v7 = vmul.f32 0.5, %v834_v21 }
 0x15d   :  { %960 = vst [vmem:[%s1776_s3 + $0x28] sm:$0xff] %v1070_v50 }
 0x15e   :  { %v882_v53 = vmul.f32 %v858_v7, %v665_v32 }
 0x160   :  { %v1076_v42 = vpack.c.bf16 %v882_v53, %v881_v6 }
 0x162   :  { %966 = vst [vmem:[%s1776_s3 + $0x58] sm:$0xff] %v1076_v42 }

// kernel: cog_replknet_forward.8
= control target key start
LH: loop header
LB: loop body
LE: loop exit
PB: predicated region body
PF: predicated region fallthrough
CT: control target
= control target key end

     0   :  { %s3556_s24 = smov 0   ;;  %s4785_s0 = inlined_call_operand.vmem [shape: f32[2,10,10,192], index: 0, kind: input, shape index: {}]   ;;  %s4786_s1 = inlined_call_operand.vmem [shape: f32[49,192], index: 1, kind: input, shape index: {}]   ;;  %s4787_s2 = inlined_call_operand.vmem [shape: f32[1,192], index: 2, kind: input, shape index: {}]   ;;  %s4788_s3 = inlined_call_operand.vmem [shape: bf16[192,48], index: 3, kind: input, shape index: {}]   ;;  %s4789_s4 = inlined_call_operand.vmem [shape: f32[1,48], index: 4, kind: input, shape index: {}]   ;;  %s4790_s5 = inlined_call_operand.vmem [shape: bf16[48,192], index: 5, kind: input, shape index: {}]   ;;  %s4791_s6 = inlined_call_operand.vmem [shape: f32[1,192], index: 6, kind: input, shape index: {}]   ;;  %s4792_s7 = inlined_call_operand.vmem [shape: f32[2,4,4,192], index: 7, kind: output, shape index: {}]  }
   0x1 LB: > { %s3421_s25 = sadd.s32 4294967295, %s3513_s24   ;;  %p3425_p0 = scmp.ge.s32.totalorder %s3513_s24, 1  ;;  %s3513_s24 = sphi %s3556_s24, %s17_s24  }
   0x2   : > { %p237_p1 = scmp.lt.s32.totalorder %s3513_s24, 3 }
   0x4   : > { %p238_p2 = pnand %p3425_p0, %p237_p1 }
   0x5   : > { %v3470_v0 = vld [vmem:[%s4788_s3] sm:$0xff] (!%p238_p2)   ;;  %v3515_v1 = vmov (!%p238_p2), 0   ;;  %v3471_v2 = vld [vmem:[%s4788_s3 + $0x8] sm:$0xff] (!%p238_p2)   ;;  %p269_p3 = scmp.lt.s32.totalorder (!%p238_p2), %s3421_s25, 1  ;;  %v3472_v3 = vld [vmem:[%s4788_s3 + $0x10] sm:$0xff] (!%p238_p2)   ;;  %v334_v4 = vlaneseq (!%p238_p2)  ;;  %vm590_vm0 = vcmask (!%p238_p2), 1042432  }
   0x6   : > { %241 = sbr.rel (%p238_p2) target bundleno = 911 (0x38f), region = 48  ;;  %3126 = vmatprep.subr.bf16.mxu0 (!%p238_p2), %v3515_v1  ;;  %3252 = vmatprep.mubr.bf16.mxu1 (!%p238_p2), %v3515_v1  ;;  %v3473_v5 = vld [vmem:[%s4788_s3 + $0x18] sm:$0xff] (!%p238_p2)   ;;  %v3474_v7 = vld [vmem:[%s4788_s3 + $0x20] sm:$0xff] (!%p238_p2)   ;;  %v3475_v16 = vld [vmem:[%s4788_s3 + $0x28] sm:$0xff] (!%p238_p2)   ;;  %vm671_vm1 = vcmask (!%p238_p2), 1041408   ;;  %vm2996_vm2 = vcmask (!%p238_p2), 519168  }
   0x7   : > { %3127 = vmatpush1.bf16.msra.mxu0 (!%p238_p2), %v3470_v0  ;;  %v335_v6 = vshrl.u32 (!%p238_p2), %v334_v4, 7  ;;  %v321_v18 = vld [vmem:[%s4786_s1 + $0x8] sm:$0xff] (!%p238_p2)  ;;  %v3476_v34 = vld [vmem:[%s4788_s3 + $0x30] sm:$0xff] (!%p238_p2)   ;;  %v3477_v51 = vld [vmem:[%s4788_s3 + $0x38] sm:$0xff] (!%p238_p2)   ;;  %vm3122_vm3 = vcmask (!%p238_p2), 523264   ;;  %vm2988_vm4 = vcmask (!%p238_p2), 1043456  }
   0x8   : > { %3128 = vmatprep.subr.bf16.mxu0 (!%p238_p2), %v3515_v1  ;;  %vm3216_vm5 = vcmask (!%p238_p2), 392192   ;;  %vm3337_vm6 = vcmask (!%p238_p2), 1040384   ;;  %vm3338_vm7 = vcmask (!%p238_p2), 1044484   ;;  %vm3360_vm8 = vcmask (!%p238_p2), 523268  }
   0x9   : > { %v3593_v8 = vsub.s32 (!%p238_p2), 0, %v335_v6  ;;  %v3595_v9 = vsub.s32 (!%p238_p2), 1, %v335_v6  ;;  %v3597_v10 = vsub.s32 (!%p238_p2), 2, %v335_v6  ;;  %v3599_v11 = vsub.s32 (!%p238_p2), 3, %v335_v6  ;;  %vm4754_vm9 = vmor (!%p238_p2), %vm3337_vm6, %vm3338_vm7 }
   0xa   : > { %v3601_v12 = vsub.s32 (!%p238_p2), 4, %v335_v6  ;;  %v3603_v13 = vsub.s32 (!%p238_p2), 5, %v335_v6  ;;  %v3605_v14 = vsub.s32 (!%p238_p2), 6, %v335_v6  ;;  %v3607_v15 = vsub.s32 (!%p238_p2), 7, %v335_v6  ;;  %vm4759_vm10 = vmor (!%p238_p2), %vm3360_vm8, %vm2988_vm4 }
   0xb   : > { %3129 = vmatpush1.bf16.msra.mxu0 (!%p238_p2), %v3471_v2  ;;  %v341_v22 = vrot.slane (!%p238_p2), %v321_v18, %v3593_v8  ;;  %v365_v23 = vrot.slane (!%p238_p2), %v321_v18, %v3595_v9  ;;  %v413_v24 = vrot.slane (!%p238_p2), %v321_v18, %v3597_v10  ;;  %v461_v25 = vrot.slane (!%p238_p2), %v321_v18, %v3599_v11 }
   0xc   : > { %3130 = vmatprep.subr.bf16.mxu0 (!%p238_p2), %v3515_v1  ;;  %v509_v26 = vrot.slane (!%p238_p2), %v321_v18, %v3601_v12  ;;  %v3634_v27 = vrot.slane (!%p238_p2), %v321_v18, %v3603_v13  ;;  %v3637_v28 = vrot.slane (!%p238_p2), %v321_v18, %v3605_v14  ;;  %v3640_v29 = vrot.slane (!%p238_p2), %v321_v18, %v3607_v15 }
   0xd   : > { %s4798_s25 = smov (!%p269_p3, %s3421_s25), 1 }
   0xe   : > { %s3460_s11 = smul.u32 320, %s4798_s25  ;;  %s3459_s17 = sshll.u32 %s4798_s25, 5 }
   0xf   : > { %3131 = vmatpush1.bf16.msra.mxu0 %v3472_v3  ;;  %s278_s18 = scalar_lea.vmem %s4792_s7, %s3459_s17 }
  0x10   : > { %3132 = vmatprep.subr.bf16.mxu0 %v3515_v1  ;;  %s3591_s16 = scalar_lea.vmem %s4785_s0, %s3460_s11 }
  0x11   : > { %v3613_v17 = vld [vmem:[%s3591_s16 + $0x8] sm:$0xff]  ;;  %v283_v6 = vld [vmem:[%s3591_s16 + $0x18] sm:$0x3] }
  0x12   : > { %v3620_v19 = vld [vmem:[%s3591_s16 + $0x28] sm:$0xff]  ;;  %v343_v30 = vmul.f32 %v341_v22, %v3613_v17  ;;  %v367_v35 = vmul.f32 %v365_v23, %v3613_v17  ;;  %v415_v39 = vmul.f32 %v413_v24, %v3613_v17  ;;  %v463_v56 = vmul.f32 %v461_v25, %v3613_v17 }
  0x13   : > { %3133 = vmatpush1.bf16.msra.mxu0 %v3473_v5  ;;  %v3623_v20 = vld [vmem:[%s3591_s16 + $0x48] sm:$0xff]  ;;  %v345_v31 = vmul.f32 %v341_v22, %v3620_v19  ;;  %v369_v36 = vmul.f32 %v365_v23, %v3620_v19  ;;  %v417_v40 = vmul.f32 %v413_v24, %v3620_v19  ;;  %v465_v57 = vmul.f32 %v461_v25, %v3620_v19  ;;  %v3478_v5 = vld [vmem:[%s4788_s3 + $0x40] sm:$0xff]  }
  0x14   : > { %3134 = vmatprep.subr.bf16.mxu0 %v3515_v1  ;;  %v3626_v21 = vld [vmem:[%s3591_s16 + $0x68] sm:$0xff]  ;;  %v347_v32 = vmul.f32 %v341_v22, %v3623_v20  ;;  %v371_v37 = vmul.f32 %v365_v23, %v3623_v20  ;;  %v419_v41 = vmul.f32 %v413_v24, %v3623_v20  ;;  %v383_v43 = vrot.slane %v367_v35, 1 }
  0x15   : > { %v349_v33 = vmul.f32 %v341_v22, %v3626_v21  ;;  %v373_v38 = vmul.f32 %v365_v23, %v3626_v21  ;;  %v421_v42 = vmul.f32 %v413_v24, %v3626_v21  ;;  %v385_v44 = vrot.slane %v369_v36, 1  ;;  %v3679_v24 = vld [vmem:[%s3591_s16 + $0x58] sm:$0x3] }
  0x16   : > { %v387_v45 = vrot.slane %v371_v37, 1  ;;  %v431_v47 = vrot.slane %v415_v39, 2  ;;  %v433_v48 = vrot.slane %v417_v40, 2  ;;  %v435_v49 = vrot.slane %v419_v41, 2  ;;  %v3479_v41 = vld [vmem:[%s4788_s3 + $0x48] sm:$0xff]  }
  0x17   : > { %3135 = vmatpush1.bf16.msra.mxu0 %v3474_v7  ;;  %v389_v46 = vrot.slane %v373_v38, 1  ;;  %v437_v50 = vrot.slane %v421_v42, 2  ;;  %v399_v52 = vadd.f32 %v383_v43, %v343_v30  ;;  %v401_v53 = vadd.f32 %v385_v44, %v345_v31  ;;  %v3671_v7 = vld [vmem:[%s3591_s16 + $0x38] sm:$0x3] }
  0x18   : > { %3136 = vmatprep.subr.bf16.mxu0 %v3515_v1  ;;  %v403_v54 = vadd.f32 %v387_v45, %v347_v32  ;;  %v467_v58 = vmul.f32 %v461_v25, %v3623_v20  ;;  %v469_v59 = vmul.f32 %v461_v25, %v3626_v21  ;;  %v479_v0 = vrot.slane %v463_v56, 3 }
  0x19   : > { %v405_v55 = vadd.f32 %v389_v46, %v349_v33  ;;  %v447_v60 = vadd.f32 %v431_v47, %v399_v52  ;;  %v449_v61 = vadd.f32 %v433_v48, %v401_v53  ;;  %v481_v2 = vrot.slane %v465_v57, 3  ;;  %v3682_v33 = vld [vmem:[%s3591_s16 + $0x78] sm:$0x3] }
  0x1a   : > { %v451_v62 = vadd.f32 %v435_v49, %v403_v54  ;;  %v483_v3 = vrot.slane %v467_v58, 3  ;;  %v485_v4 = vrot.slane %v469_v59, 3  ;;  %v513_v18 = vmul.f32 %v509_v26, %v3620_v19  ;;  %v3480_v58 = vld [vmem:[%s4788_s3 + $0x50] sm:$0xff]  }
  0x1b   : > { %3137 = vmatpush1.bf16.msra.mxu0 %v3475_v16  ;;  %v453_v63 = vadd.f32 %v437_v50, %v405_v55  ;;  %v511_v16 = vmul.f32 %v509_v26, %v3613_v17  ;;  %v515_v22 = vmul.f32 %v509_v26, %v3623_v20  ;;  %v517_v23 = vmul.f32 %v509_v26, %v3626_v21 }
  0x1c   : > { %3138 = vmatprep.subr.bf16.mxu0 %v3515_v1  ;;  %v495_v25 = vadd.f32 %v479_v0, %v447_v60  ;;  %v497_v30 = vadd.f32 %v481_v2, %v449_v61  ;;  %v499_v31 = vadd.f32 %v483_v3, %v451_v62  ;;  %v529_v35 = vrot.slane %v513_v18, 4 }
  0x1d   : > { %v501_v32 = vadd.f32 %v485_v4, %v453_v63  ;;  %v531_v36 = vrot.slane %v515_v22, 4  ;;  %v533_v37 = vrot.slane %v517_v23, 4  ;;  %v559_v38 = vmul.f32 %v3634_v27, %v3613_v17  ;;  %v3481_v23 = vld [vmem:[%s4788_s3 + $0x58] sm:$0xff]  }
  0x1e   : > { %v561_v39 = vmul.f32 %v3634_v27, %v283_v6  ;;  %v563_v26 = vmul.f32 %v3634_v27, %v3620_v19  ;;  %v565_v40 = vmul.f32 %v3634_v27, %v3671_v7  ;;  %v545_v43 = vadd.f32 %v529_v35, %v497_v30 }
  0x1f   : > { %3139 = vmatpush1.bf16.msra.mxu0 %v3476_v34  ;;  %v527_v34 = vrot.slane %v511_v16, 4  ;;  %v547_v44 = vadd.f32 %v531_v36, %v499_v31  ;;  %v549_v45 = vadd.f32 %v533_v37, %v501_v32  ;;  %v567_v46 = vmul.f32 %v3634_v27, %v3623_v20 }
  0x20   : > { %3140 = vmatprep.subr.bf16.mxu0 %v3515_v1  ;;  %v569_v47 = vmul.f32 %v3634_v27, %v3679_v24  ;;  %v571_v48 = vmul.f32 %v3634_v27, %v3626_v21  ;;  %v573_v49 = vmul.f32 %v3634_v27, %v3682_v33  ;;  %v594_v50 = vrot.slane %v559_v38, 5 }
  0x21   : > { %v543_v42 = vadd.f32 %v527_v34, %v495_v25  ;;  %v600_v52 = vrot.slane %v563_v26, 5  ;;  %v601_v53 = vrot.slane %v565_v40, 5  ;;  %v606_v54 = vrot.slane %v567_v46, 5  ;;  %v3731_v34 = vld [vmem:[%s3591_s16 + $0x88] sm:$0xff] }
  0x22   : > { %v607_v55 = vrot.slane %v569_v47, 5  ;;  %v612_v56 = vrot.slane %v571_v48, 5  ;;  %v613_v57 = vrot.slane %v573_v49, 5  ;;  %v640_v27 = vmul.f32 %v3637_v28, %v3613_v17 }
  0x23   : > { %3141 = vmatpush1.bf16.msra.mxu0 %v3477_v51  ;;  %v595_v51 = vrot.slane %v561_v39, 5  ;;  %v602_v60 = vsel %vm590_vm0, %v600_v52, %v601_v53  ;;  %v642_v61 = vmul.f32 %v3637_v28, %v283_v6  ;;  %v646_v16 = vmul.f32 %v3637_v28, %v3671_v7 }
  0x24   : > { %3142 = vmatprep.subr.bf16.mxu0 %v3515_v1  ;;  %v608_v62 = vsel %vm590_vm0, %v606_v54, %v607_v55  ;;  %v614_v63 = vsel %vm590_vm0, %v612_v56, %v613_v57  ;;  %v626_v2 = vadd.f32 %v602_v60, %v545_v43  ;;  %v648_v17 = vmul.f32 %v3637_v28, %v3623_v20 }
  0x25   : > { %v596_v59 = vsel %vm590_vm0, %v594_v50, %v595_v51  ;;  %v628_v3 = vadd.f32 %v608_v62, %v547_v44  ;;  %v630_v4 = vadd.f32 %v614_v63, %v549_v45  ;;  %v650_v6 = vmul.f32 %v3637_v28, %v3679_v24 }
  0x26   : > { %v624_v0 = vadd.f32 %v596_v59, %v543_v42  ;;  %v652_v18 = vmul.f32 %v3637_v28, %v3626_v21  ;;  %v654_v22 = vmul.f32 %v3637_v28, %v3682_v33  ;;  %v675_v25 = vrot.slane %v640_v27, 6 }
  0x27   : > { %3143 = vmatpush1.bf16.msra.mxu0 %v3478_v5  ;;  %v644_v5 = vmul.f32 %v3637_v28, %v3620_v19  ;;  %v676_v30 = vrot.slane %v642_v61, 6  ;;  %v682_v32 = vrot.slane %v646_v16, 6  ;;  %v687_v35 = vrot.slane %v648_v17, 6  ;;  %v3736_v28 = vld [vmem:[%s4786_s1 + $0x18] sm:$0xff] }
  0x28   : > { %3144 = vmatprep.subr.bf16.mxu0 %v3515_v1  ;;  %v688_v36 = vrot.slane %v650_v6, 6  ;;  %v693_v37 = vrot.slane %v652_v18, 6  ;;  %v694_v38 = vrot.slane %v654_v22, 6  ;;  %v721_v40 = vmul.f32 %v3640_v29, %v3620_v19 }
  0x29   : > { %v681_v31 = vrot.slane %v644_v5, 6  ;;  %v677_v39 = vsel %vm671_vm1, %v675_v25, %v676_v30  ;;  %v725_v47 = vmul.f32 %v3640_v29, %v3626_v21  ;;  %v727_v48 = vmul.f32 %v3640_v29, %v3731_v34 }
  0x2a   : > { %v695_v42 = vsel %vm671_vm1, %v693_v37, %v694_v38  ;;  %v705_v43 = vadd.f32 %v677_v39, %v624_v0  ;;  %v743_v51 = vrot.slane %v3736_v28, %v3593_v8  ;;  %v791_v52 = vrot.slane %v3736_v28, %v3595_v9 }
  0x2b   : > { %3145 = vmatpush1.bf16.msra.mxu0 %v3479_v41  ;;  %v683_v26 = vsel %vm671_vm1, %v681_v31, %v682_v32  ;;  %v689_v41 = vsel %vm671_vm1, %v687_v35, %v688_v36  ;;  %v711_v46 = vadd.f32 %v695_v42, %v630_v4  ;;  %v839_v55 = vrot.slane %v3736_v28, %v3597_v10 }
  0x2c   : > { %3146 = vmatprep.subr.bf16.mxu0 %v3515_v1  ;;  %v707_v44 = vadd.f32 %v683_v26, %v626_v2  ;;  %v709_v45 = vadd.f32 %v689_v41, %v628_v3  ;;  %v729_v49 = vadd.f32 %v721_v40, %v705_v43  ;;  %v887_v56 = vrot.slane %v3736_v28, %v3599_v11 }
  0x2d   : > { %v735_v54 = vadd.f32 %v727_v48, %v711_v46  ;;  %v745_v57 = vmul.f32 %v743_v51, %v3620_v19  ;;  %v751_v59 = vmul.f32 %v743_v51, %v3731_v34  ;;  %v793_v60 = vmul.f32 %v791_v52, %v3620_v19 }
  0x2e   : > { %v733_v53 = vadd.f32 %v725_v47, %v709_v45  ;;  %v795_v27 = vmul.f32 %v791_v52, %v3623_v20  ;;  %v797_v61 = vmul.f32 %v791_v52, %v3626_v21  ;;  %v799_v62 = vmul.f32 %v791_v52, %v3731_v34 }
  0x2f   : > { %3147 = vmatpush1.bf16.msra.mxu0 %v3480_v58  ;;  %v749_v58 = vmul.f32 %v743_v51, %v3626_v21  ;;  %v761_v63 = vrot.slane %v745_v57, 1  ;;  %v767_v3 = vrot.slane %v751_v59, 1  ;;  %v809_v4 = vrot.slane %v793_v60, 2 }
  0x30   : > { %3148 = vmatprep.subr.bf16.mxu0 %v3515_v1  ;;  %v723_v1 = vmul.f32 %v3640_v29, %v3623_v20  ;;  %v747_v29 = vmul.f32 %v743_v51, %v3623_v20  ;;  %v811_v5 = vrot.slane %v795_v27, 2  ;;  %v813_v16 = vrot.slane %v797_v61, 2 }
  0x31   : > { %v765_v2 = vrot.slane %v749_v58, 1  ;;  %v815_v17 = vrot.slane %v799_v62, 2  ;;  %v777_v6 = vadd.f32 %v761_v63, %v729_v49  ;;  %v841_v25 = vmul.f32 %v839_v55, %v3620_v19 }
  0x32   : > { %v731_v50 = vadd.f32 %v723_v1, %v707_v44  ;;  %v763_v0 = vrot.slane %v747_v29, 1  ;;  %v843_v30 = vmul.f32 %v839_v55, %v3623_v20  ;;  %v845_v31 = vmul.f32 %v839_v55, %v3626_v21 }
  0x33   : > { %3149 = vmatpush1.bf16.msra.mxu0 %v3481_v23  ;;  %v781_v22 = vadd.f32 %v765_v2, %v733_v53  ;;  %v783_v23 = vadd.f32 %v767_v3, %v735_v54  ;;  %v847_v32 = vmul.f32 %v839_v55, %v3731_v34  ;;  %v825_v35 = vadd.f32 %v809_v4, %v777_v6  ;;  %v3775_v53 = vld [vmem:[%s3591_s16 + $0x98] sm:$0x3] }
  0x34   : > { %v779_v18 = vadd.f32 %v763_v0, %v731_v50  ;;  %v857_v39 = vrot.slane %v841_v25, 3  ;;  %v859_v26 = vrot.slane %v843_v30, 3  ;;  %v861_v40 = vrot.slane %v845_v31, 3 }
  0x35   : > { %v829_v37 = vadd.f32 %v813_v16, %v781_v22  ;;  %v831_v38 = vadd.f32 %v815_v17, %v783_v23  ;;  %v863_v1 = vrot.slane %v847_v32, 3  ;;  %v889_v41 = vmul.f32 %v887_v56, %v3620_v19 }
  0x36   : > { %v827_v36 = vadd.f32 %v811_v5, %v779_v18  ;;  %v891_v42 = vmul.f32 %v887_v56, %v3623_v20  ;;  %v893_v43 = vmul.f32 %v887_v56, %v3626_v21  ;;  %v895_v44 = vmul.f32 %v887_v56, %v3731_v34 }
  0x37   : > { %v873_v45 = vadd.f32 %v857_v39, %v825_v35  ;;  %v877_v47 = vadd.f32 %v861_v40, %v829_v37  ;;  %v879_v48 = vadd.f32 %v863_v1, %v831_v38  ;;  %v905_v49 = vrot.slane %v889_v41, 4 }
  0x38   : > { %v875_v46 = vadd.f32 %v859_v26, %v827_v36  ;;  %v907_v50 = vrot.slane %v891_v42, 4  ;;  %v909_v51 = vrot.slane %v893_v43, 4  ;;  %v911_v52 = vrot.slane %v895_v44, 4 }
  0x39   : > { %v935_v54 = vrot.slane %v3736_v28, %v3601_v12  ;;  %v1015_v55 = vrot.slane %v3736_v28, %v3603_v13  ;;  %v1095_v57 = vrot.slane %v3736_v28, %v3605_v14  ;;  %v3785_v56 = vrot.slane %v3736_v28, %v3607_v15 }
  0x3a   : > { %v921_v29 = vadd.f32 %v905_v49, %v873_v45  ;;  %v923_v58 = vadd.f32 %v907_v50, %v875_v46  ;;  %v925_v59 = vadd.f32 %v909_v51, %v877_v47  ;;  %v927_v60 = vadd.f32 %v911_v52, %v879_v48  ;;  %v3808_v47 = vld [vmem:[%s3591_s16 + $0xa8] sm:$0xff] }
  0x3b   : > { %v937_v27 = vmul.f32 %v935_v54, %v3620_v19  ;;  %v939_v61 = vmul.f32 %v935_v54, %v3671_v7  ;;  %v941_v62 = vmul.f32 %v935_v54, %v3623_v20  ;;  %v943_v63 = vmul.f32 %v935_v54, %v3679_v24 }
  0x3c   : > { %v945_v0 = vmul.f32 %v935_v54, %v3626_v21  ;;  %v947_v2 = vmul.f32 %v935_v54, %v3682_v33  ;;  %v949_v3 = vmul.f32 %v935_v54, %v3731_v34  ;;  %v951_v28 = vmul.f32 %v935_v54, %v3775_v53 }
  0x3d   : > { %v971_v4 = vrot.slane %v937_v27, 5  ;;  %v972_v5 = vrot.slane %v939_v61, 5  ;;  %v977_v16 = vrot.slane %v941_v62, 5  ;;  %v978_v17 = vrot.slane %v943_v63, 5  ;;  %v3819_v61 = vld [vmem:[%s4786_s1 + $0x28] sm:$0xff] }
  0x3e   : > { %v983_v6 = vrot.slane %v945_v0, 5  ;;  %v984_v18 = vrot.slane %v947_v2, 5  ;;  %v989_v22 = vrot.slane %v949_v3, 5  ;;  %v990_v23 = vrot.slane %v951_v28, 5 }
  0x3f   : > { %v973_v25 = vsel %vm590_vm0, %v971_v4, %v972_v5  ;;  %v979_v30 = vsel %vm590_vm0, %v977_v16, %v978_v17  ;;  %v1017_v31 = vmul.f32 %v1015_v55, %v3620_v19  ;;  %v1019_v32 = vmul.f32 %v1015_v55, %v3671_v7 }
  0x40   : > { %v985_v35 = vsel %vm590_vm0, %v983_v6, %v984_v18  ;;  %v991_v36 = vsel %vm590_vm0, %v989_v22, %v990_v23  ;;  %v1001_v37 = vadd.f32 %v973_v25, %v921_v29  ;;  %v1003_v38 = vadd.f32 %v979_v30, %v923_v58 }
  0x41   : > { %v1005_v39 = vadd.f32 %v985_v35, %v925_v59  ;;  %v1007_v26 = vadd.f32 %v991_v36, %v927_v60  ;;  %v1021_v40 = vmul.f32 %v1015_v55, %v3623_v20  ;;  %v1023_v1 = vmul.f32 %v1015_v55, %v3679_v24 }
  0x42   : > { %v1025_v41 = vmul.f32 %v1015_v55, %v3626_v21  ;;  %v1027_v42 = vmul.f32 %v1015_v55, %v3682_v33  ;;  %v1029_v19 = vmul.f32 %v1015_v55, %v3731_v34  ;;  %v1031_v7 = vmul.f32 %v1015_v55, %v3775_v53 }
  0x43   : > { %v1051_v43 = vrot.slane %v1017_v31, 6  ;;  %v1052_v44 = vrot.slane %v1019_v32, 6  ;;  %v1057_v45 = vrot.slane %v1021_v40, 6  ;;  %v1058_v46 = vrot.slane %v1023_v1, 6 }
  0x44   : > { %v1063_v48 = vrot.slane %v1025_v41, 6  ;;  %v1064_v49 = vrot.slane %v1027_v42, 6  ;;  %v1069_v50 = vrot.slane %v1029_v19, 6  ;;  %v1070_v51 = vrot.slane %v1031_v7, 6 }
  0x45   : > { %v1053_v52 = vsel %vm671_vm1, %v1051_v43, %v1052_v44  ;;  %v1059_v54 = vsel %vm671_vm1, %v1057_v45, %v1058_v46  ;;  %v1097_v29 = vmul.f32 %v1095_v57, %v3623_v20  ;;  %v1099_v58 = vmul.f32 %v1095_v57, %v3626_v21 }
  0x46   : > { %v1065_v55 = vsel %vm671_vm1, %v1063_v48, %v1064_v49  ;;  %v1071_v59 = vsel %vm671_vm1, %v1069_v50, %v1070_v51  ;;  %v1081_v60 = vadd.f32 %v1053_v52, %v1001_v37  ;;  %v1083_v27 = vadd.f32 %v1059_v54, %v1003_v38 }
  0x47   : > { %v1085_v62 = vadd.f32 %v1065_v55, %v1005_v39  ;;  %v1087_v63 = vadd.f32 %v1071_v59, %v1007_v26  ;;  %v1101_v0 = vmul.f32 %v1095_v57, %v3731_v34  ;;  %v1103_v2 = vmul.f32 %v1095_v57, %v3808_v47 }
  0x48   : > { %v1105_v3 = vadd.f32 %v1097_v29, %v1081_v60  ;;  %v1107_v28 = vadd.f32 %v1099_v58, %v1083_v27  ;;  %v1121_v4 = vmul.f32 %v3785_v56, %v3623_v20  ;;  %v1123_v5 = vmul.f32 %v3785_v56, %v3626_v21 }
  0x49   : > { %v1109_v16 = vadd.f32 %v1101_v0, %v1085_v62  ;;  %v1111_v17 = vadd.f32 %v1103_v2, %v1087_v63  ;;  %v1125_v6 = vmul.f32 %v3785_v56, %v3731_v34  ;;  %v1127_v18 = vmul.f32 %v3785_v56, %v3808_v47 }
  0x4a   : > { %v1137_v22 = vrot.slane %v1121_v4, 1  ;;  %v1139_v23 = vrot.slane %v1123_v5, 1  ;;  %v1167_v57 = vrot.slane %v3819_v61, %v3593_v8  ;;  %v1215_v25 = vrot.slane %v3819_v61, %v3595_v9 }
  0x4b   : > { %v1141_v30 = vrot.slane %v1125_v6, 1  ;;  %v1143_v31 = vrot.slane %v1127_v18, 1  ;;  %v1263_v32 = vrot.slane %v3819_v61, %v3597_v10  ;;  %v1311_v35 = vrot.slane %v3819_v61, %v3599_v11 }
  0x4c   : > { %v1153_v36 = vadd.f32 %v1137_v22, %v1105_v3  ;;  %v1155_v37 = vadd.f32 %v1139_v23, %v1107_v28  ;;  %v1169_v56 = vmul.f32 %v1167_v57, %v3623_v20  ;;  %v1171_v38 = vmul.f32 %v1167_v57, %v3626_v21  ;;  %v3852_v3 = vld [vmem:[%s3591_s16 + $0xb8] sm:$0x3] }
  0x4d   : > { %v1157_v39 = vadd.f32 %v1141_v30, %v1109_v16  ;;  %v1159_v26 = vadd.f32 %v1143_v31, %v1111_v17  ;;  %v1173_v40 = vmul.f32 %v1167_v57, %v3731_v34  ;;  %v1175_v1 = vmul.f32 %v1167_v57, %v3808_v47 }
  0x4e   : > { %v1185_v41 = vrot.slane %v1169_v56, 2  ;;  %v1187_v42 = vrot.slane %v1171_v38, 2  ;;  %v1217_v19 = vmul.f32 %v1215_v25, %v3623_v20  ;;  %v1219_v7 = vmul.f32 %v1215_v25, %v3626_v21 }
  0x4f   : > { %v1189_v43 = vrot.slane %v1173_v40, 2  ;;  %v1191_v44 = vrot.slane %v1175_v1, 2  ;;  %v1221_v45 = vmul.f32 %v1215_v25, %v3731_v34  ;;  %v1223_v46 = vmul.f32 %v1215_v25, %v3808_v47 }
  0x50   : > { %v1201_v48 = vadd.f32 %v1185_v41, %v1153_v36  ;;  %v1203_v49 = vadd.f32 %v1187_v42, %v1155_v37  ;;  %v1233_v50 = vrot.slane %v1217_v19, 3  ;;  %v1235_v51 = vrot.slane %v1219_v7, 3 }
  0x51   : > { %v1205_v52 = vadd.f32 %v1189_v43, %v1157_v39  ;;  %v1207_v54 = vadd.f32 %v1191_v44, %v1159_v26  ;;  %v1237_v29 = vrot.slane %v1221_v45, 3  ;;  %v1239_v58 = vrot.slane %v1223_v46, 3 }
  0x52   : > { %v1249_v55 = vadd.f32 %v1233_v50, %v1201_v48  ;;  %v1251_v59 = vadd.f32 %v1235_v51, %v1203_v49  ;;  %v1265_v60 = vmul.f32 %v1263_v32, %v3623_v20  ;;  %v1267_v27 = vmul.f32 %v1263_v32, %v3626_v21 }
  0x53   : > { %v1253_v62 = vadd.f32 %v1237_v29, %v1205_v52  ;;  %v1255_v63 = vadd.f32 %v1239_v58, %v1207_v54  ;;  %v1269_v0 = vmul.f32 %v1263_v32, %v3731_v34  ;;  %v1271_v2 = vmul.f32 %v1263_v32, %v3808_v47 }
  0x54   : > { %v1281_v28 = vrot.slane %v1265_v60, 4  ;;  %v1283_v4 = vrot.slane %v1267_v27, 4  ;;  %v1313_v5 = vmul.f32 %v1311_v35, %v3623_v20  ;;  %v1315_v16 = vmul.f32 %v1311_v35, %v3679_v24 }
  0x55   : > { %v1285_v17 = vrot.slane %v1269_v0, 4  ;;  %v1287_v6 = vrot.slane %v1271_v2, 4  ;;  %v1317_v18 = vmul.f32 %v1311_v35, %v3626_v21  ;;  %v1319_v22 = vmul.f32 %v1311_v35, %v3682_v33 }
  0x56   : > { %v1297_v23 = vadd.f32 %v1281_v28, %v1249_v55  ;;  %v1299_v57 = vadd.f32 %v1283_v4, %v1251_v59  ;;  %v1321_v25 = vmul.f32 %v1311_v35, %v3731_v34  ;;  %v1323_v30 = vmul.f32 %v1311_v35, %v3775_v53  ;;  %v3879_v28 = vld [vmem:[%s3591_s16 + $0xc8] sm:$0xff] }
  0x57   : > { %v1301_v31 = vadd.f32 %v1285_v17, %v1253_v62  ;;  %v1303_v32 = vadd.f32 %v1287_v6, %v1255_v63  ;;  %v1325_v36 = vmul.f32 %v1311_v35, %v3808_v47  ;;  %v1327_v37 = vmul.f32 %v1311_v35, %v3852_v3  ;;  %v3886_v17 = vld [vmem:[%s4786_s1 + $0x38] sm:$0xff] }
  0x58   : > { %v1347_v56 = vrot.slane %v1313_v5, 5  ;;  %v1348_v38 = vrot.slane %v1315_v16, 5  ;;  %v1353_v39 = vrot.slane %v1317_v18, 5  ;;  %v1354_v26 = vrot.slane %v1319_v22, 5 }
  0x59   : > { %v1359_v40 = vrot.slane %v1321_v25, 5  ;;  %v1360_v1 = vrot.slane %v1323_v30, 5  ;;  %v1365_v41 = vrot.slane %v1325_v36, 5  ;;  %v1366_v42 = vrot.slane %v1327_v37, 5 }
  0x5a   : > { %v1349_v19 = vsel %vm590_vm0, %v1347_v56, %v1348_v38  ;;  %v1355_v7 = vsel %vm590_vm0, %v1353_v39, %v1354_v26  ;;  %v1391_v43 = vrot.slane %v3819_v61, %v3601_v12  ;;  %v1471_v44 = vrot.slane %v3819_v61, %v3603_v13 }
  0x5b   : > { %v1361_v35 = vsel %vm590_vm0, %v1359_v40, %v1360_v1  ;;  %v1367_v45 = vsel %vm590_vm0, %v1365_v41, %v1366_v42  ;;  %v1377_v46 = vadd.f32 %v1349_v19, %v1297_v23  ;;  %v1379_v48 = vadd.f32 %v1355_v7, %v1299_v57 }
  0x5c   : > { %v1381_v49 = vadd.f32 %v1361_v35, %v1301_v31  ;;  %v1383_v50 = vadd.f32 %v1367_v45, %v1303_v32  ;;  %v1393_v51 = vmul.f32 %v1391_v43, %v3623_v20  ;;  %v1395_v52 = vmul.f32 %v1391_v43, %v3679_v24 }
  0x5d   : > { %v1397_v54 = vmul.f32 %v1391_v43, %v3626_v21  ;;  %v1399_v29 = vmul.f32 %v1391_v43, %v3682_v33  ;;  %v1401_v58 = vmul.f32 %v1391_v43, %v3731_v34  ;;  %v1403_v55 = vmul.f32 %v1391_v43, %v3775_v53 }
  0x5e   : > { %v1405_v59 = vmul.f32 %v1391_v43, %v3808_v47  ;;  %v1407_v60 = vmul.f32 %v1391_v43, %v3852_v3  ;;  %v1427_v27 = vrot.slane %v1393_v51, 6  ;;  %v1428_v62 = vrot.slane %v1395_v52, 6 }
  0x5f   : > { %v1433_v63 = vrot.slane %v1397_v54, 6  ;;  %v1434_v0 = vrot.slane %v1399_v29, 6  ;;  %v1439_v2 = vrot.slane %v1401_v58, 6  ;;  %v1440_v20 = vrot.slane %v1403_v55, 6 }
  0x60   : > { %v1429_v24 = vsel %vm671_vm1, %v1427_v27, %v1428_v62  ;;  %v1445_v4 = vrot.slane %v1405_v59, 6  ;;  %v1446_v5 = vrot.slane %v1407_v60, 6  ;;  %v1473_v16 = vmul.f32 %v1471_v44, %v3626_v21 }
  0x61   : > { %v1435_v6 = vsel %vm671_vm1, %v1433_v63, %v1434_v0  ;;  %v1441_v18 = vsel %vm671_vm1, %v1439_v2, %v1440_v20  ;;  %v1457_v22 = vadd.f32 %v1429_v24, %v1377_v46  ;;  %v1475_v23 = vmul.f32 %v1471_v44, %v3731_v34 }
  0x62   : > { %v1447_v57 = vsel %vm671_vm1, %v1445_v4, %v1446_v5  ;;  %v1459_v25 = vadd.f32 %v1435_v6, %v1379_v48  ;;  %v1461_v30 = vadd.f32 %v1441_v18, %v1381_v49  ;;  %v1477_v31 = vmul.f32 %v1471_v44, %v3808_v47 }
  0x63   : > { %v1463_v32 = vadd.f32 %v1447_v57, %v1383_v50  ;;  %v1479_v36 = vmul.f32 %v1471_v44, %v3879_v28  ;;  %v1481_v37 = vadd.f32 %v1473_v16, %v1457_v22  ;;  %v1495_v56 = vrot.slane %v3819_v61, %v3605_v14 }
  0x64   : > { %v1483_v38 = vadd.f32 %v1475_v23, %v1459_v25  ;;  %v1485_v39 = vadd.f32 %v1477_v31, %v1461_v30  ;;  %v1543_v26 = vrot.slane %v3819_v61, %v3607_v15  ;;  %v1591_v40 = vrot.slane %v3886_v17, %v3593_v8 }
  0x65   : > { %v1487_v1 = vadd.f32 %v1479_v36, %v1463_v32  ;;  %v1497_v41 = vmul.f32 %v1495_v56, %v3626_v21  ;;  %v1499_v42 = vmul.f32 %v1495_v56, %v3731_v34  ;;  %v1501_v19 = vmul.f32 %v1495_v56, %v3808_v47 }
  0x66   : > { %v1503_v7 = vmul.f32 %v1495_v56, %v3879_v28  ;;  %v1545_v43 = vmul.f32 %v1543_v26, %v3626_v21  ;;  %v1547_v44 = vmul.f32 %v1543_v26, %v3731_v34  ;;  %v1549_v35 = vmul.f32 %v1543_v26, %v3808_v47 }
  0x67   : > { %v1513_v45 = vrot.slane %v1497_v41, 1  ;;  %v1515_v61 = vrot.slane %v1499_v42, 1  ;;  %v1517_v46 = vrot.slane %v1501_v19, 1  ;;  %v1551_v48 = vmul.f32 %v1543_v26, %v3879_v28 }
  0x68   : > { %v1519_v49 = vrot.slane %v1503_v7, 1  ;;  %v1561_v50 = vrot.slane %v1545_v43, 2  ;;  %v1563_v51 = vrot.slane %v1547_v44, 2  ;;  %v1565_v52 = vrot.slane %v1549_v35, 2 }
  0x69   : > { %v1529_v54 = vadd.f32 %v1513_v45, %v1481_v37  ;;  %v1531_v29 = vadd.f32 %v1515_v61, %v1483_v38  ;;  %v1533_v58 = vadd.f32 %v1517_v46, %v1485_v39  ;;  %v1567_v55 = vrot.slane %v1551_v48, 2  ;;  %v3926_v38 = vld [vmem:[%s3591_s16 + $0xd8] sm:$0x3] }
  0x6a   : > { %v1535_v59 = vadd.f32 %v1519_v49, %v1487_v1  ;;  %v1593_v60 = vmul.f32 %v1591_v40, %v3626_v21  ;;  %v1595_v27 = vmul.f32 %v1591_v40, %v3731_v34  ;;  %v1597_v62 = vmul.f32 %v1591_v40, %v3808_v47 }
  0x6b   : > { %v1577_v63 = vadd.f32 %v1561_v50, %v1529_v54  ;;  %v1579_v0 = vadd.f32 %v1563_v51, %v1531_v29  ;;  %v1581_v2 = vadd.f32 %v1565_v52, %v1533_v58  ;;  %v1599_v20 = vmul.f32 %v1591_v40, %v3879_v28 }
  0x6c   : > { %v1583_v24 = vadd.f32 %v1567_v55, %v1535_v59  ;;  %v1609_v4 = vrot.slane %v1593_v60, 3  ;;  %v1611_v5 = vrot.slane %v1595_v27, 3  ;;  %v1613_v16 = vrot.slane %v1597_v62, 3 }
  0x6d   : > { %v1615_v6 = vrot.slane %v1599_v20, 3  ;;  %v1639_v18 = vrot.slane %v3886_v17, %v3595_v9  ;;  %v1687_v22 = vrot.slane %v3886_v17, %v3597_v10  ;;  %v1767_v23 = vrot.slane %v3886_v17, %v3599_v11 }
  0x6e   : > { %v1625_v57 = vadd.f32 %v1609_v4, %v1577_v63  ;;  %v1627_v25 = vadd.f32 %v1611_v5, %v1579_v0  ;;  %v1629_v30 = vadd.f32 %v1613_v16, %v1581_v2  ;;  %v3920_v31 = vrot.slane %v3886_v17, %v3601_v12 }
  0x6f   : > { %v1631_v32 = vadd.f32 %v1615_v6, %v1583_v24  ;;  %v1641_v36 = vmul.f32 %v1639_v18, %v3626_v21  ;;  %v1643_v37 = vmul.f32 %v1639_v18, %v3731_v34  ;;  %v1645_v56 = vmul.f32 %v1639_v18, %v3808_v47 }
  0x70   : > { %v1647_v39 = vmul.f32 %v1639_v18, %v3879_v28  ;;  %v1689_v26 = vmul.f32 %v1687_v22, %v3626_v21  ;;  %v1691_v40 = vmul.f32 %v1687_v22, %v3682_v33  ;;  %v1693_v1 = vmul.f32 %v1687_v22, %v3731_v34 }
  0x71   : > { %v1657_v41 = vrot.slane %v1641_v36, 4  ;;  %v1659_v42 = vrot.slane %v1643_v37, 4  ;;  %v1661_v19 = vrot.slane %v1645_v56, 4  ;;  %v1695_v7 = vmul.f32 %v1687_v22, %v3775_v53  ;;  %v3950_v36 = vld [vmem:[%s3591_s16 + $0xe8] sm:$0xff] }
  0x72   : > { %v1663_v43 = vrot.slane %v1647_v39, 4  ;;  %v1697_v44 = vmul.f32 %v1687_v22, %v3808_v47  ;;  %v1699_v35 = vmul.f32 %v1687_v22, %v3852_v3  ;;  %v1701_v45 = vmul.f32 %v1687_v22, %v3879_v28 }
  0x73   : > { %v1673_v61 = vadd.f32 %v1657_v41, %v1625_v57  ;;  %v1675_v46 = vadd.f32 %v1659_v42, %v1627_v25  ;;  %v1677_v48 = vadd.f32 %v1661_v19, %v1629_v30  ;;  %v1703_v49 = vmul.f32 %v1687_v22, %v3926_v38 }
  0x74   : > { %v1679_v50 = vadd.f32 %v1663_v43, %v1631_v32  ;;  %v1723_v51 = vrot.slane %v1689_v26, 5  ;;  %v1724_v52 = vrot.slane %v1691_v40, 5  ;;  %v1729_v54 = vrot.slane %v1693_v1, 5 }
  0x75   : > { %v1730_v29 = vrot.slane %v1695_v7, 5  ;;  %v1735_v58 = vrot.slane %v1697_v44, 5  ;;  %v1736_v55 = vrot.slane %v1699_v35, 5  ;;  %v1741_v59 = vrot.slane %v1701_v45, 5 }
  0x76   : > { %v1725_v60 = vsel %vm590_vm0, %v1723_v51, %v1724_v52  ;;  %v1742_v27 = vrot.slane %v1703_v49, 5  ;;  %v1769_v62 = vmul.f32 %v1767_v23, %v3626_v21  ;;  %v1771_v63 = vmul.f32 %v1767_v23, %v3682_v33 }
  0x77   : > { %v1731_v0 = vsel %vm590_vm0, %v1729_v54, %v1730_v29  ;;  %v1737_v2 = vsel %vm590_vm0, %v1735_v58, %v1736_v55  ;;  %v1753_v20 = vadd.f32 %v1725_v60, %v1673_v61  ;;  %v1773_v24 = vmul.f32 %v1767_v23, %v3731_v34 }
  0x78   : > { %v1743_v4 = vsel %vm590_vm0, %v1741_v59, %v1742_v27  ;;  %v1755_v5 = vadd.f32 %v1731_v0, %v1675_v46  ;;  %v1757_v16 = vadd.f32 %v1737_v2, %v1677_v48  ;;  %v1775_v6 = vmul.f32 %v1767_v23, %v3775_v53 }
  0x79   : > { %v1759_v18 = vadd.f32 %v1743_v4, %v1679_v50  ;;  %v1777_v22 = vmul.f32 %v1767_v23, %v3808_v47  ;;  %v1779_v21 = vmul.f32 %v1767_v23, %v3852_v3  ;;  %v1781_v33 = vmul.f32 %v1767_v23, %v3879_v28 }
  0x7a   : > { %v1783_v57 = vmul.f32 %v1767_v23, %v3926_v38  ;;  %v1803_v25 = vrot.slane %v1769_v62, 6  ;;  %v1804_v30 = vrot.slane %v1771_v63, 6  ;;  %v1809_v32 = vrot.slane %v1773_v24, 6  ;;  %v3960_v23 = vld [vmem:[%s4786_s1 + $0x48] sm:$0xff] }
  0x7b   : > { %v1810_v37 = vrot.slane %v1775_v6, 6  ;;  %v1815_v56 = vrot.slane %v1777_v22, 6  ;;  %v1816_v39 = vrot.slane %v1779_v21, 6  ;;  %v1821_v26 = vrot.slane %v1781_v33, 6 }
  0x7c   : > { %v1805_v40 = vsel %vm671_vm1, %v1803_v25, %v1804_v30  ;;  %v1822_v1 = vrot.slane %v1783_v57, 6  ;;  %v1849_v41 = vmul.f32 %v3920_v31, %v3731_v34  ;;  %v1851_v42 = vmul.f32 %v3920_v31, %v3808_v47 }
  0x7d   : > { %v1811_v19 = vsel %vm671_vm1, %v1809_v32, %v1810_v37  ;;  %v1817_v7 = vsel %vm671_vm1, %v1815_v56, %v1816_v39  ;;  %v1833_v43 = vadd.f32 %v1805_v40, %v1753_v20  ;;  %v1853_v44 = vmul.f32 %v3920_v31, %v3879_v28 }
  0x7e   : > { %v1823_v35 = vsel %vm671_vm1, %v1821_v26, %v1822_v1  ;;  %v1835_v45 = vadd.f32 %v1811_v19, %v1755_v5  ;;  %v1837_v61 = vadd.f32 %v1817_v7, %v1757_v16  ;;  %v1855_v46 = vmul.f32 %v3920_v31, %v3950_v36 }
  0x7f   : > { %v1839_v48 = vadd.f32 %v1823_v35, %v1759_v18  ;;  %v1857_v49 = vadd.f32 %v1849_v41, %v1833_v43  ;;  %v1871_v50 = vrot.slane %v3886_v17, %v3603_v13  ;;  %v1919_v51 = vrot.slane %v3886_v17, %v3605_v14 }
  0x80   : > { %v1859_v52 = vadd.f32 %v1851_v42, %v1835_v45  ;;  %v1861_v54 = vadd.f32 %v1853_v44, %v1837_v61  ;;  %v1967_v29 = vrot.slane %v3886_v17, %v3607_v15  ;;  %v2015_v58 = vrot.slane %v3960_v23, %v3593_v8 }
  0x81   : > { %v1863_v55 = vadd.f32 %v1855_v46, %v1839_v48  ;;  %v1873_v59 = vmul.f32 %v1871_v50, %v3731_v34  ;;  %v1875_v31 = vmul.f32 %v1871_v50, %v3808_v47  ;;  %v1877_v60 = vmul.f32 %v1871_v50, %v3879_v28 }
  0x82   : > { %v1879_v27 = vmul.f32 %v1871_v50, %v3950_v36  ;;  %v1921_v62 = vmul.f32 %v1919_v51, %v3731_v34  ;;  %v1923_v63 = vmul.f32 %v1919_v51, %v3808_v47  ;;  %v1925_v0 = vmul.f32 %v1919_v51, %v3879_v28 }
  0x83   : > { %v1889_v2 = vrot.slane %v1873_v59, 1  ;;  %v1891_v17 = vrot.slane %v1875_v31, 1  ;;  %v1893_v20 = vrot.slane %v1877_v60, 1  ;;  %v1927_v24 = vmul.f32 %v1919_v51, %v3950_v36  ;;  %v4000_v59 = vld [vmem:[%s3591_s16 + $0xf8] sm:$0x3] }
  0x84   : > { %v1895_v4 = vrot.slane %v1879_v27, 1  ;;  %v1937_v5 = vrot.slane %v1921_v62, 2  ;;  %v1939_v16 = vrot.slane %v1923_v63, 2  ;;  %v1941_v6 = vrot.slane %v1925_v0, 2 }
  0x85   : > { %v1905_v18 = vadd.f32 %v1889_v2, %v1857_v49  ;;  %v1907_v22 = vadd.f32 %v1891_v17, %v1859_v52  ;;  %v1909_v21 = vadd.f32 %v1893_v20, %v1861_v54  ;;  %v1943_v33 = vrot.slane %v1927_v24, 2 }
  0x86   : > { %v1911_v57 = vadd.f32 %v1895_v4, %v1863_v55  ;;  %v1969_v25 = vmul.f32 %v1967_v29, %v3731_v34  ;;  %v1971_v30 = vmul.f32 %v1967_v29, %v3808_v47  ;;  %v1973_v32 = vmul.f32 %v1967_v29, %v3879_v28 }
  0x87   : > { %v1953_v37 = vadd.f32 %v1937_v5, %v1905_v18  ;;  %v1955_v56 = vadd.f32 %v1939_v16, %v1907_v22  ;;  %v1957_v39 = vadd.f32 %v1941_v6, %v1909_v21  ;;  %v1975_v26 = vmul.f32 %v1967_v29, %v3950_v36 }
  0x88   : > { %v1959_v40 = vadd.f32 %v1943_v33, %v1911_v57  ;;  %v1985_v1 = vrot.slane %v1969_v25, 3  ;;  %v1987_v41 = vrot.slane %v1971_v30, 3  ;;  %v1989_v42 = vrot.slane %v1973_v32, 3 }
  0x89   : > { %v1991_v19 = vrot.slane %v1975_v26, 3  ;;  %v2017_v7 = vmul.f32 %v2015_v58, %v3731_v34  ;;  %v2019_v43 = vmul.f32 %v2015_v58, %v3808_v47  ;;  %v2021_v44 = vmul.f32 %v2015_v58, %v3879_v28 }
  0x8a   : > { %v2001_v35 = vadd.f32 %v1985_v1, %v1953_v37  ;;  %v2003_v45 = vadd.f32 %v1987_v41, %v1955_v56  ;;  %v2005_v61 = vadd.f32 %v1989_v42, %v1957_v39  ;;  %v2023_v46 = vmul.f32 %v2015_v58, %v3950_v36 }
  0x8b   : > { %v2007_v48 = vadd.f32 %v1991_v19, %v1959_v40  ;;  %v2033_v49 = vrot.slane %v2017_v7, 4  ;;  %v2035_v50 = vrot.slane %v2019_v43, 4  ;;  %v2037_v51 = vrot.slane %v2021_v44, 4 }
  0x8c   : > { %v2039_v52 = vrot.slane %v2023_v46, 4  ;;  %v2063_v54 = vrot.slane %v3960_v23, %v3595_v9  ;;  %v2143_v29 = vrot.slane %v3960_v23, %v3597_v10  ;;  %v2223_v55 = vrot.slane %v3960_v23, %v3599_v11  ;;  %v4025_v46 = vld [vmem:[%s3591_s16 + $0x108] sm:$0xff] }
  0x8d   : > { %v2049_v31 = vadd.f32 %v2033_v49, %v2001_v35  ;;  %v2051_v60 = vadd.f32 %v2035_v50, %v2003_v45  ;;  %v2053_v27 = vadd.f32 %v2037_v51, %v2005_v61  ;;  %v2247_v58 = vrot.slane %v3960_v23, %v3601_v12 }
  0x8e   : > { %v2055_v62 = vadd.f32 %v2039_v52, %v2007_v48  ;;  %v2065_v63 = vmul.f32 %v2063_v54, %v3731_v34  ;;  %v2067_v0 = vmul.f32 %v2063_v54, %v3775_v53  ;;  %v2069_v2 = vmul.f32 %v2063_v54, %v3808_v47 }
  0x8f   : > { %v2071_v17 = vmul.f32 %v2063_v54, %v3852_v3  ;;  %v2073_v20 = vmul.f32 %v2063_v54, %v3879_v28  ;;  %v2075_v24 = vmul.f32 %v2063_v54, %v3926_v38  ;;  %v2077_v4 = vmul.f32 %v2063_v54, %v3950_v36 }
  0x90   : > { %v2079_v5 = vmul.f32 %v2063_v54, %v4000_v59  ;;  %v2099_v16 = vrot.slane %v2065_v63, 5  ;;  %v2100_v6 = vrot.slane %v2067_v0, 5  ;;  %v2105_v18 = vrot.slane %v2069_v2, 5 }
  0x91   : > { %v2106_v22 = vrot.slane %v2071_v17, 5  ;;  %v2111_v21 = vrot.slane %v2073_v20, 5  ;;  %v2112_v33 = vrot.slane %v2075_v24, 5  ;;  %v2117_v57 = vrot.slane %v2077_v4, 5 }
  0x92   : > { %v2101_v25 = vsel %vm590_vm0, %v2099_v16, %v2100_v6  ;;  %v2118_v30 = vrot.slane %v2079_v5, 5  ;;  %v2145_v32 = vmul.f32 %v2143_v29, %v3731_v34  ;;  %v2147_v37 = vmul.f32 %v2143_v29, %v3775_v53 }
  0x93   : > { %v2107_v56 = vsel %vm590_vm0, %v2105_v18, %v2106_v22  ;;  %v2113_v39 = vsel %vm590_vm0, %v2111_v21, %v2112_v33  ;;  %v2129_v26 = vadd.f32 %v2101_v25, %v2049_v31  ;;  %v2149_v40 = vmul.f32 %v2143_v29, %v3808_v47 }
  0x94   : > { %v2119_v1 = vsel %vm590_vm0, %v2117_v57, %v2118_v30  ;;  %v2131_v41 = vadd.f32 %v2107_v56, %v2051_v60  ;;  %v2133_v42 = vadd.f32 %v2113_v39, %v2053_v27  ;;  %v2151_v19 = vmul.f32 %v2143_v29, %v3852_v3 }
  0x95   : > { %v2135_v7 = vadd.f32 %v2119_v1, %v2055_v62  ;;  %v2153_v43 = vmul.f32 %v2143_v29, %v3879_v28  ;;  %v2155_v34 = vmul.f32 %v2143_v29, %v3926_v38  ;;  %v2157_v53 = vmul.f32 %v2143_v29, %v3950_v36 }
  0x96   : > { %v2159_v44 = vmul.f32 %v2143_v29, %v4000_v59  ;;  %v2179_v35 = vrot.slane %v2145_v32, 6  ;;  %v2180_v45 = vrot.slane %v2147_v37, 6  ;;  %v2185_v61 = vrot.slane %v2149_v40, 6 }
  0x97   : > { %v2186_v48 = vrot.slane %v2151_v19, 6  ;;  %v2191_v49 = vrot.slane %v2153_v43, 6  ;;  %v2192_v50 = vrot.slane %v2155_v34, 6  ;;  %v2197_v51 = vrot.slane %v2157_v53, 6 }
  0x98   : > { %v2181_v52 = vsel %vm671_vm1, %v2179_v35, %v2180_v45  ;;  %v2198_v54 = vrot.slane %v2159_v44, 6  ;;  %v2225_v31 = vmul.f32 %v2223_v55, %v3808_v47  ;;  %v2227_v60 = vmul.f32 %v2223_v55, %v3879_v28 }
  0x99   : > { %v2187_v27 = vsel %vm671_vm1, %v2185_v61, %v2186_v48  ;;  %v2193_v29 = vsel %vm671_vm1, %v2191_v49, %v2192_v50  ;;  %v2209_v62 = vadd.f32 %v2181_v52, %v2129_v26  ;;  %v2229_v63 = vmul.f32 %v2223_v55, %v3950_v36 }
  0x9a   : > { %v2199_v0 = vsel %vm671_vm1, %v2197_v51, %v2198_v54  ;;  %v2211_v2 = vadd.f32 %v2187_v27, %v2131_v41  ;;  %v2213_v17 = vadd.f32 %v2193_v29, %v2133_v42  ;;  %v2231_v20 = vmul.f32 %v2223_v55, %v4025_v46  ;;  %v4056_v51 = vld [vmem:[%s4786_s1 + $0x58] sm:$0xff] }
  0x9b   : > { %v2215_v24 = vadd.f32 %v2199_v0, %v2135_v7  ;;  %v2233_v4 = vadd.f32 %v2225_v31, %v2209_v62  ;;  %v2249_v5 = vmul.f32 %v2247_v58, %v3808_v47  ;;  %v2251_v16 = vmul.f32 %v2247_v58, %v3879_v28 }
  0x9c   : > { %v2235_v6 = vadd.f32 %v2227_v60, %v2211_v2  ;;  %v2237_v18 = vadd.f32 %v2229_v63, %v2213_v17  ;;  %v2253_v22 = vmul.f32 %v2247_v58, %v3950_v36  ;;  %v2255_v21 = vmul.f32 %v2247_v58, %v4025_v46 }
  0x9d   : > { %v2239_v33 = vadd.f32 %v2231_v20, %v2215_v24  ;;  %v2265_v57 = vrot.slane %v2249_v5, 1  ;;  %v2267_v25 = vrot.slane %v2251_v16, 1  ;;  %v2295_v30 = vrot.slane %v3960_v23, %v3603_v13 }
  0x9e   : > { %v2269_v32 = vrot.slane %v2253_v22, 1  ;;  %v2271_v55 = vrot.slane %v2255_v21, 1  ;;  %v2343_v37 = vrot.slane %v3960_v23, %v3605_v14  ;;  %v2391_v56 = vrot.slane %v3960_v23, %v3607_v15 }
  0x9f   : > { %v2281_v39 = vadd.f32 %v2265_v57, %v2233_v4  ;;  %v2283_v26 = vadd.f32 %v2267_v25, %v2235_v6  ;;  %v2297_v40 = vmul.f32 %v2295_v30, %v3808_v47  ;;  %v2299_v58 = vmul.f32 %v2295_v30, %v3879_v28  ;;  %v4067_v6 = vld [vmem:[%s3591_s16 + $0x118] sm:$0x3] }
  0xa0   : > { %v2285_v1 = vadd.f32 %v2269_v32, %v2237_v18  ;;  %v2287_v41 = vadd.f32 %v2271_v55, %v2239_v33  ;;  %v2301_v42 = vmul.f32 %v2295_v30, %v3950_v36  ;;  %v2303_v19 = vmul.f32 %v2295_v30, %v4025_v46 }
  0xa1   : > { %v2313_v7 = vrot.slane %v2297_v40, 2  ;;  %v2315_v43 = vrot.slane %v2299_v58, 2  ;;  %v2345_v34 = vmul.f32 %v2343_v37, %v3808_v47  ;;  %v2347_v53 = vmul.f32 %v2343_v37, %v3879_v28 }
  0xa2   : > { %v2317_v44 = vrot.slane %v2301_v42, 2  ;;  %v2319_v23 = vrot.slane %v2303_v19, 2  ;;  %v2349_v35 = vmul.f32 %v2343_v37, %v3950_v36  ;;  %v2351_v45 = vmul.f32 %v2343_v37, %v4025_v46 }
  0xa3   : > { %v2329_v61 = vadd.f32 %v2313_v7, %v2281_v39  ;;  %v2331_v48 = vadd.f32 %v2315_v43, %v2283_v26  ;;  %v2361_v49 = vrot.slane %v2345_v34, 3  ;;  %v2363_v50 = vrot.slane %v2347_v53, 3 }
  0xa4   : > { %v2333_v52 = vadd.f32 %v2317_v44, %v2285_v1  ;;  %v2335_v54 = vadd.f32 %v2319_v23, %v2287_v41  ;;  %v2365_v31 = vrot.slane %v2349_v35, 3  ;;  %v2367_v60 = vrot.slane %v2351_v45, 3 }
  0xa5   : > { %v2377_v27 = vadd.f32 %v2361_v49, %v2329_v61  ;;  %v2379_v29 = vadd.f32 %v2363_v50, %v2331_v48  ;;  %v2393_v62 = vmul.f32 %v2391_v56, %v3808_v47  ;;  %v2395_v63 = vmul.f32 %v2391_v56, %v3879_v28 }
  0xa6   : > { %v2381_v0 = vadd.f32 %v2365_v31, %v2333_v52  ;;  %v2383_v2 = vadd.f32 %v2367_v60, %v2335_v54  ;;  %v2397_v17 = vmul.f32 %v2391_v56, %v3950_v36  ;;  %v2399_v20 = vmul.f32 %v2391_v56, %v4025_v46 }
  0xa7   : > { %v2409_v24 = vrot.slane %v2393_v62, 4  ;;  %v2411_v4 = vrot.slane %v2395_v63, 4  ;;  %v2439_v5 = vrot.slane %v4056_v51, %v3593_v8  ;;  %v2519_v16 = vrot.slane %v4056_v51, %v3595_v9 }
  0xa8   : > { %v2413_v18 = vrot.slane %v2397_v17, 4  ;;  %v2415_v22 = vrot.slane %v2399_v20, 4  ;;  %v2599_v21 = vrot.slane %v4056_v51, %v3597_v10  ;;  %v4073_v33 = vrot.slane %v4056_v51, %v3599_v11  ;;  %v4096_v20 = vld [vmem:[%s3591_s16 + $0x128] sm:$0xff] }
  0xa9   : > { %v2425_v57 = vadd.f32 %v2409_v24, %v2377_v27  ;;  %v2427_v25 = vadd.f32 %v2411_v4, %v2379_v29  ;;  %v2441_v30 = vmul.f32 %v2439_v5, %v3808_v47  ;;  %v2443_v32 = vmul.f32 %v2439_v5, %v3852_v3 }
  0xaa   : > { %v2429_v55 = vadd.f32 %v2413_v18, %v2381_v0  ;;  %v2431_v37 = vadd.f32 %v2415_v22, %v2383_v2  ;;  %v2445_v56 = vmul.f32 %v2439_v5, %v3879_v28  ;;  %v2447_v39 = vmul.f32 %v2439_v5, %v3926_v38 }
  0xab   : > { %v2449_v26 = vmul.f32 %v2439_v5, %v3950_v36  ;;  %v2451_v40 = vmul.f32 %v2439_v5, %v4000_v59  ;;  %v2453_v58 = vmul.f32 %v2439_v5, %v4025_v46  ;;  %v2455_v1 = vmul.f32 %v2439_v5, %v4067_v6 }
  0xac   : > { %v2475_v41 = vrot.slane %v2441_v30, 5  ;;  %v2476_v42 = vrot.slane %v2443_v32, 5  ;;  %v2481_v19 = vrot.slane %v2445_v56, 5  ;;  %v2482_v7 = vrot.slane %v2447_v39, 5 }
  0xad   : > { %v2487_v43 = vrot.slane %v2449_v26, 5  ;;  %v2488_v34 = vrot.slane %v2451_v40, 5  ;;  %v2493_v53 = vrot.slane %v2453_v58, 5  ;;  %v2494_v44 = vrot.slane %v2455_v1, 5 }
  0xae   : > { %v2477_v23 = vsel %vm590_vm0, %v2475_v41, %v2476_v42  ;;  %v2483_v35 = vsel %vm590_vm0, %v2481_v19, %v2482_v7  ;;  %v2521_v45 = vmul.f32 %v2519_v16, %v3808_v47  ;;  %v2523_v61 = vmul.f32 %v2519_v16, %v3852_v3 }
  0xaf   : > { %v2489_v48 = vsel %vm590_vm0, %v2487_v43, %v2488_v34  ;;  %v2495_v49 = vsel %vm590_vm0, %v2493_v53, %v2494_v44  ;;  %v2505_v50 = vadd.f32 %v2477_v23, %v2425_v57  ;;  %v2507_v52 = vadd.f32 %v2483_v35, %v2427_v25 }
  0xb0   : > { %v2509_v54 = vadd.f32 %v2489_v48, %v2429_v55  ;;  %v2511_v31 = vadd.f32 %v2495_v49, %v2431_v37  ;;  %v2525_v60 = vmul.f32 %v2519_v16, %v3879_v28  ;;  %v2527_v27 = vmul.f32 %v2519_v16, %v3926_v38 }
  0xb1   : > { %v2529_v29 = vmul.f32 %v2519_v16, %v3950_v36  ;;  %v2531_v62 = vmul.f32 %v2519_v16, %v4000_v59  ;;  %v2533_v47 = vmul.f32 %v2519_v16, %v4025_v46  ;;  %v2535_v3 = vmul.f32 %v2519_v16, %v4067_v6 }
  0xb2   : > { %v2555_v63 = vrot.slane %v2521_v45, 6  ;;  %v2556_v0 = vrot.slane %v2523_v61, 6  ;;  %v2561_v2 = vrot.slane %v2525_v60, 6  ;;  %v2562_v17 = vrot.slane %v2527_v27, 6 }
  0xb3   : > { %v2567_v24 = vrot.slane %v2529_v29, 6  ;;  %v2568_v4 = vrot.slane %v2531_v62, 6  ;;  %v2573_v5 = vrot.slane %v2533_v47, 6  ;;  %v2574_v18 = vrot.slane %v2535_v3, 6 }
  0xb4   : > { %v2557_v22 = vsel %vm671_vm1, %v2555_v63, %v2556_v0  ;;  %v2563_v57 = vsel %vm671_vm1, %v2561_v2, %v2562_v17  ;;  %v2601_v25 = vmul.f32 %v2599_v21, %v3879_v28  ;;  %v2603_v30 = vmul.f32 %v2599_v21, %v3950_v36 }
  0xb5   : > { %v2569_v16 = vsel %vm671_vm1, %v2567_v24, %v2568_v4  ;;  %v2575_v32 = vsel %vm671_vm1, %v2573_v5, %v2574_v18  ;;  %v2585_v55 = vadd.f32 %v2557_v22, %v2505_v50  ;;  %v2587_v37 = vadd.f32 %v2563_v57, %v2507_v52 }
  0xb6   : > { %v2589_v56 = vadd.f32 %v2569_v16, %v2509_v54  ;;  %v2591_v39 = vadd.f32 %v2575_v32, %v2511_v31  ;;  %v2605_v26 = vmul.f32 %v2599_v21, %v4025_v46  ;;  %v2607_v40 = vmul.f32 %v2599_v21, %v4096_v20 }
  0xb7   : > { %v2609_v58 = vadd.f32 %v2601_v25, %v2585_v55  ;;  %v2611_v1 = vadd.f32 %v2603_v30, %v2587_v37  ;;  %v2625_v41 = vmul.f32 %v4073_v33, %v3879_v28  ;;  %v2627_v42 = vmul.f32 %v4073_v33, %v3950_v36 }
  0xb8   : > { %v2613_v19 = vadd.f32 %v2605_v26, %v2589_v56  ;;  %v2615_v7 = vadd.f32 %v2607_v40, %v2591_v39  ;;  %v2629_v43 = vmul.f32 %v4073_v33, %v4025_v46  ;;  %v2631_v34 = vmul.f32 %v4073_v33, %v4096_v20  ;;  %v319_v40 = vld [vmem:[%s3591_s16 + $0x138] sm:$0x3] }
  0xb9   : > { %v2641_v53 = vrot.slane %v2625_v41, 1  ;;  %v2643_v44 = vrot.slane %v2627_v42, 1  ;;  %v2671_v21 = vrot.slane %v4056_v51, %v3601_v12  ;;  %v2719_v23 = vrot.slane %v4056_v51, %v3603_v13 }
  0xba   : > { %v2645_v35 = vrot.slane %v2629_v43, 1  ;;  %v2647_v45 = vrot.slane %v2631_v34, 1  ;;  %v2767_v61 = vrot.slane %v4056_v51, %v3605_v14  ;;  %v2815_v48 = vrot.slane %v4056_v51, %v3607_v15 }
  0xbb   : > { %v2657_v49 = vadd.f32 %v2641_v53, %v2609_v58  ;;  %v2659_v50 = vadd.f32 %v2643_v44, %v2611_v1  ;;  %v2673_v33 = vmul.f32 %v2671_v21, %v3879_v28  ;;  %v2675_v52 = vmul.f32 %v2671_v21, %v3950_v36 }
  0xbc   : > { %v2661_v54 = vadd.f32 %v2645_v35, %v2613_v19  ;;  %v2663_v31 = vadd.f32 %v2647_v45, %v2615_v7  ;;  %v2677_v60 = vmul.f32 %v2671_v21, %v4025_v46  ;;  %v2679_v27 = vmul.f32 %v2671_v21, %v4096_v20  ;;  %v3430_v35 = vld [vmem:[%s4786_s1 + $0x68] ss:$0 sm:$0xff] }
  0xbd   : > { %v2689_v29 = vrot.slane %v2673_v33, 2  ;;  %v2691_v62 = vrot.slane %v2675_v52, 2  ;;  %v2721_v47 = vmul.f32 %v2719_v23, %v3879_v28  ;;  %v2723_v3 = vmul.f32 %v2719_v23, %v3950_v36 }
  0xbe   : > { %v2693_v63 = vrot.slane %v2677_v60, 2  ;;  %v2695_v51 = vrot.slane %v2679_v27, 2  ;;  %v2725_v0 = vmul.f32 %v2719_v23, %v4025_v46  ;;  %v2727_v2 = vmul.f32 %v2719_v23, %v4096_v20 }
  0xbf   : > { %v2705_v17 = vadd.f32 %v2689_v29, %v2657_v49  ;;  %v2707_v24 = vadd.f32 %v2691_v62, %v2659_v50  ;;  %v2737_v4 = vrot.slane %v2721_v47, 3  ;;  %v2739_v5 = vrot.slane %v2723_v3, 3 }
  0xc0   : > { %v2709_v18 = vadd.f32 %v2693_v63, %v2661_v54  ;;  %v2711_v22 = vadd.f32 %v2695_v51, %v2663_v31  ;;  %v2741_v57 = vrot.slane %v2725_v0, 3  ;;  %v2743_v25 = vrot.slane %v2727_v2, 3 }
  0xc1   : > { %v2753_v30 = vadd.f32 %v2737_v4, %v2705_v17  ;;  %v2755_v16 = vadd.f32 %v2739_v5, %v2707_v24  ;;  %v2769_v32 = vmul.f32 %v2767_v61, %v3879_v28  ;;  %v2771_v55 = vmul.f32 %v2767_v61, %v3950_v36 }
  0xc2   : > { %v2757_v37 = vadd.f32 %v2741_v57, %v2709_v18  ;;  %v2759_v56 = vadd.f32 %v2743_v25, %v2711_v22  ;;  %v2773_v39 = vmul.f32 %v2767_v61, %v4025_v46  ;;  %v2775_v26 = vmul.f32 %v2767_v61, %v4096_v20 }
  0xc3   : > { %v2785_v58 = vrot.slane %v2769_v32, 4  ;;  %v2787_v1 = vrot.slane %v2771_v55, 4  ;;  %v2817_v41 = vmul.f32 %v2815_v48, %v3879_v28  ;;  %v2819_v42 = vmul.f32 %v2815_v48, %v3926_v38 }
  0xc4   : > { %v2789_v19 = vrot.slane %v2773_v39, 4  ;;  %v2791_v7 = vrot.slane %v2775_v26, 4  ;;  %v2821_v43 = vmul.f32 %v2815_v48, %v3950_v36  ;;  %v2823_v34 = vmul.f32 %v2815_v48, %v4000_v59 }
  0xc5   : > { %v2801_v53 = vadd.f32 %v2785_v58, %v2753_v30  ;;  %v2803_v44 = vadd.f32 %v2787_v1, %v2755_v16  ;;  %v2825_v21 = vmul.f32 %v2815_v48, %v4025_v46  ;;  %v2827_v23 = vmul.f32 %v2815_v48, %v4067_v6 }
  0xc6   : > { %v2805_v45 = vadd.f32 %v2789_v19, %v2757_v37  ;;  %v2807_v61 = vadd.f32 %v2791_v7, %v2759_v56  ;;  %v2829_v49 = vmul.f32 %v2815_v48, %v4096_v20  ;;  %v2831_v50 = vmul.f32 %v2815_v48, %v319_v40 }
  0xc7   : > { %v2851_v33 = vrot.slane %v2817_v41, 5  ;;  %v2852_v52 = vrot.slane %v2819_v42, 5  ;;  %v2857_v54 = vrot.slane %v2821_v43, 5  ;;  %v2858_v31 = vrot.slane %v2823_v34, 5 }
  0xc8   : > { %v2863_v60 = vrot.slane %v2825_v21, 5  ;;  %v2864_v27 = vrot.slane %v2827_v23, 5  ;;  %v2869_v29 = vrot.slane %v2829_v49, 5  ;;  %v2870_v62 = vrot.slane %v2831_v50, 5  ;;  %v4185_v23 = vld [vmem:[%s3591_s16] sm:$0xff] }
  0xc9   : > { %v2853_v47 = vsel %vm590_vm0, %v2851_v33, %v2852_v52  ;;  %v2859_v3 = vsel %vm590_vm0, %v2857_v54, %v2858_v31  ;;  %v2897_v63 = vmul.f32 %v3430_v35, %v3879_v28  ;;  %v2899_v51 = vmul.f32 %v3430_v35, %v3926_v38  ;;  %v2968_v38 = vld [vmem:[%s4787_s2] sm:$0x3] }
  0xca   : > { %v2865_v0 = vsel %vm590_vm0, %v2863_v60, %v2864_v27  ;;  %v2871_v48 = vsel %vm590_vm0, %v2869_v29, %v2870_v62  ;;  %v2881_v2 = vadd.f32 %v2853_v47, %v2801_v53  ;;  %v2883_v17 = vadd.f32 %v2859_v3, %v2803_v44  ;;  %v4202_v52 = vld [vmem:[%s3591_s16 + $0x60] sm:$0xff] }
  0xcb   : > { %v2885_v24 = vadd.f32 %v2865_v0, %v2805_v45  ;;  %v2887_v4 = vadd.f32 %v2871_v48, %v2807_v61  ;;  %v2901_v5 = vmul.f32 %v3430_v35, %v3950_v36  ;;  %v2903_v18 = vmul.f32 %v3430_v35, %v4000_v59  ;;  %v4191_v45 = vld [vmem:[%s3591_s16 + $0x40] sm:$0xff] }
  0xcc   : > { %v2905_v22 = vmul.f32 %v3430_v35, %v4025_v46  ;;  %v2907_v57 = vmul.f32 %v3430_v35, %v4067_v6  ;;  %v2909_v28 = vmul.f32 %v3430_v35, %v4096_v20  ;;  %v2911_v25 = vmul.f32 %v3430_v35, %v319_v40  ;;  %v4165_v20 = vld [vmem:[%s4786_s1] sm:$0xff] }
  0xcd   : > { %v2931_v30 = vrot.slane %v2897_v63, 6  ;;  %v2932_v16 = vrot.slane %v2899_v51, 6  ;;  %v2937_v32 = vrot.slane %v2901_v5, 6  ;;  %v2938_v55 = vrot.slane %v2903_v18, 6  ;;  %v4188_v35 = vld [vmem:[%s3591_s16 + $0x20] sm:$0xff] }
  0xce   : > { %v2943_v37 = vrot.slane %v2905_v22, 6  ;;  %v2944_v56 = vrot.slane %v2907_v57, 6  ;;  %v2949_v36 = vrot.slane %v2909_v28, 6  ;;  %v2950_v39 = vrot.slane %v2911_v25, 6 }
  0xcf   : > { %v2933_v59 = vsel %vm671_vm1, %v2931_v30, %v2932_v16  ;;  %v2939_v46 = vsel %vm671_vm1, %v2937_v32, %v2938_v55  ;;  %v2977_v6 = vrot.slane %v2968_v38, %v3595_v9  ;;  %v4170_v19 = vrot.slane %v2968_v38, %v3593_v8 }
  0xd0   : > { %v2945_v26 = vsel %vm671_vm1, %v2943_v37, %v2944_v56  ;;  %v2951_v40 = vsel %vm671_vm1, %v2949_v36, %v2950_v39  ;;  %v2961_v58 = vadd.f32 %v2933_v59, %v2881_v2  ;;  %v2963_v1 = vadd.f32 %v2939_v46, %v2883_v17 }
  0xd1   : > { %v2965_v41 = vadd.f32 %v2945_v26, %v2885_v24  ;;  %v2967_v42 = vadd.f32 %v2951_v40, %v2887_v4  ;;  %v337_v34 = vrot.slane %v4165_v20, %v3593_v8  ;;  %v361_v53 = vrot.slane %v4165_v20, %v3595_v9 }
  0xd2   : > { %v4172_v7 = vadd.f32 %v2977_v6, %v2961_v58  ;;  %v4174_v43 = vadd.f32 %v2977_v6, %v2963_v1  ;;  %v409_v61 = vrot.slane %v4165_v20, %v3597_v10  ;;  %v457_v49 = vrot.slane %v4165_v20, %v3599_v11 }
  0xd3   : > { %v4180_v44 = vadd.f32 %v2977_v6, %v2965_v41  ;;  %v4182_v21 = vadd.f32 %v2977_v6, %v2967_v42  ;;  %v342_v54 = vmul.f32 %v337_v34, %v4185_v23  ;;  %v344_v31 = vmul.f32 %v337_v34, %v4188_v35 }
  0xd4   : > { %v2997_v50 = vsel %vm2996_vm2, %v4172_v7, 0.0  ;;  %v2998_v33 = vsel %vm2996_vm2, %v4174_v43, 0.0  ;;  %v346_v62 = vmul.f32 %v337_v34, %v4191_v45  ;;  %v348_v47 = vmul.f32 %v337_v34, %v4202_v52 }
  0xd5   : > { %v2999_v60 = vadd.f32 %v2998_v33, %v2997_v50  ;;  %v3000_v27 = vsel %vm2996_vm2, %v4180_v44, 0.0  ;;  %v3002_v29 = vsel %vm2996_vm2, %v4182_v21, 0.0  ;;  %v366_v3 = vmul.f32 %v361_v53, %v4185_v23 }
  0xd6   : > { %v368_v63 = vmul.f32 %v361_v53, %v4188_v35  ;;  %v370_v51 = vmul.f32 %v361_v53, %v4191_v45  ;;  %v372_v48 = vmul.f32 %v361_v53, %v4202_v52  ;;  %v414_v2 = vmul.f32 %v409_v61, %v4185_v23 }
  0xd7   : > { %v3001_v0 = vadd.f32 %v3000_v27, %v2999_v60  ;;  %v416_v17 = vmul.f32 %v409_v61, %v4188_v35  ;;  %v382_v24 = vrot.slane %v366_v3, 1  ;;  %v418_v18 = vmul.f32 %v409_v61, %v4191_v45  ;;  %v282_v60 = vld [vmem:[%s3591_s16 + $0x10] sm:$0x3] }
  0xd8   : > { %v384_v4 = vrot.slane %v368_v63, 1  ;;  %v386_v5 = vrot.slane %v370_v51, 1  ;;  %v388_v57 = vrot.slane %v372_v48, 1  ;;  %v420_v28 = vmul.f32 %v409_v61, %v4202_v52 }
  0xd9   : > { %v3003_v22 = vadd.f32 %v3002_v29, %v3001_v0  ;;  %v430_v25 = vrot.slane %v414_v2, 2  ;;  %v398_v38 = vadd.f32 %v382_v24, %v342_v54  ;;  %v432_v32 = vrot.slane %v416_v17, 2  ;;  %v4241_v24 = vld [vmem:[%s3591_s16 + $0x50] sm:$0x3] }
  0xda   : > { %v400_v30 = vadd.f32 %v384_v4, %v344_v31  ;;  %v402_v16 = vadd.f32 %v386_v5, %v346_v62  ;;  %v404_v37 = vadd.f32 %v388_v57, %v348_v47  ;;  %v434_v56 = vrot.slane %v418_v18, 2  ;;  %v4233_v47 = vld [vmem:[%s3591_s16 + $0x30] sm:$0x3] }
  0xdb   : > { %v3006_v55 = vmul.f32 0.25, %v3003_v22  ;;  %v436_v36 = vrot.slane %v420_v28, 2  ;;  %v446_v39 = vadd.f32 %v430_v25, %v398_v38  ;;  %v462_v46 = vmul.f32 %v457_v49, %v4185_v23  ;;  %v4244_v28 = vld [vmem:[%s3591_s16 + $0x70] sm:$0x3] }
  0xdc   : > { %v448_v59 = vadd.f32 %v432_v32, %v400_v30  ;;  %v464_v6 = vmul.f32 %v457_v49, %v4188_v35  ;;  %v450_v40 = vadd.f32 %v434_v56, %v402_v16  ;;  %v466_v1 = vmul.f32 %v457_v49, %v4191_v45 }
  0xdd   : > { %v3014_v26 = vsel %vm2996_vm2, %v3006_v55, 0.0  ;;  %v452_v58 = vadd.f32 %v436_v36, %v404_v37  ;;  %v468_v42 = vmul.f32 %v457_v49, %v4202_v52  ;;  %v478_v34 = vrot.slane %v462_v46, 3 }
  0xde   : > { %v3015_v41 = vrot.slane %v3014_v26, 4  ;;  %v480_v53 = vrot.slane %v464_v6, 3  ;;  %v482_v61 = vrot.slane %v466_v1, 3  ;;  %v505_v50 = vrot.slane %v4165_v20, %v3601_v12 }
  0xdf   : > { %v553_v33 = vrot.slane %v4165_v20, %v3603_v13  ;;  %v634_v54 = vrot.slane %v4165_v20, %v3605_v14  ;;  %v484_v27 = vrot.slane %v468_v42, 3  ;;  %v494_v29 = vadd.f32 %v478_v34, %v446_v39 }
  0xe0   : > { %v3016_v31 = vadd.f32 %v3015_v41, %v3014_v26  ;;  %v496_v62 = vadd.f32 %v480_v53, %v448_v59  ;;  %v498_v49 = vadd.f32 %v482_v61, %v450_v40  ;;  %v510_v3 = vmul.f32 %v505_v50, %v4185_v23 }
  0xe1   : > { %v512_v63 = vmul.f32 %v505_v50, %v4188_v35  ;;  %v514_v51 = vmul.f32 %v505_v50, %v4191_v45  ;;  %v500_v48 = vadd.f32 %v484_v27, %v452_v58  ;;  %v516_v2 = vmul.f32 %v505_v50, %v4202_v52 }
  0xe2   : > { %v3017_v0 = vrot.slane %v3016_v31, 2  ;;  %v558_v17 = vmul.f32 %v553_v33, %v4185_v23  ;;  %v526_v4 = vrot.slane %v510_v3, 4  ;;  %v560_v22 = vmul.f32 %v553_v33, %v282_v60 }
  0xe3   : > { %v528_v5 = vrot.slane %v512_v63, 4  ;;  %v530_v18 = vrot.slane %v514_v51, 4  ;;  %v532_v25 = vrot.slane %v516_v2, 4  ;;  %v562_v38 = vmul.f32 %v553_v33, %v4188_v35 }
  0xe4   : > { %v3018_v57 = vadd.f32 %v3017_v0, %v3016_v31  ;;  %v564_v30 = vmul.f32 %v553_v33, %v4233_v47  ;;  %v542_v16 = vadd.f32 %v526_v4, %v494_v29  ;;  %v566_v37 = vmul.f32 %v553_v33, %v4191_v45 }
  0xe5   : > { %v544_v32 = vadd.f32 %v528_v5, %v496_v62  ;;  %v546_v55 = vadd.f32 %v530_v18, %v498_v49  ;;  %v548_v36 = vadd.f32 %v532_v25, %v500_v48  ;;  %v568_v39 = vmul.f32 %v553_v33, %v4241_v24 }
  0xe6   : > { %v3019_v56 = vrot.slane %v3018_v57, 1  ;;  %v570_v59 = vmul.f32 %v553_v33, %v4202_v52  ;;  %v572_v46 = vmul.f32 %v553_v33, %v4244_v28  ;;  %v591_v6 = vrot.slane %v558_v17, 5 }
  0xe7   : > { %v592_v26 = vrot.slane %v560_v22, 5  ;;  %v597_v40 = vrot.slane %v562_v38, 5  ;;  %v598_v1 = vrot.slane %v564_v30, 5  ;;  %v603_v41 = vrot.slane %v566_v37, 5 }
  0xe8   : > { %v3020_v58 = vadd.f32 %v3019_v56, %v3018_v57  ;;  %v604_v42 = vrot.slane %v568_v39, 5  ;;  %v609_v53 = vrot.slane %v570_v59, 5  ;;  %v610_v61 = vrot.slane %v572_v46, 5 }
  0xe9   : > { %v593_v34 = vsel %vm590_vm0, %v591_v6, %v592_v26  ;;  %v639_v50 = vmul.f32 %v634_v54, %v4185_v23  ;;  %v599_v27 = vsel %vm590_vm0, %v597_v40, %v598_v1  ;;  %v641_v63 = vmul.f32 %v634_v54, %v282_v60  ;;  %v4262_v23 = vld [vmem:[%s4786_s1 + $0x10] sm:$0xff] }
  0xea   : > { %v3022_v31 = vmul.f32 0.25, %v3020_v58  ;;  %v605_v29 = vsel %vm590_vm0, %v603_v41, %v604_v42  ;;  %v623_v62 = vadd.f32 %v593_v34, %v542_v16  ;;  %v611_v33 = vsel %vm590_vm0, %v609_v53, %v610_v61 }
  0xeb   : > { %v625_v49 = vadd.f32 %v599_v27, %v544_v32  ;;  %v627_v3 = vadd.f32 %v605_v29, %v546_v55  ;;  %v629_v0 = vadd.f32 %v611_v33, %v548_v36  ;;  %v643_v48 = vmul.f32 %v634_v54, %v4188_v35  ;;  %v4270_v55 = vld [vmem:[%s3591_s16 + $0x80] sm:$0xff] }
  0xec   : > { %v3024_v51 = vpack.c.bf16 %v3022_v31, %v3022_v31  ;;  %v645_v2 = vmul.f32 %v634_v54, %v4233_v47  ;;  %v647_v17 = vmul.f32 %v634_v54, %v4191_v45  ;;  %v649_v4 = vmul.f32 %v634_v54, %v4241_v24 }
  0xed   : > { %v651_v5 = vmul.f32 %v634_v54, %v4202_v52  ;;  %v653_v60 = vmul.f32 %v634_v54, %v4244_v28  ;;  %v672_v18 = vrot.slane %v639_v50, 6  ;;  %v673_v22 = vrot.slane %v641_v63, 6 }
  0xee   : > { %3443 = vmatprep.mubr.msk.bf16.mxu0 %vm3122_vm3, %v3024_v51  ;;  %v678_v57 = vrot.slane %v643_v48, 6  ;;  %v679_v25 = vrot.slane %v645_v2, 6  ;;  %v684_v38 = vrot.slane %v647_v17, 6  ;;  %v685_v30 = vrot.slane %v649_v4, 6 }
  0xef   : > { %v690_v16 = vrot.slane %v651_v5, 6  ;;  %v691_v32 = vrot.slane %v653_v60, 6  ;;  %v674_v37 = vsel %vm671_vm1, %v672_v18, %v673_v22  ;;  %v715_v36 = vrot.slane %v4165_v20, %v3607_v15 }
  0xf0   : > { %v680_v56 = vsel %vm671_vm1, %v678_v57, %v679_v25  ;;  %v739_v54 = vrot.slane %v4262_v23, %v3593_v8  ;;  %v686_v39 = vsel %vm671_vm1, %v684_v38, %v685_v30  ;;  %v704_v46 = vadd.f32 %v674_v37, %v623_v62 }
  0xf1   : > { %v692_v59 = vsel %vm671_vm1, %v690_v16, %v691_v32  ;;  %v706_v6 = vadd.f32 %v680_v56, %v625_v49  ;;  %v708_v26 = vadd.f32 %v686_v39, %v627_v3  ;;  %v720_v58 = vmul.f32 %v715_v36, %v4188_v35 }
  0xf2   : > { %v710_v40 = vadd.f32 %v692_v59, %v629_v0  ;;  %v722_v1 = vmul.f32 %v715_v36, %v4191_v45  ;;  %v724_v41 = vmul.f32 %v715_v36, %v4202_v52  ;;  %v726_v42 = vmul.f32 %v715_v36, %v4270_v55 }
  0xf3   : > { %v744_v20 = vmul.f32 %v739_v54, %v4188_v35  ;;  %v746_v34 = vmul.f32 %v739_v54, %v4191_v45  ;;  %v728_v53 = vadd.f32 %v720_v58, %v704_v46  ;;  %v748_v50 = vmul.f32 %v739_v54, %v4202_v52 }
  0xf4   : > { %v730_v61 = vadd.f32 %v722_v1, %v706_v6  ;;  %v750_v31 = vmul.f32 %v739_v54, %v4270_v55  ;;  %v732_v27 = vadd.f32 %v724_v41, %v708_v26  ;;  %v734_v29 = vadd.f32 %v726_v42, %v710_v40 }
  0xf5   : > { %v760_v62 = vrot.slane %v744_v20, 1  ;;  %v762_v33 = vrot.slane %v746_v34, 1  ;;  %v764_v49 = vrot.slane %v748_v50, 1  ;;  %v787_v63 = vrot.slane %v4262_v23, %v3595_v9 }
  0xf6   : > { %v766_v3 = vrot.slane %v750_v31, 1  ;;  %v835_v51 = vrot.slane %v4262_v23, %v3597_v10  ;;  %v883_v2 = vrot.slane %v4262_v23, %v3599_v11  ;;  %v931_v17 = vrot.slane %v4262_v23, %v3601_v12 }
  0xf7   : > { %v776_v0 = vadd.f32 %v760_v62, %v728_v53  ;;  %v778_v48 = vadd.f32 %v762_v33, %v730_v61  ;;  %v780_v4 = vadd.f32 %v764_v49, %v732_v27  ;;  %v792_v60 = vmul.f32 %v787_v63, %v4188_v35 }
  0xf8   : > { %v782_v5 = vadd.f32 %v766_v3, %v734_v29  ;;  %v794_v18 = vmul.f32 %v787_v63, %v4191_v45  ;;  %v796_v22 = vmul.f32 %v787_v63, %v4202_v52  ;;  %v798_v57 = vmul.f32 %v787_v63, %v4270_v55  ;;  %v4309_v29 = vld [vmem:[%s3591_s16 + $0x90] sm:$0x3] }
  0xf9   : > { %v840_v25 = vmul.f32 %v835_v51, %v4188_v35  ;;  %v842_v38 = vmul.f32 %v835_v51, %v4191_v45  ;;  %v808_v30 = vrot.slane %v792_v60, 2  ;;  %v844_v32 = vmul.f32 %v835_v51, %v4202_v52 }
  0xfa   : > { %v810_v16 = vrot.slane %v794_v18, 2  ;;  %v846_v37 = vmul.f32 %v835_v51, %v4270_v55  ;;  %v812_v56 = vrot.slane %v796_v22, 2  ;;  %v814_v36 = vrot.slane %v798_v57, 2 }
  0xfb   : > { %v856_v54 = vrot.slane %v840_v25, 3  ;;  %v858_v39 = vrot.slane %v842_v38, 3  ;;  %v824_v59 = vadd.f32 %v808_v30, %v776_v0  ;;  %v860_v6 = vrot.slane %v844_v32, 3 }
  0xfc   : > { %v826_v46 = vadd.f32 %v810_v16, %v778_v48  ;;  %v862_v26 = vrot.slane %v846_v37, 3  ;;  %v828_v40 = vadd.f32 %v812_v56, %v780_v4  ;;  %v830_v58 = vadd.f32 %v814_v36, %v782_v5 }
  0xfd   : > { %v888_v1 = vmul.f32 %v883_v2, %v4188_v35  ;;  %v890_v41 = vmul.f32 %v883_v2, %v4191_v45  ;;  %v872_v42 = vadd.f32 %v856_v54, %v824_v59  ;;  %v892_v34 = vmul.f32 %v883_v2, %v4202_v52 }
  0xfe   : > { %v874_v20 = vadd.f32 %v858_v39, %v826_v46  ;;  %v894_v53 = vmul.f32 %v883_v2, %v4270_v55  ;;  %v876_v61 = vadd.f32 %v860_v6, %v828_v40  ;;  %v878_v50 = vadd.f32 %v862_v26, %v830_v58 }
  0xff   : > { %v904_v31 = vrot.slane %v888_v1, 4  ;;  %v906_v27 = vrot.slane %v890_v41, 4  ;;  %v908_v62 = vrot.slane %v892_v34, 4  ;;  %v936_v49 = vmul.f32 %v931_v17, %v4188_v35 }
 0x100   : > { %v910_v33 = vrot.slane %v894_v53, 4  ;;  %v938_v3 = vmul.f32 %v931_v17, %v4233_v47  ;;  %v940_v0 = vmul.f32 %v931_v17, %v4191_v45  ;;  %v942_v48 = vmul.f32 %v931_v17, %v4241_v24 }
 0x101   : > { %v920_v63 = vadd.f32 %v904_v31, %v872_v42  ;;  %v922_v51 = vadd.f32 %v906_v27, %v874_v20  ;;  %v924_v4 = vadd.f32 %v908_v62, %v876_v61  ;;  %v944_v5 = vmul.f32 %v931_v17, %v4202_v52 }
 0x102   : > { %v926_v2 = vadd.f32 %v910_v33, %v878_v50  ;;  %v946_v60 = vmul.f32 %v931_v17, %v4244_v28  ;;  %v948_v18 = vmul.f32 %v931_v17, %v4270_v55  ;;  %v950_v22 = vmul.f32 %v931_v17, %v4309_v29 }
 0x103   : > { %v968_v57 = vrot.slane %v936_v49, 5  ;;  %v969_v25 = vrot.slane %v938_v3, 5  ;;  %v974_v38 = vrot.slane %v940_v0, 5  ;;  %v975_v30 = vrot.slane %v942_v48, 5 }
 0x104   : > { %v980_v16 = vrot.slane %v944_v5, 5  ;;  %v981_v32 = vrot.slane %v946_v60, 5  ;;  %v986_v56 = vrot.slane %v948_v18, 5  ;;  %v987_v36 = vrot.slane %v950_v22, 5 }
 0x105   : > { %v970_v37 = vsel %vm590_vm0, %v968_v57, %v969_v25  ;;  %v1011_v54 = vrot.slane %v4262_v23, %v3603_v13  ;;  %v976_v39 = vsel %vm590_vm0, %v974_v38, %v975_v30  ;;  %v1091_v17 = vrot.slane %v4262_v23, %v3605_v14 }
 0x106   : > { %v982_v59 = vsel %vm590_vm0, %v980_v16, %v981_v32  ;;  %v1000_v46 = vadd.f32 %v970_v37, %v920_v63  ;;  %v988_v6 = vsel %vm590_vm0, %v986_v56, %v987_v36  ;;  %v1002_v26 = vadd.f32 %v976_v39, %v922_v51  ;;  %v4341_v51 = vld [vmem:[%s4786_s1 + $0x20] sm:$0xff] }
 0x107   : > { %v1004_v40 = vadd.f32 %v982_v59, %v924_v4  ;;  %v1016_v58 = vmul.f32 %v1011_v54, %v4188_v35  ;;  %v1006_v1 = vadd.f32 %v988_v6, %v926_v2  ;;  %v1018_v41 = vmul.f32 %v1011_v54, %v4233_v47  ;;  %v4336_v35 = vld [vmem:[%s3591_s16 + $0xa0] sm:$0xff] }
 0x108   : > { %v1020_v42 = vmul.f32 %v1011_v54, %v4191_v45  ;;  %v1022_v20 = vmul.f32 %v1011_v54, %v4241_v24  ;;  %v1024_v34 = vmul.f32 %v1011_v54, %v4202_v52  ;;  %v1026_v53 = vmul.f32 %v1011_v54, %v4244_v28 }
 0x109   : > { %v1028_v61 = vmul.f32 %v1011_v54, %v4270_v55  ;;  %v1030_v50 = vmul.f32 %v1011_v54, %v4309_v29  ;;  %v1048_v31 = vrot.slane %v1016_v58, 6  ;;  %v1049_v27 = vrot.slane %v1018_v41, 6 }
 0x10a   : > { %v1054_v62 = vrot.slane %v1020_v42, 6  ;;  %v1055_v33 = vrot.slane %v1022_v20, 6  ;;  %v1060_v49 = vrot.slane %v1024_v34, 6  ;;  %v1061_v47 = vrot.slane %v1026_v53, 6 }
 0x10b   : > { %v1066_v3 = vrot.slane %v1028_v61, 6  ;;  %v1067_v63 = vrot.slane %v1030_v50, 6  ;;  %v1050_v0 = vsel %vm671_vm1, %v1048_v31, %v1049_v27  ;;  %v1096_v4 = vmul.f32 %v1091_v17, %v4191_v45 }
 0x10c   : > { %v1056_v48 = vsel %vm671_vm1, %v1054_v62, %v1055_v33  ;;  %v1098_v2 = vmul.f32 %v1091_v17, %v4202_v52  ;;  %v1062_v5 = vsel %vm671_vm1, %v1060_v49, %v1061_v47  ;;  %v1080_v18 = vadd.f32 %v1050_v0, %v1000_v46 }
 0x10d   : > { %v1068_v60 = vsel %vm671_vm1, %v1066_v3, %v1067_v63  ;;  %v1082_v22 = vadd.f32 %v1056_v48, %v1002_v26  ;;  %v1084_v57 = vadd.f32 %v1062_v5, %v1004_v40  ;;  %v1100_v38 = vmul.f32 %v1091_v17, %v4270_v55 }
 0x10e   : > { %v1086_v25 = vadd.f32 %v1068_v60, %v1006_v1  ;;  %v1102_v30 = vmul.f32 %v1091_v17, %v4336_v35  ;;  %v1104_v16 = vadd.f32 %v1096_v4, %v1080_v18  ;;  %v1115_v37 = vrot.slane %v4262_v23, %v3607_v15 }
 0x10f   : > { %v1106_v32 = vadd.f32 %v1098_v2, %v1082_v22  ;;  %v1163_v56 = vrot.slane %v4341_v51, %v3593_v8  ;;  %v1108_v36 = vadd.f32 %v1100_v38, %v1084_v57  ;;  %v1211_v39 = vrot.slane %v4341_v51, %v3595_v9 }
 0x110   : > { %v1110_v54 = vadd.f32 %v1102_v30, %v1086_v25  ;;  %v1259_v59 = vrot.slane %v4341_v51, %v3597_v10  ;;  %v1120_v46 = vmul.f32 %v1115_v37, %v4191_v45  ;;  %v1122_v17 = vmul.f32 %v1115_v37, %v4202_v52 }
 0x111   : > { %v1124_v6 = vmul.f32 %v1115_v37, %v4270_v55  ;;  %v1126_v26 = vmul.f32 %v1115_v37, %v4336_v35  ;;  %v1168_v23 = vmul.f32 %v1163_v56, %v4191_v45  ;;  %v1170_v40 = vmul.f32 %v1163_v56, %v4202_v52 }
 0x112   : > { %v1172_v58 = vmul.f32 %v1163_v56, %v4270_v55  ;;  %v1174_v1 = vmul.f32 %v1163_v56, %v4336_v35  ;;  %v1136_v41 = vrot.slane %v1120_v46, 1  ;;  %v1138_v42 = vrot.slane %v1122_v17, 1 }
 0x113   : > { %v1140_v20 = vrot.slane %v1124_v6, 1  ;;  %v1142_v34 = vrot.slane %v1126_v26, 1  ;;  %v1184_v53 = vrot.slane %v1168_v23, 2  ;;  %v1186_v61 = vrot.slane %v1170_v40, 2  ;;  %v4376_v6 = vld [vmem:[%s3591_s16 + $0xb0] sm:$0x3] }
 0x114   : > { %v1188_v50 = vrot.slane %v1172_v58, 2  ;;  %v1190_v31 = vrot.slane %v1174_v1, 2  ;;  %v1152_v27 = vadd.f32 %v1136_v41, %v1104_v16  ;;  %v1154_v62 = vadd.f32 %v1138_v42, %v1106_v32 }
 0x115   : > { %v1156_v33 = vadd.f32 %v1140_v20, %v1108_v36  ;;  %v1158_v49 = vadd.f32 %v1142_v34, %v1110_v54  ;;  %v1216_v47 = vmul.f32 %v1211_v39, %v4191_v45  ;;  %v1218_v3 = vmul.f32 %v1211_v39, %v4202_v52 }
 0x116   : > { %v1220_v63 = vmul.f32 %v1211_v39, %v4270_v55  ;;  %v1222_v0 = vmul.f32 %v1211_v39, %v4336_v35  ;;  %v1200_v48 = vadd.f32 %v1184_v53, %v1152_v27  ;;  %v1202_v4 = vadd.f32 %v1186_v61, %v1154_v62 }
 0x117   : > { %v1204_v2 = vadd.f32 %v1188_v50, %v1156_v33  ;;  %v1206_v5 = vadd.f32 %v1190_v31, %v1158_v49  ;;  %v1232_v60 = vrot.slane %v1216_v47, 3  ;;  %v1234_v18 = vrot.slane %v1218_v3, 3 }
 0x118   : > { %v1236_v22 = vrot.slane %v1220_v63, 3  ;;  %v1238_v57 = vrot.slane %v1222_v0, 3  ;;  %v1264_v25 = vmul.f32 %v1259_v59, %v4191_v45  ;;  %v1266_v38 = vmul.f32 %v1259_v59, %v4202_v52 }
 0x119   : > { %v1268_v30 = vmul.f32 %v1259_v59, %v4270_v55  ;;  %v1270_v16 = vmul.f32 %v1259_v59, %v4336_v35  ;;  %v1248_v32 = vadd.f32 %v1232_v60, %v1200_v48  ;;  %v1250_v37 = vadd.f32 %v1234_v18, %v1202_v4 }
 0x11a   : > { %v1252_v56 = vadd.f32 %v1236_v22, %v1204_v2  ;;  %v1254_v36 = vadd.f32 %v1238_v57, %v1206_v5  ;;  %v1280_v54 = vrot.slane %v1264_v25, 4  ;;  %v1282_v39 = vrot.slane %v1266_v38, 4 }
 0x11b   : > { %v1284_v46 = vrot.slane %v1268_v30, 4  ;;  %v1286_v17 = vrot.slane %v1270_v16, 4  ;;  %v1307_v26 = vrot.slane %v4341_v51, %v3599_v11  ;;  %v1387_v23 = vrot.slane %v4341_v51, %v3601_v12 }
 0x11c   : > { %v1467_v40 = vrot.slane %v4341_v51, %v3603_v13  ;;  %v4386_v59 = vrot.slane %v4341_v51, %v3605_v14  ;;  %v1296_v58 = vadd.f32 %v1280_v54, %v1248_v32  ;;  %v1298_v1 = vadd.f32 %v1282_v39, %v1250_v37 }
 0x11d   : > { %v1300_v41 = vadd.f32 %v1284_v46, %v1252_v56  ;;  %v1302_v42 = vadd.f32 %v1286_v17, %v1254_v36  ;;  %v1312_v20 = vmul.f32 %v1307_v26, %v4191_v45  ;;  %v1314_v34 = vmul.f32 %v1307_v26, %v4241_v24 }
 0x11e   : > { %v1316_v53 = vmul.f32 %v1307_v26, %v4202_v52  ;;  %v1318_v61 = vmul.f32 %v1307_v26, %v4244_v28  ;;  %v1320_v50 = vmul.f32 %v1307_v26, %v4270_v55  ;;  %v1322_v31 = vmul.f32 %v1307_v26, %v4309_v29 }
 0x11f   : > { %v1324_v27 = vmul.f32 %v1307_v26, %v4336_v35  ;;  %v1326_v62 = vmul.f32 %v1307_v26, %v4376_v6  ;;  %v1344_v33 = vrot.slane %v1312_v20, 5  ;;  %v1345_v49 = vrot.slane %v1314_v34, 5  ;;  %v4409_v26 = vld [vmem:[%s3591_s16 + $0xc0] sm:$0xff] }
 0x120   : > { %v1350_v47 = vrot.slane %v1316_v53, 5  ;;  %v1351_v3 = vrot.slane %v1318_v61, 5  ;;  %v1356_v63 = vrot.slane %v1320_v50, 5  ;;  %v1357_v0 = vrot.slane %v1322_v31, 5 }
 0x121   : > { %v1362_v48 = vrot.slane %v1324_v27, 5  ;;  %v1363_v4 = vrot.slane %v1326_v62, 5  ;;  %v1346_v2 = vsel %vm590_vm0, %v1344_v33, %v1345_v49  ;;  %v1392_v60 = vmul.f32 %v1387_v23, %v4191_v45  ;;  %v4420_v62 = vld [vmem:[%s4786_s1 + $0x30] sm:$0xff] }
 0x122   : > { %v1352_v5 = vsel %vm590_vm0, %v1350_v47, %v1351_v3  ;;  %v1394_v18 = vmul.f32 %v1387_v23, %v4241_v24  ;;  %v1358_v22 = vsel %vm590_vm0, %v1356_v63, %v1357_v0  ;;  %v1376_v25 = vadd.f32 %v1346_v2, %v1296_v58 }
 0x123   : > { %v1364_v57 = vsel %vm590_vm0, %v1362_v48, %v1363_v4  ;;  %v1378_v38 = vadd.f32 %v1352_v5, %v1298_v1  ;;  %v1380_v30 = vadd.f32 %v1358_v22, %v1300_v41  ;;  %v1396_v32 = vmul.f32 %v1387_v23, %v4202_v52 }
 0x124   : > { %v1382_v16 = vadd.f32 %v1364_v57, %v1302_v42  ;;  %v1398_v37 = vmul.f32 %v1387_v23, %v4244_v28  ;;  %v1400_v56 = vmul.f32 %v1387_v23, %v4270_v55  ;;  %v1402_v36 = vmul.f32 %v1387_v23, %v4309_v29 }
 0x125   : > { %v1404_v45 = vmul.f32 %v1387_v23, %v4336_v35  ;;  %v1406_v24 = vmul.f32 %v1387_v23, %v4376_v6  ;;  %v1424_v54 = vrot.slane %v1392_v60, 6  ;;  %v1425_v39 = vrot.slane %v1394_v18, 6 }
 0x126   : > { %v1430_v46 = vrot.slane %v1396_v32, 6  ;;  %v1431_v17 = vrot.slane %v1398_v37, 6  ;;  %v1436_v58 = vrot.slane %v1400_v56, 6  ;;  %v1437_v1 = vrot.slane %v1402_v36, 6 }
 0x127   : > { %v1442_v41 = vrot.slane %v1404_v45, 6  ;;  %v1443_v42 = vrot.slane %v1406_v24, 6  ;;  %v1426_v20 = vsel %vm671_vm1, %v1424_v54, %v1425_v39  ;;  %v1472_v53 = vmul.f32 %v1467_v40, %v4202_v52 }
 0x128   : > { %v1432_v34 = vsel %vm671_vm1, %v1430_v46, %v1431_v17  ;;  %v1474_v61 = vmul.f32 %v1467_v40, %v4270_v55  ;;  %v1438_v23 = vsel %vm671_vm1, %v1436_v58, %v1437_v1  ;;  %v1456_v31 = vadd.f32 %v1426_v20, %v1376_v25 }
 0x129   : > { %v1444_v50 = vsel %vm671_vm1, %v1442_v41, %v1443_v42  ;;  %v1458_v27 = vadd.f32 %v1432_v34, %v1378_v38  ;;  %v1460_v33 = vadd.f32 %v1438_v23, %v1380_v30  ;;  %v1476_v47 = vmul.f32 %v1467_v40, %v4336_v35 }
 0x12a   : > { %v1462_v49 = vadd.f32 %v1444_v50, %v1382_v16  ;;  %v1478_v3 = vmul.f32 %v1467_v40, %v4409_v26  ;;  %v1480_v63 = vadd.f32 %v1472_v53, %v1456_v31  ;;  %v1496_v48 = vmul.f32 %v4386_v59, %v4202_v52 }
 0x12b   : > { %v1482_v0 = vadd.f32 %v1474_v61, %v1458_v27  ;;  %v1498_v4 = vmul.f32 %v4386_v59, %v4270_v55  ;;  %v1484_v2 = vadd.f32 %v1476_v47, %v1460_v33  ;;  %v1500_v60 = vmul.f32 %v4386_v59, %v4336_v35 }
 0x12c   : > { %v1486_v5 = vadd.f32 %v1478_v3, %v1462_v49  ;;  %v1502_v18 = vmul.f32 %v4386_v59, %v4409_v26  ;;  %v1512_v22 = vrot.slane %v1496_v48, 1  ;;  %v1539_v40 = vrot.slane %v4341_v51, %v3607_v15 }
 0x12d   : > { %v1514_v57 = vrot.slane %v1498_v4, 1  ;;  %v1587_v25 = vrot.slane %v4420_v62, %v3593_v8  ;;  %v1516_v38 = vrot.slane %v1500_v60, 1  ;;  %v1635_v16 = vrot.slane %v4420_v62, %v3595_v9  ;;  %v3484_v60 = vld [vmem:[%s4790_s5] ss:$8 sps:$4 sm:$0xff]  }
 0x12e   : > { %v1518_v30 = vrot.slane %v1502_v18, 1  ;;  %v1683_v32 = vrot.slane %v4420_v62, %v3597_v10  ;;  %v1528_v37 = vadd.f32 %v1512_v22, %v1480_v63  ;;  %v1544_v59 = vmul.f32 %v1539_v40, %v4202_v52  ;;  %v3485_v18 = vld [vmem:[%s4790_s5 + $0x14] ss:$8 sps:$4 sm:$0xff]   ;;  %v4462_v22 = vld [vmem:[%s3591_s16 + $0xd0] sm:$0x3] }
 0x12f   : > { %v1530_v56 = vadd.f32 %v1514_v57, %v1482_v0  ;;  %v1546_v36 = vmul.f32 %v1539_v40, %v4270_v55  ;;  %v1532_v45 = vadd.f32 %v1516_v38, %v1484_v2  ;;  %v1548_v51 = vmul.f32 %v1539_v40, %v4336_v35 }
 0x130   : > { %v1534_v24 = vadd.f32 %v1518_v30, %v1486_v5  ;;  %v1550_v54 = vmul.f32 %v1539_v40, %v4409_v26  ;;  %v1560_v39 = vrot.slane %v1544_v59, 2  ;;  %v1592_v17 = vmul.f32 %v1587_v25, %v4202_v52  ;;  %v3482_v5 = vld [vmem:[%s4790_s5 + $0x4] ss:$8 sps:$4 sm:$0xff]  }
 0x131   : > { %v1562_v46 = vrot.slane %v1546_v36, 2  ;;  %v1594_v58 = vmul.f32 %v1587_v25, %v4270_v55  ;;  %v1564_v1 = vrot.slane %v1548_v51, 2  ;;  %v1596_v42 = vmul.f32 %v1587_v25, %v4336_v35  ;;  %3220 = vmatprep.subr.bf16.mxu1 %v3482_v5 }
 0x132   : > { %v1566_v41 = vrot.slane %v1550_v54, 2  ;;  %v1598_v20 = vmul.f32 %v1587_v25, %v4409_v26  ;;  %v1576_v34 = vadd.f32 %v1560_v39, %v1528_v37  ;;  %v1608_v61 = vrot.slane %v1592_v17, 3  ;;  %3221 = vmatpush1.bf16.msra.mxu1 %v3484_v60 }
 0x133   : > { %v1578_v53 = vadd.f32 %v1562_v46, %v1530_v56  ;;  %v1610_v23 = vrot.slane %v1594_v58, 3  ;;  %v1580_v50 = vadd.f32 %v1564_v1, %v1532_v45  ;;  %v1612_v27 = vrot.slane %v1596_v42, 3  ;;  %3222 = vmatprep.subr.bf16.mxu1 %v3485_v18 }
 0x134   : > { %v1582_v31 = vadd.f32 %v1566_v41, %v1534_v24  ;;  %v1614_v33 = vrot.slane %v1598_v20, 3  ;;  %v1624_v49 = vadd.f32 %v1608_v61, %v1576_v34  ;;  %v1640_v3 = vmul.f32 %v1635_v16, %v4202_v52 }
 0x135   : > { %v1626_v47 = vadd.f32 %v1610_v23, %v1578_v53  ;;  %v1642_v63 = vmul.f32 %v1635_v16, %v4270_v55  ;;  %v1628_v0 = vadd.f32 %v1612_v27, %v1580_v50  ;;  %v1644_v4 = vmul.f32 %v1635_v16, %v4336_v35 }
 0x136   : > { %v1630_v48 = vadd.f32 %v1614_v33, %v1582_v31  ;;  %v1646_v2 = vmul.f32 %v1635_v16, %v4409_v26  ;;  %v1656_v57 = vrot.slane %v1640_v3, 4  ;;  %v1688_v25 = vmul.f32 %v1683_v32, %v4202_v52 }
 0x137   : > { %v1658_v40 = vrot.slane %v1642_v63, 4  ;;  %v1690_v38 = vmul.f32 %v1683_v32, %v4244_v28  ;;  %v1660_v30 = vrot.slane %v1644_v4, 4  ;;  %v1692_v37 = vmul.f32 %v1683_v32, %v4270_v55 }
 0x138   : > { %v1662_v16 = vrot.slane %v1646_v2, 4  ;;  %v1694_v56 = vmul.f32 %v1683_v32, %v4309_v29  ;;  %v1672_v59 = vadd.f32 %v1656_v57, %v1624_v49  ;;  %v1696_v45 = vmul.f32 %v1683_v32, %v4336_v35 }
 0x139   : > { %v1674_v36 = vadd.f32 %v1658_v40, %v1626_v47  ;;  %v1698_v24 = vmul.f32 %v1683_v32, %v4376_v6  ;;  %v1676_v51 = vadd.f32 %v1660_v30, %v1628_v0  ;;  %v1700_v39 = vmul.f32 %v1683_v32, %v4409_v26 }
 0x13a   : > { %v1678_v54 = vadd.f32 %v1662_v16, %v1630_v48  ;;  %v1702_v46 = vmul.f32 %v1683_v32, %v4462_v22  ;;  %v1720_v17 = vrot.slane %v1688_v25, 5  ;;  %v1721_v58 = vrot.slane %v1690_v38, 5  ;;  %v4489_v16 = vld [vmem:[%s3591_s16 + $0xe0] sm:$0xff] }
 0x13b   : > { %v1726_v1 = vrot.slane %v1692_v37, 5  ;;  %v1727_v41 = vrot.slane %v1694_v56, 5  ;;  %v1732_v42 = vrot.slane %v1696_v45, 5  ;;  %v1733_v20 = vrot.slane %v1698_v24, 5 }
 0x13c   : > { %v1738_v34 = vrot.slane %v1700_v39, 5  ;;  %v1739_v53 = vrot.slane %v1702_v46, 5  ;;  %v1722_v61 = vsel %vm590_vm0, %v1720_v17, %v1721_v58  ;;  %v1763_v50 = vrot.slane %v4420_v62, %v3599_v11 }
 0x13d   : > { %v1728_v23 = vsel %vm590_vm0, %v1726_v1, %v1727_v41  ;;  %v1843_v31 = vrot.slane %v4420_v62, %v3601_v12  ;;  %v1734_v32 = vsel %vm590_vm0, %v1732_v42, %v1733_v20  ;;  %v1752_v33 = vadd.f32 %v1722_v61, %v1672_v59 }
 0x13e   : > { %v1740_v27 = vsel %vm590_vm0, %v1738_v34, %v1739_v53  ;;  %v1754_v49 = vadd.f32 %v1728_v23, %v1674_v36  ;;  %v1756_v47 = vadd.f32 %v1734_v32, %v1676_v51  ;;  %v1768_v63 = vmul.f32 %v1763_v50, %v4202_v52 }
 0x13f   : > { %v1758_v3 = vadd.f32 %v1740_v27, %v1678_v54  ;;  %v1770_v0 = vmul.f32 %v1763_v50, %v4244_v28  ;;  %v1772_v48 = vmul.f32 %v1763_v50, %v4270_v55  ;;  %v1774_v4 = vmul.f32 %v1763_v50, %v4309_v29 }
 0x140   : > { %v1776_v2 = vmul.f32 %v1763_v50, %v4336_v35  ;;  %v1778_v5 = vmul.f32 %v1763_v50, %v4376_v6  ;;  %v1780_v60 = vmul.f32 %v1763_v50, %v4409_v26  ;;  %v1782_v18 = vmul.f32 %v1763_v50, %v4462_v22 }
 0x141   : > { %v1800_v57 = vrot.slane %v1768_v63, 6  ;;  %v1801_v40 = vrot.slane %v1770_v0, 6  ;;  %v1806_v25 = vrot.slane %v1772_v48, 6  ;;  %v1807_v38 = vrot.slane %v1774_v4, 6 }
 0x142   : > { %v1812_v30 = vrot.slane %v1776_v2, 6  ;;  %v1813_v52 = vrot.slane %v1778_v5, 6  ;;  %v1818_v37 = vrot.slane %v1780_v60, 6  ;;  %v1819_v56 = vrot.slane %v1782_v18, 6 }
 0x143   : > { %v1802_v28 = vsel %vm671_vm1, %v1800_v57, %v1801_v40  ;;  %v1848_v59 = vmul.f32 %v1843_v31, %v4270_v55  ;;  %v1808_v36 = vsel %vm671_vm1, %v1806_v25, %v1807_v38  ;;  %v1850_v51 = vmul.f32 %v1843_v31, %v4336_v35  ;;  %v4516_v25 = vld [vmem:[%s4786_s1 + $0x40] sm:$0xff] }
 0x144   : > { %v1814_v45 = vsel %vm671_vm1, %v1812_v30, %v1813_v52  ;;  %v1832_v24 = vadd.f32 %v1802_v28, %v1752_v33  ;;  %v1820_v54 = vsel %vm671_vm1, %v1818_v37, %v1819_v56  ;;  %v1834_v39 = vadd.f32 %v1808_v36, %v1754_v49 }
 0x145   : > { %v1836_v46 = vadd.f32 %v1814_v45, %v1756_v47  ;;  %v1852_v17 = vmul.f32 %v1843_v31, %v4409_v26  ;;  %v1838_v58 = vadd.f32 %v1820_v54, %v1758_v3  ;;  %v1854_v1 = vmul.f32 %v1843_v31, %v4489_v16 }
 0x146   : > { %v1856_v41 = vadd.f32 %v1848_v59, %v1832_v24  ;;  %v1867_v42 = vrot.slane %v4420_v62, %v3603_v13  ;;  %v1858_v20 = vadd.f32 %v1850_v51, %v1834_v39  ;;  %v1915_v53 = vrot.slane %v4420_v62, %v3605_v14 }
 0x147   : > { %v1860_v34 = vadd.f32 %v1852_v17, %v1836_v46  ;;  %v1963_v61 = vrot.slane %v4420_v62, %v3607_v15  ;;  %v1862_v23 = vadd.f32 %v1854_v1, %v1838_v58  ;;  %v2011_v46 = vrot.slane %v4516_v25, %v3593_v8 }
 0x148   : > { %v1872_v50 = vmul.f32 %v1867_v42, %v4270_v55  ;;  %v1874_v32 = vmul.f32 %v1867_v42, %v4336_v35  ;;  %v1876_v27 = vmul.f32 %v1867_v42, %v4409_v26  ;;  %v1878_v31 = vmul.f32 %v1867_v42, %v4489_v16 }
 0x149   : > { %v1920_v33 = vmul.f32 %v1915_v53, %v4270_v55  ;;  %v1922_v49 = vmul.f32 %v1915_v53, %v4336_v35  ;;  %v1924_v47 = vmul.f32 %v1915_v53, %v4409_v26  ;;  %v1926_v62 = vmul.f32 %v1915_v53, %v4489_v16 }
 0x14a   : > { %v1888_v3 = vrot.slane %v1872_v50, 1  ;;  %v1890_v63 = vrot.slane %v1874_v32, 1  ;;  %v1892_v0 = vrot.slane %v1876_v27, 1  ;;  %v1894_v48 = vrot.slane %v1878_v31, 1  ;;  %v4536_v50 = vld [vmem:[%s3591_s16 + $0xf0] sm:$0x3] }
 0x14b   : > { %v1936_v4 = vrot.slane %v1920_v33, 2  ;;  %v1938_v2 = vrot.slane %v1922_v49, 2  ;;  %v1940_v5 = vrot.slane %v1924_v47, 2  ;;  %v1942_v40 = vrot.slane %v1926_v62, 2 }
 0x14c   : > { %v1904_v60 = vadd.f32 %v1888_v3, %v1856_v41  ;;  %v1906_v18 = vadd.f32 %v1890_v63, %v1858_v20  ;;  %v1908_v57 = vadd.f32 %v1892_v0, %v1860_v34  ;;  %v1910_v38 = vadd.f32 %v1894_v48, %v1862_v23 }
 0x14d   : > { %v1968_v30 = vmul.f32 %v1963_v61, %v4270_v55  ;;  %v1970_v52 = vmul.f32 %v1963_v61, %v4336_v35  ;;  %v1972_v28 = vmul.f32 %v1963_v61, %v4409_v26  ;;  %v1974_v36 = vmul.f32 %v1963_v61, %v4489_v16 }
 0x14e   : > { %v1952_v37 = vadd.f32 %v1936_v4, %v1904_v60  ;;  %v1954_v56 = vadd.f32 %v1938_v2, %v1906_v18  ;;  %v1956_v59 = vadd.f32 %v1940_v5, %v1908_v57  ;;  %v1958_v45 = vadd.f32 %v1942_v40, %v1910_v38 }
 0x14f   : > { %v1984_v24 = vrot.slane %v1968_v30, 3  ;;  %v1986_v51 = vrot.slane %v1970_v52, 3  ;;  %v1988_v54 = vrot.slane %v1972_v28, 3  ;;  %v1990_v39 = vrot.slane %v1974_v36, 3 }
 0x150   : > { %v2059_v17 = vrot.slane %v4516_v25, %v3595_v9  ;;  %v2139_v58 = vrot.slane %v4516_v25, %v3597_v10  ;;  %v4530_v20 = vrot.slane %v4516_v25, %v3599_v11  ;;  %v2016_v53 = vmul.f32 %v2011_v46, %v4270_v55 }
 0x151   : > { %v2000_v1 = vadd.f32 %v1984_v24, %v1952_v37  ;;  %v2002_v41 = vadd.f32 %v1986_v51, %v1954_v56  ;;  %v2004_v42 = vadd.f32 %v1988_v54, %v1956_v59  ;;  %v2006_v34 = vadd.f32 %v1990_v39, %v1958_v45 }
 0x152   : > { %v2018_v61 = vmul.f32 %v2011_v46, %v4336_v35  ;;  %v2020_v23 = vmul.f32 %v2011_v46, %v4409_v26  ;;  %v2022_v32 = vmul.f32 %v2011_v46, %v4489_v16  ;;  %v2064_v27 = vmul.f32 %v2059_v17, %v4270_v55 }
 0x153   : > { %v2066_v31 = vmul.f32 %v2059_v17, %v4309_v29  ;;  %v2068_v33 = vmul.f32 %v2059_v17, %v4336_v35  ;;  %v2032_v49 = vrot.slane %v2016_v53, 4  ;;  %v2070_v63 = vmul.f32 %v2059_v17, %v4376_v6 }
 0x154   : > { %v2034_v47 = vrot.slane %v2018_v61, 4  ;;  %v2036_v3 = vrot.slane %v2020_v23, 4  ;;  %v2038_v0 = vrot.slane %v2022_v32, 4  ;;  %v2072_v62 = vmul.f32 %v2059_v17, %v4409_v26 }
 0x155   : > { %v2074_v48 = vmul.f32 %v2059_v17, %v4462_v22  ;;  %v2076_v4 = vmul.f32 %v2059_v17, %v4489_v16  ;;  %v2048_v2 = vadd.f32 %v2032_v49, %v2000_v1  ;;  %v2078_v18 = vmul.f32 %v2059_v17, %v4536_v50 }
 0x156   : > { %v2050_v5 = vadd.f32 %v2034_v47, %v2002_v41  ;;  %v2052_v60 = vadd.f32 %v2036_v3, %v2004_v42  ;;  %v2054_v57 = vadd.f32 %v2038_v0, %v2006_v34  ;;  %v2096_v40 = vrot.slane %v2064_v27, 5 }
 0x157   : > { %v2097_v38 = vrot.slane %v2066_v31, 5  ;;  %v2102_v30 = vrot.slane %v2068_v33, 5  ;;  %v2103_v52 = vrot.slane %v2070_v63, 5  ;;  %v2108_v28 = vrot.slane %v2072_v62, 5  ;;  %v4560_v31 = vld [vmem:[%s3591_s16 + $0x100] sm:$0xff] }
 0x158   : > { %v2109_v37 = vrot.slane %v2074_v48, 5  ;;  %v2114_v56 = vrot.slane %v2076_v4, 5  ;;  %v2115_v36 = vrot.slane %v2078_v18, 5  ;;  %v2144_v45 = vmul.f32 %v2139_v58, %v4270_v55 }
 0x159   : > { %v2098_v59 = vsel %vm590_vm0, %v2096_v40, %v2097_v38  ;;  %v2146_v24 = vmul.f32 %v2139_v58, %v4309_v29  ;;  %v2104_v51 = vsel %vm590_vm0, %v2102_v30, %v2103_v52  ;;  %v2148_v46 = vmul.f32 %v2139_v58, %v4336_v35 }
 0x15a   : > { %v2110_v54 = vsel %vm590_vm0, %v2108_v28, %v2109_v37  ;;  %v2128_v39 = vadd.f32 %v2098_v59, %v2048_v2  ;;  %v2116_v17 = vsel %vm590_vm0, %v2114_v56, %v2115_v36  ;;  %v2130_v1 = vadd.f32 %v2104_v51, %v2050_v5 }
 0x15b   : > { %v2132_v41 = vadd.f32 %v2110_v54, %v2052_v60  ;;  %v2150_v42 = vmul.f32 %v2139_v58, %v4376_v6  ;;  %v2134_v34 = vadd.f32 %v2116_v17, %v2054_v57  ;;  %v2152_v53 = vmul.f32 %v2139_v58, %v4409_v26 }
 0x15c   : > { %v2154_v55 = vmul.f32 %v2139_v58, %v4462_v22  ;;  %v2156_v29 = vmul.f32 %v2139_v58, %v4489_v16  ;;  %v2158_v61 = vmul.f32 %v2139_v58, %v4536_v50  ;;  %v2176_v23 = vrot.slane %v2144_v45, 6 }
 0x15d   : > { %v2177_v32 = vrot.slane %v2146_v24, 6  ;;  %v2182_v27 = vrot.slane %v2148_v46, 6  ;;  %v2183_v33 = vrot.slane %v2150_v42, 6  ;;  %v2188_v49 = vrot.slane %v2152_v53, 6 }
 0x15e   : > { %v2189_v47 = vrot.slane %v2154_v55, 6  ;;  %v2194_v3 = vrot.slane %v2156_v29, 6  ;;  %v2195_v0 = vrot.slane %v2158_v61, 6  ;;  %v2224_v62 = vmul.f32 %v4530_v20, %v4336_v35 }
 0x15f   : > { %v2178_v63 = vsel %vm671_vm1, %v2176_v23, %v2177_v32  ;;  %v2226_v48 = vmul.f32 %v4530_v20, %v4409_v26  ;;  %v2184_v58 = vsel %vm671_vm1, %v2182_v27, %v2183_v33  ;;  %v2228_v5 = vmul.f32 %v4530_v20, %v4489_v16 }
 0x160   : > { %v2190_v4 = vsel %vm671_vm1, %v2188_v49, %v2189_v47  ;;  %v2208_v2 = vadd.f32 %v2178_v63, %v2128_v39  ;;  %v2196_v60 = vsel %vm671_vm1, %v2194_v3, %v2195_v0  ;;  %v2210_v18 = vadd.f32 %v2184_v58, %v2130_v1 }
 0x161   : > { %v2212_v57 = vadd.f32 %v2190_v4, %v2132_v41  ;;  %v2230_v40 = vmul.f32 %v4530_v20, %v4560_v31  ;;  %v2214_v38 = vadd.f32 %v2196_v60, %v2134_v34  ;;  %v2243_v52 = vrot.slane %v4516_v25, %v3601_v12  ;;  %v4597_v60 = vld [vmem:[%s4786_s1 + $0x50] sm:$0xff] }
 0x162   : > { %v2232_v30 = vadd.f32 %v2224_v62, %v2208_v2  ;;  %v2291_v28 = vrot.slane %v4516_v25, %v3603_v13  ;;  %v2234_v37 = vadd.f32 %v2226_v48, %v2210_v18  ;;  %v2339_v59 = vrot.slane %v4516_v25, %v3605_v14 }
 0x163   : > { %v2236_v56 = vadd.f32 %v2228_v5, %v2212_v57  ;;  %v2387_v36 = vrot.slane %v4516_v25, %v3607_v15  ;;  %v2238_v45 = vadd.f32 %v2230_v40, %v2214_v38  ;;  %v2248_v24 = vmul.f32 %v2243_v52, %v4336_v35 }
 0x164   : > { %v2250_v20 = vmul.f32 %v2243_v52, %v4409_v26  ;;  %v2252_v51 = vmul.f32 %v2243_v52, %v4489_v16  ;;  %v2254_v54 = vmul.f32 %v2243_v52, %v4560_v31  ;;  %v2296_v39 = vmul.f32 %v2291_v28, %v4336_v35 }
 0x165   : > { %v2298_v46 = vmul.f32 %v2291_v28, %v4409_v26  ;;  %v2300_v17 = vmul.f32 %v2291_v28, %v4489_v16  ;;  %v2264_v1 = vrot.slane %v2248_v24, 1  ;;  %v2302_v25 = vmul.f32 %v2291_v28, %v4560_v31 }
 0x166   : > { %v2266_v41 = vrot.slane %v2250_v20, 1  ;;  %v2268_v42 = vrot.slane %v2252_v51, 1  ;;  %v2270_v34 = vrot.slane %v2254_v54, 1  ;;  %v2312_v53 = vrot.slane %v2296_v39, 2 }
 0x167   : > { %v2314_v55 = vrot.slane %v2298_v46, 2  ;;  %v2316_v29 = vrot.slane %v2300_v17, 2  ;;  %v2280_v61 = vadd.f32 %v2264_v1, %v2232_v30  ;;  %v2318_v27 = vrot.slane %v2302_v25, 2  ;;  %v4610_v46 = vld [vmem:[%s3591_s16 + $0x110] sm:$0x3] }
 0x168   : > { %v2282_v23 = vadd.f32 %v2266_v41, %v2234_v37  ;;  %v2284_v32 = vadd.f32 %v2268_v42, %v2236_v56  ;;  %v2286_v33 = vadd.f32 %v2270_v34, %v2238_v45  ;;  %v2344_v49 = vmul.f32 %v2339_v59, %v4336_v35 }
 0x169   : > { %v2346_v47 = vmul.f32 %v2339_v59, %v4409_v26  ;;  %v2348_v3 = vmul.f32 %v2339_v59, %v4489_v16  ;;  %v2328_v63 = vadd.f32 %v2312_v53, %v2280_v61  ;;  %v2350_v48 = vmul.f32 %v2339_v59, %v4560_v31 }
 0x16a   : > { %v2330_v0 = vadd.f32 %v2314_v55, %v2282_v23  ;;  %v2332_v62 = vadd.f32 %v2316_v29, %v2284_v32  ;;  %v2334_v58 = vadd.f32 %v2318_v27, %v2286_v33  ;;  %v2360_v4 = vrot.slane %v2344_v49, 3 }
 0x16b   : > { %v2362_v2 = vrot.slane %v2346_v47, 3  ;;  %v2364_v5 = vrot.slane %v2348_v3, 3  ;;  %v2366_v18 = vrot.slane %v2350_v48, 3  ;;  %v2392_v57 = vmul.f32 %v2387_v36, %v4336_v35 }
 0x16c   : > { %v2394_v40 = vmul.f32 %v2387_v36, %v4409_v26  ;;  %v2396_v38 = vmul.f32 %v2387_v36, %v4489_v16  ;;  %v2376_v30 = vadd.f32 %v2360_v4, %v2328_v63  ;;  %v2398_v37 = vmul.f32 %v2387_v36, %v4560_v31 }
 0x16d   : > { %v2378_v52 = vadd.f32 %v2362_v2, %v2330_v0  ;;  %v2380_v28 = vadd.f32 %v2364_v5, %v2332_v62  ;;  %v2382_v56 = vadd.f32 %v2366_v18, %v2334_v58  ;;  %v2408_v59 = vrot.slane %v2392_v57, 4 }
 0x16e   : > { %v2410_v45 = vrot.slane %v2394_v40, 4  ;;  %v2412_v24 = vrot.slane %v2396_v38, 4  ;;  %v2414_v20 = vrot.slane %v2398_v37, 4  ;;  %v2435_v51 = vrot.slane %v4597_v60, %v3593_v8 }
 0x16f   : > { %v2515_v54 = vrot.slane %v4597_v60, %v3595_v9  ;;  %v2595_v39 = vrot.slane %v4597_v60, %v3597_v10  ;;  %v2424_v17 = vadd.f32 %v2408_v59, %v2376_v30  ;;  %v2619_v36 = vrot.slane %v4597_v60, %v3599_v11 }
 0x170   : > { %v2426_v1 = vadd.f32 %v2410_v45, %v2378_v52  ;;  %v2428_v41 = vadd.f32 %v2412_v24, %v2380_v28  ;;  %v2430_v42 = vadd.f32 %v2414_v20, %v2382_v56  ;;  %v2440_v25 = vmul.f32 %v2435_v51, %v4336_v35  ;;  %v4635_v45 = vld [vmem:[%s3591_s16 + $0x120] sm:$0xff] }
 0x171   : > { %v2442_v34 = vmul.f32 %v2435_v51, %v4376_v6  ;;  %v2444_v53 = vmul.f32 %v2435_v51, %v4409_v26  ;;  %v2446_v55 = vmul.f32 %v2435_v51, %v4462_v22  ;;  %v2448_v29 = vmul.f32 %v2435_v51, %v4489_v16 }
 0x172   : > { %v2450_v10 = vmul.f32 %v2435_v51, %v4536_v50  ;;  %v2452_v61 = vmul.f32 %v2435_v51, %v4560_v31  ;;  %v2454_v23 = vmul.f32 %v2435_v51, %v4610_v46  ;;  %v2472_v32 = vrot.slane %v2440_v25, 5 }
 0x173   : > { %v2473_v27 = vrot.slane %v2442_v34, 5  ;;  %v2478_v11 = vrot.slane %v2444_v53, 5  ;;  %v2479_v33 = vrot.slane %v2446_v55, 5  ;;  %v2484_v49 = vrot.slane %v2448_v29, 5 }
 0x174   : > { %v2485_v47 = vrot.slane %v2450_v10, 5  ;;  %v2490_v3 = vrot.slane %v2452_v61, 5  ;;  %v2491_v0 = vrot.slane %v2454_v23, 5  ;;  %v2520_v62 = vmul.f32 %v2515_v54, %v4336_v35 }
 0x175   : > { %v2474_v63 = vsel %vm590_vm0, %v2472_v32, %v2473_v27  ;;  %v2522_v48 = vmul.f32 %v2515_v54, %v4376_v6  ;;  %v2480_v58 = vsel %vm590_vm0, %v2478_v11, %v2479_v33  ;;  %v2524_v5 = vmul.f32 %v2515_v54, %v4409_v26 }
 0x176   : > { %v2486_v4 = vsel %vm590_vm0, %v2484_v49, %v2485_v47  ;;  %v2504_v2 = vadd.f32 %v2474_v63, %v2424_v17  ;;  %v2492_v18 = vsel %vm590_vm0, %v2490_v3, %v2491_v0  ;;  %v2506_v57 = vadd.f32 %v2480_v58, %v2426_v1 }
 0x177   : > { %v2508_v40 = vadd.f32 %v2486_v4, %v2428_v41  ;;  %v2526_v38 = vmul.f32 %v2515_v54, %v4462_v22  ;;  %v2510_v30 = vadd.f32 %v2492_v18, %v2430_v42  ;;  %v2528_v52 = vmul.f32 %v2515_v54, %v4489_v16 }
 0x178   : > { %v2530_v35 = vmul.f32 %v2515_v54, %v4536_v50  ;;  %v2532_v6 = vmul.f32 %v2515_v54, %v4560_v31  ;;  %v2534_v28 = vmul.f32 %v2515_v54, %v4610_v46  ;;  %v2552_v37 = vrot.slane %v2520_v62, 6 }
 0x179   : > { %v2553_v56 = vrot.slane %v2522_v48, 6  ;;  %v2558_v59 = vrot.slane %v2524_v5, 6  ;;  %v2559_v24 = vrot.slane %v2526_v38, 6  ;;  %v2564_v20 = vrot.slane %v2528_v52, 6 }
 0x17a   : > { %v2565_v51 = vrot.slane %v2530_v35, 6  ;;  %v2570_v17 = vrot.slane %v2532_v6, 6  ;;  %v2571_v41 = vrot.slane %v2534_v28, 6  ;;  %v2600_v42 = vmul.f32 %v2595_v39, %v4409_v26 }
 0x17b   : > { %v2554_v1 = vsel %vm671_vm1, %v2552_v37, %v2553_v56  ;;  %v2602_v25 = vmul.f32 %v2595_v39, %v4489_v16  ;;  %v2560_v34 = vsel %vm671_vm1, %v2558_v59, %v2559_v24  ;;  %v2604_v55 = vmul.f32 %v2595_v39, %v4560_v31 }
 0x17c   : > { %v2566_v54 = vsel %vm671_vm1, %v2564_v20, %v2565_v51  ;;  %v2584_v53 = vadd.f32 %v2554_v1, %v2504_v2  ;;  %v2572_v29 = vsel %vm671_vm1, %v2570_v17, %v2571_v41  ;;  %v2586_v10 = vadd.f32 %v2560_v34, %v2506_v57  ;;  %v3429_v1 = vld [vmem:[%s4786_s1 + $0x60] ss:$0 sm:$0xff] }
 0x17d   : > { %v2588_v61 = vadd.f32 %v2566_v54, %v2508_v40  ;;  %v2606_v23 = vmul.f32 %v2595_v39, %v4635_v45  ;;  %v2590_v32 = vadd.f32 %v2572_v29, %v2510_v30  ;;  %v2624_v11 = vmul.f32 %v2619_v36, %v4409_v26 }
 0x17e   : > { %v2608_v27 = vadd.f32 %v2600_v42, %v2584_v53  ;;  %v2626_v33 = vmul.f32 %v2619_v36, %v4489_v16  ;;  %v2610_v49 = vadd.f32 %v2602_v25, %v2586_v10  ;;  %v2628_v3 = vmul.f32 %v2619_v36, %v4560_v31 }
 0x17f   : > { %v2612_v47 = vadd.f32 %v2604_v55, %v2588_v61  ;;  %v2630_v63 = vmul.f32 %v2619_v36, %v4635_v45  ;;  %v2614_v0 = vadd.f32 %v2606_v23, %v2590_v32  ;;  %v2640_v62 = vrot.slane %v2624_v11, 1 }
 0x180   : > { %v2642_v48 = vrot.slane %v2626_v33, 1  ;;  %v2667_v58 = vrot.slane %v4597_v60, %v3601_v12  ;;  %v2644_v4 = vrot.slane %v2628_v3, 1  ;;  %v2715_v2 = vrot.slane %v4597_v60, %v3603_v13 }
 0x181   : > { %v2646_v39 = vrot.slane %v2630_v63, 1  ;;  %v2763_v5 = vrot.slane %v4597_v60, %v3605_v14  ;;  %v2656_v18 = vadd.f32 %v2640_v62, %v2608_v27  ;;  %v2811_v33 = vrot.slane %v4597_v60, %v3607_v15 }
 0x182   : > { %v2658_v57 = vadd.f32 %v2642_v48, %v2610_v49  ;;  %v2672_v40 = vmul.f32 %v2667_v58, %v4409_v26  ;;  %v2674_v36 = vmul.f32 %v2667_v58, %v4489_v16  ;;  %v2660_v38 = vadd.f32 %v2644_v4, %v2612_v47  ;;  %v318_v47 = vld [vmem:[%s3591_s16 + $0x130] sm:$0x3] }
 0x183   : > { %v2662_v30 = vadd.f32 %v2646_v39, %v2614_v0  ;;  %v2676_v52 = vmul.f32 %v2667_v58, %v4560_v31  ;;  %v2678_v12 = vmul.f32 %v2667_v58, %v4635_v45  ;;  %v2720_v28 = vmul.f32 %v2715_v2, %v4409_v26 }
 0x184   : > { %v2688_v35 = vrot.slane %v2672_v40, 2  ;;  %v2690_v6 = vrot.slane %v2674_v36, 2  ;;  %v2722_v13 = vmul.f32 %v2715_v2, %v4489_v16  ;;  %v2724_v56 = vmul.f32 %v2715_v2, %v4560_v31 }
 0x185   : > { %v2692_v37 = vrot.slane %v2676_v52, 2  ;;  %v2694_v14 = vrot.slane %v2678_v12, 2  ;;  %v2726_v59 = vmul.f32 %v2715_v2, %v4635_v45  ;;  %v2736_v51 = vrot.slane %v2720_v28, 3 }
 0x186   : > { %v2704_v24 = vadd.f32 %v2688_v35, %v2656_v18  ;;  %v2706_v20 = vadd.f32 %v2690_v6, %v2658_v57  ;;  %v2738_v17 = vrot.slane %v2722_v13, 3  ;;  %v2740_v25 = vrot.slane %v2724_v56, 3 }
 0x187   : > { %v2708_v41 = vadd.f32 %v2692_v37, %v2660_v38  ;;  %v2710_v42 = vadd.f32 %v2694_v14, %v2662_v30  ;;  %v2742_v34 = vrot.slane %v2726_v59, 3  ;;  %v2768_v55 = vmul.f32 %v2763_v5, %v4409_v26 }
 0x188   : > { %v2752_v54 = vadd.f32 %v2736_v51, %v2704_v24  ;;  %v2754_v53 = vadd.f32 %v2738_v17, %v2706_v20  ;;  %v2770_v29 = vmul.f32 %v2763_v5, %v4489_v16  ;;  %v2772_v23 = vmul.f32 %v2763_v5, %v4560_v31 }
 0x189   : > { %v2756_v10 = vadd.f32 %v2740_v25, %v2708_v41  ;;  %v2758_v61 = vadd.f32 %v2742_v34, %v2710_v42  ;;  %v2774_v32 = vmul.f32 %v2763_v5, %v4635_v45  ;;  %v2784_v27 = vrot.slane %v2768_v55, 4 }
 0x18a   : > { %v2786_v11 = vrot.slane %v2770_v29, 4  ;;  %v2896_v49 = vmul.f32 %v3429_v1, %v4409_v26  ;;  %v2788_v3 = vrot.slane %v2772_v23, 4  ;;  %v2898_v0 = vmul.f32 %v3429_v1, %v4462_v22 }
 0x18b   : > { %v2790_v63 = vrot.slane %v2774_v32, 4  ;;  %v2900_v62 = vmul.f32 %v3429_v1, %v4489_v16  ;;  %v2800_v48 = vadd.f32 %v2784_v27, %v2752_v54  ;;  %v2816_v4 = vmul.f32 %v2811_v33, %v4409_v26 }
 0x18c   : > { %v2802_v58 = vadd.f32 %v2786_v11, %v2754_v53  ;;  %v2818_v39 = vmul.f32 %v2811_v33, %v4462_v22  ;;  %v2804_v2 = vadd.f32 %v2788_v3, %v2756_v10  ;;  %v2820_v18 = vmul.f32 %v2811_v33, %v4489_v16 }
 0x18d   : > { %v2806_v5 = vadd.f32 %v2790_v63, %v2758_v61  ;;  %v2822_v15 = vmul.f32 %v2811_v33, %v4536_v50  ;;  %v2824_v60 = vmul.f32 %v2811_v33, %v4560_v31  ;;  %v2826_v57 = vmul.f32 %v2811_v33, %v4610_v46 }
 0x18e   : > { %v2828_v40 = vmul.f32 %v2811_v33, %v4635_v45  ;;  %v2830_v36 = vmul.f32 %v2811_v33, %v318_v47  ;;  %v2848_v38 = vrot.slane %v2816_v4, 5  ;;  %v2849_v30 = vrot.slane %v2818_v39, 5 }
 0x18f   : > { %v2854_v52 = vrot.slane %v2820_v18, 5  ;;  %v2855_v12 = vrot.slane %v2822_v15, 5  ;;  %v2860_v26 = vrot.slane %v2824_v60, 5  ;;  %v2861_v35 = vrot.slane %v2826_v57, 5 }
 0x190   : > { %v2866_v22 = vrot.slane %v2828_v40, 5  ;;  %v2867_v6 = vrot.slane %v2830_v36, 5  ;;  %v2850_v28 = vsel %vm590_vm0, %v2848_v38, %v2849_v30  ;;  %v2902_v13 = vmul.f32 %v3429_v1, %v4536_v50  ;;  %v3487_v38 = vld [vmem:[%s4790_s5 + $0x10] ss:$8 sps:$4 sm:$0xff]   ;;  %v3488_v30 = vld [vmem:[%s4790_s5 + $0x24] ss:$8 sps:$4 sm:$0xff]  }
 0x191   : > { %v2856_v16 = vsel %vm590_vm0, %v2854_v52, %v2855_v12  ;;  %v2904_v37 = vmul.f32 %v3429_v1, %v4560_v31  ;;  %v2862_v14 = vsel %vm590_vm0, %v2860_v26, %v2861_v35  ;;  %v2880_v59 = vadd.f32 %v2850_v28, %v2800_v48  ;;  %3223 = vmatpush1.bf16.msra.mxu1 %v3487_v38  ;;  %v3490_v52 = vld [vmem:[%s4790_s5 + $0x20] ss:$8 sps:$4 sm:$0xff]  }
 0x192   : > { %v2868_v56 = vsel %vm590_vm0, %v2866_v22, %v2867_v6  ;;  %v2882_v24 = vadd.f32 %v2856_v16, %v2802_v58  ;;  %v2884_v20 = vadd.f32 %v2862_v14, %v2804_v2  ;;  %v2906_v17 = vmul.f32 %v3429_v1, %v4610_v46  ;;  %3224 = vmatprep.subr.bf16.mxu1 %v3488_v30  ;;  %v3049_v12 = vld [vmem:[%s4789_s4] sm:$0x1] }
 0x193   : > { %v2886_v51 = vadd.f32 %v2868_v56, %v2806_v5  ;;  %v2908_v41 = vmul.f32 %v3429_v1, %v4635_v45  ;;  %v2910_v42 = vmul.f32 %v3429_v1, %v318_v47  ;;  %v2928_v25 = vrot.slane %v2896_v49, 6 }
 0x194   : > { %v2929_v34 = vrot.slane %v2898_v0, 6  ;;  %v2934_v54 = vrot.slane %v2900_v62, 6  ;;  %v2935_v53 = vrot.slane %v2902_v13, 6  ;;  %v2940_v50 = vrot.slane %v2904_v37, 6  ;;  %v3174_v37 = vld [vmem:[%s4791_s6] sm:$0x3] }
 0x195   : > { %v2941_v55 = vrot.slane %v2906_v17, 6  ;;  %v2946_v31 = vrot.slane %v2908_v41, 6  ;;  %v2947_v10 = vrot.slane %v2910_v42, 6  ;;  %3225 = vmatpush1.bf16.msra.mxu1 %v3490_v52  ;;  %v3209_v14 = vrot.slane %v3174_v37, %v3593_v8 }
 0x196   : > { %v2930_v29 = vsel %vm671_vm1, %v2928_v25, %v2929_v34  ;;  %v2936_v61 = vsel %vm671_vm1, %v2934_v54, %v2935_v53  ;;  %v3213_v56 = vrot.slane %v3174_v37, %v3595_v9 }
 0x197   : > { %v2942_v23 = vsel %vm671_vm1, %v2940_v50, %v2941_v55  ;;  %v2960_v32 = vadd.f32 %v2930_v29, %v2880_v59  ;;  %v2948_v46 = vsel %vm671_vm1, %v2946_v31, %v2947_v10  ;;  %v2962_v27 = vadd.f32 %v2936_v61, %v2882_v24 }
 0x198   : > { %v2964_v45 = vadd.f32 %v2942_v23, %v2884_v20  ;;  %v2966_v1 = vadd.f32 %v2948_v46, %v2886_v51 }
 0x199   : > { %v4696_v11 = vadd.f32 %v4170_v19, %v2960_v32  ;;  %v4699_v33 = vadd.f32 %v4170_v19, %v2962_v27 }
 0x19a   : > { %v4702_v49 = vadd.f32 %v4170_v19, %v2964_v45  ;;  %v4705_v47 = vadd.f32 %v4170_v19, %v2966_v1 }
 0x19b   : > { %v2989_v3 = vsel %vm2988_vm4, %v4696_v11, 0.0  ;;  %v2990_v63 = vsel %vm2988_vm4, %v4699_v33, 0.0 }
 0x19c   : > { %v2992_v0 = vsel %vm2988_vm4, %v4702_v49, 0.0  ;;  %v2991_v62 = vadd.f32 %v2990_v63, %v2989_v3  ;;  %v2994_v48 = vsel %vm2988_vm4, %v4705_v47, 0.0 }
 0x19e   : > { %v2993_v58 = vadd.f32 %v2992_v0, %v2991_v62  ;;  %v3499_v0 = vld [vmem:[%s3591_s16 + $0x60] sm:$0xff] }
 0x1a0   : > { %v2995_v4 = vadd.f32 %v2994_v48, %v2993_v58  ;;  %v3501_v48 = vld [vmem:[%s3591_s16 + $0xa0] sm:$0xff] }
 0x1a2   : > { %v3005_v39 = vmul.f32 0.25, %v2995_v4 }
 0x1a4   : > { %v3007_v2 = vsel %vm2988_vm4, %v3005_v39, 0.0  ;;  %v3503_v39 = vld [vmem:[%s3591_s16 + $0x68] sm:$0xff] }
 0x1a5   : > { %v3008_v19 = vrot.slane %v3007_v2, 4 }
 0x1a7   : > { %v3009_v5 = vadd.f32 %v3008_v19, %v3007_v2  ;;  %v3504_v19 = vld [vmem:[%s3591_s16 + $0x88] sm:$0xff] }
 0x1a9   : > { %v3010_v18 = vrot.slane %v3009_v5, 2 }
 0x1ab   : > { %v3011_v15 = vadd.f32 %v3010_v18, %v3009_v5  ;;  %v3505_v18 = vld [vmem:[%s3591_s16 + $0xa8] sm:$0xff] }
 0x1ad   : > { %v3012_v60 = vrot.slane %v3011_v15, 1 }
 0x1af   : > { %v3013_v57 = vadd.f32 %v3012_v60, %v3011_v15  ;;  %v3506_v60 = vld [vmem:[%s3591_s16 + $0xc8] sm:$0xff] }
 0x1b1   : > { %v3021_v40 = vmul.f32 0.25, %v3013_v57 }
 0x1b3   : > { %v3023_v36 = vpack.c.bf16 %v3021_v40, %v3021_v40 }
 0x1b5   : > { %3159 = vmatmul.mubr.bf16.vlgmr.msra.gmra.mrb[0].mxu0 %v3023_v36 }
 0x288   : > { %v3160_v26 = vpop.f32.mrb[0].mxu0 }
 0x289   : > { %v3161_v35 = vadd.f32 %v3160_v26, %v3049_v12  ;;  %v3162_v22 = vpop.f32.mrb[1].mxu0 }
 0x28a   : > { %v3163_v6 = vpop.f32.mrb[2].mxu0 }
 0x28b   : > { %v3166_v28 = vmax.f32 %v3161_v35, 0.0  ;;  %v3164_v16 = vpop.f32.mrb[3].mxu0 }
 0x28d   : > { %v3167_v13 = vpack.c.bf16 %v3166_v28, %v3166_v28 }
 0x28f   : > { %3450 = vmatmul.mubr.msk.bf16.vlgmr.msra.gmra.mrb[0].mxu1 %vm3216_vm5, %v3167_v13 }
 0x362   : > { %v3254_v59 = vpop.f32.mrb[0].mxu1 }
 0x363   : > { %v3255_v24 = vadd.f32 %v3254_v59, %v3209_v14  ;;  %v3256_v20 = vpop.f32.mrb[1].mxu1 }
 0x364   : > { %v3257_v51 = vadd.f32 %v3256_v20, %v3213_v56  ;;  %v3258_v17 = vpop.f32.mrb[2].mxu1 }
 0x365   : > { %v3451_v41 = vmul.f32 -1.442695, %v3255_v24  ;;  %v3259_v42 = vpop.f32.mrb[3].mxu1 }
 0x366   : > { %v3452_v25 = vmul.f32 -1.442695, %v3257_v51 }
 0x367   : > { %3491 = vpow2.f32 %v3451_v41 }
 0x368   : > { %3493 = vpow2.f32 %v3452_v25 }
 0x371   : > { %v3492_v34 = vpop.eup %3491 }
 0x372   : > { %v3494_v54 = vpop.eup %3493  ;;  %v3267_v53 = vadd.f32 1.0, %v3492_v34 }
 0x373   : > { %v3268_v50 = vadd.f32 1.0, %v3494_v54 }
 0x374   : > { %3495 = vrcp.f32 %v3267_v53 }
 0x375   : > { %3497 = vrcp.f32 %v3268_v50 }
 0x37e   : > { %v3496_v55 = vpop.eup %3495 }
 0x37f   : > { %v3498_v31 = vpop.eup %3497  ;;  %v3276_v9 = vrot.slane %v3496_v55, %v3593_v8 }
 0x380   : > { %v3280_v29 = vrot.slane %v3498_v31, %v3593_v8 }
 0x381   : > { %v3281_v10 = vmul.f32 %v3276_v9, %v4696_v11  ;;  %v3283_v61 = vmul.f32 %v3276_v9, %v4699_v33  ;;  %v3285_v23 = vmul.f32 %v3276_v9, %v4702_v49  ;;  %v3287_v32 = vmul.f32 %v3276_v9, %v4705_v47 }
 0x382   : > { %v3282_v46 = vmul.f32 %v3280_v29, %v4172_v7  ;;  %v3284_v27 = vmul.f32 %v3280_v29, %v4174_v43  ;;  %v3286_v45 = vmul.f32 %v3280_v29, %v4180_v44  ;;  %v3288_v8 = vmul.f32 %v3280_v29, %v4182_v21  ;;  %v3500_v43 = vld [vmem:[%s3591_s16 + $0x80] sm:$0xff] }
 0x383   : > { %v3297_v1 = vrot.slane %v3281_v10, 5  ;;  %v3299_v11 = vrot.slane %v3283_v61, 5  ;;  %v3301_v3 = vrot.slane %v3285_v23, 5  ;;  %v3303_v33 = vrot.slane %v3287_v32, 5  ;;  %v3502_v21 = vld [vmem:[%s3591_s16 + $0xc0] sm:$0xff] }
 0x384   : > { %v3298_v49 = vrot.slane %v3282_v46, 5  ;;  %v3300_v63 = vrot.slane %v3284_v27, 5  ;;  %v3302_v47 = vrot.slane %v3286_v45, 5  ;;  %v3304_v7 = vrot.slane %v3288_v8, 5 }
 0x385   : > { %v3313_v62 = vadd.f32 %v3499_v0, %v3297_v1  ;;  %v3315_v44 = vadd.f32 %v3500_v43, %v3299_v11  ;;  %v3317_v58 = vadd.f32 %v3501_v48, %v3301_v3  ;;  %v3319_v4 = vadd.f32 %v3502_v21, %v3303_v33 }
 0x386   : > { %v3314_v2 = vadd.f32 %v3503_v39, %v3298_v49  ;;  %v3316_v5 = vadd.f32 %v3504_v19, %v3300_v63  ;;  %v3318_v15 = vadd.f32 %v3505_v18, %v3302_v47  ;;  %v3320_v57 = vadd.f32 %v3506_v60, %v3304_v7 }
 0x388   : > { %v3329_v40 = vcombine.low %v3313_v62, %v3314_v2  ;;  %v3330_v36 = vcombine.high %v3313_v62, %v3314_v2  ;;  %v3331_v38 = vcombine.low %v3315_v44, %v3316_v5  ;;  %v3332_v30 = vcombine.high %v3315_v44, %v3316_v5 }
 0x389   : > { %v3333_v52 = vcombine.low %v3317_v58, %v3318_v15  ;;  %v3334_v12 = vcombine.high %v3317_v58, %v3318_v15  ;;  %v3335_v26 = vcombine.low %v3319_v4, %v3320_v57  ;;  %v3336_v35 = vcombine.high %v3319_v4, %v3320_v57 }
 0x38a   : > { %v3453_v28 = vrot.slane %v3329_v40, 11  ;;  %v3342_v16 = vrot.slane %v3330_v36, 7  ;;  %v3454_v13 = vrot.slane %v3331_v38, 11  ;;  %v3346_v37 = vrot.slane %v3332_v30, 7 }
 0x38b   : > { %v3455_v14 = vrot.slane %v3333_v52, 11  ;;  %v3350_v56 = vrot.slane %v3334_v12, 7  ;;  %v3456_v59 = vrot.slane %v3335_v26, 11  ;;  %v3354_v24 = vrot.slane %v3336_v35, 7 }
 0x38c   : > { %v3343_v20 = vsel %vm4754_vm9, %v3453_v28, %v3342_v16  ;;  %v3347_v51 = vsel %vm4754_vm9, %v3454_v13, %v3346_v37 }
 0x38d   : > { %v3351_v17 = vsel %vm4754_vm9, %v3455_v14, %v3350_v56  ;;  %v3355_v41 = vsel %vm4754_vm9, %v3456_v59, %v3354_v24  ;;  %3362 = vst.msk [vmem:[%s278_s18] sm:$0xff] %vm4759_vm10, %v3343_v20  ;;  %3363 = vst.msk [vmem:[%s278_s18 + $0x8] sm:$0xff] %vm4759_vm10, %v3347_v51 }
 0x38e   : > { %3364 = vst.msk [vmem:[%s278_s18 + $0x10] sm:$0xff] %vm4759_vm10, %v3351_v17  ;;  %3365 = vst.msk [vmem:[%s278_s18 + $0x18] sm:$0xff] %vm4759_vm10, %v3355_v41 }
 0x38f PF: > { %s17_s24 = sadd.s32 1, %s3513_s24  }
 0x390   : > { %p14_p4 = scmp.ge.s32.totalorder %s17_s24, 4  }
 0x392   :  { %16 = sbr.rel (!%p14_p4) target bundleno = 1 (0x1), region = 78 }

// kernel: cog_replknet_forward.10
= control target key start
LH: loop header
LB: loop body
LE: loop exit
PB: predicated region body
PF: predicated region fallthrough
CT: control target
= control target key end

     0   :  { %vm853_vm0 = vcmask 523264   ;;  %s1595_s1 = inlined_call_operand.vmem [shape: bf16[768,192], index: 1, kind: input, shape index: {}]   ;;  %s1596_s0 = inlined_call_operand.vmem [shape: bf16[32,768], index: 0, kind: input, shape index: {}]   ;;  %s1597_s2 = inlined_call_operand.vmem [shape: f32[1,192], index: 2, kind: input, shape index: {}]   ;;  %s1598_s3 = inlined_call_operand.vmem [shape: f32[32,192], index: 3, kind: input, shape index: {}]   ;;  %s1599_s4 = inlined_call_operand.vmem [shape: f32[32,192], index: 4, kind: output, shape index: {}]  }
   0x1   :  { %v1029_v0 = vld [vmem:[%s1595_s1 + $0x4] ss:$8 sps:$4 sm:$0xff]   ;;  %v1033_v2 = vld [vmem:[%s1595_s1] ss:$8 sps:$4 sm:$0xff]   ;;  %v1035_v4 = vld [vmem:[%s1595_s1 + $0x14] ss:$8 sps:$4 sm:$0xff]  }
   0x2   :  { %v1031_v1 = vld [vmem:[%s1595_s1 + $0x104] ss:$8 sps:$4 sm:$0xff]   ;;  %677 = vmatprep.subr.bf16.mxu1 %v1029_v0  ;;  %v1034_v3 = vld [vmem:[%s1595_s1 + $0x100] ss:$8 sps:$4 sm:$0xff]   ;;  %v1037_v5 = vld [vmem:[%s1595_s1 + $0x114] ss:$8 sps:$4 sm:$0xff]  }
   0x3   :  { %730 = vmatprep.subr.bf16.mxu0 %v1031_v1  ;;  %678 = vmatpush1.bf16.msra.mxu1 %v1033_v2  ;;  %v1039_v6 = vld [vmem:[%s1595_s1 + $0x10] ss:$8 sps:$4 sm:$0xff]   ;;  %v1041_v8 = vld [vmem:[%s1595_s1 + $0x24] ss:$8 sps:$4 sm:$0xff]   ;;  %v1045_v10 = vld [vmem:[%s1595_s1 + $0x20] ss:$8 sps:$4 sm:$0xff]  }
   0x4   :  { %731 = vmatpush1.bf16.msra.mxu0 %v1034_v3  ;;  %679 = vmatprep.subr.bf16.mxu1 %v1035_v4  ;;  %v1040_v7 = vld [vmem:[%s1595_s1 + $0x110] ss:$8 sps:$4 sm:$0xff]   ;;  %v1043_v9 = vld [vmem:[%s1595_s1 + $0x124] ss:$8 sps:$4 sm:$0xff]   ;;  %v1046_v11 = vld [vmem:[%s1595_s1 + $0x120] ss:$8 sps:$4 sm:$0xff]  }
   0x5   :  { %732 = vmatprep.subr.bf16.mxu0 %v1037_v5  ;;  %v1047_v12 = vld [vmem:[%s1595_s1 + $0x34] ss:$8 sps:$4 sm:$0xff]   ;;  %v1051_v14 = vld [vmem:[%s1595_s1 + $0x30] ss:$8 sps:$4 sm:$0xff]   ;;  %v1053_v16 = vld [vmem:[%s1595_s1 + $0x44] ss:$8 sps:$4 sm:$0xff]  }
   0x6   :  { %v1049_v13 = vld [vmem:[%s1595_s1 + $0x134] ss:$8 sps:$4 sm:$0xff]   ;;  %v1052_v15 = vld [vmem:[%s1595_s1 + $0x130] ss:$8 sps:$4 sm:$0xff]   ;;  %v1055_v17 = vld [vmem:[%s1595_s1 + $0x144] ss:$8 sps:$4 sm:$0xff]  }
   0x7   :  { %680 = vmatpush1.bf16.msra.mxu1 %v1039_v6  ;;  %v1057_v18 = vld [vmem:[%s1595_s1 + $0x40] ss:$8 sps:$4 sm:$0xff]   ;;  %v1059_v20 = vld [vmem:[%s1595_s1 + $0x54] ss:$8 sps:$4 sm:$0xff]   ;;  %v1063_v22 = vld [vmem:[%s1595_s1 + $0x50] ss:$8 sps:$4 sm:$0xff]  }
   0x8   :  { %733 = vmatpush1.bf16.msra.mxu0 %v1040_v7  ;;  %681 = vmatprep.subr.bf16.mxu1 %v1041_v8  ;;  %v1058_v19 = vld [vmem:[%s1595_s1 + $0x140] ss:$8 sps:$4 sm:$0xff]   ;;  %v1061_v21 = vld [vmem:[%s1595_s1 + $0x154] ss:$8 sps:$4 sm:$0xff]   ;;  %v1064_v23 = vld [vmem:[%s1595_s1 + $0x150] ss:$8 sps:$4 sm:$0xff]  }
   0x9   :  { %734 = vmatprep.subr.bf16.mxu0 %v1043_v9  ;;  %v1065_v24 = vld [vmem:[%s1595_s1 + $0x64] ss:$8 sps:$4 sm:$0xff]   ;;  %v1069_v26 = vld [vmem:[%s1595_s1 + $0x60] ss:$8 sps:$4 sm:$0xff]   ;;  %v1071_v28 = vld [vmem:[%s1595_s1 + $0x74] ss:$8 sps:$4 sm:$0xff]  }
   0xa   :  { %v1067_v25 = vld [vmem:[%s1595_s1 + $0x164] ss:$8 sps:$4 sm:$0xff]   ;;  %v1070_v27 = vld [vmem:[%s1595_s1 + $0x160] ss:$8 sps:$4 sm:$0xff]   ;;  %v1073_v29 = vld [vmem:[%s1595_s1 + $0x174] ss:$8 sps:$4 sm:$0xff]  }
   0xb   :  { %682 = vmatpush1.bf16.msra.mxu1 %v1045_v10  ;;  %v1075_v30 = vld [vmem:[%s1595_s1 + $0x70] ss:$8 sps:$4 sm:$0xff]   ;;  %v1077_v32 = vld [vmem:[%s1595_s1 + $0x84] ss:$8 sps:$4 sm:$0xff]   ;;  %v1081_v34 = vld [vmem:[%s1595_s1 + $0x80] ss:$8 sps:$4 sm:$0xff]  }
   0xc   :  { %735 = vmatpush1.bf16.msra.mxu0 %v1046_v11  ;;  %683 = vmatprep.subr.bf16.mxu1 %v1047_v12  ;;  %v1076_v31 = vld [vmem:[%s1595_s1 + $0x170] ss:$8 sps:$4 sm:$0xff]   ;;  %v1079_v33 = vld [vmem:[%s1595_s1 + $0x184] ss:$8 sps:$4 sm:$0xff]   ;;  %v1082_v35 = vld [vmem:[%s1595_s1 + $0x180] ss:$8 sps:$4 sm:$0xff]  }
   0xd   :  { %736 = vmatprep.subr.bf16.mxu0 %v1049_v13  ;;  %v1083_v36 = vld [vmem:[%s1595_s1 + $0x94] ss:$8 sps:$4 sm:$0xff]   ;;  %v1087_v38 = vld [vmem:[%s1595_s1 + $0x90] ss:$8 sps:$4 sm:$0xff]   ;;  %v1089_v40 = vld [vmem:[%s1595_s1 + $0xa4] ss:$8 sps:$4 sm:$0xff]  }
   0xe   :  { %v1085_v37 = vld [vmem:[%s1595_s1 + $0x194] ss:$8 sps:$4 sm:$0xff]   ;;  %v1088_v39 = vld [vmem:[%s1595_s1 + $0x190] ss:$8 sps:$4 sm:$0xff]   ;;  %v1091_v41 = vld [vmem:[%s1595_s1 + $0x1a4] ss:$8 sps:$4 sm:$0xff]  }
   0xf   :  { %684 = vmatpush1.bf16.msra.mxu1 %v1051_v14  ;;  %v1093_v42 = vld [vmem:[%s1595_s1 + $0xa0] ss:$8 sps:$4 sm:$0xff]   ;;  %v1095_v44 = vld [vmem:[%s1595_s1 + $0xb4] ss:$8 sps:$4 sm:$0xff]   ;;  %v1099_v46 = vld [vmem:[%s1595_s1 + $0xb0] ss:$8 sps:$4 sm:$0xff]  }
  0x10   :  { %737 = vmatpush1.bf16.msra.mxu0 %v1052_v15  ;;  %685 = vmatprep.subr.bf16.mxu1 %v1053_v16  ;;  %v1094_v43 = vld [vmem:[%s1595_s1 + $0x1a0] ss:$8 sps:$4 sm:$0xff]   ;;  %v1097_v45 = vld [vmem:[%s1595_s1 + $0x1b4] ss:$8 sps:$4 sm:$0xff]   ;;  %v1100_v47 = vld [vmem:[%s1595_s1 + $0x1b0] ss:$8 sps:$4 sm:$0xff]  }
  0x11   :  { %738 = vmatprep.subr.bf16.mxu0 %v1055_v17  ;;  %v1101_v48 = vld [vmem:[%s1595_s1 + $0xc4] ss:$8 sps:$4 sm:$0xff]   ;;  %v1105_v52 = vld [vmem:[%s1595_s1 + $0xc0] ss:$8 sps:$4 sm:$0xff]   ;;  %v1107_v54 = vld [vmem:[%s1595_s1 + $0xd4] ss:$8 sps:$4 sm:$0xff]  }
  0x12   :  { %v1127_v49 = vld [vmem:[%s1596_s0 + $0x4] ss:$24 sps:$4 sm:$0xff]   ;;  %v1106_v53 = vld [vmem:[%s1595_s1 + $0x1c0] ss:$8 sps:$4 sm:$0xff]   ;;  %v1111_v56 = vld [vmem:[%s1595_s1 + $0xd0] ss:$8 sps:$4 sm:$0xff]  }
  0x13   :  { %686 = vmatpush1.bf16.msra.mxu1 %v1057_v18  ;;  %v1103_v50 = vld [vmem:[%s1595_s1 + $0x1c4] ss:$8 sps:$4 sm:$0xff]   ;;  %709 = vmatprep.mubr.bf16.mxu1 %v1127_v49  ;;  %v1109_v55 = vld [vmem:[%s1595_s1 + $0x1d4] ss:$8 sps:$4 sm:$0xff]   ;;  %v1112_v57 = vld [vmem:[%s1595_s1 + $0x1d0] ss:$8 sps:$4 sm:$0xff]  }
  0x14   :  { %739 = vmatpush1.bf16.msra.mxu0 %v1058_v19  ;;  %687 = vmatprep.subr.bf16.mxu1 %v1059_v20  ;;  %v1130_v51 = vld [vmem:[%s1596_s0 + $0xc] ss:$24 sps:$4 sm:$0xff]   ;;  %v1117_v60 = vld [vmem:[%s1595_s1 + $0xe0] ss:$8 sps:$4 sm:$0xff]   ;;  %v1119_v62 = vld [vmem:[%s1595_s1 + $0xf4] ss:$8 sps:$4 sm:$0xff]  }
  0x15   :  { %740 = vmatprep.subr.bf16.mxu0 %v1061_v21  ;;  %762 = vmatprep.mubr.bf16.mxu0 %v1130_v51  ;;  %v1113_v58 = vld [vmem:[%s1595_s1 + $0xe4] ss:$8 sps:$4 sm:$0xff]   ;;  %v1118_v61 = vld [vmem:[%s1595_s1 + $0x1e0] ss:$8 sps:$4 sm:$0xff]   ;;  %v1121_v63 = vld [vmem:[%s1595_s1 + $0x1f4] ss:$8 sps:$4 sm:$0xff]  }
  0x16   :  { %v1115_v59 = vld [vmem:[%s1595_s1 + $0x1e4] ss:$8 sps:$4 sm:$0xff]   ;;  %v1123_v0 = vld [vmem:[%s1595_s1 + $0xf0] ss:$8 sps:$4 sm:$0xff]   ;;  %v1128_v4 = vld [vmem:[%s1596_s0 + $0x8] ss:$24 sps:$4 sm:$0xff]  }
  0x17   :  { %688 = vmatpush1.bf16.msra.mxu1 %v1063_v22  ;;  %v1124_v1 = vld [vmem:[%s1595_s1 + $0x1f0] ss:$8 sps:$4 sm:$0xff]   ;;  %v1133_v2 = vld [vmem:[%s1595_s1 + $0x204] ss:$8 sps:$4 sm:$0xff]   ;;  %v1131_v5 = vld [vmem:[%s1595_s1 + $0x200] ss:$8 sps:$4 sm:$0xff]  }
  0x18   :  { %741 = vmatpush1.bf16.msra.mxu0 %v1064_v23  ;;  %689 = vmatprep.subr.bf16.mxu1 %v1065_v24  ;;  %v1125_v3 = vld [vmem:[%s1596_s0] ss:$24 sps:$4 sm:$0xff]   ;;  %v1136_v6 = vld [vmem:[%s1595_s1 + $0x214] ss:$8 sps:$4 sm:$0xff]   ;;  %v1139_v10 = vld [vmem:[%s1595_s1 + $0x224] ss:$8 sps:$4 sm:$0xff]  }
  0x19   :  { %742 = vmatprep.subr.bf16.mxu0 %v1067_v25  ;;  %v1170_v7 = vld [vmem:[%s1596_s0 + $0x34] ss:$24 sps:$4 sm:$0xff]   ;;  %v1134_v9 = vld [vmem:[%s1595_s1 + $0x210] ss:$8 sps:$4 sm:$0xff]   ;;  %v1137_v13 = vld [vmem:[%s1595_s1 + $0x220] ss:$8 sps:$4 sm:$0xff]  }
  0x1a   :  { %v1173_v8 = vld [vmem:[%s1596_s0 + $0x3c] ss:$24 sps:$4 sm:$0xff]   ;;  %v1172_v11 = vld [vmem:[%s1596_s0 + $0x30] ss:$24 sps:$4 sm:$0xff]   ;;  %v1145_v18 = vld [vmem:[%s1595_s1 + $0x244] ss:$8 sps:$4 sm:$0xff]  }
  0x1b   :  { %690 = vmatpush1.bf16.msra.mxu1 %v1069_v26  ;;  %v1178_v12 = vld [vmem:[%s1596_s0 + $0x38] ss:$24 sps:$4 sm:$0xff]   ;;  %v1142_v14 = vld [vmem:[%s1595_s1 + $0x234] ss:$8 sps:$4 sm:$0xff]   ;;  %v1143_v19 = vld [vmem:[%s1595_s1 + $0x240] ss:$8 sps:$4 sm:$0xff]  }
  0x1c   :  { %743 = vmatpush1.bf16.msra.mxu0 %v1070_v27  ;;  %691 = vmatprep.subr.bf16.mxu1 %v1071_v28  ;;  %v1187_v15 = vld [vmem:[%s1596_s0 + $0x14] ss:$24 sps:$4 sm:$0xff]   ;;  %v1190_v16 = vld [vmem:[%s1596_s0 + $0x44] ss:$24 sps:$4 sm:$0xff]   ;;  %v1140_v17 = vld [vmem:[%s1595_s1 + $0x230] ss:$8 sps:$4 sm:$0xff]  }
  0x1d   :  { %744 = vmatprep.subr.bf16.mxu0 %v1073_v29  ;;  %v1148_v20 = vld [vmem:[%s1595_s1 + $0x254] ss:$8 sps:$4 sm:$0xff]   ;;  %v1146_v21 = vld [vmem:[%s1595_s1 + $0x250] ss:$8 sps:$4 sm:$0xff]   ;;  %v1151_v22 = vld [vmem:[%s1595_s1 + $0x264] ss:$8 sps:$4 sm:$0xff]  }
  0x1e   :  { %v1149_v23 = vld [vmem:[%s1595_s1 + $0x260] ss:$8 sps:$4 sm:$0xff]   ;;  %v1154_v24 = vld [vmem:[%s1595_s1 + $0x274] ss:$8 sps:$4 sm:$0xff]   ;;  %v1152_v25 = vld [vmem:[%s1595_s1 + $0x270] ss:$8 sps:$4 sm:$0xff]  }
  0x1f   :  { %692 = vmatpush1.bf16.msra.mxu1 %v1075_v30  ;;  %v1157_v26 = vld [vmem:[%s1595_s1 + $0x284] ss:$8 sps:$4 sm:$0xff]   ;;  %v1155_v27 = vld [vmem:[%s1595_s1 + $0x280] ss:$8 sps:$4 sm:$0xff]   ;;  %v1160_v28 = vld [vmem:[%s1595_s1 + $0x294] ss:$8 sps:$4 sm:$0xff]  }
  0x20   :  { %745 = vmatpush1.bf16.msra.mxu0 %v1076_v31  ;;  %693 = vmatprep.subr.bf16.mxu1 %v1077_v32  ;;  %v1158_v29 = vld [vmem:[%s1595_s1 + $0x290] ss:$8 sps:$4 sm:$0xff]   ;;  %v1163_v30 = vld [vmem:[%s1595_s1 + $0x2a4] ss:$8 sps:$4 sm:$0xff]   ;;  %v1161_v31 = vld [vmem:[%s1595_s1 + $0x2a0] ss:$8 sps:$4 sm:$0xff]  }
  0x21   :  { %746 = vmatprep.subr.bf16.mxu0 %v1079_v33  ;;  %v1166_v32 = vld [vmem:[%s1595_s1 + $0x2b4] ss:$8 sps:$4 sm:$0xff]   ;;  %v1164_v33 = vld [vmem:[%s1595_s1 + $0x2b0] ss:$8 sps:$4 sm:$0xff]   ;;  %v125_v51 = vld [vmem:[%s1597_s2] sm:$0x3] }
  0x23   :  { %694 = vmatpush1.bf16.msra.mxu1 %v1081_v34  ;;  %v1169_v34 = vld [vmem:[%s1595_s1 + $0x2c4] ss:$8 sps:$4 sm:$0xff]  }
  0x24   :  { %747 = vmatpush1.bf16.msra.mxu0 %v1082_v35  ;;  %695 = vmatprep.subr.bf16.mxu1 %v1083_v36  ;;  %v1167_v35 = vld [vmem:[%s1595_s1 + $0x2c0] ss:$8 sps:$4 sm:$0xff]   ;;  %v1177_v36 = vld [vmem:[%s1595_s1 + $0x2d4] ss:$8 sps:$4 sm:$0xff]  }
  0x25   :  { %748 = vmatprep.subr.bf16.mxu0 %v1085_v37  ;;  %v1175_v37 = vld [vmem:[%s1595_s1 + $0x2d0] ss:$8 sps:$4 sm:$0xff]  }
  0x27   :  { %696 = vmatpush1.bf16.msra.mxu1 %v1087_v38  ;;  %v1181_v38 = vld [vmem:[%s1595_s1 + $0x2e4] ss:$8 sps:$4 sm:$0xff]  }
  0x28   :  { %749 = vmatpush1.bf16.msra.mxu0 %v1088_v39  ;;  %697 = vmatprep.subr.bf16.mxu1 %v1089_v40  ;;  %v1179_v39 = vld [vmem:[%s1595_s1 + $0x2e0] ss:$8 sps:$4 sm:$0xff]   ;;  %v1184_v40 = vld [vmem:[%s1595_s1 + $0x2f4] ss:$8 sps:$4 sm:$0xff]  }
  0x29   :  { %750 = vmatprep.subr.bf16.mxu0 %v1091_v41  ;;  %v1182_v41 = vld [vmem:[%s1595_s1 + $0x2f0] ss:$8 sps:$4 sm:$0xff]  }
  0x2b   :  { %698 = vmatpush1.bf16.msra.mxu1 %v1093_v42  ;;  %v1185_v42 = vld [vmem:[%s1596_s0 + $0x10] ss:$24 sps:$4 sm:$0xff]  }
  0x2c   :  { %751 = vmatpush1.bf16.msra.mxu0 %v1094_v43  ;;  %699 = vmatprep.subr.bf16.mxu1 %v1095_v44  ;;  %v1188_v43 = vld [vmem:[%s1596_s0 + $0x40] ss:$24 sps:$4 sm:$0xff]   ;;  %v127_v44 = vlaneseq }
  0x2d   :  { %752 = vmatprep.subr.bf16.mxu0 %v1097_v45 }
  0x2e   :  { %v128_v45 = vshrl.u32 %v127_v44, 7 }
  0x2f   :  { %700 = vmatpush1.bf16.msra.mxu1 %v1099_v46 }
  0x30   :  { %753 = vmatpush1.bf16.msra.mxu0 %v1100_v47  ;;  %701 = vmatprep.subr.bf16.mxu1 %v1101_v48  ;;  %v129_v49 = vsub.s32 0, %v128_v45 }
  0x31   :  { %754 = vmatprep.subr.bf16.mxu0 %v1103_v50 }
  0x33   :  { %702 = vmatpush1.bf16.msra.mxu1 %v1105_v52  ;;  %v133_v52 = vsub.s32 1, %v128_v45 }
  0x34   :  { %755 = vmatpush1.bf16.msra.mxu0 %v1106_v53  ;;  %703 = vmatprep.subr.bf16.mxu1 %v1107_v54  ;;  %v130_v53 = vrot.slane %v125_v51, %v129_v49 }
  0x35   :  { %756 = vmatprep.subr.bf16.mxu0 %v1109_v55  ;;  %v134_v54 = vrot.slane %v125_v51, %v133_v52 }
  0x37   :  { %704 = vmatpush1.bf16.msra.mxu1 %v1111_v56 }
  0x38   :  { %757 = vmatpush1.bf16.msra.mxu0 %v1112_v57  ;;  %705 = vmatprep.subr.bf16.mxu1 %v1113_v58 }
  0x39   :  { %758 = vmatprep.subr.bf16.mxu0 %v1115_v59 }
  0x3b   :  { %706 = vmatpush1.bf16.msra.mxu1 %v1117_v60 }
  0x3c   :  { %759 = vmatpush1.bf16.msra.mxu0 %v1118_v61  ;;  %707 = vmatprep.subr.bf16.mxu1 %v1119_v62 }
  0x3d   :  { %760 = vmatprep.subr.bf16.mxu0 %v1121_v63 }
  0x3f   :  { %708 = vmatpush1.bf16.msra.mxu1 %v1123_v0 }
  0x40   :  { %761 = vmatpush1.bf16.msra.mxu0 %v1124_v1  ;;  %973 = vmatprep.subr.bf16.mxu1 %v1133_v2 }
  0x41   :  { %783 = vmatprep.subr.bf16.mxu0 %v1133_v2 }
  0x42   :  { %710 = vmatmul.mubr.bf16.vlgmr.msra.gmra.mrb[0].mxu1 %v1125_v3 }
  0x43   :  { %763 = vmatmul.mubr.bf16.vlgmr.msra.gmra.mrb[0].mxu0 %v1128_v4  ;;  %989 = vmatpush1.bf16.msra.mxu1 %v1131_v5 }
  0x44   :  { %784 = vmatpush1.bf16.msra.mxu0 %v1131_v5  ;;  %974 = vmatprep.subr.bf16.mxu1 %v1136_v6 }
  0x45   :  { %785 = vmatprep.subr.bf16.mxu0 %v1136_v6  ;;  %719 = vmatprep.mubr.bf16.mxu1 %v1170_v7 }
  0x46   :  { %772 = vmatprep.mubr.bf16.mxu0 %v1173_v8 }
  0x47   :  { %990 = vmatpush1.bf16.msra.mxu1 %v1134_v9 }
  0x48   :  { %786 = vmatpush1.bf16.msra.mxu0 %v1134_v9  ;;  %975 = vmatprep.subr.bf16.mxu1 %v1139_v10 }
  0x49   :  { %787 = vmatprep.subr.bf16.mxu0 %v1139_v10  ;;  %v836_v10 = vld [vmem:[%s1598_s3] sm:$0xff] }
  0x4a   :  { %720 = vmatmul.mubr.bf16.gmra.mrb[4].mxu1 %v1172_v11 }
  0x4b   :  { %773 = vmatmul.mubr.bf16.gmra.mrb[4].mxu0 %v1178_v12  ;;  %991 = vmatpush1.bf16.msra.mxu1 %v1137_v13  ;;  %v840_v12 = vld [vmem:[%s1598_s3 + $0x20] sm:$0xff] }
  0x4c   :  { %788 = vmatpush1.bf16.msra.mxu0 %v1137_v13  ;;  %976 = vmatprep.subr.bf16.mxu1 %v1142_v14 }
  0x4d   :  { %789 = vmatprep.subr.bf16.mxu0 %v1142_v14  ;;  %815 = vmatprep.mubr.bf16.mxu0 %v1187_v15 }
  0x4e   :  { %825 = vmatprep.mubr.bf16.mxu1 %v1190_v16 }
  0x4f   :  { %992 = vmatpush1.bf16.msra.mxu1 %v1140_v17 }
  0x50   :  { %790 = vmatpush1.bf16.msra.mxu0 %v1140_v17  ;;  %977 = vmatprep.subr.bf16.mxu1 %v1145_v18  ;;  %v837_v17 = vld [vmem:[%s1598_s3 + $0x8] sm:$0xff] }
  0x51   :  { %791 = vmatprep.subr.bf16.mxu0 %v1145_v18 }
  0x53   :  { %993 = vmatpush1.bf16.msra.mxu1 %v1143_v19 }
  0x54   :  { %792 = vmatpush1.bf16.msra.mxu0 %v1143_v19  ;;  %978 = vmatprep.subr.bf16.mxu1 %v1148_v20  ;;  %v841_v19 = vld [vmem:[%s1598_s3 + $0x28] sm:$0xff] }
  0x55   :  { %793 = vmatprep.subr.bf16.mxu0 %v1148_v20 }
  0x57   :  { %994 = vmatpush1.bf16.msra.mxu1 %v1146_v21 }
  0x58   :  { %794 = vmatpush1.bf16.msra.mxu0 %v1146_v21  ;;  %979 = vmatprep.subr.bf16.mxu1 %v1151_v22 }
  0x59   :  { %795 = vmatprep.subr.bf16.mxu0 %v1151_v22 }
  0x5b   :  { %995 = vmatpush1.bf16.msra.mxu1 %v1149_v23 }
  0x5c   :  { %796 = vmatpush1.bf16.msra.mxu0 %v1149_v23  ;;  %980 = vmatprep.subr.bf16.mxu1 %v1154_v24 }
  0x5d   :  { %797 = vmatprep.subr.bf16.mxu0 %v1154_v24  ;;  %v838_v24 = vld [vmem:[%s1598_s3 + $0x10] sm:$0xff] }
  0x5f   :  { %996 = vmatpush1.bf16.msra.mxu1 %v1152_v25 }
  0x60   :  { %798 = vmatpush1.bf16.msra.mxu0 %v1152_v25  ;;  %981 = vmatprep.subr.bf16.mxu1 %v1157_v26 }
  0x61   :  { %799 = vmatprep.subr.bf16.mxu0 %v1157_v26  ;;  %v842_v26 = vld [vmem:[%s1598_s3 + $0x30] sm:$0xff] }
  0x63   :  { %997 = vmatpush1.bf16.msra.mxu1 %v1155_v27 }
  0x64   :  { %800 = vmatpush1.bf16.msra.mxu0 %v1155_v27  ;;  %982 = vmatprep.subr.bf16.mxu1 %v1160_v28 }
  0x65   :  { %801 = vmatprep.subr.bf16.mxu0 %v1160_v28 }
  0x67   :  { %998 = vmatpush1.bf16.msra.mxu1 %v1158_v29 }
  0x68   :  { %802 = vmatpush1.bf16.msra.mxu0 %v1158_v29  ;;  %983 = vmatprep.subr.bf16.mxu1 %v1163_v30 }
  0x69   :  { %803 = vmatprep.subr.bf16.mxu0 %v1163_v30 }
  0x6b   :  { %999 = vmatpush1.bf16.msra.mxu1 %v1161_v31 }
  0x6c   :  { %804 = vmatpush1.bf16.msra.mxu0 %v1161_v31  ;;  %984 = vmatprep.subr.bf16.mxu1 %v1166_v32 }
  0x6d   :  { %805 = vmatprep.subr.bf16.mxu0 %v1166_v32  ;;  %v839_v32 = vld [vmem:[%s1598_s3 + $0x18] sm:$0xff] }
  0x6f   :  { %1000 = vmatpush1.bf16.msra.mxu1 %v1164_v33 }
  0x70   :  { %806 = vmatpush1.bf16.msra.mxu0 %v1164_v33  ;;  %985 = vmatprep.subr.bf16.mxu1 %v1169_v34 }
  0x71   :  { %807 = vmatprep.subr.bf16.mxu0 %v1169_v34  ;;  %v843_v34 = vld [vmem:[%s1598_s3 + $0x38] sm:$0xff] }
  0x73   :  { %1001 = vmatpush1.bf16.msra.mxu1 %v1167_v35 }
  0x74   :  { %808 = vmatpush1.bf16.msra.mxu0 %v1167_v35  ;;  %986 = vmatprep.subr.bf16.mxu1 %v1177_v36 }
  0x75   :  { %809 = vmatprep.subr.bf16.mxu0 %v1177_v36 }
  0x77   :  { %1002 = vmatpush1.bf16.msra.mxu1 %v1175_v37 }
  0x78   :  { %810 = vmatpush1.bf16.msra.mxu0 %v1175_v37  ;;  %987 = vmatprep.subr.bf16.mxu1 %v1181_v38 }
  0x79   :  { %811 = vmatprep.subr.bf16.mxu0 %v1181_v38 }
  0x7b   :  { %1003 = vmatpush1.bf16.msra.mxu1 %v1179_v39 }
  0x7c   :  { %812 = vmatpush1.bf16.msra.mxu0 %v1179_v39  ;;  %988 = vmatprep.subr.bf16.mxu1 %v1184_v40 }
  0x7d   :  { %813 = vmatprep.subr.bf16.mxu0 %v1184_v40 }
  0x7f   :  { %1004 = vmatpush1.bf16.msra.mxu1 %v1182_v41 }
  0x80   :  { %814 = vmatpush1.bf16.msra.mxu0 %v1182_v41 }
  0x82   :  { %826 = vmatmul.mubr.bf16.vlgmr.msra.gmra.mrb[8].mxu1 %v1188_v43 }
  0x83   :  { %816 = vmatmul.mubr.bf16.vlgmr.msra.gmra.mrb[0].mxu0 %v1185_v42 }
 0x115   :  { %v711_v46 = vpop.f32.mrb[0].mxu1 }
 0x116   :  { %v713_v47 = vpop.f32.mrb[1].mxu1  ;;  %v712_v7 = vadd.f32 %v711_v46, %v130_v53 }
 0x117   :  { %v715_v48 = vpop.f32.mrb[2].mxu1  ;;  %v714_v8 = vadd.f32 %v713_v47, %v134_v54 }
 0x118   :  { %v717_v50 = vpop.f32.mrb[3].mxu1  ;;  %v716_v13 = vadd.f32 %v715_v48, %v130_v53 }
 0x119   :  { %v718_v20 = vadd.f32 %v717_v50, %v134_v54 }
 0x11d   :  { %v721_v55 = vpop.f32.mrb[4].mxu1 }
 0x11e   :  { %v774_v56 = vpop.f32.mrb[4].mxu0  ;;  %v722_v57 = vadd.f32 %v721_v55, %v130_v53  ;;  %v723_v58 = vpop.f32.mrb[5].mxu1 }
 0x11f   :  { %v776_v59 = vpop.f32.mrb[5].mxu0  ;;  %v724_v60 = vadd.f32 %v723_v58, %v134_v54  ;;  %v725_v61 = vpop.f32.mrb[6].mxu1 }
 0x120   :  { %v778_v62 = vpop.f32.mrb[6].mxu0  ;;  %v726_v63 = vadd.f32 %v725_v61, %v130_v53  ;;  %v775_v0 = vadd.f32 %v774_v56, %v722_v57  ;;  %v727_v1 = vpop.f32.mrb[7].mxu1 }
 0x121   :  { %v780_v2 = vpop.f32.mrb[7].mxu0  ;;  %v728_v3 = vadd.f32 %v727_v1, %v134_v54  ;;  %v777_v4 = vadd.f32 %v776_v59, %v724_v60 }
 0x122   :  { %v779_v5 = vadd.f32 %v778_v62, %v726_v63 }
 0x123   :  { %v781_v6 = vadd.f32 %v780_v2, %v728_v3 }
 0x155   :  { %v827_v11 = vpop.f32.mrb[8].mxu1 }
 0x156   :  { %v817_v9 = vpop.f32.mrb[0].mxu0  ;;  %v828_v15 = vadd.f32 %v827_v11, %v775_v0  ;;  %v829_v18 = vpop.f32.mrb[9].mxu1 }
 0x157   :  { %v1006_v14 = vadd.f32 %v817_v9, %v712_v7  ;;  %v819_v16 = vpop.f32.mrb[1].mxu0  ;;  %v830_v22 = vadd.f32 %v829_v18, %v777_v4  ;;  %v831_v25 = vpop.f32.mrb[10].mxu1 }
 0x158   :  { %v1008_v21 = vadd.f32 %v819_v16, %v714_v8  ;;  %v821_v23 = vpop.f32.mrb[2].mxu0  ;;  %v848_v28 = vadd.f32 %v840_v12, %v828_v15  ;;  %v832_v30 = vadd.f32 %v831_v25, %v779_v5  ;;  %v833_v33 = vpop.f32.mrb[11].mxu1 }
 0x159   :  { %v844_v27 = vadd.f32 %v1006_v14, %v836_v10  ;;  %v1010_v29 = vadd.f32 %v821_v23, %v716_v13  ;;  %v823_v31 = vpop.f32.mrb[3].mxu0  ;;  %v849_v36 = vadd.f32 %v841_v19, %v830_v22  ;;  %v834_v38 = vadd.f32 %v833_v33, %v781_v6 }
 0x15a   :  { %v845_v35 = vadd.f32 %v1008_v21, %v837_v17  ;;  %v1012_v37 = vadd.f32 %v823_v31, %v718_v20  ;;  %857 = vst [vmem:[%s1599_s4 + $0x20] sm:$0xff] %v848_v28  ;;  %v850_v40 = vadd.f32 %v842_v26, %v832_v30 }
 0x15b   :  { %852 = vst [vmem:[%s1599_s4] sm:$0xff] %v844_v27  ;;  %v846_v39 = vadd.f32 %v1010_v29, %v838_v24  ;;  %858 = vst.msk [vmem:[%s1599_s4 + $0x28] sm:$0xff] %vm853_vm0, %v849_v36  ;;  %v851_v42 = vadd.f32 %v843_v34, %v834_v38 }
 0x15c   :  { %854 = vst.msk [vmem:[%s1599_s4 + $0x8] sm:$0xff] %vm853_vm0, %v845_v35  ;;  %v847_v41 = vadd.f32 %v1012_v37, %v839_v32  ;;  %859 = vst [vmem:[%s1599_s4 + $0x30] sm:$0xff] %v850_v40 }
 0x15d   :  { %855 = vst [vmem:[%s1599_s4 + $0x10] sm:$0xff] %v846_v39  ;;  %860 = vst.msk [vmem:[%s1599_s4 + $0x38] sm:$0xff] %vm853_vm0, %v851_v42 }
 0x15e   :  { %856 = vst.msk [vmem:[%s1599_s4 + $0x18] sm:$0xff] %vm853_vm0, %v847_v41 }

// kernel: cog_replknet_forward.11
= control target key start
LH: loop header
LB: loop body
LE: loop exit
PB: predicated region body
PF: predicated region fallthrough
CT: control target
= control target key end

     0   :  { %vm37_vm0 = vcmask 523264   ;;  %s518_s0 = inlined_call_operand.vmem [shape: f32[2,16,192], index: 0, kind: input, shape index: {}]   ;;  %s519_s1 = inlined_call_operand.vmem [shape: f32[1,192], index: 1, kind: input, shape index: {}]   ;;  %s520_s2 = inlined_call_operand.vmem [shape: f32[1,192], index: 2, kind: input, shape index: {}]   ;;  %s521_s3 = inlined_call_operand.vmem [shape: bf16[192,128], index: 3, kind: input, shape index: {}]   ;;  %s522_s4 = inlined_call_operand.vmem [shape: f32[1,128], index: 4, kind: input, shape index: {}]   ;;  %s523_s5 = inlined_call_operand.hbm [shape: f32[2,128], index: 5, kind: output, shape index: {}]  }
   0x1   :  { %v22_v0 = vld [vmem:[%s518_s0] sm:$0xff]  ;;  %v23_v1 = vld [vmem:[%s518_s0 + $0x8] sm:$0xff]  ;;  %v24_v2 = vld [vmem:[%s518_s0 + $0x10] sm:$0xff] }
   0x2   :  { %v25_v3 = vld [vmem:[%s518_s0 + $0x18] sm:$0xff]  ;;  %v26_v4 = vld [vmem:[%s518_s0 + $0x20] sm:$0xff]  ;;  %v27_v5 = vld [vmem:[%s518_s0 + $0x28] sm:$0xff]  ;;  %v30_v6 = vadd.f32 %v24_v2, %v22_v0  ;;  %v38_v7 = vsel %vm37_vm0, %v23_v1, 0.0 }
   0x3   :  { %v28_v8 = vld [vmem:[%s518_s0 + $0x30] sm:$0xff]  ;;  %v29_v9 = vld [vmem:[%s518_s0 + $0x38] sm:$0xff]  ;;  %v39_v10 = vsel %vm37_vm0, %v25_v3, 0.0  ;;  %v54_v11 = vsel %vm37_vm0, %v27_v5, 0.0 }
   0x4   :  { %v31_v12 = vrot.slane %v30_v6, 4  ;;  %v40_v13 = vadd.f32 %v39_v10, %v38_v7  ;;  %v47_v14 = vadd.f32 %v28_v8, %v26_v4  ;;  %v55_v15 = vsel %vm37_vm0, %v29_v9, 0.0 }
   0x5   :  { %v56_v16 = vadd.f32 %v55_v15, %v54_v11 }
   0x6   :  { %v32_v17 = vadd.f32 %v31_v12, %v30_v6  ;;  %v41_v18 = vrot.slane %v40_v13, 4  ;;  %v48_v19 = vrot.slane %v47_v14, 4 }
   0x7   :  { %v57_v20 = vrot.slane %v56_v16, 4 }
   0x8   :  { %v33_v21 = vrot.slane %v32_v17, 2  ;;  %v42_v22 = vadd.f32 %v41_v18, %v40_v13  ;;  %v49_v23 = vadd.f32 %v48_v19, %v47_v14 }
   0x9   :  { %v58_v24 = vadd.f32 %v57_v20, %v56_v16 }
   0xa   :  { %v34_v25 = vadd.f32 %v33_v21, %v32_v17  ;;  %v43_v26 = vrot.slane %v42_v22, 2  ;;  %v50_v27 = vrot.slane %v49_v23, 2 }
   0xb   :  { %v59_v28 = vrot.slane %v58_v24, 2 }
   0xc   :  { %v35_v29 = vrot.slane %v34_v25, 1  ;;  %v44_v30 = vadd.f32 %v43_v26, %v42_v22  ;;  %v51_v31 = vadd.f32 %v50_v27, %v49_v23 }
   0xd   :  { %v60_v32 = vadd.f32 %v59_v28, %v58_v24 }
   0xe   :  { %v36_v33 = vadd.f32 %v35_v29, %v34_v25  ;;  %v45_v34 = vrot.slane %v44_v30, 1  ;;  %v52_v35 = vrot.slane %v51_v31, 1 }
   0xf   :  { %10 = vsyncpa [#allocation3], 0  ;;  %v61_v36 = vrot.slane %v60_v32, 1  ;;  %vm72_vm1 = vcmask 1041409   ;;  %vm77_vm2 = vcmask 1041408   ;;  %vm79_vm3 = vcmask 517120  }
  0x10   :  { %v46_v37 = vadd.f32 %v45_v34, %v44_v30  ;;  %v53_v38 = vadd.f32 %v52_v35, %v51_v31  ;;  %v64_v39 = vmul.f32 0.0625, %v36_v33  ;;  %v352_v49 = vld [vmem:[%s521_s3] sm:$0xff]   ;;  %v390_v50 = vmov 0   ;;  %v353_v51 = vld [vmem:[%s521_s3 + $0x8] sm:$0xff]   ;;  %v354_v52 = vld [vmem:[%s521_s3 + $0x10] sm:$0xff]  }
  0x11   :  { %v62_v40 = vadd.f32 %v61_v36, %v60_v32  ;;  %281 = vmatprep.subr.bf16.mxu0 %v390_v50  ;;  %v355_v53 = vld [vmem:[%s521_s3 + $0x18] sm:$0xff]   ;;  %v356_v8 = vld [vmem:[%s521_s3 + $0x20] sm:$0xff]   ;;  %v357_v9 = vld [vmem:[%s521_s3 + $0x28] sm:$0xff]   ;;  %v126_v18 = vlaneseq }
  0x12   :  { %v65_v41 = vmul.f32 0.0625, %v46_v37  ;;  %v66_v42 = vmul.f32 0.0625, %v53_v38  ;;  %282 = vmatpush1.bf16.msra.mxu0 %v352_v49  ;;  %v358_v10 = vld [vmem:[%s521_s3 + $0x30] sm:$0xff]   ;;  %v359_v11 = vld [vmem:[%s521_s3 + $0x38] sm:$0xff]   ;;  %v360_v12 = vld [vmem:[%s521_s3 + $0x40] sm:$0xff]  }
  0x13   :  { %v67_v43 = vmul.f32 0.0625, %v62_v40  ;;  %283 = vmatprep.subr.bf16.mxu0 %v390_v50  ;;  %v361_v13 = vld [vmem:[%s521_s3 + $0x48] sm:$0xff]   ;;  %v362_v14 = vld [vmem:[%s521_s3 + $0x50] sm:$0xff]   ;;  %v363_v15 = vld [vmem:[%s521_s3 + $0x58] sm:$0xff]   ;;  %v127_v20 = vshrl.u32 %v126_v18, 7  ;;  %s391_s3 = smov [#allocation2]  }
  0x14   :  { %v73_v44 = vsel %vm72_vm1, %v66_v42, %v64_v39  ;;  %v124_v23 = vld [vmem:[%s519_s1] sm:$0x3]  ;;  %s328_s10 = sshll.u32 %s391_s3, 4  ;;  %s329_s10 = int_to_ptr.vmem [resolvable:$true] %s328_s10 }
  0x15   :  { %v74_v45 = vsel %vm72_vm1, %v67_v43, %v65_v41  ;;  %v78_v46 = vsel %vm77_vm2, %v73_v44, 0.0  ;;  %v128_v21 = vsub.s32 0, %v127_v20  ;;  %v132_v22 = vsub.s32 1, %v127_v20  ;;  %v140_v24 = vld [vmem:[%s520_s2] sm:$0x3]  ;;  %s366_s11 = scalar_lea.vmem %s329_s10, 32  ;;  %p371_p1 = scmp.lt.s32.totalorder %s329_s10, %s329_s10 }
  0x16   :  { %v80_v47 = vsel %vm79_vm3, %v74_v45, 0.0  ;;  %284 = vmatpush1.bf16.msra.mxu0 %v353_v51  ;;  %p367_p0 = scmp.ne.s32.totalorder %s329_s10, %s366_s11  ;;  %p372_p2 = scmp.lt.s32.totalorder %s366_s11, %s366_s11 }
  0x17   :  { %v81_v48 = vadd.f32 %v80_v47, %v78_v46  ;;  %285 = vmatprep.subr.bf16.mxu0 %v390_v50  ;;  %v129_v25 = vrot.slane %v124_v23, %v128_v21  ;;  %v133_v26 = vrot.slane %v124_v23, %v132_v22  ;;  %v145_v28 = vrot.slane %v140_v24, %v128_v21 }
  0x18   :  { %v149_v31 = vrot.slane %v140_v24, %v132_v22  ;;  %p373_p3 = por %p372_p2, %p371_p1 }
  0x19   :  { %82 = vadd.xlane.f32.xlu0 %v81_v48 }
  0x1a   :  { %286 = vmatpush1.bf16.msra.mxu0 %v354_v52  ;;  %p374_p4 = pnand %p373_p3, %p367_p0 }
  0x1b   :  { %287 = vmatprep.subr.bf16.mxu0 %v390_v50 }
  0x1e   :  { %288 = vmatpush1.bf16.msra.mxu0 %v355_v53 }
  0x1f   :  { %289 = vmatprep.subr.bf16.mxu0 %v390_v50 }
  0x22   :  { %290 = vmatpush1.bf16.msra.mxu0 %v356_v8 }
  0x23   :  { %291 = vmatprep.subr.bf16.mxu0 %v390_v50 }
  0x26   :  { %292 = vmatpush1.bf16.msra.mxu0 %v357_v9 }
  0x27   :  { %293 = vmatprep.subr.bf16.mxu0 %v390_v50 }
  0x2a   :  { %294 = vmatpush1.bf16.msra.mxu0 %v358_v10 }
  0x2b   :  { %295 = vmatprep.subr.bf16.mxu0 %v390_v50 }
  0x2e   :  { %296 = vmatpush1.bf16.msra.mxu0 %v359_v11 }
  0x2f   :  { %297 = vmatprep.subr.bf16.mxu0 %v390_v50 }
  0x32   :  { %298 = vmatpush1.bf16.msra.mxu0 %v360_v12 }
  0x33   :  { %299 = vmatprep.subr.bf16.mxu0 %v390_v50 }
  0x36   :  { %300 = vmatpush1.bf16.msra.mxu0 %v361_v13 }
  0x37   :  { %301 = vmatprep.subr.bf16.mxu0 %v390_v50 }
  0x3a   :  { %302 = vmatpush1.bf16.msra.mxu0 %v362_v14 }
  0x3b   :  { %303 = vmatprep.subr.bf16.mxu0 %v390_v50 }
  0x3e   :  { %304 = vmatpush1.bf16.msra.mxu0 %v363_v15 }
  0xa6   :  { %v83_v54 = vpop.xlane.xlu0 %82 }
  0xa7   :  { %v85_v55 = vmul.f32 0.0052083335, %v83_v54 }
  0xa9   :  { %v87_v56 = vrot.slane %v85_v55, 1  ;;  %v90_v57 = vsub.f32 %v64_v39, %v85_v55  ;;  %v91_v58 = vsub.f32 %v65_v41, %v85_v55 }
  0xab   :  { %v92_v59 = vsub.f32 %v66_v42, %v87_v56  ;;  %v93_v60 = vsub.f32 %v67_v43, %v87_v56  ;;  %v94_v63 = vmul.f32 %v90_v57, %v90_v57  ;;  %v95_v0 = vmul.f32 %v91_v58, %v91_v58 }
  0xad   :  { %v96_v61 = vmul.f32 %v92_v59, %v92_v59  ;;  %v97_v62 = vmul.f32 %v93_v60, %v93_v60 }
  0xaf   :  { %v102_v1 = vrot.slane %v96_v61, 7  ;;  %v104_v2 = vrot.slane %v97_v62, 7 }
  0xb1   :  { %v103_v3 = vsel %vm72_vm1, %v102_v1, %v94_v63  ;;  %v105_v4 = vsel %vm72_vm1, %v104_v2, %v95_v0 }
  0xb2   :  { %v108_v5 = vsel %vm77_vm2, %v103_v3, 0.0  ;;  %v109_v6 = vsel %vm79_vm3, %v105_v4, 0.0 }
  0xb3   :  { %v110_v7 = vadd.f32 %v109_v6, %v108_v5 }
  0xb5   :  { %111 = vadd.xlane.f32.xlu0 %v110_v7 }
 0x142   :  { %v112_v16 = vpop.xlane.xlu0 %111 }
 0x143   :  { %v113_v17 = vmul.f32 0.0052083335, %v112_v16 }
 0x145   :  { %v114_v19 = vadd.f32 1e-05, %v113_v17 }
 0x147   :  { %364 = vrsqrt.f32 %v114_v19 }
 0x151   :  { %v365_v27 = vpop.eup %364 }
 0x152   :  { %v117_v29 = vrot.slane %v365_v27, 1  ;;  %v121_v30 = vmul.f32 %v365_v27, %v91_v58  ;;  %v120_v32 = vmul.f32 %v365_v27, %v90_v57  ;;  %v336_v57 = vld [vmem:[%s522_s4] ss:$0 sm:$0xff] }
 0x154   :  { %v123_v33 = vmul.f32 %v117_v29, %v93_v60  ;;  %v137_v34 = vmul.f32 %v133_v26, %v121_v30  ;;  %v122_v35 = vmul.f32 %v117_v29, %v92_v59  ;;  %v136_v36 = vmul.f32 %v129_v25, %v120_v32 }
 0x156   :  { %v139_v37 = vmul.f32 %v133_v26, %v123_v33  ;;  %v153_v38 = vadd.f32 %v149_v31, %v137_v34  ;;  %v138_v39 = vmul.f32 %v129_v25, %v122_v35  ;;  %v152_v40 = vadd.f32 %v145_v28, %v136_v36 }
 0x158   :  { %v155_v41 = vadd.f32 %v149_v31, %v139_v37  ;;  %v154_v42 = vadd.f32 %v145_v28, %v138_v39  ;;  %v157_v43 = vpack.c.bf16 %v153_v38, %v153_v38  ;;  %v156_v45 = vpack.c.bf16 %v152_v40, %v152_v40 }
 0x15a   :  { %v159_v44 = vpack.c.bf16 %v155_v41, %v155_v41  ;;  %v158_v46 = vpack.c.bf16 %v154_v42, %v154_v42  ;;  %v196_v49 = vunpack.c.l.b16 %v157_v43  ;;  %v195_v51 = vunpack.c.l.b16 %v156_v45 }
 0x15c   :  { %v198_v47 = vunpack.c.l.b16 %v159_v44  ;;  %v197_v48 = vunpack.c.l.b16 %v158_v46 }
 0x15e   :  { %v201_v50 = vrot.slane %v198_v47, 7  ;;  %v199_v52 = vrot.slane %v197_v48, 7 }
 0x160   :  { %v202_v53 = vsel %vm72_vm1, %v201_v50, %v196_v49  ;;  %v200_v54 = vsel %vm72_vm1, %v199_v52, %v195_v51 }
 0x161   :  { %v204_v55 = vpack.c.b16 %v202_v53, %v202_v53  ;;  %v203_v56 = vpack.c.b16 %v200_v54, %v200_v54 }
 0x163   :  { %349 = vmatprep.mubr.msk.bf16.mxu0 %vm37_vm0, %v204_v55 }
 0x164   :  { %314 = vmatmul.mubr.bf16.vlgmr.msra.gmra.mrb[0].mxu0 %v203_v56 }
 0x237   :  { %v315_v58 = vpop.f32.mrb[0].mxu0 }
 0x238   :  { %v316_v59 = vadd.f32 %v336_v57, %v315_v58  ;;  %v317_v60 = vpop.f32.mrb[1].mxu0 }
 0x239   :  { %v318_v61 = vpop.f32.mrb[2].mxu0 }
 0x23a   :  { %321 = vst [vmem:[#allocation2] sm:$0x3] %v316_v59  ;;  %v319_v62 = vpop.f32.mrb[3].mxu0 }
 0x23b   :  { %377 = shalt.err (!%p374_p4)
}
 0x23c   :  { %s378_s4 = scalar_lea.hbm %s523_s5, 32 }
 0x23d   :  { %p379_p5 = scmp.ne.s32.totalorder %s523_s5, %s378_s4  ;;  %p382_p6 = scmp.lt.u32.totalorder %s378_s4, %s523_s5 }
 0x23f   :  { %p384_p7 = pnand %p382_p6, %p379_p5 }
 0x241   :  { %387 = shalt.err (!%p384_p7)
}
 0x242   :  { %331 = dma.vmem_to_hbm [thread:$0]  %s329_s10, 32, %s523_s5, [#allocation3]  }
 0x243   :  { %388 = dma.done.wait [#allocation3], 32  }
 0x244   :  { %389 = vsyncadd [#allocation3], 4294967264 }
 0x245   :  { %335 = vsyncpa [#allocation3], 1 }

</bundles_post_ra>
